<compile_context>
chip_gen: v5e
topology: v5e:2x2
jax: 0.10.0
libtpu: 0.0.40
codegen_flags: <defaults>
</compile_context>

<pallas_src>
import jax
import jax.numpy as jnp
from jax import lax
from jax.experimental import pallas as pl
from jax.experimental.pallas import tpu as pltpu

D_MODEL = 400
HEADS = 8
HEAD_DIM = D_MODEL // HEADS       # 50
HEAD_DIM_PAD = 64                 # zero-padded head dim (exact; lane-aligned slices)
MLP_DIM = 200


# ----------------------------------------------------------------------------
# In-kernel helpers (operate on values; traced inside the fused kernels)
# ----------------------------------------------------------------------------
def _gelu_tanh(x):
    # TODO(synk): PyTorch nn.GELU() defaults to the exact erf form; the tanh
    # approximation is used here for guaranteed Mosaic lowering.
    return 0.5 * x * (1.0 + jnp.tanh(0.7978845608028654 * (x + 0.044715 * x * x * x)))


def _layernorm(x, g, b):
    mean = jnp.mean(x, axis=-1, keepdims=True)
    xc = x - mean
    var = jnp.mean(xc * xc, axis=-1, keepdims=True)
    return xc * lax.rsqrt(var + 1e-5) * g + b


def _logsoftmax_rows(x):
    m = jnp.max(x, axis=1, keepdims=True)
    lse = jnp.log(jnp.sum(jnp.exp(x - m), axis=1, keepdims=True)) + m
    return x - lse


def _transformer_ct(z_ref, pe_w_ref, pe_b_ref, ctok_ref,
                    ln1_g_ref, ln1_b_ref, wqkv_ref, wo_ref, out_b_ref,
                    ln2_g_ref, ln2_b_ref, ff1_w_ref, ff1_b_ref,
                    ff2_w_ref, ff2_b_ref):
    """Seq_Transformer (depth=1) on z:(B, L, C). Returns c_t:(B, D) as a value."""
    B, L, _ = z_ref.shape
    D = pe_w_ref.shape[1]
    H, DHP = HEADS, HEAD_DIM_PAD
    N = B * (L + 1)
    # NOTE: TS-TCC Attention uses scale = dim ** -0.5 (full model dim, not per
    # head); kept as-is to match the reference implementation.
    scale = float(D) ** -0.5

    # patch_to_embedding on the batch-flattened tokens: one lane-dense matmul.
    z_flat = jnp.concatenate([z_ref[b] for b in range(B)], axis=0)        # (B*L, C)
    emb = jnp.dot(z_flat.astype(jnp.bfloat16), pe_w_ref[...],
                  preferred_element_type=jnp.float32) + pe_b_ref[...]      # (B*L, D)

    # Batch-flattened token slab: rows [0, B) are the per-batch c_tokens,
    # rows [B + b*L, B + (b+1)*L) are the embedded tokens of batch b.
    # (Token order within the slab is irrelevant given the batch mask below.)
    x0 = jnp.concatenate(
        [jnp.broadcast_to(ctok_ref[...], (B, D)), emb], axis=0)           # (N, D)

    # Block-diagonal batch mask (hoisted; trace-time loop, no integer div).
    r = lax.broadcasted_iota(jnp.int32, (N, N), 0)
    c = lax.broadcasted_iota(jnp.int32, (N, N), 1)
    same = None
    for b in range(B):
        r_in = (r == b) | ((r >= B + b * L) & (r < B + (b + 1) * L))
        c_in = (c == b) | ((c >= B + b * L) & (c < B + (b + 1) * L))
        blk = r_in & c_in
        same = blk if same is None else (same | blk)
    attn_bias = jnp.where(same, 0.0, -1e30)                               # (N, N)

    # Residual(PreNorm(Attention)): one fused QKV matmul, tiny per-head
    # softmax over the masked slab, one fused output projection.
    h = _layernorm(x0, ln1_g_ref[...], ln1_b_ref[...]).astype(jnp.bfloat16)
    qkv = jnp.dot(h, wqkv_ref[...], preferred_element_type=jnp.float32)   # (N, 3*H*DHP)
    heads = []
    for hd in range(H):                                                   # unrolled (8)
        q = qkv[:, hd * DHP:(hd + 1) * DHP]                               # (N, DHP)
        k = qkv[:, (H + hd) * DHP:(H + hd + 1) * DHP]
        v = qkv[:, (2 * H + hd) * DHP:(2 * H + hd + 1) * DHP]
        s = pl.dot(q, k, trans_b=True) * scale + attn_bias                # (N, N)
        m = jnp.max(s, axis=-1, keepdims=True)
        p = jnp.exp(s - m)
        p = p / jnp.sum(p, axis=-1, keepdims=True)                        # exact divide
        heads.append(jnp.dot(p, v, preferred_element_type=jnp.float32))   # (N, DHP)
    attn = jnp.concatenate(heads, axis=1).astype(jnp.bfloat16)            # (N, H*DHP)
    attn = jnp.dot(attn, wo_ref[...], preferred_element_type=jnp.float32)  # (N, D)
    x1 = x0 + attn + out_b_ref[...]                # to_out bias (dropout: identity)

    # Residual(PreNorm(FeedForward))
    h = _layernorm(x1, ln2_g_ref[...], ln2_b_ref[...]).astype(jnp.bfloat16)
    h = jnp.dot(h, ff1_w_ref[...], preferred_element_type=jnp.float32) + ff1_b_ref[...]
    h = _gelu_tanh(h).astype(jnp.bfloat16)
    h = jnp.dot(h, ff2_w_ref[...], preferred_element_type=jnp.float32) + ff2_b_ref[...]
    x2 = x1 + h

    # c_t = the B c_token rows (rows 0..B-1 of the slab), one contiguous slice.
    return x2[0:B, :]                                                     # (B, D)


# ----------------------------------------------------------------------------
# Fused kernels (one pallas_call per TC.forward branch)
# ----------------------------------------------------------------------------
def _tc_nce_kernel(z2_ref, z3_ref,
                   pe_w_ref, pe_b_ref, ctok_ref, ln1_g_ref, ln1_b_ref,
                   wqkv_ref, wo_ref, out_b_ref, ln2_g_ref, ln2_b_ref,
                   ff1_w_ref, ff1_b_ref, ff2_w_ref, ff2_b_ref,
                   wkb_ref, wkw_hbm_ref,
                   o_ref,
                   wkw_vmem, wkw_sem):
    S, B, C = z3_ref.shape

    # Overlap the late-used Wk weight DMA (HBM -> VMEM) with transformer compute.
    wk_copy = pltpu.make_async_copy(wkw_hbm_ref, wkw_vmem, wkw_sem)
    wk_copy.start()

    c_t = _transformer_ct(z2_ref, pe_w_ref, pe_b_ref, ctok_ref,
                          ln1_g_ref, ln1_b_ref, wqkv_ref, wo_ref, out_b_ref,
                          ln2_g_ref, ln2_b_ref, ff1_w_ref, ff1_b_ref,
                          ff2_w_ref, ff2_b_ref)                           # (B, D)

    wk_copy.wait()
    # All S per-timestep Wk linears collapsed into one lane-dense (D, S*C) matmul.
    pred_all = jnp.dot(c_t.astype(jnp.bfloat16), wkw_vmem[...],
                       preferred_element_type=jnp.float32) + wkb_ref[...]  # (B, S*C)

    rows = lax.broadcasted_iota(jnp.int32, (B, B), 0)
    cols = lax.broadcasted_iota(jnp.int32, (B, B), 1)
    eye = rows == cols                                   # hoisted out of the S loop
    acc = jnp.zeros((1, 1), jnp.float32)
    for i in range(S):                                   # statically unrolled (S small)
        enc = z3_ref[i]                                  # (B, C) f32
        pred_i = pred_all[:, i * C:(i + 1) * C]          # (B, C), 128-aligned lane slice
        total = pl.dot(enc, pred_i, trans_b=True)        # (B, B); pred^T folded into dot
        lsm = _logsoftmax_rows(total)                    # LogSoftmax(dim=1)
        acc = acc + jnp.sum(jnp.where(eye, lsm, 0.0))
    o_ref[...] = acc * (-1.0 / (B * S))                  # nce /= -1. * batch * seq_len


def _tc_proj_kernel(z_ref,
                    pe_w_ref, pe_b_ref, ctok_ref, ln1_g_ref, ln1_b_ref,
                    wqkv_ref, wo_ref, out_b_ref, ln2_g_ref, ln2_b_ref,
                    ff1_w_ref, ff1_b_ref, ff2_w_ref, ff2_b_ref,
                    ph1_w_ref, ph1_b_ref, ph2_w_ref, ph2_b_ref, ph3_w_ref, ph3_b_ref,
                    o_ref):
    c_t = _transformer_ct(z_ref, pe_w_ref, pe_b_ref, ctok_ref,
                          ln1_g_ref, ln1_b_ref, wqkv_ref, wo_ref, out_b_ref,
                          ln2_g_ref, ln2_b_ref, ff1_w_ref, ff1_b_ref,
                          ff2_w_ref, ff2_b_ref)
    # projection_head (dropout: identity in eval) + LogSoftmax(dim=1), fused.
    y = jnp.dot(c_t.astype(jnp.bfloat16), ph1_w_ref[...],
                preferred_element_type=jnp.float32) + ph1_b_ref[...]
    y = jnp.maximum(y, 0.0)
    y = jnp.dot(y.astype(jnp.bfloat16), ph2_w_ref[...],
                preferred_element_type=jnp.float32) + ph2_b_ref[...]
    y = jnp.maximum(y, 0.0)
    y = jnp.dot(y.astype(jnp.bfloat16), ph3_w_ref[...],
                preferred_element_type=jnp.float32) + ph3_b_ref[...]
    o_ref[...] = _logsoftmax_rows(y)


# ----------------------------------------------------------------------------
# Parameters + wrappers
# ----------------------------------------------------------------------------
_TRANSFORMER_KEYS = ("pe_w", "pe_b", "c_token", "ln1_g", "ln1_b",
                     "wqkv", "wo", "out_b", "ln2_g", "ln2_b",
                     "ff1_w", "ff1_b", "ff2_w", "ff2_b")


def init_params(key, num_channels, seq_len):
    D, H, dh, dhp, M = D_MODEL, HEADS, HEAD_DIM, HEAD_DIM_PAD, MLP_DIM
    C = num_channels
    keys = jax.random.split(key, 12)

    def w(k, shape, scale=0.02):
        return (scale * jax.random.normal(k, shape)).astype(jnp.float32)

    # Per-head projections, then packed lane-dense and zero-padded 50 -> 64
    # (padding is exact: padded Q/K dims contribute 0, padded V cols hit zero
    # rows of the packed to_out weight).
    # NOTE: torch Linear stores (out_features, in_features); real checkpoints
    # must be transposed before packing.
    wq = w(keys[2], (H, D, dh))
    wk = w(keys[3], (H, D, dh))
    wv = w(keys[4], (H, D, dh))
    wo_h = w(keys[5], (H, dh, D))

    def pack_proj(x):                                     # (H, D, dh) -> (D, H*dhp)
        xp = jnp.pad(x, ((0, 0), (0, 0), (0, dhp - dh)))
        return jnp.transpose(xp, (1, 0, 2)).reshape(D, H * dhp)

    wqkv = jnp.concatenate([pack_proj(wq), pack_proj(wk), pack_proj(wv)], axis=1)
    wo = jnp.pad(wo_h, ((0, 0), (0, dhp - dh), (0, 0))).reshape(H * dhp, D)

    return {
        # Seq_Transformer (large weights stored bf16; MXU accumulates in f32)
        "pe_w": w(keys[0], (C, D)).astype(jnp.bfloat16),   # patch_to_embedding
        "pe_b": jnp.zeros((1, D), jnp.float32),
        "c_token": w(keys[1], (1, D), scale=1.0),
        "ln1_g": jnp.ones((1, D), jnp.float32),
        "ln1_b": jnp.zeros((1, D), jnp.float32),
        "wqkv": wqkv.astype(jnp.bfloat16),                 # (D, 3*H*dhp) fused to_qkv
        "wo": wo.astype(jnp.bfloat16),                     # (H*dhp, D)    fused to_out
        "out_b": jnp.zeros((1, D), jnp.float32),
        "ln2_g": jnp.ones((1, D), jnp.float32),
        "ln2_b": jnp.zeros((1, D), jnp.float32),
        "ff1_w": w(keys[6], (D, M)).astype(jnp.bfloat16),
        "ff1_b": jnp.zeros((1, M), jnp.float32),
        "ff2_w": w(keys[7], (M, D)).astype(jnp.bfloat16),
        "ff2_b": jnp.zeros((1, D), jnp.float32),
        # Wk: seq_len x Linear(400, C) packed into one lane-dense (D, S*C) weight
        "wk_w_flat": w(keys[8], (D, seq_len * C)).astype(jnp.bfloat16),
        "wk_b_flat": jnp.zeros((1, seq_len * C), jnp.float32),
        # projection_head: 400 -> 100 -> 20 -> 2
        "ph1_w": w(keys[9], (D, 100)).astype(jnp.bfloat16),
        "ph1_b": jnp.zeros((1, 100), jnp.float32),
        "ph2_w": w(keys[10], (100, 20)).astype(jnp.bfloat16),
        "ph2_b": jnp.zeros((1, 20), jnp.float32),
        "ph3_w": w(keys[11], (20, 2)).astype(jnp.bfloat16),
        "ph3_b": jnp.zeros((1, 2), jnp.float32),
    }


def _vmem_spec():
    return pl.BlockSpec(memory_space=pltpu.MemorySpace.VMEM)


def tc_forward_tag0(params, features_aug1, features_aug2, features_aug3):
    """TC.forward with tag == 0. Returns the scalar NCE loss."""
    del features_aug1                                    # unused in the torch branch too
    B, C, S = features_aug2.shape
    z2 = jnp.transpose(features_aug2, (0, 2, 1))         # (B, S, C)
    z3 = jnp.transpose(features_aug3, (2, 0, 1))         # (S, B, C) == encode_samples3
    tw = [params[k] for k in _TRANSFORMER_KEYS]
    n_vmem_in = 2 + len(tw) + 1                          # z2, z3, transformer, wk_b_flat
    out = pl.pallas_call(
        _tc_nce_kernel,
        out_shape=jax.ShapeDtypeStruct((1, 1), jnp.float32),
        in_specs=[_vmem_spec() for _ in range(n_vmem_in)]
                 + [pl.BlockSpec(memory_space=pl.ANY)],  # wk_w_flat: manual overlapped DMA
        out_specs=_vmem_spec(),
        scratch_shapes=[pltpu.VMEM(params["wk_w_flat"].shape, params["wk_w_flat"].dtype),
                        pltpu.SemaphoreType.DMA],
        compiler_params=pltpu.CompilerParams(vmem_limit_bytes=32 * 1024 * 1024),
    )(z2, z3, *tw, params["wk_b_flat"], params["wk_w_flat"])
    return out[0, 0]


def tc_forward_tag1(params, features_aug1, features_aug2, features_aug3):
    """TC.forward with tag != 0. Returns (B, 2) log-softmax of projection head."""
    z = jnp.concatenate([features_aug1, features_aug2, features_aug3], axis=-1)
    z = jnp.transpose(z, (0, 2, 1))                      # (B, 3S, C)
    B = z.shape[0]
    tw = [params[k] for k in _TRANSFORMER_KEYS]
    ph = [params[k] for k in ("ph1_w", "ph1_b", "ph2_w", "ph2_b", "ph3_w", "ph3_b")]
    n_in = 1 + len(tw) + len(ph)
    # TODO(synk): on v7x a batch-parallel grid axis would use both TensorCores;
    # at B=2 the single fused call is launch/DMA bound so it is omitted.
    return pl.pallas_call(
        _tc_proj_kernel,
        out_shape=jax.ShapeDtypeStruct((B, 2), jnp.float32),
        in_specs=[_vmem_spec() for _ in range(n_in)],
        out_specs=_vmem_spec(),
        compiler_params=pltpu.CompilerParams(vmem_limit_bytes=32 * 1024 * 1024),
    )(z, *tw, *ph)


# ----------------------------------------------------------------------------
if __name__ == "__main__":
    # final_out_channels must equal the transformer patch_size (=128) per the
    # module's shape constraints; keep batch/seq small.
    B, C, S = 2, 128, 4  # batch, final_out_channels, seq_len (== features_len)
    key = jax.random.PRNGKey(0)
    kp, k1, k2, k3 = jax.random.split(key, 4)
    params = init_params(kp, C, S)

    f1 = jax.random.normal(k1, (B, C, S), jnp.float32)
    f2 = jax.random.normal(k2, (B, C, S), jnp.float32)
    f3 = jax.random.normal(k3, (B, C, S), jnp.float32)

    nce = jax.jit(tc_forward_tag0)(params, f1, f2, f3)
    logits = jax.jit(tc_forward_tag1)(params, f1, f2, f3)
    nce = jax.block_until_ready(nce)
    logits = jax.block_until_ready(logits)

    assert nce.shape == () and bool(jnp.isfinite(nce))
    assert logits.shape == (B, 2) and bool(jnp.all(jnp.isfinite(logits)))
    print("KERNEL_OK")
</pallas_src>

<mosaic_0001>
module attributes {stable_mosaic.version = 11 : i64} {
  func.func @_tc_nce_kernel(%arg0: memref<2x4x128xf32, #tpu.memory_space<vmem>>, %arg1: memref<4x2x128xf32, #tpu.memory_space<vmem>>, %arg2: memref<128x400xbf16, #tpu.memory_space<vmem>>, %arg3: memref<1x400xf32, #tpu.memory_space<vmem>>, %arg4: memref<1x400xf32, #tpu.memory_space<vmem>>, %arg5: memref<1x400xf32, #tpu.memory_space<vmem>>, %arg6: memref<1x400xf32, #tpu.memory_space<vmem>>, %arg7: memref<400x1536xbf16, #tpu.memory_space<vmem>>, %arg8: memref<512x400xbf16, #tpu.memory_space<vmem>>, %arg9: memref<1x400xf32, #tpu.memory_space<vmem>>, %arg10: memref<1x400xf32, #tpu.memory_space<vmem>>, %arg11: memref<1x400xf32, #tpu.memory_space<vmem>>, %arg12: memref<400x200xbf16, #tpu.memory_space<vmem>>, %arg13: memref<1x200xf32, #tpu.memory_space<vmem>>, %arg14: memref<200x400xbf16, #tpu.memory_space<vmem>>, %arg15: memref<1x400xf32, #tpu.memory_space<vmem>>, %arg16: memref<1x512xf32, #tpu.memory_space<vmem>>, %arg17: memref<400x512xbf16, #tpu.memory_space<any>>, %arg18: memref<1x1xf32, #tpu.memory_space<vmem>>, %arg19: memref<400x512xbf16, #tpu.memory_space<vmem>>, %arg20: memref<!tpu.dma_semaphore, #tpu.memory_space<semaphore_mem>>) attributes {dimension_semantics = [], scalar_prefetch = 0 : i64, scratch_operands = 2 : i64, tpu.core_type = #tpu.core_type<tc>} {
    tpu.enqueue_dma source(%arg17 : memref<400x512xbf16, #tpu.memory_space<any>>) target(%arg19 : memref<400x512xbf16, #tpu.memory_space<vmem>>) target_semaphore(%arg20 : memref<!tpu.dma_semaphore, #tpu.memory_space<semaphore_mem>>)
    %c0 = arith.constant 0 : index
    %c0_0 = arith.constant 0 : index
    %c0_1 = arith.constant 0 : index
    %0 = vector.load %arg0[%c0, %c0_0, %c0_1] : memref<2x4x128xf32, #tpu.memory_space<vmem>>, vector<1x4x128xf32>
    %1 = vector.shape_cast %0 : vector<1x4x128xf32> to vector<4x128xf32>
    %c1 = arith.constant 1 : index
    %c0_2 = arith.constant 0 : index
    %c0_3 = arith.constant 0 : index
    %2 = vector.load %arg0[%c1, %c0_2, %c0_3] : memref<2x4x128xf32, #tpu.memory_space<vmem>>, vector<1x4x128xf32>
    %3 = vector.shape_cast %2 : vector<1x4x128xf32> to vector<4x128xf32>
    %4 = tpu.concatenate %1, %3 in 0 : vector<4x128xf32>, vector<4x128xf32> -> vector<8x128xf32>
    %5 = arith.truncf %4 : vector<8x128xf32> to vector<8x128xbf16>
    %c0_4 = arith.constant 0 : index
    %c0_5 = arith.constant 0 : index
    %6 = vector.load %arg2[%c0_4, %c0_5] : memref<128x400xbf16, #tpu.memory_space<vmem>>, vector<128x400xbf16>
    %cst = arith.constant dense<0.000000e+00> : vector<8x400xf32>
    %7 = tpu.matmul %5, %6, %cst {dimension_numbers = #tpu.dot_dimension_numbers<[1], [0], [0], [1], [0, 0, 1, 1], [], []>} : vector<8x128xbf16>, vector<128x400xbf16>, vector<8x400xf32> -> vector<8x400xf32>
    %c0_6 = arith.constant 0 : index
    %c0_7 = arith.constant 0 : index
    %8 = vector.load %arg3[%c0_6, %c0_7] : memref<1x400xf32, #tpu.memory_space<vmem>>, vector<1x400xf32>
    %9 = vector.broadcast %8 : vector<1x400xf32> to vector<8x400xf32>
    %10 = arith.addf %7, %9 : vector<8x400xf32>
    %c0_8 = arith.constant 0 : index
    %c0_9 = arith.constant 0 : index
    %11 = vector.load %arg4[%c0_8, %c0_9] : memref<1x400xf32, #tpu.memory_space<vmem>>, vector<1x400xf32>
    %12 = vector.shape_cast %11 : vector<1x400xf32> to vector<1x400xf32>
    %13 = vector.broadcast %12 : vector<1x400xf32> to vector<2x400xf32>
    %14 = tpu.concatenate %13, %10 in 0 : vector<2x400xf32>, vector<8x400xf32> -> vector<10x400xf32>
    %15 = tpu.iota {dimensions = array<i32: 0>} : vector<10x10xi32>
    %16 = tpu.iota {dimensions = array<i32: 1>} : vector<10x10xi32>
    %c0_i32 = arith.constant 0 : i32
    %17 = vector.broadcast %c0_i32 : i32 to vector<10x10xi32>
    %18 = arith.cmpi eq, %15, %17 : vector<10x10xi32>
    %c2_i32 = arith.constant 2 : i32
    %19 = vector.broadcast %c2_i32 : i32 to vector<10x10xi32>
    %20 = arith.cmpi sge, %15, %19 : vector<10x10xi32>
    %c6_i32 = arith.constant 6 : i32
    %21 = vector.broadcast %c6_i32 : i32 to vector<10x10xi32>
    %22 = arith.cmpi slt, %15, %21 : vector<10x10xi32>
    %23 = arith.andi %20, %22 : vector<10x10xi1>
    %24 = arith.ori %18, %23 : vector<10x10xi1>
    %c0_i32_10 = arith.constant 0 : i32
    %25 = vector.broadcast %c0_i32_10 : i32 to vector<10x10xi32>
    %26 = arith.cmpi eq, %16, %25 : vector<10x10xi32>
    %c2_i32_11 = arith.constant 2 : i32
    %27 = vector.broadcast %c2_i32_11 : i32 to vector<10x10xi32>
    %28 = arith.cmpi sge, %16, %27 : vector<10x10xi32>
    %c6_i32_12 = arith.constant 6 : i32
    %29 = vector.broadcast %c6_i32_12 : i32 to vector<10x10xi32>
    %30 = arith.cmpi slt, %16, %29 : vector<10x10xi32>
    %31 = arith.andi %28, %30 : vector<10x10xi1>
    %32 = arith.ori %26, %31 : vector<10x10xi1>
    %33 = arith.andi %24, %32 : vector<10x10xi1>
    %c1_i32 = arith.constant 1 : i32
    %34 = vector.broadcast %c1_i32 : i32 to vector<10x10xi32>
    %35 = arith.cmpi eq, %15, %34 : vector<10x10xi32>
    %c6_i32_13 = arith.constant 6 : i32
    %36 = vector.broadcast %c6_i32_13 : i32 to vector<10x10xi32>
    %37 = arith.cmpi sge, %15, %36 : vector<10x10xi32>
    %c10_i32 = arith.constant 10 : i32
    %38 = vector.broadcast %c10_i32 : i32 to vector<10x10xi32>
    %39 = arith.cmpi slt, %15, %38 : vector<10x10xi32>
    %40 = arith.andi %37, %39 : vector<10x10xi1>
    %41 = arith.ori %35, %40 : vector<10x10xi1>
    %c1_i32_14 = arith.constant 1 : i32
    %42 = vector.broadcast %c1_i32_14 : i32 to vector<10x10xi32>
    %43 = arith.cmpi eq, %16, %42 : vector<10x10xi32>
    %c6_i32_15 = arith.constant 6 : i32
    %44 = vector.broadcast %c6_i32_15 : i32 to vector<10x10xi32>
    %45 = arith.cmpi sge, %16, %44 : vector<10x10xi32>
    %c10_i32_16 = arith.constant 10 : i32
    %46 = vector.broadcast %c10_i32_16 : i32 to vector<10x10xi32>
    %47 = arith.cmpi slt, %16, %46 : vector<10x10xi32>
    %48 = arith.andi %45, %47 : vector<10x10xi1>
    %49 = arith.ori %43, %48 : vector<10x10xi1>
    %50 = arith.andi %41, %49 : vector<10x10xi1>
    %51 = arith.ori %33, %50 : vector<10x10xi1>
    %cst_17 = arith.constant 0.000000e+00 : f32
    %cst_18 = arith.constant -1.000000e+30 : f32
    %52 = vector.broadcast %cst_17 : f32 to vector<10x10xf32>
    %53 = vector.broadcast %cst_18 : f32 to vector<10x10xf32>
    %54 = arith.select %51, %52, %53 : vector<10x10xi1>, vector<10x10xf32>
    %c0_19 = arith.constant 0 : index
    %c0_20 = arith.constant 0 : index
    %55 = vector.load %arg5[%c0_19, %c0_20] : memref<1x400xf32, #tpu.memory_space<vmem>>, vector<1x400xf32>
    %c0_21 = arith.constant 0 : index
    %c0_22 = arith.constant 0 : index
    %56 = vector.load %arg6[%c0_21, %c0_22] : memref<1x400xf32, #tpu.memory_space<vmem>>, vector<1x400xf32>
    %cst_23 = arith.constant dense<0.000000e+00> : vector<10xf32>
    %57 = vector.multi_reduction <add>, %14, %cst_23 [1] : vector<10x400xf32> to vector<10xf32>
    %58 = vector.shape_cast %57 : vector<10xf32> to vector<10x1xf32>
    %cst_24 = arith.constant 4.000000e+02 : f32
    %59 = vector.broadcast %cst_24 : f32 to vector<10x1xf32>
    %60 = arith.divf %58, %59 : vector<10x1xf32>
    %61 = vector.broadcast %60 : vector<10x1xf32> to vector<10x400xf32>
    %62 = arith.subf %14, %61 : vector<10x400xf32>
    %63 = arith.mulf %62, %62 : vector<10x400xf32>
    %cst_25 = arith.constant dense<0.000000e+00> : vector<10xf32>
    %64 = vector.multi_reduction <add>, %63, %cst_25 [1] : vector<10x400xf32> to vector<10xf32>
    %65 = vector.shape_cast %64 : vector<10xf32> to vector<10x1xf32>
    %cst_26 = arith.constant 4.000000e+02 : f32
    %66 = vector.broadcast %cst_26 : f32 to vector<10x1xf32>
    %67 = arith.divf %65, %66 : vector<10x1xf32>
    %cst_27 = arith.constant 9.99999974E-6 : f32
    %68 = vector.broadcast %cst_27 : f32 to vector<10x1xf32>
    %69 = arith.addf %67, %68 : vector<10x1xf32>
    %70 = math.rsqrt %69 : vector<10x1xf32>
    %71 = vector.broadcast %70 : vector<10x1xf32> to vector<10x400xf32>
    %72 = arith.mulf %62, %71 : vector<10x400xf32>
    %73 = vector.broadcast %55 : vector<1x400xf32> to vector<10x400xf32>
    %74 = arith.mulf %72, %73 : vector<10x400xf32>
    %75 = vector.broadcast %56 : vector<1x400xf32> to vector<10x400xf32>
    %76 = arith.addf %74, %75 : vector<10x400xf32>
    %77 = arith.truncf %76 : vector<10x400xf32> to vector<10x400xbf16>
    %c0_28 = arith.constant 0 : index
    %c0_29 = arith.constant 0 : index
    %78 = vector.load %arg7[%c0_28, %c0_29] : memref<400x1536xbf16, #tpu.memory_space<vmem>>, vector<400x1536xbf16>
    %cst_30 = arith.constant dense<0.000000e+00> : vector<10x1536xf32>
    %79 = tpu.matmul %77, %78, %cst_30 {dimension_numbers = #tpu.dot_dimension_numbers<[1], [0], [0], [1], [0, 0, 1, 1], [], []>} : vector<10x400xbf16>, vector<400x1536xbf16>, vector<10x1536xf32> -> vector<10x1536xf32>
    %80 = vector.extract_strided_slice %79 {offsets = [0, 0], sizes = [10, 64], strides = [1, 1]} : vector<10x1536xf32> to vector<10x64xf32>
    %81 = vector.extract_strided_slice %79 {offsets = [0, 512], sizes = [10, 64], strides = [1, 1]} : vector<10x1536xf32> to vector<10x64xf32>
    %82 = vector.extract_strided_slice %79 {offsets = [0, 1024], sizes = [10, 64], strides = [1, 1]} : vector<10x1536xf32> to vector<10x64xf32>
    %cst_31 = arith.constant dense<0.000000e+00> : vector<10x10xf32>
    %83 = tpu.matmul %80, %81, %cst_31 {dimension_numbers = #tpu.dot_dimension_numbers<[1], [1], [0], [0], [0, 0, 1, 0], [], []>} : vector<10x64xf32>, vector<10x64xf32>, vector<10x10xf32> -> vector<10x10xf32>
    %cst_32 = arith.constant 5.000000e-02 : f32
    %84 = vector.broadcast %cst_32 : f32 to vector<10x10xf32>
    %85 = arith.mulf %83, %84 : vector<10x10xf32>
    %86 = arith.addf %85, %54 : vector<10x10xf32>
    %cst_33 = arith.constant dense<0xFF800000> : vector<10xf32>
    %87 = vector.multi_reduction <maximumf>, %86, %cst_33 [1] : vector<10x10xf32> to vector<10xf32>
    %88 = vector.shape_cast %87 : vector<10xf32> to vector<10x1xf32>
    %89 = vector.broadcast %88 : vector<10x1xf32> to vector<10x10xf32>
    %90 = arith.subf %86, %89 : vector<10x10xf32>
    %91 = math.exp %90 : vector<10x10xf32>
    %cst_34 = arith.constant dense<0.000000e+00> : vector<10xf32>
    %92 = vector.multi_reduction <add>, %91, %cst_34 [1] : vector<10x10xf32> to vector<10xf32>
    %93 = vector.shape_cast %92 : vector<10xf32> to vector<10x1xf32>
    %94 = vector.broadcast %93 : vector<10x1xf32> to vector<10x10xf32>
    %95 = arith.divf %91, %94 : vector<10x10xf32>
    %cst_35 = arith.constant dense<0.000000e+00> : vector<10x64xf32>
    %96 = tpu.matmul %95, %82, %cst_35 {dimension_numbers = #tpu.dot_dimension_numbers<[1], [0], [0], [1], [0, 0, 1, 1], [], []>} : vector<10x10xf32>, vector<10x64xf32>, vector<10x64xf32> -> vector<10x64xf32>
    %97 = vector.extract_strided_slice %79 {offsets = [0, 64], sizes = [10, 64], strides = [1, 1]} : vector<10x1536xf32> to vector<10x64xf32>
    %98 = vector.extract_strided_slice %79 {offsets = [0, 576], sizes = [10, 64], strides = [1, 1]} : vector<10x1536xf32> to vector<10x64xf32>
    %99 = vector.extract_strided_slice %79 {offsets = [0, 1088], sizes = [10, 64], strides = [1, 1]} : vector<10x1536xf32> to vector<10x64xf32>
    %cst_36 = arith.constant dense<0.000000e+00> : vector<10x10xf32>
    %100 = tpu.matmul %97, %98, %cst_36 {dimension_numbers = #tpu.dot_dimension_numbers<[1], [1], [0], [0], [0, 0, 1, 0], [], []>} : vector<10x64xf32>, vector<10x64xf32>, vector<10x10xf32> -> vector<10x10xf32>
    %cst_37 = arith.constant 5.000000e-02 : f32
    %101 = vector.broadcast %cst_37 : f32 to vector<10x10xf32>
    %102 = arith.mulf %100, %101 : vector<10x10xf32>
    %103 = arith.addf %102, %54 : vector<10x10xf32>
    %cst_38 = arith.constant dense<0xFF800000> : vector<10xf32>
    %104 = vector.multi_reduction <maximumf>, %103, %cst_38 [1] : vector<10x10xf32> to vector<10xf32>
    %105 = vector.shape_cast %104 : vector<10xf32> to vector<10x1xf32>
    %106 = vector.broadcast %105 : vector<10x1xf32> to vector<10x10xf32>
    %107 = arith.subf %103, %106 : vector<10x10xf32>
    %108 = math.exp %107 : vector<10x10xf32>
    %cst_39 = arith.constant dense<0.000000e+00> : vector<10xf32>
    %109 = vector.multi_reduction <add>, %108, %cst_39 [1] : vector<10x10xf32> to vector<10xf32>
    %110 = vector.shape_cast %109 : vector<10xf32> to vector<10x1xf32>
    %111 = vector.broadcast %110 : vector<10x1xf32> to vector<10x10xf32>
    %112 = arith.divf %108, %111 : vector<10x10xf32>
    %cst_40 = arith.constant dense<0.000000e+00> : vector<10x64xf32>
    %113 = tpu.matmul %112, %99, %cst_40 {dimension_numbers = #tpu.dot_dimension_numbers<[1], [0], [0], [1], [0, 0, 1, 1], [], []>} : vector<10x10xf32>, vector<10x64xf32>, vector<10x64xf32> -> vector<10x64xf32>
    %114 = vector.extract_strided_slice %79 {offsets = [0, 128], sizes = [10, 64], strides = [1, 1]} : vector<10x1536xf32> to vector<10x64xf32>
    %115 = vector.extract_strided_slice %79 {offsets = [0, 640], sizes = [10, 64], strides = [1, 1]} : vector<10x1536xf32> to vector<10x64xf32>
    %116 = vector.extract_strided_slice %79 {offsets = [0, 1152], sizes = [10, 64], strides = [1, 1]} : vector<10x1536xf32> to vector<10x64xf32>
    %cst_41 = arith.constant dense<0.000000e+00> : vector<10x10xf32>
    %117 = tpu.matmul %114, %115, %cst_41 {dimension_numbers = #tpu.dot_dimension_numbers<[1], [1], [0], [0], [0, 0, 1, 0], [], []>} : vector<10x64xf32>, vector<10x64xf32>, vector<10x10xf32> -> vector<10x10xf32>
    %cst_42 = arith.constant 5.000000e-02 : f32
    %118 = vector.broadcast %cst_42 : f32 to vector<10x10xf32>
    %119 = arith.mulf %117, %118 : vector<10x10xf32>
    %120 = arith.addf %119, %54 : vector<10x10xf32>
    %cst_43 = arith.constant dense<0xFF800000> : vector<10xf32>
    %121 = vector.multi_reduction <maximumf>, %120, %cst_43 [1] : vector<10x10xf32> to vector<10xf32>
    %122 = vector.shape_cast %121 : vector<10xf32> to vector<10x1xf32>
    %123 = vector.broadcast %122 : vector<10x1xf32> to vector<10x10xf32>
    %124 = arith.subf %120, %123 : vector<10x10xf32>
    %125 = math.exp %124 : vector<10x10xf32>
    %cst_44 = arith.constant dense<0.000000e+00> : vector<10xf32>
    %126 = vector.multi_reduction <add>, %125, %cst_44 [1] : vector<10x10xf32> to vector<10xf32>
    %127 = vector.shape_cast %126 : vector<10xf32> to vector<10x1xf32>
    %128 = vector.broadcast %127 : vector<10x1xf32> to vector<10x10xf32>
    %129 = arith.divf %125, %128 : vector<10x10xf32>
    %cst_45 = arith.constant dense<0.000000e+00> : vector<10x64xf32>
    %130 = tpu.matmul %129, %116, %cst_45 {dimension_numbers = #tpu.dot_dimension_numbers<[1], [0], [0], [1], [0, 0, 1, 1], [], []>} : vector<10x10xf32>, vector<10x64xf32>, vector<10x64xf32> -> vector<10x64xf32>
    %131 = vector.extract_strided_slice %79 {offsets = [0, 192], sizes = [10, 64], strides = [1, 1]} : vector<10x1536xf32> to vector<10x64xf32>
    %132 = vector.extract_strided_slice %79 {offsets = [0, 704], sizes = [10, 64], strides = [1, 1]} : vector<10x1536xf32> to vector<10x64xf32>
    %133 = vector.extract_strided_slice %79 {offsets = [0, 1216], sizes = [10, 64], strides = [1, 1]} : vector<10x1536xf32> to vector<10x64xf32>
    %cst_46 = arith.constant dense<0.000000e+00> : vector<10x10xf32>
    %134 = tpu.matmul %131, %132, %cst_46 {dimension_numbers = #tpu.dot_dimension_numbers<[1], [1], [0], [0], [0, 0, 1, 0], [], []>} : vector<10x64xf32>, vector<10x64xf32>, vector<10x10xf32> -> vector<10x10xf32>
    %cst_47 = arith.constant 5.000000e-02 : f32
    %135 = vector.broadcast %cst_47 : f32 to vector<10x10xf32>
    %136 = arith.mulf %134, %135 : vector<10x10xf32>
    %137 = arith.addf %136, %54 : vector<10x10xf32>
    %cst_48 = arith.constant dense<0xFF800000> : vector<10xf32>
    %138 = vector.multi_reduction <maximumf>, %137, %cst_48 [1] : vector<10x10xf32> to vector<10xf32>
    %139 = vector.shape_cast %138 : vector<10xf32> to vector<10x1xf32>
    %140 = vector.broadcast %139 : vector<10x1xf32> to vector<10x10xf32>
    %141 = arith.subf %137, %140 : vector<10x10xf32>
    %142 = math.exp %141 : vector<10x10xf32>
    %cst_49 = arith.constant dense<0.000000e+00> : vector<10xf32>
    %143 = vector.multi_reduction <add>, %142, %cst_49 [1] : vector<10x10xf32> to vector<10xf32>
    %144 = vector.shape_cast %143 : vector<10xf32> to vector<10x1xf32>
    %145 = vector.broadcast %144 : vector<10x1xf32> to vector<10x10xf32>
    %146 = arith.divf %142, %145 : vector<10x10xf32>
    %cst_50 = arith.constant dense<0.000000e+00> : vector<10x64xf32>
    %147 = tpu.matmul %146, %133, %cst_50 {dimension_numbers = #tpu.dot_dimension_numbers<[1], [0], [0], [1], [0, 0, 1, 1], [], []>} : vector<10x10xf32>, vector<10x64xf32>, vector<10x64xf32> -> vector<10x64xf32>
    %148 = vector.extract_strided_slice %79 {offsets = [0, 256], sizes = [10, 64], strides = [1, 1]} : vector<10x1536xf32> to vector<10x64xf32>
    %149 = vector.extract_strided_slice %79 {offsets = [0, 768], sizes = [10, 64], strides = [1, 1]} : vector<10x1536xf32> to vector<10x64xf32>
    %150 = vector.extract_strided_slice %79 {offsets = [0, 1280], sizes = [10, 64], strides = [1, 1]} : vector<10x1536xf32> to vector<10x64xf32>
    %cst_51 = arith.constant dense<0.000000e+00> : vector<10x10xf32>
    %151 = tpu.matmul %148, %149, %cst_51 {dimension_numbers = #tpu.dot_dimension_numbers<[1], [1], [0], [0], [0, 0, 1, 0], [], []>} : vector<10x64xf32>, vector<10x64xf32>, vector<10x10xf32> -> vector<10x10xf32>
    %cst_52 = arith.constant 5.000000e-02 : f32
    %152 = vector.broadcast %cst_52 : f32 to vector<10x10xf32>
    %153 = arith.mulf %151, %152 : vector<10x10xf32>
    %154 = arith.addf %153, %54 : vector<10x10xf32>
    %cst_53 = arith.constant dense<0xFF800000> : vector<10xf32>
    %155 = vector.multi_reduction <maximumf>, %154, %cst_53 [1] : vector<10x10xf32> to vector<10xf32>
    %156 = vector.shape_cast %155 : vector<10xf32> to vector<10x1xf32>
    %157 = vector.broadcast %156 : vector<10x1xf32> to vector<10x10xf32>
    %158 = arith.subf %154, %157 : vector<10x10xf32>
    %159 = math.exp %158 : vector<10x10xf32>
    %cst_54 = arith.constant dense<0.000000e+00> : vector<10xf32>
    %160 = vector.multi_reduction <add>, %159, %cst_54 [1] : vector<10x10xf32> to vector<10xf32>
    %161 = vector.shape_cast %160 : vector<10xf32> to vector<10x1xf32>
    %162 = vector.broadcast %161 : vector<10x1xf32> to vector<10x10xf32>
    %163 = arith.divf %159, %162 : vector<10x10xf32>
    %cst_55 = arith.constant dense<0.000000e+00> : vector<10x64xf32>
    %164 = tpu.matmul %163, %150, %cst_55 {dimension_numbers = #tpu.dot_dimension_numbers<[1], [0], [0], [1], [0, 0, 1, 1], [], []>} : vector<10x10xf32>, vector<10x64xf32>, vector<10x64xf32> -> vector<10x64xf32>
    %165 = vector.extract_strided_slice %79 {offsets = [0, 320], sizes = [10, 64], strides = [1, 1]} : vector<10x1536xf32> to vector<10x64xf32>
    %166 = vector.extract_strided_slice %79 {offsets = [0, 832], sizes = [10, 64], strides = [1, 1]} : vector<10x1536xf32> to vector<10x64xf32>
    %167 = vector.extract_strided_slice %79 {offsets = [0, 1344], sizes = [10, 64], strides = [1, 1]} : vector<10x1536xf32> to vector<10x64xf32>
    %cst_56 = arith.constant dense<0.000000e+00> : vector<10x10xf32>
    %168 = tpu.matmul %165, %166, %cst_56 {dimension_numbers = #tpu.dot_dimension_numbers<[1], [1], [0], [0], [0, 0, 1, 0], [], []>} : vector<10x64xf32>, vector<10x64xf32>, vector<10x10xf32> -> vector<10x10xf32>
    %cst_57 = arith.constant 5.000000e-02 : f32
    %169 = vector.broadcast %cst_57 : f32 to vector<10x10xf32>
    %170 = arith.mulf %168, %169 : vector<10x10xf32>
    %171 = arith.addf %170, %54 : vector<10x10xf32>
    %cst_58 = arith.constant dense<0xFF800000> : vector<10xf32>
    %172 = vector.multi_reduction <maximumf>, %171, %cst_58 [1] : vector<10x10xf32> to vector<10xf32>
    %173 = vector.shape_cast %172 : vector<10xf32> to vector<10x1xf32>
    %174 = vector.broadcast %173 : vector<10x1xf32> to vector<10x10xf32>
    %175 = arith.subf %171, %174 : vector<10x10xf32>
    %176 = math.exp %175 : vector<10x10xf32>
    %cst_59 = arith.constant dense<0.000000e+00> : vector<10xf32>
    %177 = vector.multi_reduction <add>, %176, %cst_59 [1] : vector<10x10xf32> to vector<10xf32>
    %178 = vector.shape_cast %177 : vector<10xf32> to vector<10x1xf32>
    %179 = vector.broadcast %178 : vector<10x1xf32> to vector<10x10xf32>
    %180 = arith.divf %176, %179 : vector<10x10xf32>
    %cst_60 = arith.constant dense<0.000000e+00> : vector<10x64xf32>
    %181 = tpu.matmul %180, %167, %cst_60 {dimension_numbers = #tpu.dot_dimension_numbers<[1], [0], [0], [1], [0, 0, 1, 1], [], []>} : vector<10x10xf32>, vector<10x64xf32>, vector<10x64xf32> -> vector<10x64xf32>
    %182 = vector.extract_strided_slice %79 {offsets = [0, 384], sizes = [10, 64], strides = [1, 1]} : vector<10x1536xf32> to vector<10x64xf32>
    %183 = vector.extract_strided_slice %79 {offsets = [0, 896], sizes = [10, 64], strides = [1, 1]} : vector<10x1536xf32> to vector<10x64xf32>
    %184 = vector.extract_strided_slice %79 {offsets = [0, 1408], sizes = [10, 64], strides = [1, 1]} : vector<10x1536xf32> to vector<10x64xf32>
    %cst_61 = arith.constant dense<0.000000e+00> : vector<10x10xf32>
    %185 = tpu.matmul %182, %183, %cst_61 {dimension_numbers = #tpu.dot_dimension_numbers<[1], [1], [0], [0], [0, 0, 1, 0], [], []>} : vector<10x64xf32>, vector<10x64xf32>, vector<10x10xf32> -> vector<10x10xf32>
    %cst_62 = arith.constant 5.000000e-02 : f32
    %186 = vector.broadcast %cst_62 : f32 to vector<10x10xf32>
    %187 = arith.mulf %185, %186 : vector<10x10xf32>
    %188 = arith.addf %187, %54 : vector<10x10xf32>
    %cst_63 = arith.constant dense<0xFF800000> : vector<10xf32>
    %189 = vector.multi_reduction <maximumf>, %188, %cst_63 [1] : vector<10x10xf32> to vector<10xf32>
    %190 = vector.shape_cast %189 : vector<10xf32> to vector<10x1xf32>
    %191 = vector.broadcast %190 : vector<10x1xf32> to vector<10x10xf32>
    %192 = arith.subf %188, %191 : vector<10x10xf32>
    %193 = math.exp %192 : vector<10x10xf32>
    %cst_64 = arith.constant dense<0.000000e+00> : vector<10xf32>
    %194 = vector.multi_reduction <add>, %193, %cst_64 [1] : vector<10x10xf32> to vector<10xf32>
    %195 = vector.shape_cast %194 : vector<10xf32> to vector<10x1xf32>
    %196 = vector.broadcast %195 : vector<10x1xf32> to vector<10x10xf32>
    %197 = arith.divf %193, %196 : vector<10x10xf32>
    %cst_65 = arith.constant dense<0.000000e+00> : vector<10x64xf32>
    %198 = tpu.matmul %197, %184, %cst_65 {dimension_numbers = #tpu.dot_dimension_numbers<[1], [0], [0], [1], [0, 0, 1, 1], [], []>} : vector<10x10xf32>, vector<10x64xf32>, vector<10x64xf32> -> vector<10x64xf32>
    %199 = vector.extract_strided_slice %79 {offsets = [0, 448], sizes = [10, 64], strides = [1, 1]} : vector<10x1536xf32> to vector<10x64xf32>
    %200 = vector.extract_strided_slice %79 {offsets = [0, 960], sizes = [10, 64], strides = [1, 1]} : vector<10x1536xf32> to vector<10x64xf32>
    %201 = vector.extract_strided_slice %79 {offsets = [0, 1472], sizes = [10, 64], strides = [1, 1]} : vector<10x1536xf32> to vector<10x64xf32>
    %cst_66 = arith.constant dense<0.000000e+00> : vector<10x10xf32>
    %202 = tpu.matmul %199, %200, %cst_66 {dimension_numbers = #tpu.dot_dimension_numbers<[1], [1], [0], [0], [0, 0, 1, 0], [], []>} : vector<10x64xf32>, vector<10x64xf32>, vector<10x10xf32> -> vector<10x10xf32>
    %cst_67 = arith.constant 5.000000e-02 : f32
    %203 = vector.broadcast %cst_67 : f32 to vector<10x10xf32>
    %204 = arith.mulf %202, %203 : vector<10x10xf32>
    %205 = arith.addf %204, %54 : vector<10x10xf32>
    %cst_68 = arith.constant dense<0xFF800000> : vector<10xf32>
    %206 = vector.multi_reduction <maximumf>, %205, %cst_68 [1] : vector<10x10xf32> to vector<10xf32>
    %207 = vector.shape_cast %206 : vector<10xf32> to vector<10x1xf32>
    %208 = vector.broadcast %207 : vector<10x1xf32> to vector<10x10xf32>
    %209 = arith.subf %205, %208 : vector<10x10xf32>
    %210 = math.exp %209 : vector<10x10xf32>
    %cst_69 = arith.constant dense<0.000000e+00> : vector<10xf32>
    %211 = vector.multi_reduction <add>, %210, %cst_69 [1] : vector<10x10xf32> to vector<10xf32>
    %212 = vector.shape_cast %211 : vector<10xf32> to vector<10x1xf32>
    %213 = vector.broadcast %212 : vector<10x1xf32> to vector<10x10xf32>
    %214 = arith.divf %210, %213 : vector<10x10xf32>
    %cst_70 = arith.constant dense<0.000000e+00> : vector<10x64xf32>
    %215 = tpu.matmul %214, %201, %cst_70 {dimension_numbers = #tpu.dot_dimension_numbers<[1], [0], [0], [1], [0, 0, 1, 1], [], []>} : vector<10x10xf32>, vector<10x64xf32>, vector<10x64xf32> -> vector<10x64xf32>
    %216 = tpu.concatenate %96, %113, %130, %147, %164, %181, %198, %215 in 1 : vector<10x64xf32>, vector<10x64xf32>, vector<10x64xf32>, vector<10x64xf32>, vector<10x64xf32>, vector<10x64xf32>, vector<10x64xf32>, vector<10x64xf32> -> vector<10x512xf32>
    %217 = arith.truncf %216 : vector<10x512xf32> to vector<10x512xbf16>
    %c0_71 = arith.constant 0 : index
    %c0_72 = arith.constant 0 : index
    %218 = vector.load %arg8[%c0_71, %c0_72] : memref<512x400xbf16, #tpu.memory_space<vmem>>, vector<512x400xbf16>
    %cst_73 = arith.constant dense<0.000000e+00> : vector<10x400xf32>
    %219 = tpu.matmul %217, %218, %cst_73 {dimension_numbers = #tpu.dot_dimension_numbers<[1], [0], [0], [1], [0, 0, 1, 1], [], []>} : vector<10x512xbf16>, vector<512x400xbf16>, vector<10x400xf32> -> vector<10x400xf32>
    %220 = arith.addf %14, %219 : vector<10x400xf32>
    %c0_74 = arith.constant 0 : index
    %c0_75 = arith.constant 0 : index
    %221 = vector.load %arg9[%c0_74, %c0_75] : memref<1x400xf32, #tpu.memory_space<vmem>>, vector<1x400xf32>
    %222 = vector.broadcast %221 : vector<1x400xf32> to vector<10x400xf32>
    %223 = arith.addf %220, %222 : vector<10x400xf32>
    %c0_76 = arith.constant 0 : index
    %c0_77 = arith.constant 0 : index
    %224 = vector.load %arg10[%c0_76, %c0_77] : memref<1x400xf32, #tpu.memory_space<vmem>>, vector<1x400xf32>
    %c0_78 = arith.constant 0 : index
    %c0_79 = arith.constant 0 : index
    %225 = vector.load %arg11[%c0_78, %c0_79] : memref<1x400xf32, #tpu.memory_space<vmem>>, vector<1x400xf32>
    %cst_80 = arith.constant dense<0.000000e+00> : vector<10xf32>
    %226 = vector.multi_reduction <add>, %223, %cst_80 [1] : vector<10x400xf32> to vector<10xf32>
    %227 = vector.shape_cast %226 : vector<10xf32> to vector<10x1xf32>
    %cst_81 = arith.constant 4.000000e+02 : f32
    %228 = vector.broadcast %cst_81 : f32 to vector<10x1xf32>
    %229 = arith.divf %227, %228 : vector<10x1xf32>
    %230 = vector.broadcast %229 : vector<10x1xf32> to vector<10x400xf32>
    %231 = arith.subf %223, %230 : vector<10x400xf32>
    %232 = arith.mulf %231, %231 : vector<10x400xf32>
    %cst_82 = arith.constant dense<0.000000e+00> : vector<10xf32>
    %233 = vector.multi_reduction <add>, %232, %cst_82 [1] : vector<10x400xf32> to vector<10xf32>
    %234 = vector.shape_cast %233 : vector<10xf32> to vector<10x1xf32>
    %cst_83 = arith.constant 4.000000e+02 : f32
    %235 = vector.broadcast %cst_83 : f32 to vector<10x1xf32>
    %236 = arith.divf %234, %235 : vector<10x1xf32>
    %cst_84 = arith.constant 9.99999974E-6 : f32
    %237 = vector.broadcast %cst_84 : f32 to vector<10x1xf32>
    %238 = arith.addf %236, %237 : vector<10x1xf32>
    %239 = math.rsqrt %238 : vector<10x1xf32>
    %240 = vector.broadcast %239 : vector<10x1xf32> to vector<10x400xf32>
    %241 = arith.mulf %231, %240 : vector<10x400xf32>
    %242 = vector.broadcast %224 : vector<1x400xf32> to vector<10x400xf32>
    %243 = arith.mulf %241, %242 : vector<10x400xf32>
    %244 = vector.broadcast %225 : vector<1x400xf32> to vector<10x400xf32>
    %245 = arith.addf %243, %244 : vector<10x400xf32>
    %246 = arith.truncf %245 : vector<10x400xf32> to vector<10x400xbf16>
    %c0_85 = arith.constant 0 : index
    %c0_86 = arith.constant 0 : index
    %247 = vector.load %arg12[%c0_85, %c0_86] : memref<400x200xbf16, #tpu.memory_space<vmem>>, vector<400x200xbf16>
    %cst_87 = arith.constant dense<0.000000e+00> : vector<10x200xf32>
    %248 = tpu.matmul %246, %247, %cst_87 {dimension_numbers = #tpu.dot_dimension_numbers<[1], [0], [0], [1], [0, 0, 1, 1], [], []>} : vector<10x400xbf16>, vector<400x200xbf16>, vector<10x200xf32> -> vector<10x200xf32>
    %c0_88 = arith.constant 0 : index
    %c0_89 = arith.constant 0 : index
    %249 = vector.load %arg13[%c0_88, %c0_89] : memref<1x200xf32, #tpu.memory_space<vmem>>, vector<1x200xf32>
    %250 = vector.broadcast %249 : vector<1x200xf32> to vector<10x200xf32>
    %251 = arith.addf %248, %250 : vector<10x200xf32>
    %cst_90 = arith.constant 5.000000e-01 : f32
    %252 = vector.broadcast %cst_90 : f32 to vector<10x200xf32>
    %253 = arith.mulf %252, %251 : vector<10x200xf32>
    %cst_91 = arith.constant 4.471500e-02 : f32
    %254 = vector.broadcast %cst_91 : f32 to vector<10x200xf32>
    %255 = arith.mulf %254, %251 : vector<10x200xf32>
    %256 = arith.mulf %255, %251 : vector<10x200xf32>
    %257 = arith.mulf %256, %251 : vector<10x200xf32>
    %258 = arith.addf %251, %257 : vector<10x200xf32>
    %cst_92 = arith.constant 0.797884583 : f32
    %259 = vector.broadcast %cst_92 : f32 to vector<10x200xf32>
    %260 = arith.mulf %259, %258 : vector<10x200xf32>
    %261 = math.tanh %260 : vector<10x200xf32>
    %cst_93 = arith.constant 1.000000e+00 : f32
    %262 = vector.broadcast %cst_93 : f32 to vector<10x200xf32>
    %263 = arith.addf %262, %261 : vector<10x200xf32>
    %264 = arith.mulf %253, %263 : vector<10x200xf32>
    %265 = arith.truncf %264 : vector<10x200xf32> to vector<10x200xbf16>
    %c0_94 = arith.constant 0 : index
    %c0_95 = arith.constant 0 : index
    %266 = vector.load %arg14[%c0_94, %c0_95] : memref<200x400xbf16, #tpu.memory_space<vmem>>, vector<200x400xbf16>
    %cst_96 = arith.constant dense<0.000000e+00> : vector<10x400xf32>
    %267 = tpu.matmul %265, %266, %cst_96 {dimension_numbers = #tpu.dot_dimension_numbers<[1], [0], [0], [1], [0, 0, 1, 1], [], []>} : vector<10x200xbf16>, vector<200x400xbf16>, vector<10x400xf32> -> vector<10x400xf32>
    %c0_97 = arith.constant 0 : index
    %c0_98 = arith.constant 0 : index
    %268 = vector.load %arg15[%c0_97, %c0_98] : memref<1x400xf32, #tpu.memory_space<vmem>>, vector<1x400xf32>
    %269 = vector.broadcast %268 : vector<1x400xf32> to vector<10x400xf32>
    %270 = arith.addf %267, %269 : vector<10x400xf32>
    %271 = arith.addf %223, %270 : vector<10x400xf32>
    %272 = vector.extract_strided_slice %271 {offsets = [0, 0], sizes = [2, 400], strides = [1, 1]} : vector<10x400xf32> to vector<2x400xf32>
    tpu.wait_dma2 semaphore(%arg20 : memref<!tpu.dma_semaphore, #tpu.memory_space<semaphore_mem>>) src(%arg17 : memref<400x512xbf16, #tpu.memory_space<any>>) dst(%arg19 : memref<400x512xbf16, #tpu.memory_space<vmem>>)
    %273 = arith.truncf %272 : vector<2x400xf32> to vector<2x400xbf16>
    %c0_99 = arith.constant 0 : index
    %c0_100 = arith.constant 0 : index
    %274 = vector.load %arg19[%c0_99, %c0_100] : memref<400x512xbf16, #tpu.memory_space<vmem>>, vector<400x512xbf16>
    %cst_101 = arith.constant dense<0.000000e+00> : vector<2x512xf32>
    %275 = tpu.matmul %273, %274, %cst_101 {dimension_numbers = #tpu.dot_dimension_numbers<[1], [0], [0], [1], [0, 0, 1, 1], [], []>} : vector<2x400xbf16>, vector<400x512xbf16>, vector<2x512xf32> -> vector<2x512xf32>
    %c0_102 = arith.constant 0 : index
    %c0_103 = arith.constant 0 : index
    %276 = vector.load %arg16[%c0_102, %c0_103] : memref<1x512xf32, #tpu.memory_space<vmem>>, vector<1x512xf32>
    %277 = vector.broadcast %276 : vector<1x512xf32> to vector<2x512xf32>
    %278 = arith.addf %275, %277 : vector<2x512xf32>
    %279 = tpu.iota {dimensions = array<i32: 0>} : vector<2x2xi32>
    %280 = tpu.iota {dimensions = array<i32: 1>} : vector<2x2xi32>
    %281 = arith.cmpi eq, %279, %280 : vector<2x2xi32>
    %cst_104 = arith.constant 0.000000e+00 : f32
    %282 = vector.broadcast %cst_104 : f32 to vector<1x1xf32>
    %c0_105 = arith.constant 0 : index
    %c0_106 = arith.constant 0 : index
    %c0_107 = arith.constant 0 : index
    %283 = vector.load %arg1[%c0_105, %c0_106, %c0_107] : memref<4x2x128xf32, #tpu.memory_space<vmem>>, vector<1x2x128xf32>
    %284 = vector.shape_cast %283 : vector<1x2x128xf32> to vector<2x128xf32>
    %285 = vector.extract_strided_slice %278 {offsets = [0, 0], sizes = [2, 128], strides = [1, 1]} : vector<2x512xf32> to vector<2x128xf32>
    %cst_108 = arith.constant dense<0.000000e+00> : vector<2x2xf32>
    %286 = tpu.matmul %284, %285, %cst_108 {dimension_numbers = #tpu.dot_dimension_numbers<[1], [1], [0], [0], [0, 0, 1, 0], [], []>} : vector<2x128xf32>, vector<2x128xf32>, vector<2x2xf32> -> vector<2x2xf32>
    %cst_109 = arith.constant dense<0xFF800000> : vector<2xf32>
    %287 = vector.multi_reduction <maximumf>, %286, %cst_109 [1] : vector<2x2xf32> to vector<2xf32>
    %288 = vector.shape_cast %287 : vector<2xf32> to vector<2x1xf32>
    %289 = vector.broadcast %288 : vector<2x1xf32> to vector<2x2xf32>
    %290 = arith.subf %286, %289 : vector<2x2xf32>
    %291 = math.exp %290 : vector<2x2xf32>
    %cst_110 = arith.constant dense<0.000000e+00> : vector<2xf32>
    %292 = vector.multi_reduction <add>, %291, %cst_110 [1] : vector<2x2xf32> to vector<2xf32>
    %293 = vector.shape_cast %292 : vector<2xf32> to vector<2x1xf32>
    %294 = math.log %293 : vector<2x1xf32>
    %295 = arith.addf %294, %288 : vector<2x1xf32>
    %296 = vector.broadcast %295 : vector<2x1xf32> to vector<2x2xf32>
    %297 = arith.subf %286, %296 : vector<2x2xf32>
    %cst_111 = arith.constant 0.000000e+00 : f32
    %298 = vector.broadcast %cst_111 : f32 to vector<2x2xf32>
    %299 = arith.select %281, %297, %298 : vector<2x2xi1>, vector<2x2xf32>
    %300 = vector.shape_cast %299 : vector<2x2xf32> to vector<1x2x2xf32>
    %cst_112 = arith.constant dense<0.000000e+00> : vector<1xf32>
    %301 = vector.multi_reduction <add>, %300, %cst_112 [1, 2] : vector<1x2x2xf32> to vector<1xf32>
    %302 = vector.shape_cast %301 : vector<1xf32> to vector<1x1x1xf32>
    %303 = vector.extract %302[0, 0, 0] : f32 from vector<1x1x1xf32>
    %304 = vector.broadcast %303 : f32 to vector<1x1xf32>
    %305 = arith.addf %282, %304 : vector<1x1xf32>
    %c1_113 = arith.constant 1 : index
    %c0_114 = arith.constant 0 : index
    %c0_115 = arith.constant 0 : index
    %306 = vector.load %arg1[%c1_113, %c0_114, %c0_115] : memref<4x2x128xf32, #tpu.memory_space<vmem>>, vector<1x2x128xf32>
    %307 = vector.shape_cast %306 : vector<1x2x128xf32> to vector<2x128xf32>
    %308 = vector.extract_strided_slice %278 {offsets = [0, 128], sizes = [2, 128], strides = [1, 1]} : vector<2x512xf32> to vector<2x128xf32>
    %cst_116 = arith.constant dense<0.000000e+00> : vector<2x2xf32>
    %309 = tpu.matmul %307, %308, %cst_116 {dimension_numbers = #tpu.dot_dimension_numbers<[1], [1], [0], [0], [0, 0, 1, 0], [], []>} : vector<2x128xf32>, vector<2x128xf32>, vector<2x2xf32> -> vector<2x2xf32>
    %cst_117 = arith.constant dense<0xFF800000> : vector<2xf32>
    %310 = vector.multi_reduction <maximumf>, %309, %cst_117 [1] : vector<2x2xf32> to vector<2xf32>
    %311 = vector.shape_cast %310 : vector<2xf32> to vector<2x1xf32>
    %312 = vector.broadcast %311 : vector<2x1xf32> to vector<2x2xf32>
    %313 = arith.subf %309, %312 : vector<2x2xf32>
    %314 = math.exp %313 : vector<2x2xf32>
    %cst_118 = arith.constant dense<0.000000e+00> : vector<2xf32>
    %315 = vector.multi_reduction <add>, %314, %cst_118 [1] : vector<2x2xf32> to vector<2xf32>
    %316 = vector.shape_cast %315 : vector<2xf32> to vector<2x1xf32>
    %317 = math.log %316 : vector<2x1xf32>
    %318 = arith.addf %317, %311 : vector<2x1xf32>
    %319 = vector.broadcast %318 : vector<2x1xf32> to vector<2x2xf32>
    %320 = arith.subf %309, %319 : vector<2x2xf32>
    %cst_119 = arith.constant 0.000000e+00 : f32
    %321 = vector.broadcast %cst_119 : f32 to vector<2x2xf32>
    %322 = arith.select %281, %320, %321 : vector<2x2xi1>, vector<2x2xf32>
    %323 = vector.shape_cast %322 : vector<2x2xf32> to vector<1x2x2xf32>
    %cst_120 = arith.constant dense<0.000000e+00> : vector<1xf32>
    %324 = vector.multi_reduction <add>, %323, %cst_120 [1, 2] : vector<1x2x2xf32> to vector<1xf32>
    %325 = vector.shape_cast %324 : vector<1xf32> to vector<1x1x1xf32>
    %326 = vector.extract %325[0, 0, 0] : f32 from vector<1x1x1xf32>
    %327 = vector.broadcast %326 : f32 to vector<1x1xf32>
    %328 = arith.addf %305, %327 : vector<1x1xf32>
    %c2 = arith.constant 2 : index
    %c0_121 = arith.constant 0 : index
    %c0_122 = arith.constant 0 : index
    %329 = vector.load %arg1[%c2, %c0_121, %c0_122] : memref<4x2x128xf32, #tpu.memory_space<vmem>>, vector<1x2x128xf32>
    %330 = vector.shape_cast %329 : vector<1x2x128xf32> to vector<2x128xf32>
    %331 = vector.extract_strided_slice %278 {offsets = [0, 256], sizes = [2, 128], strides = [1, 1]} : vector<2x512xf32> to vector<2x128xf32>
    %cst_123 = arith.constant dense<0.000000e+00> : vector<2x2xf32>
    %332 = tpu.matmul %330, %331, %cst_123 {dimension_numbers = #tpu.dot_dimension_numbers<[1], [1], [0], [0], [0, 0, 1, 0], [], []>} : vector<2x128xf32>, vector<2x128xf32>, vector<2x2xf32> -> vector<2x2xf32>
    %cst_124 = arith.constant dense<0xFF800000> : vector<2xf32>
    %333 = vector.multi_reduction <maximumf>, %332, %cst_124 [1] : vector<2x2xf32> to vector<2xf32>
    %334 = vector.shape_cast %333 : vector<2xf32> to vector<2x1xf32>
    %335 = vector.broadcast %334 : vector<2x1xf32> to vector<2x2xf32>
    %336 = arith.subf %332, %335 : vector<2x2xf32>
    %337 = math.exp %336 : vector<2x2xf32>
    %cst_125 = arith.constant dense<0.000000e+00> : vector<2xf32>
    %338 = vector.multi_reduction <add>, %337, %cst_125 [1] : vector<2x2xf32> to vector<2xf32>
    %339 = vector.shape_cast %338 : vector<2xf32> to vector<2x1xf32>
    %340 = math.log %339 : vector<2x1xf32>
    %341 = arith.addf %340, %334 : vector<2x1xf32>
    %342 = vector.broadcast %341 : vector<2x1xf32> to vector<2x2xf32>
    %343 = arith.subf %332, %342 : vector<2x2xf32>
    %cst_126 = arith.constant 0.000000e+00 : f32
    %344 = vector.broadcast %cst_126 : f32 to vector<2x2xf32>
    %345 = arith.select %281, %343, %344 : vector<2x2xi1>, vector<2x2xf32>
    %346 = vector.shape_cast %345 : vector<2x2xf32> to vector<1x2x2xf32>
    %cst_127 = arith.constant dense<0.000000e+00> : vector<1xf32>
    %347 = vector.multi_reduction <add>, %346, %cst_127 [1, 2] : vector<1x2x2xf32> to vector<1xf32>
    %348 = vector.shape_cast %347 : vector<1xf32> to vector<1x1x1xf32>
    %349 = vector.extract %348[0, 0, 0] : f32 from vector<1x1x1xf32>
    %350 = vector.broadcast %349 : f32 to vector<1x1xf32>
    %351 = arith.addf %328, %350 : vector<1x1xf32>
    %c3 = arith.constant 3 : index
    %c0_128 = arith.constant 0 : index
    %c0_129 = arith.constant 0 : index
    %352 = vector.load %arg1[%c3, %c0_128, %c0_129] : memref<4x2x128xf32, #tpu.memory_space<vmem>>, vector<1x2x128xf32>
    %353 = vector.shape_cast %352 : vector<1x2x128xf32> to vector<2x128xf32>
    %354 = vector.extract_strided_slice %278 {offsets = [0, 384], sizes = [2, 128], strides = [1, 1]} : vector<2x512xf32> to vector<2x128xf32>
    %cst_130 = arith.constant dense<0.000000e+00> : vector<2x2xf32>
    %355 = tpu.matmul %353, %354, %cst_130 {dimension_numbers = #tpu.dot_dimension_numbers<[1], [1], [0], [0], [0, 0, 1, 0], [], []>} : vector<2x128xf32>, vector<2x128xf32>, vector<2x2xf32> -> vector<2x2xf32>
    %cst_131 = arith.constant dense<0xFF800000> : vector<2xf32>
    %356 = vector.multi_reduction <maximumf>, %355, %cst_131 [1] : vector<2x2xf32> to vector<2xf32>
    %357 = vector.shape_cast %356 : vector<2xf32> to vector<2x1xf32>
    %358 = vector.broadcast %357 : vector<2x1xf32> to vector<2x2xf32>
    %359 = arith.subf %355, %358 : vector<2x2xf32>
    %360 = math.exp %359 : vector<2x2xf32>
    %cst_132 = arith.constant dense<0.000000e+00> : vector<2xf32>
    %361 = vector.multi_reduction <add>, %360, %cst_132 [1] : vector<2x2xf32> to vector<2xf32>
    %362 = vector.shape_cast %361 : vector<2xf32> to vector<2x1xf32>
    %363 = math.log %362 : vector<2x1xf32>
    %364 = arith.addf %363, %357 : vector<2x1xf32>
    %365 = vector.broadcast %364 : vector<2x1xf32> to vector<2x2xf32>
    %366 = arith.subf %355, %365 : vector<2x2xf32>
    %cst_133 = arith.constant 0.000000e+00 : f32
    %367 = vector.broadcast %cst_133 : f32 to vector<2x2xf32>
    %368 = arith.select %281, %366, %367 : vector<2x2xi1>, vector<2x2xf32>
    %369 = vector.shape_cast %368 : vector<2x2xf32> to vector<1x2x2xf32>
    %cst_134 = arith.constant dense<0.000000e+00> : vector<1xf32>
    %370 = vector.multi_reduction <add>, %369, %cst_134 [1, 2] : vector<1x2x2xf32> to vector<1xf32>
    %371 = vector.shape_cast %370 : vector<1xf32> to vector<1x1x1xf32>
    %372 = vector.extract %371[0, 0, 0] : f32 from vector<1x1x1xf32>
    %373 = vector.broadcast %372 : f32 to vector<1x1xf32>
    %374 = arith.addf %351, %373 : vector<1x1xf32>
    %cst_135 = arith.constant -1.250000e-01 : f32
    %375 = vector.broadcast %cst_135 : f32 to vector<1x1xf32>
    %376 = arith.mulf %374, %375 : vector<1x1xf32>
    %c0_136 = arith.constant 0 : index
    %c0_137 = arith.constant 0 : index
    %377 = vector.load %arg18[%c0_136, %c0_137] : memref<1x1xf32, #tpu.memory_space<vmem>>, vector<1x1xf32>
    tpu.vector_store %arg18[%c0_136, %c0_137], %376 {strides = array<i32>} : memref<1x1xf32, #tpu.memory_space<vmem>>, vector<1x1xf32>,
    return
  }
}

</mosaic_0001>

<bundles_post_ra>
// kernel: tc_forward_tag0.1
= control target key start
LH: loop header
LB: loop body
LE: loop exit
PB: predicated region body
PF: predicated region fallthrough
CT: control target
= control target key end

     0   :  { %s13210_s0 = inlined_call_operand.hbm [shape: f32[2,4,128], index: 0, kind: input, shape index: {}]   ;;  %s13211_s1 = inlined_call_operand.vmem [shape: f32[4,2,128], index: 1, kind: input, shape index: {}]   ;;  %s13212_s2 = inlined_call_operand.vmem [shape: bf16[128,400], index: 2, kind: input, shape index: {}]   ;;  %s13213_s3 = inlined_call_operand.hbm [shape: f32[1,400], index: 3, kind: input, shape index: {}]   ;;  %s13214_s4 = inlined_call_operand.hbm [shape: f32[1,400], index: 4, kind: input, shape index: {}]   ;;  %s13215_s5 = inlined_call_operand.hbm [shape: f32[1,400], index: 5, kind: input, shape index: {}]   ;;  %s13216_s6 = inlined_call_operand.hbm [shape: f32[1,400], index: 6, kind: input, shape index: {}]   ;;  %s13217_s7 = inlined_call_operand.hbm [shape: bf16[400,1536], index: 7, kind: input, shape index: {}]   ;;  %s13218_s8 = inlined_call_operand.vmem [shape: bf16[512,400], index: 8, kind: input, shape index: {}]   ;;  %s13219_s9 = inlined_call_operand.hbm [shape: f32[1,400], index: 9, kind: input, shape index: {}]   ;;  %s13220_s10 = inlined_call_operand.hbm [shape: f32[1,400], index: 10, kind: input, shape index: {}]   ;;  %s13221_s11 = inlined_call_operand.hbm [shape: f32[1,400], index: 11, kind: input, shape index: {}]   ;;  %s13222_s12 = inlined_call_operand.hbm [shape: bf16[400,200], index: 12, kind: input, shape index: {}]   ;;  %s13223_s13 = inlined_call_operand.hbm [shape: f32[1,200], index: 13, kind: input, shape index: {}]   ;;  %s13224_s14 = inlined_call_operand.hbm [shape: bf16[200,400], index: 14, kind: input, shape index: {}]   ;;  %s13225_s15 = inlined_call_operand.hbm [shape: f32[1,400], index: 15, kind: input, shape index: {}]   ;;  %s13226_s16 = inlined_call_operand.hbm [shape: f32[1,512], index: 16, kind: input, shape index: {}]   ;;  %s13227_s17 = inlined_call_operand.hbm [shape: bf16[400,512], index: 17, kind: input, shape index: {}]   ;;  %s13228_s18 = inlined_call_operand.hbm [shape: f32[1,1], index: 18, kind: output, shape index: {}]  }
   0x1   :  { %13236 = sst [smem:[#allocation42_spill]] %s13210_s0 }
   0x2   :  { %13237 = sst [smem:[#allocation43_spill]] %s13211_s1 }
   0x3   :  { %13238 = sst [smem:[#allocation44_spill]] %s13212_s2 }
   0x4   :  { %23 = vsyncpa [#allocation5], 0 }
   0x5   :  { %24 = vsyncpa [#allocation8], 0 }
   0x6   :  { %25 = vsyncpa [#allocation11], 0 }
   0x7   :  { %26 = vsyncpa [#allocation14], 0 }
   0x8   :  { %27 = vsyncpa [#allocation17], 0 }
   0x9   :  { %28 = vsyncpa [#allocation20], 0 }
   0xa   :  { %29 = vsyncpa [#allocation23], 0 }
   0xb   :  { %30 = vsyncpa [#allocation26], 0  ;;  %s54_s29 = sshll.u32 %s13213_s3, 4  ;;  %s55_s29 = int_to_ptr.hbm [resolvable:$true] %s54_s29 }
   0xc   :  { %31 = vsyncpa [#allocation6], 0  ;;  %s11261_s30 = smov [#allocation7]   ;;  %s76_s20 = sshll.u32 %s13215_s5, 4  ;;  %s77_s20 = int_to_ptr.hbm [resolvable:$true] %s76_s20 }
   0xd   :  { %s56_s0 = sshll.u32 %s11261_s30, 4  ;;  %s11262_s21 = smov [#allocation10]   ;;  %s57_s0 = int_to_ptr.vmem [resolvable:$true] %s56_s0 }
   0xe   :  { %59 = dma.hbm_to_vmem [thread:$0]  %s55_s29, 64, %s57_s0, [#allocation8]  }
   0xf   :  { %s78_s22 = sshll.u32 %s11262_s21, 4  ;;  %s97_s24 = sshll.u32 %s13217_s7, 4  ;;  %s79_s22 = int_to_ptr.vmem [resolvable:$true] %s78_s22  ;;  %s98_s24 = int_to_ptr.hbm [resolvable:$true] %s97_s24 }
  0x10   :  { %81 = dma.hbm_to_vmem [thread:$0]  %s77_s20, 64, %s79_s22, [#allocation11]  }
  0x11   :  { %s11263_s3 = smov [#allocation13]   ;;  %s124_s28 = sshll.u32 %s13220_s10, 4  ;;  %s125_s28 = int_to_ptr.hbm [resolvable:$true] %s124_s28 }
  0x12   :  { %s99_s25 = sshll.u32 %s11263_s3, 4  ;;  %s11264_s30 = smov 768   ;;  %s100_s25 = int_to_ptr.vmem [resolvable:$true] %s99_s25 }
  0x13   :  { %s11265_s5 = smov 48   ;;  %s11266_s29 = smov [#allocation16]  }
  0x14   :  { %105 = dma.hbm_to_vmem [thread:$0]  %s98_s24, 38400, %s100_s25, [#allocation14], %s11264_s30, %s11264_s30, %s11265_s5  }
  0x15   :  { %s126_s0 = sshll.u32 %s11266_s29, 4  ;;  %s145_s7 = sshll.u32 %s13222_s12, 4  ;;  %s127_s0 = int_to_ptr.vmem [resolvable:$true] %s126_s0  ;;  %s146_s7 = int_to_ptr.hbm [resolvable:$true] %s145_s7 }
  0x16   :  { %129 = dma.hbm_to_vmem [thread:$0]  %s125_s28, 64, %s127_s0, [#allocation17]  }
  0x17   :  { %s11267_s20 = smov [#allocation19]   ;;  %s169_s10 = sshll.u32 %s13224_s14, 4  ;;  %s170_s10 = int_to_ptr.hbm [resolvable:$true] %s169_s10 }
  0x18   :  { %s147_s21 = sshll.u32 %s11267_s20, 4  ;;  %s11268_s23 = smov 128   ;;  %s148_s21 = int_to_ptr.vmem [resolvable:$true] %s147_s21 }
  0x19   :  { %s11269_s3 = smov 8   ;;  %s11270_s24 = smov [#allocation22]  }
  0x1a   :  { %153 = dma.hbm_to_vmem [thread:$0]  %s146_s7, 6400, %s148_s21, [#allocation20], %s11268_s23, %s11268_s23, %s11269_s3  }
  0x1b   :  { %s171_s25 = sshll.u32 %s11270_s24, 4  ;;  %s11271_s26 = smov 256   ;;  %s172_s25 = int_to_ptr.vmem [resolvable:$true] %s171_s25 }
  0x1c   :  { %s11272_s27 = smov 16   ;;  %s13239_s28 = sld [smem:[#allocation42_spill]] }
  0x1d   :  { %177 = dma.hbm_to_vmem [thread:$0]  %s170_s10, 6400, %s172_s25, [#allocation23], %s11271_s26, %s11271_s26, %s11272_s27  }
  0x1e   :  { %s11273_s29 = smov [#allocation4]   ;;  %s65_s1 = sshll.u32 %s13214_s4, 4  ;;  %s66_s1 = int_to_ptr.hbm [resolvable:$true] %s65_s1 }
  0x1f   :  { %s38_s0 = sshll.u32 %s11273_s29, 4  ;;  %s11274_s7 = smov 64   ;;  %s39_s0 = int_to_ptr.vmem [resolvable:$true] %s38_s0 }
  0x20   :  { %s11275_s20 = smov 4   ;;  %s11276_s21 = smov [#allocation9]  }
  0x21   :  { %s67_s22 = sshll.u32 %s11276_s21, 4  ;;  %s87_s23 = sshll.u32 %s13216_s6, 4  ;;  %s68_s22 = int_to_ptr.vmem [resolvable:$true] %s67_s22  ;;  %s88_s23 = int_to_ptr.hbm [resolvable:$true] %s87_s23 }
  0x22   :  { %s36_s5 = sshll.u32 %s13239_s28, 4  ;;  %s113_s25 = sshll.u32 %s13219_s9, 4  ;;  %s37_s5 = int_to_ptr.hbm [resolvable:$true] %s36_s5  ;;  %s114_s25 = int_to_ptr.hbm [resolvable:$true] %s113_s25 }
  0x23   :  { %44 = dma.hbm_to_vmem [thread:$0]  %s37_s5, 128, %s39_s0, [#allocation5], %s11274_s7, %s11274_s7, %s11275_s20  }
  0x24   :  { %70 = dma.hbm_to_vmem [thread:$0]  %s66_s1, 64, %s68_s22, [#allocation8]  }
  0x25   :  { %s11277_s4 = smov [#allocation12]   ;;  %s11278_s27 = smov [#allocation15]  }
  0x26   :  { %s89_s26 = sshll.u32 %s11277_s4, 4  ;;  %s115_s12 = sshll.u32 %s11278_s27, 4  ;;  %s90_s26 = int_to_ptr.vmem [resolvable:$true] %s89_s26  ;;  %s116_s12 = int_to_ptr.vmem [resolvable:$true] %s115_s12 }
  0x27   :  { %92 = dma.hbm_to_vmem [thread:$0]  %s88_s23, 64, %s90_s26, [#allocation11]  }
  0x28   :  { %s135_s5 = sshll.u32 %s13221_s11, 4  ;;  %s159_s0 = sshll.u32 %s13223_s13, 4  ;;  %s136_s5 = int_to_ptr.hbm [resolvable:$true] %s135_s5  ;;  %s160_s0 = int_to_ptr.hbm [resolvable:$true] %s159_s0 }
  0x29   :  { %118 = dma.hbm_to_vmem [thread:$0]  %s114_s25, 64, %s116_s12, [#allocation14]  }
  0x2a   :  { %s11279_s19 = smov [#allocation18]   ;;  %s11280_s14 = smov [#allocation21]  }
  0x2b   :  { %s137_s9 = sshll.u32 %s11279_s19, 4  ;;  %s161_s1 = sshll.u32 %s11280_s14, 4  ;;  %s138_s9 = int_to_ptr.vmem [resolvable:$true] %s137_s9  ;;  %s162_s1 = int_to_ptr.vmem [resolvable:$true] %s161_s1 }
  0x2c   :  { %140 = dma.hbm_to_vmem [thread:$0]  %s136_s5, 64, %s138_s9, [#allocation17]  }
  0x2d   :  { %s183_s22 = sshll.u32 %s13225_s15, 4  ;;  %s194_s10 = sshll.u32 %s13226_s16, 4  ;;  %s184_s22 = int_to_ptr.hbm [resolvable:$true] %s183_s22  ;;  %s195_s10 = int_to_ptr.hbm [resolvable:$true] %s194_s10 }
  0x2e   :  { %164 = dma.hbm_to_vmem [thread:$0]  %s160_s0, 32, %s162_s1, [#allocation20]  }
  0x2f   :  { %s11281_s23 = smov [#allocation24]   ;;  %s11282_s3 = smov [#allocation25]  }
  0x30   :  { %s185_s13 = sshll.u32 %s11281_s23, 4  ;;  %s196_s24 = sshll.u32 %s11282_s3, 4  ;;  %s186_s13 = int_to_ptr.vmem [resolvable:$true] %s185_s13  ;;  %s197_s24 = int_to_ptr.vmem [resolvable:$true] %s196_s24 }
  0x31   :  { %188 = dma.hbm_to_vmem [thread:$0]  %s184_s22, 64, %s186_s13, [#allocation23]  }
  0x32   :  { %199 = dma.hbm_to_vmem [thread:$0]  %s195_s10, 64, %s197_s24, [#allocation26]  }
  0x33   :  { %11241 = dma.done.wait [#allocation5], 128  }
  0x34   :  { %11242 = vsyncadd [#allocation5], 4294967168 }
  0x35   :  { %11243 = dma.done.wait [#allocation8], 128  }
  0x36   :  { %11244 = vsyncadd [#allocation8], 4294967168 }
  0x37   :  { %11245 = dma.done.wait [#allocation11], 128  }
  0x38   :  { %11246 = vsyncadd [#allocation11], 4294967168 }
  0x39   :  { %11247 = dma.done.wait [#allocation14], 38464  }
  0x3a   :  { %11248 = vsyncadd [#allocation14], 4294928832 }
  0x3b   :  { %11249 = dma.done.wait [#allocation17], 128  }
  0x3c   :  { %11250 = vsyncadd [#allocation17], 4294967168 }
  0x3d   :  { %11251 = dma.done.wait [#allocation20], 6432  }
  0x3e   :  { %11252 = vsyncadd [#allocation20], 4294960864 }
  0x3f   :  { %11253 = dma.done.wait [#allocation23], 6464  }
  0x40   :  { %11254 = vsyncadd [#allocation23], 4294960832 }
  0x41   :  { %11255 = dma.done.wait [#allocation26], 64  }
  0x42   :  { %11256 = vsyncadd [#allocation26], 4294967232  ;;  %s13240_s25 = sld [smem:[#allocation44_spill]]  ;;  %vm13231_vm0 = vcmask 1043456   ;;  %vm13234_vm1 = vcmask 1041408   ;;  %vm13232_vm2 = vcmask 123904  }
  0x43   :  { %vm13233_vm3 = vcmask 130048   ;;  %vm13235_vm11 = vcmask 523264   ;;  %s264_s0 = sshll.u32 %s13227_s17, 4  ;;  %s11285_s19 = smov [#allocation2]   ;;  %s265_s0 = int_to_ptr.hbm [resolvable:$true] %s264_s0 }
  0x44   :  { %s266_s9 = sshll.u32 %s11285_s19, 4  ;;  %s267_s9 = int_to_ptr.vmem [resolvable:$true] %s266_s9 }
  0x45   :  { %269 = dma.hbm_to_vmem [thread:$0]  %s265_s0, 12800, %s267_s9, [#allocation3] }
  0x48   :  { %v7442_v0 = vld [vmem:[%s13240_s25 + $0xe0] sm:$0xf]  ;;  %v10072_v1 = vld [vmem:[%s13240_s25 + $0xec] sm:$0xf0]  ;;  %v10070_v2 = vld [vmem:[%s13240_s25 + $0xe4] sm:$0xf] }
  0x49   :  { %v7443_v3 = vor.u32 %v10072_v1, %v7442_v0  ;;  %v7444_v4 = vld [vmem:[%s13240_s25 + $0xf0] sm:$0xf0]  ;;  %v7450_v5 = vld [vmem:[%s13240_s25 + $0xe8] sm:$0xf]  ;;  %v10073_v6 = vld [vmem:[%s13240_s25 + $0xf4] sm:$0xf0] }
  0x4a   :  { %v7447_v7 = vor.u32 %v10070_v2, %v7444_v4  ;;  %v7451_v8 = vor.u32 %v10073_v6, %v7450_v5  ;;  %v10071_v9 = vld [vmem:[%s13240_s25 + $0xec] sm:$0xf]  ;;  %v7452_v10 = vld [vmem:[%s13240_s25 + $0xf8] sm:$0xf0]  ;;  %v7426_v11 = vld [vmem:[%s13240_s25 + $0xc0] sm:$0xf] }
  0x4b   :  { %481 = vmatpush.bf16.msra.mxu0 %v7443_v3  ;;  %v7455_v12 = vor.u32 %v10071_v9, %v7452_v10  ;;  %v10068_v13 = vld [vmem:[%s13240_s25 + $0xcc] sm:$0xf0]  ;;  %v10066_v14 = vld [vmem:[%s13240_s25 + $0xc4] sm:$0xf]  ;;  %v7428_v15 = vld [vmem:[%s13240_s25 + $0xd0] sm:$0xf0] }
  0x4c   :  { %494 = vmatpush.bf16.msra.mxu1 %v7447_v7  ;;  %507 = vmatpush.bf16.msra.mxu2 %v7451_v8  ;;  %v7427_v16 = vor.u32 %v10068_v13, %v7426_v11  ;;  %v7431_v17 = vor.u32 %v10066_v14, %v7428_v15  ;;  %v7434_v18 = vld [vmem:[%s13240_s25 + $0xc8] sm:$0xf]  ;;  %v10069_v19 = vld [vmem:[%s13240_s25 + $0xd4] sm:$0xf0]  ;;  %v10067_v20 = vld [vmem:[%s13240_s25 + $0xcc] sm:$0xf] }
  0x4d   :  { %520 = vmatpush.bf16.msra.mxu3 %v7455_v12  ;;  %v7435_v21 = vor.u32 %v10069_v19, %v7434_v18  ;;  %v7436_v22 = vld [vmem:[%s13240_s25 + $0xd8] sm:$0xf0]  ;;  %v7410_v23 = vld [vmem:[%s13240_s25 + $0xa0] sm:$0xf]  ;;  %v10064_v24 = vld [vmem:[%s13240_s25 + $0xac] sm:$0xf0] }
  0x4e   :  { %v7439_v25 = vor.u32 %v10067_v20, %v7436_v22  ;;  %v10062_v26 = vld [vmem:[%s13240_s25 + $0xa4] sm:$0xf]  ;;  %v7412_v27 = vld [vmem:[%s13240_s25 + $0xb0] sm:$0xf0]  ;;  %v7418_v28 = vld [vmem:[%s13240_s25 + $0xa8] sm:$0xf]  ;;  %v7411_v29 = vor.u32 %v10064_v24, %v7410_v23 }
  0x4f   :  { %482 = vmatpush.bf16.msra.mxu0 %v7427_v16  ;;  %v10065_v30 = vld [vmem:[%s13240_s25 + $0xb4] sm:$0xf0]  ;;  %v10063_v31 = vld [vmem:[%s13240_s25 + $0xac] sm:$0xf]  ;;  %v7420_v32 = vld [vmem:[%s13240_s25 + $0xb8] sm:$0xf0]  ;;  %v7415_v33 = vor.u32 %v10062_v26, %v7412_v27 }
  0x50   :  { %495 = vmatpush.bf16.msra.mxu1 %v7431_v17  ;;  %508 = vmatpush.bf16.msra.mxu2 %v7435_v21  ;;  %v7419_v34 = vor.u32 %v10065_v30, %v7418_v28  ;;  %v7394_v35 = vld [vmem:[%s13240_s25 + $0x80] sm:$0xf]  ;;  %v10060_v36 = vld [vmem:[%s13240_s25 + $0x8c] sm:$0xf0]  ;;  %v10058_v37 = vld [vmem:[%s13240_s25 + $0x84] sm:$0xf]  ;;  %v7423_v38 = vor.u32 %v10063_v31, %v7420_v32 }
  0x51   :  { %521 = vmatpush.bf16.msra.mxu3 %v7439_v25  ;;  %v7396_v39 = vld [vmem:[%s13240_s25 + $0x90] sm:$0xf0]  ;;  %v7402_v40 = vld [vmem:[%s13240_s25 + $0x88] sm:$0xf]  ;;  %v10061_v41 = vld [vmem:[%s13240_s25 + $0x94] sm:$0xf0]  ;;  %v7395_v44 = vor.u32 %v10060_v36, %v7394_v35 }
  0x52   :  { %v10059_v42 = vld [vmem:[%s13240_s25 + $0x8c] sm:$0xf]  ;;  %v7404_v43 = vld [vmem:[%s13240_s25 + $0x98] sm:$0xf0]  ;;  %v7399_v45 = vor.u32 %v10058_v37, %v7396_v39  ;;  %v7403_v46 = vor.u32 %v10061_v41, %v7402_v40  ;;  %v7378_v47 = vld [vmem:[%s13240_s25 + $0x60] sm:$0xf] }
  0x53   :  { %483 = vmatpush.bf16.msra.mxu0 %v7411_v29  ;;  %v10056_v48 = vld [vmem:[%s13240_s25 + $0x6c] sm:$0xf0]  ;;  %v10054_v49 = vld [vmem:[%s13240_s25 + $0x64] sm:$0xf]  ;;  %v7407_v50 = vor.u32 %v10059_v42, %v7404_v43  ;;  %v7380_v51 = vld [vmem:[%s13240_s25 + $0x70] sm:$0xf0] }
  0x54   :  { %496 = vmatpush.bf16.msra.mxu1 %v7415_v33  ;;  %509 = vmatpush.bf16.msra.mxu2 %v7419_v34  ;;  %v7386_v52 = vld [vmem:[%s13240_s25 + $0x68] sm:$0xf]  ;;  %v10057_v53 = vld [vmem:[%s13240_s25 + $0x74] sm:$0xf0]  ;;  %v10055_v54 = vld [vmem:[%s13240_s25 + $0x6c] sm:$0xf]  ;;  %v7379_v56 = vor.u32 %v10056_v48, %v7378_v47  ;;  %v7383_v57 = vor.u32 %v10054_v49, %v7380_v51 }
  0x55   :  { %522 = vmatpush.bf16.msra.mxu3 %v7423_v38  ;;  %v7388_v55 = vld [vmem:[%s13240_s25 + $0x78] sm:$0xf0]  ;;  %v7387_v58 = vor.u32 %v10057_v53, %v7386_v52  ;;  %v7362_v59 = vld [vmem:[%s13240_s25 + $0x40] sm:$0xf]  ;;  %v10052_v60 = vld [vmem:[%s13240_s25 + $0x4c] sm:$0xf0] }
  0x56   :  { %v10050_v61 = vld [vmem:[%s13240_s25 + $0x44] sm:$0xf]  ;;  %v7391_v62 = vor.u32 %v10055_v54, %v7388_v55  ;;  %v7364_v63 = vld [vmem:[%s13240_s25 + $0x50] sm:$0xf0]  ;;  %v7370_v0 = vld [vmem:[%s13240_s25 + $0x48] sm:$0xf]  ;;  %v7363_v4 = vor.u32 %v10052_v60, %v7362_v59 }
  0x57   :  { %484 = vmatpush.bf16.msra.mxu0 %v7395_v44  ;;  %v10053_v1 = vld [vmem:[%s13240_s25 + $0x54] sm:$0xf0]  ;;  %v10051_v2 = vld [vmem:[%s13240_s25 + $0x4c] sm:$0xf]  ;;  %v7372_v3 = vld [vmem:[%s13240_s25 + $0x58] sm:$0xf0]  ;;  %v7367_v6 = vor.u32 %v10050_v61, %v7364_v63 }
  0x58   :  { %497 = vmatpush.bf16.msra.mxu1 %v7399_v45  ;;  %510 = vmatpush.bf16.msra.mxu2 %v7403_v46  ;;  %v7346_v5 = vld [vmem:[%s13240_s25 + $0x20] sm:$0xf]  ;;  %v7371_v7 = vor.u32 %v10053_v1, %v7370_v0  ;;  %v10048_v8 = vld [vmem:[%s13240_s25 + $0x2c] sm:$0xf0]  ;;  %v10046_v9 = vld [vmem:[%s13240_s25 + $0x24] sm:$0xf]  ;;  %v7375_v11 = vor.u32 %v10051_v2, %v7372_v3 }
  0x59   :  { %523 = vmatpush.bf16.msra.mxu3 %v7407_v50  ;;  %v7348_v10 = vld [vmem:[%s13240_s25 + $0x30] sm:$0xf0]  ;;  %v7354_v12 = vld [vmem:[%s13240_s25 + $0x28] sm:$0xf]  ;;  %v10049_v13 = vld [vmem:[%s13240_s25 + $0x34] sm:$0xf0]  ;;  %v7347_v17 = vor.u32 %v10048_v8, %v7346_v5 }
  0x5a   :  { %v272_v14 = vld [vmem:[#allocation4 + $0x4] sm:$0xf]  ;;  %v10047_v15 = vld [vmem:[%s13240_s25 + $0x2c] sm:$0xf]  ;;  %v7356_v16 = vld [vmem:[%s13240_s25 + $0x38] sm:$0xf0]  ;;  %v7351_v21 = vor.u32 %v10046_v9, %v7348_v10  ;;  %v7355_v22 = vor.u32 %v10049_v13, %v7354_v12 }
  0x5b   :  { %485 = vmatpush.bf16.msra.mxu0 %v7379_v56  ;;  %v7330_v18 = vld [vmem:[%s13240_s25] sm:$0xf]  ;;  %v10044_v19 = vld [vmem:[%s13240_s25 + $0xc] sm:$0xf0]  ;;  %v274_v20 = vrot.slane %v272_v14, 4  ;;  %v7359_v25 = vor.u32 %v10047_v15, %v7356_v16  ;;  %v11283_v14 = vmov 400.0  }
  0x5c   :  { %498 = vmatpush.bf16.msra.mxu1 %v7383_v57  ;;  %511 = vmatpush.bf16.msra.mxu2 %v7387_v58  ;;  %v10042_v23 = vld [vmem:[%s13240_s25 + $0x4] sm:$0xf]  ;;  %v270_v24 = vld [vmem:[#allocation4] sm:$0xf]  ;;  %v7332_v26 = vld [vmem:[%s13240_s25 + $0x10] sm:$0xf0]  ;;  %v7331_v31 = vor.u32 %v10044_v19, %v7330_v18  ;;  %10759 = vrcp.f32 %v11283_v14 }
  0x5d   :  { %524 = vmatpush.bf16.msra.mxu3 %v7391_v62  ;;  %v7338_v27 = vld [vmem:[%s13240_s25 + $0x8] sm:$0xf]  ;;  %v10045_v28 = vld [vmem:[%s13240_s25 + $0x14] sm:$0xf0]  ;;  %v10043_v29 = vld [vmem:[%s13240_s25 + $0xc] sm:$0xf]  ;;  %v277_v32 = vsel %vm13231_vm0, %v270_v24, %v274_v20  ;;  %v7335_v33 = vor.u32 %v10042_v23, %v7332_v26 }
  0x5e   :  { %v7340_v30 = vld [vmem:[%s13240_s25 + $0x18] sm:$0xf0]  ;;  %v7339_v34 = vor.u32 %v10045_v28, %v7338_v27  ;;  %v278_v36 = vpack.c.bf16 %v277_v32, %v277_v32  ;;  %v311_v37 = vld [vmem:[#allocation7] sm:$0xf]  ;;  %v533_v48 = vld [vmem:[#allocation9] sm:$0xf] }
  0x5f   :  { %486 = vmatpush.bf16.msra.mxu0 %v7363_v4  ;;  %v7343_v35 = vor.u32 %v10043_v29, %v7340_v30  ;;  %v313_v38 = vperm.slane %v311_v37, 0  ;;  %v314_v39 = vperm.slane %v311_v37, 1  ;;  %v315_v46 = vperm.slane %v311_v37, 2  ;;  %v7794_v20 = vld [vmem:[#allocation13 + $0x2a0] sm:$0xf] }
  0x60   :  { %499 = vmatpush.bf16.msra.mxu1 %v7367_v6  ;;  %512 = vmatpush.bf16.msra.mxu2 %v7371_v7  ;;  %v316_v47 = vperm.slane %v311_v37, 3  ;;  %v535_v55 = vperm.slane %v533_v48, 0  ;;  %v536_v56 = vperm.slane %v533_v48, 1  ;;  %v537_v63 = vperm.slane %v533_v48, 2  ;;  %v10152_v24 = vld [vmem:[#allocation13 + $0x26c] sm:$0xf0] }
  0x61   :  { %525 = vmatpush.bf16.msra.mxu3 %v7375_v11  ;;  %v538_v4 = vperm.slane %v533_v48, 3  ;;  %v7698_v28 = vld [vmem:[#allocation13 + $0x1e0] sm:$0xf]  ;;  %v10260_v29 = vld [vmem:[#allocation13 + $0x5cc] sm:$0xf0] }
  0x62   :  { %v10760_v15 = vpop.eup %10759  ;;  %v10116_v48 = vld [vmem:[#allocation13 + $0x14c] sm:$0xf0] }
  0x63   :  { %487 = vmatpush.bf16.msra.mxu0 %v7347_v17  ;;  %v623_v16 = vmul.f32 400.0, %v10760_v15  ;;  %vm627_vm4 = vweird.f32 %v10760_v15 }
  0x64   :  { %500 = vmatpush.bf16.msra.mxu1 %v7351_v21  ;;  %513 = vmatpush.bf16.msra.mxu2 %v7355_v22  ;;  %v10164_v21 = vld [vmem:[#allocation13 + $0x2cc] sm:$0xf0]  ;;  %v7746_v22 = vld [vmem:[#allocation13 + $0x240] sm:$0xf] }
  0x65   :  { %526 = vmatpush.bf16.msra.mxu3 %v7359_v25  ;;  %v624_v17 = vsub.f32 1.0, %v623_v16  ;;  %v7795_v23 = vor.u32 %v10164_v21, %v7794_v20  ;;  %v8178_v25 = vld [vmem:[#allocation13 + $0x5a0] sm:$0xf]  ;;  %v7747_v27 = vor.u32 %v10152_v24, %v7746_v22  ;;  %v10236_v21 = vld [vmem:[#allocation13 + $0x50c] sm:$0xf0] }
  0x66   :  { %v8179_v32 = vor.u32 %v10260_v29, %v8178_v25  ;;  %v8082_v20 = vld [vmem:[#allocation13 + $0x4e0] sm:$0xf]  ;;  %v10092_v24 = vld [vmem:[#allocation13 + $0x8c] sm:$0xf0] }
  0x67   :  { %488 = vmatpush.bf16.msra.mxu0 %v7331_v31  ;;  %v625_v18 = vmul.f32 %v10760_v15, %v624_v17  ;;  %v10140_v31 = vld [vmem:[#allocation13 + $0x20c] sm:$0xf0]  ;;  %v7554_v17 = vld [vmem:[#allocation13 + $0xc0] sm:$0xf]  ;;  %v8083_v22 = vor.u32 %v10236_v21, %v8082_v20  ;;  %v10230_v20 = vld [vmem:[#allocation13 + $0x4e4] sm:$0xf] }
  0x68   :  { %501 = vmatpush.bf16.msra.mxu1 %v7335_v33  ;;  %514 = vmatpush.bf16.msra.mxu2 %v7339_v34  ;;  %v8130_v33 = vld [vmem:[#allocation13 + $0x540] sm:$0xf]  ;;  %v10248_v34 = vld [vmem:[#allocation13 + $0x56c] sm:$0xf0]  ;;  %v7699_v37 = vor.u32 %v10140_v31, %v7698_v28  ;;  %v8084_v21 = vld [vmem:[#allocation13 + $0x510] sm:$0xf0] }
  0x69   :  { %527 = vmatpush.bf16.msra.mxu3 %v7343_v35  ;;  %v626_v19 = vadd.f32 %v10760_v15, %v625_v18  ;;  %v8131_v35 = vor.u32 %v10248_v34, %v8130_v33  ;;  %v10104_v18 = vld [vmem:[#allocation13 + $0xec] sm:$0xf0]  ;;  %v8562_v29 = vld [vmem:[#allocation13 + $0x8a0] sm:$0xf] }
  0x6a   :  { %489 = vmatmul.bf16.vlgmr.msra.gmra.mxu0 %v278_v36  ;;  %v10356_v31 = vld [vmem:[#allocation13 + $0x8cc] sm:$0xf0]  ;;  %v7458_v33 = vld [vmem:[#allocation13] sm:$0xf] }
  0x6b   :  { %502 = vmatmul.bf16.vlgmr.msra.gmra.mxu1 %v278_v36  ;;  %515 = vmatmul.bf16.vlgmr.msra.gmra.mxu2 %v278_v36  ;;  %v11656_v30 = vsel %vm627_vm4, %v10760_v15, %v626_v19  ;;  %v7555_v19 = vor.u32 %v10104_v18, %v7554_v17  ;;  %v10080_v34 = vld [vmem:[#allocation13 + $0x2c] sm:$0xf0]  ;;  %v10134_v17 = vld [vmem:[#allocation13 + $0x1e4] sm:$0xf] }
  0x6c   :  { %528 = vmatmul.bf16.vlgmr.msra.gmra.mxu3 %v278_v36  ;;  %2535 = vmatpush.bf16.msrb.mxu0 %v7795_v23  ;;  %v7506_v23 = vld [vmem:[#allocation13 + $0x60] sm:$0xf] }
  0x6d   :  { %2549 = vmatpush.bf16.msrb.mxu1 %v8179_v32  ;;  %v7507_v25 = vor.u32 %v10092_v24, %v7506_v23  ;;  %v8563_v32 = vor.u32 %v10356_v31, %v8562_v29  ;;  %v8087_v23 = vor.u32 %v10230_v20, %v8084_v21  ;;  %v8418_v24 = vld [vmem:[#allocation13 + $0x780] sm:$0xf]  ;;  %v10122_v29 = vld [vmem:[#allocation13 + $0x184] sm:$0xf]  ;;  %v7508_v21 = vld [vmem:[#allocation13 + $0x90] sm:$0xf0] }
  0x6e   :  { %v10086_v20 = vld [vmem:[#allocation13 + $0x64] sm:$0xf] }
  0x6f   :  { %2563 = vmatpush.bf16.msrb.mxu2 %v8563_v32  ;;  %v7652_v32 = vld [vmem:[#allocation13 + $0x1b0] sm:$0xf0] }
  0x70   :  { %2536 = vmatpush.bf16.msrb.mxu0 %v7747_v27  ;;  %v10224_v27 = vld [vmem:[#allocation13 + $0x4ac] sm:$0xf0] }
  0x71   :  { %2550 = vmatpush.bf16.msrb.mxu1 %v8131_v35  ;;  %v8610_v35 = vld [vmem:[#allocation13 + $0x900] sm:$0xf] }
  0x74   :  { %2537 = vmatpush.bf16.msrb.mxu0 %v7699_v37  ;;  %v10368_v37 = vld [vmem:[#allocation13 + $0x92c] sm:$0xf0] }
  0x75   :  { %2551 = vmatpush.bf16.msrb.mxu1 %v8083_v22 }
  0xe7   :  { %v490_v40 = vpop.f32.mrf.mxu0 }
  0xe8   :  { %v491_v41 = vadd.f32 %v490_v40, %v313_v38  ;;  %v503_v42 = vpop.f32.mrf.mxu1  ;;  %v7650_v38 = vld [vmem:[#allocation13 + $0x180] sm:$0xf] }
  0xe9   :  { %v504_v43 = vadd.f32 %v503_v42, %v314_v39  ;;  %v10128_v39 = vld [vmem:[#allocation13 + $0x1ac] sm:$0xf0] }
  0xea   :  { %v11619_v44 = vrot.slane %v491_v41, 6 }
  0xeb   :  { %v11621_v45 = vrot.slane %v504_v43, 6  ;;  %v7651_v43 = vor.u32 %v10128_v39, %v7650_v38  ;;  %v7986_v38 = vld [vmem:[#allocation13 + $0x420] sm:$0xf]  ;;  %v10212_v39 = vld [vmem:[#allocation13 + $0x44c] sm:$0xf0] }
  0xec   :  { %v612_v49 = vsel %vm13234_vm1, %v11619_v44, 0.0  ;;  %v11635_v0 = vsel %vm13234_vm1, %v535_v55, %v11619_v44 }
  0xed   :  { %v613_v50 = vsel %vm13234_vm1, %v11621_v45, 0.0  ;;  %v11639_v1 = vsel %vm13234_vm1, %v536_v56, %v11621_v45  ;;  %2538 = vmatpush.bf16.msrb.mxu0 %v7651_v43  ;;  %v7987_v43 = vor.u32 %v10212_v39, %v7986_v38  ;;  %v10308_v38 = vld [vmem:[#allocation13 + $0x74c] sm:$0xf0]  ;;  %v10350_v39 = vld [vmem:[#allocation13 + $0x8a4] sm:$0xf] }
  0xee   :  { %v516_v51 = vpop.f32.mrf.mxu2  ;;  %v614_v59 = vadd.f32 %v613_v50, %v612_v49  ;;  %v605_v7 = vadd.f32 %v11639_v1, %v11635_v0 }
  0xef   :  { %v517_v52 = vadd.f32 %v516_v51, %v315_v46  ;;  %v529_v53 = vpop.f32.mrf.mxu3  ;;  %v492_v54 = vpop.f32.mrf.mxu0 }
  0xf0   :  { %v530_v57 = vadd.f32 %v529_v53, %v316_v47  ;;  %v505_v58 = vpop.f32.mrf.mxu1  ;;  %v7602_v47 = vld [vmem:[#allocation13 + $0x120] sm:$0xf] }
  0xf1   :  { %v11627_v60 = vrot.slane %v517_v52, 6  ;;  %v7603_v55 = vor.u32 %v10116_v48, %v7602_v47  ;;  %v7796_v47 = vld [vmem:[#allocation13 + $0x2d0] sm:$0xf0]  ;;  %v10254_v48 = vld [vmem:[#allocation13 + $0x5a4] sm:$0xf] }
  0xf2   :  { %v11629_v61 = vrot.slane %v530_v57, 6 }
  0xf3   :  { %v615_v62 = vsel %vm13234_vm1, %v11627_v60, 0.0  ;;  %v11647_v9 = vsel %vm13234_vm1, %v537_v63, %v11627_v60  ;;  %2539 = vmatpush.bf16.msrb.mxu0 %v7603_v55  ;;  %v8514_v55 = vld [vmem:[#allocation13 + $0x840] sm:$0xf] }
  0xf4   :  { %v616_v2 = vadd.f32 %v615_v62, %v614_v59  ;;  %v618_v3 = vsel %vm13232_vm2, %v11629_v61, 0.0  ;;  %v11651_v10 = vsel %vm13234_vm1, %v538_v4, %v11629_v61  ;;  %v606_v11 = vadd.f32 %v605_v7, %v11647_v9 }
  0xf5   :  { %v608_v12 = vsel %vm13233_vm3, %v11651_v10, 0.0 }
  0xf6   :  { %v518_v5 = vpop.f32.mrf.mxu2  ;;  %v619_v6 = vadd.f32 %v618_v3, %v616_v2  ;;  %v609_v13 = vadd.f32 %v608_v12, %v606_v11 }
  0xf7   :  { %v531_v8 = vpop.f32.mrf.mxu3  ;;  %2540 = vmatpush.bf16.msrb.mxu0 %v7555_v19  ;;  %v7700_v19 = vld [vmem:[#allocation13 + $0x210] sm:$0xf0] }
  0xf8   :  { %620 = vadd.xlane.f32.xlu0 %v619_v6  ;;  %v7703_v22 = vor.u32 %v10134_v17, %v7700_v19  ;;  %v8468_v17 = vld [vmem:[#allocation13 + $0x810] sm:$0xf0] }
  0xfb   :  { %2541 = vmatpush.bf16.msrb.mxu0 %v7507_v25  ;;  %v10320_v25 = vld [vmem:[#allocation13 + $0x7ac] sm:$0xf0] }
 0x100   :  { %610 = vadd.xlane.f32.xlu0 %v609_v13 }
 0x16b   :  { %v621_v26 = vpop.xlane.xlu0 %620 }
 0x16c   :  { %v630_v36 = vmul.f32 %v11656_v30, %v621_v26  ;;  %v8034_v26 = vld [vmem:[#allocation13 + $0x480] sm:$0xf] }
 0x16d   :  { %v8035_v28 = vor.u32 %v10224_v27, %v8034_v26  ;;  %v8419_v26 = vor.u32 %v10320_v25, %v8418_v24  ;;  %v7842_v27 = vld [vmem:[#allocation13 + $0x300] sm:$0xf]  ;;  %v7511_v24 = vor.u32 %v10086_v20, %v7508_v21  ;;  %v7892_v25 = vld [vmem:[#allocation13 + $0x390] sm:$0xf0] }
 0x16e   :  { %v11660_v40 = vsub.f32 %v11619_v44, %v630_v36  ;;  %v11663_v41 = vsub.f32 %v11621_v45, %v630_v36  ;;  %v11689_v59 = vsub.f32 %v11627_v60, %v630_v36  ;;  %v11697_v6 = vsub.f32 %v11629_v61, %v630_v36 }
 0x16f   :  { %2552 = vmatpush.bf16.msrb.mxu1 %v8035_v28  ;;  %v7459_v36 = vor.u32 %v10080_v34, %v7458_v33  ;;  %v10176_v28 = vld [vmem:[#allocation13 + $0x32c] sm:$0xf0]  ;;  %v10218_v33 = vld [vmem:[#allocation13 + $0x484] sm:$0xf]  ;;  %v8036_v34 = vld [vmem:[#allocation13 + $0x4b0] sm:$0xf0] }
 0x170   :  { %v643_v53 = vmul.f32 %v11660_v40, %v11660_v40  ;;  %v644_v54 = vmul.f32 %v11663_v41, %v11663_v41  ;;  %v645_v7 = vmul.f32 %v11689_v59, %v11689_v59  ;;  %v646_v12 = vmul.f32 %v11697_v6, %v11697_v6 }
 0x171   :  { %2542 = vmatpush.bf16.msrb.mxu0 %v7459_v36  ;;  %v7843_v31 = vor.u32 %v10176_v28, %v7842_v27  ;;  %v8039_v36 = vor.u32 %v10218_v33, %v8036_v34  ;;  %v10272_v27 = vld [vmem:[#allocation13 + $0x62c] sm:$0xf0] }
 0x172   :  { %v653_v2 = vsel %vm13234_vm1, %v643_v53, 0.0  ;;  %v654_v3 = vsel %vm13234_vm1, %v644_v54, 0.0  ;;  %v656_v13 = vsel %vm13234_vm1, %v645_v7, 0.0  ;;  %v658_v15 = vsel %vm13232_vm2, %v646_v12, 0.0  ;;  %v8180_v54 = vld [vmem:[#allocation13 + $0x5d0] sm:$0xf0] }
 0x173   :  { %v611_v42 = vpop.xlane.xlu0 %610  ;;  %v655_v11 = vadd.f32 %v654_v3, %v653_v2  ;;  %2553 = vmatpush.bf16.msrb.mxu1 %v7987_v43  ;;  %v10146_v2 = vld [vmem:[#allocation13 + $0x244] sm:$0xf]  ;;  %v8132_v7 = vld [vmem:[#allocation13 + $0x570] sm:$0xf0]  ;;  %v8466_v12 = vld [vmem:[#allocation13 + $0x7e0] sm:$0xf] }
 0x174   :  { %v629_v46 = vmul.f32 %v11656_v30, %v611_v42  ;;  %v8611_v42 = vor.u32 %v10368_v37, %v8610_v35  ;;  %v7655_v35 = vor.u32 %v10122_v29, %v7652_v32  ;;  %v8370_v37 = vld [vmem:[#allocation13 + $0x720] sm:$0xf]  ;;  %v8564_v43 = vld [vmem:[#allocation13 + $0x8d0] sm:$0xf0] }
 0x175   :  { %v657_v14 = vadd.f32 %v656_v13, %v655_v11  ;;  %v10332_v13 = vld [vmem:[#allocation13 + $0x80c] sm:$0xf0]  ;;  %v8420_v32 = vld [vmem:[#allocation13 + $0x7b0] sm:$0xf0] }
 0x176   :  { %v11667_v49 = vsub.f32 %v11635_v0, %v629_v46  ;;  %v11670_v50 = vsub.f32 %v11639_v1, %v629_v46  ;;  %v11673_v51 = vsub.f32 %v11647_v9, %v629_v46  ;;  %v11676_v52 = vsub.f32 %v11651_v10, %v629_v46  ;;  %v10158_v46 = vld [vmem:[#allocation13 + $0x2a4] sm:$0xf]  ;;  %2584 = vmatpush.bf16.msrb.mxu3 %v8611_v42 }
 0x177   :  { %v659_v16 = vadd.f32 %v658_v15, %v657_v14  ;;  %v7799_v53 = vor.u32 %v10158_v46, %v7796_v47  ;;  %v8467_v14 = vor.u32 %v10332_v13, %v8466_v12  ;;  %v7890_v15 = vld [vmem:[#allocation13 + $0x360] sm:$0xf]  ;;  %v8371_v42 = vor.u32 %v10308_v38, %v8370_v37  ;;  %v10110_v47 = vld [vmem:[#allocation13 + $0x124] sm:$0xf]  ;;  %v10284_v13 = vld [vmem:[#allocation13 + $0x68c] sm:$0xf0] }
 0x178   :  { %v639_v56 = vmul.f32 %v11667_v49, %v11667_v49  ;;  %v640_v57 = vmul.f32 %v11670_v50, %v11670_v50  ;;  %v642_v58 = vmul.f32 %v11676_v52, %v11676_v52  ;;  %v641_v62 = vmul.f32 %v11673_v51, %v11673_v51  ;;  %v8274_v12 = vld [vmem:[#allocation13 + $0x660] sm:$0xf]  ;;  %v10170_v37 = vld [vmem:[#allocation13 + $0x304] sm:$0xf] }
 0x179   :  { %v8567_v46 = vor.u32 %v10350_v39, %v8564_v43  ;;  %v7844_v39 = vld [vmem:[#allocation13 + $0x330] sm:$0xf0] }
 0x17a   :  { %v647_v63 = vadd.f32 %v640_v57, %v639_v56  ;;  %v649_v5 = vsel %vm13233_vm3, %v642_v58, 0.0  ;;  %v10344_v56 = vld [vmem:[#allocation13 + $0x86c] sm:$0xf0]  ;;  %v8183_v57 = vor.u32 %v10254_v48, %v8180_v54  ;;  %2591 = vmatpush.bf16.msra.mxu3 %v7799_v53  ;;  %v7604_v48 = vld [vmem:[#allocation13 + $0x150] sm:$0xf0] }
 0x17b   :  { %v8515_v58 = vor.u32 %v10344_v56, %v8514_v55  ;;  %v10206_v53 = vld [vmem:[#allocation13 + $0x424] sm:$0xf]  ;;  %v7607_v54 = vor.u32 %v10110_v47, %v7604_v48  ;;  %v7988_v55 = vld [vmem:[#allocation13 + $0x450] sm:$0xf0]  ;;  %v8322_v56 = vld [vmem:[#allocation13 + $0x6c0] sm:$0xf] }
 0x17c   :  { %v648_v4 = vadd.f32 %v647_v63, %v641_v62  ;;  %v7938_v62 = vld [vmem:[#allocation13 + $0x3c0] sm:$0xf]  ;;  %v10200_v63 = vld [vmem:[#allocation13 + $0x3ec] sm:$0xf0]  ;;  %2605 = vmatpush.bf16.msra.mxu0 %v8183_v57  ;;  %v8612_v43 = vld [vmem:[#allocation13 + $0x930] sm:$0xf0] }
 0x17d   :  { %2564 = vmatpush.bf16.msrb.mxu2 %v8515_v58  ;;  %v7939_v3 = vor.u32 %v10200_v63, %v7938_v62  ;;  %v10296_v57 = vld [vmem:[#allocation13 + $0x6ec] sm:$0xf0]  ;;  %v7991_v58 = vor.u32 %v10206_v53, %v7988_v55  ;;  %v10338_v63 = vld [vmem:[#allocation13 + $0x844] sm:$0xf]  ;;  %v8372_v53 = vld [vmem:[#allocation13 + $0x750] sm:$0xf0] }
 0x17e   :  { %v650_v8 = vadd.f32 %v649_v5, %v648_v4  ;;  %v7748_v4 = vld [vmem:[#allocation13 + $0x270] sm:$0xf0]  ;;  %v10242_v5 = vld [vmem:[#allocation13 + $0x544] sm:$0xf]  ;;  %v8323_v62 = vor.u32 %v10296_v57, %v8322_v56 }
 0x17f   :  { %v8135_v11 = vor.u32 %v10242_v5, %v8132_v7  ;;  %2554 = vmatpush.bf16.msrb.mxu1 %v7939_v3  ;;  %v7556_v5 = vld [vmem:[#allocation13 + $0xf0] sm:$0xf0]  ;;  %v10194_v7 = vld [vmem:[#allocation13 + $0x3c4] sm:$0xf] }
 0x180   :  { %651 = vadd.xlane.f32.xlu1 %v650_v8  ;;  %v7751_v8 = vor.u32 %v10146_v2, %v7748_v4  ;;  %v8516_v2 = vld [vmem:[#allocation13 + $0x870] sm:$0xf0]  ;;  %v10098_v4 = vld [vmem:[#allocation13 + $0xc4] sm:$0xf] }
 0x181   :  { %2606 = vmatpush.bf16.msra.mxu0 %v8135_v11  ;;  %2565 = vmatpush.bf16.msrb.mxu2 %v8467_v14  ;;  %v8519_v3 = vor.u32 %v10338_v63, %v8516_v2  ;;  %v7940_v11 = vld [vmem:[#allocation13 + $0x3f0] sm:$0xf0]  ;;  %v10302_v48 = vld [vmem:[#allocation13 + $0x724] sm:$0xf] }
 0x182   :  { %2592 = vmatpush.bf16.msra.mxu3 %v7751_v8  ;;  %v7559_v8 = vor.u32 %v10098_v4, %v7556_v5  ;;  %v7943_v14 = vor.u32 %v10194_v7, %v7940_v11  ;;  %v10290_v57 = vld [vmem:[#allocation13 + $0x6c4] sm:$0xf]  ;;  %v8276_v7 = vld [vmem:[#allocation13 + $0x690] sm:$0xf0] }
 0x183   :  { %v10278_v5 = vld [vmem:[#allocation13 + $0x664] sm:$0xf] }
 0x185   :  { %2607 = vmatpush.bf16.msra.mxu0 %v8087_v23  ;;  %2566 = vmatpush.bf16.msrb.mxu2 %v8419_v26  ;;  %v8226_v26 = vld [vmem:[#allocation13 + $0x600] sm:$0xf] }
 0x186   :  { %2593 = vmatpush.bf16.msra.mxu3 %v7703_v22  ;;  %v10182_v22 = vld [vmem:[#allocation13 + $0x364] sm:$0xf]  ;;  %v8227_v29 = vor.u32 %v10272_v27, %v8226_v26 }
 0x187   :  { %v7895_v28 = vor.u32 %v10182_v22, %v7892_v25  ;;  %v604_v25 = vld [vmem:[#allocation12] sm:$0xf] }
 0x188   :  { %660 = vadd.xlane.f32.xlu1 %v659_v16  ;;  %v10188_v16 = vld [vmem:[#allocation13 + $0x38c] sm:$0xf0] }
 0x189   :  { %v7891_v18 = vor.u32 %v10188_v16, %v7890_v15  ;;  %2608 = vmatpush.bf16.msra.mxu0 %v8039_v36  ;;  %2567 = vmatpush.bf16.msrb.mxu2 %v8371_v42  ;;  %v8275_v15 = vor.u32 %v10284_v13, %v8274_v12  ;;  %v10326_v16 = vld [vmem:[#allocation13 + $0x7e4] sm:$0xf]  ;;  %v7460_v36 = vld [vmem:[#allocation13 + $0x30] sm:$0xf0] }
 0x18a   :  { %2594 = vmatpush.bf16.msra.mxu3 %v7655_v35  ;;  %v10074_v35 = vld [vmem:[#allocation13 + $0x4] sm:$0xf] }
 0x18b   :  { %2555 = vmatpush.bf16.msrb.mxu1 %v7891_v18  ;;  %v8471_v18 = vor.u32 %v10326_v16, %v8468_v17  ;;  %v7463_v38 = vor.u32 %v10074_v35, %v7460_v36  ;;  %v10362_v42 = vld [vmem:[#allocation13 + $0x904] sm:$0xf]  ;;  %v713_v36 = vperm.slane %v604_v25, 1 }
 0x18c   :  { %v8615_v47 = vor.u32 %v10362_v42, %v8612_v43  ;;  %v10266_v13 = vld [vmem:[#allocation13 + $0x604] sm:$0xf] }
 0x18d   :  { %2609 = vmatpush.bf16.msra.mxu0 %v7991_v58  ;;  %2568 = vmatpush.bf16.msrb.mxu2 %v8323_v62  ;;  %v8324_v58 = vld [vmem:[#allocation13 + $0x6f0] sm:$0xf0] }
 0x18e   :  { %2595 = vmatpush.bf16.msra.mxu3 %v7607_v54  ;;  %v8375_v54 = vor.u32 %v10302_v48, %v8372_v53  ;;  %v8327_v2 = vor.u32 %v10290_v57, %v8324_v58  ;;  %v7802_v48 = vld [vmem:[#allocation13 + $0x2a8] sm:$0xf]  ;;  %v10165_v57 = vld [vmem:[#allocation13 + $0x2d4] sm:$0xf0] }
 0x18f   :  { %2556 = vmatpush.bf16.msrb.mxu1 %v7843_v31  ;;  %v10314_v31 = vld [vmem:[#allocation13 + $0x784] sm:$0xf]  ;;  %v8186_v58 = vld [vmem:[#allocation13 + $0x5a8] sm:$0xf] }
 0x190   :  { %v8423_v34 = vor.u32 %v10314_v31, %v8420_v32 }
 0x191   :  { %2610 = vmatpush.bf16.msra.mxu0 %v7943_v14  ;;  %2569 = vmatpush.bf16.msrb.mxu2 %v8275_v15  ;;  %v8228_v14 = vld [vmem:[#allocation13 + $0x630] sm:$0xf0] }
 0x192   :  { %2596 = vmatpush.bf16.msra.mxu3 %v7559_v8  ;;  %v8279_v8 = vor.u32 %v10278_v5, %v8276_v7  ;;  %v8231_v16 = vor.u32 %v10266_v13, %v8228_v14  ;;  %v8570_v5 = vld [vmem:[#allocation13 + $0x8a8] sm:$0xf] }
 0x193   :  { %2619 = vmatpush.bf16.msra.mxu1 %v8567_v46  ;;  %v7847_v46 = vor.u32 %v10170_v37, %v7844_v39  ;;  %v714_v37 = vperm.slane %v604_v25, 2 }
 0x195   :  { %2611 = vmatpush.bf16.msra.mxu0 %v7895_v28  ;;  %2570 = vmatpush.bf16.msrb.mxu2 %v8227_v29 }
 0x196   :  { %2597 = vmatpush.bf16.msra.mxu3 %v7511_v24 }
 0x197   :  { %2620 = vmatpush.bf16.msra.mxu1 %v8519_v3 }
 0x199   :  { %2640 = vmatpush.bf16.msra.mxu2 %v8615_v47  ;;  %2612 = vmatpush.bf16.msra.mxu0 %v7847_v46 }
 0x19a   :  { %2598 = vmatpush.bf16.msra.mxu3 %v7463_v38  ;;  %v715_v38 = vperm.slane %v604_v25, 3 }
 0x19b   :  { %2621 = vmatpush.bf16.msra.mxu1 %v8471_v18 }
 0x19f   :  { %2622 = vmatpush.bf16.msra.mxu1 %v8423_v34  ;;  %v712_v34 = vperm.slane %v604_v25, 0  ;;  %v10345_v25 = vld [vmem:[#allocation13 + $0x874] sm:$0xf0] }
 0x1a3   :  { %2623 = vmatpush.bf16.msra.mxu1 %v8375_v54 }
 0x1a7   :  { %2624 = vmatpush.bf16.msra.mxu1 %v8327_v2 }
 0x1ab   :  { %2625 = vmatpush.bf16.msra.mxu1 %v8279_v8 }
 0x1af   :  { %2626 = vmatpush.bf16.msra.mxu1 %v8231_v16 }
 0x1f3   :  { %v652_v19 = vpop.xlane.xlu1 %651 }
 0x1f4   :  { %v662_v23 = vmul.f32 %v652_v19, %v11656_v30  ;;  %v603_v19 = vld [vmem:[#allocation10] sm:$0xf] }
 0x1f5   :  { %v695_v22 = vperm.slane %v603_v19, 0  ;;  %v697_v26 = vperm.slane %v603_v19, 2  ;;  %v698_v27 = vperm.slane %v603_v19, 3 }
 0x1f6   :  { %v664_v33 = vadd.f32 1e-05, %v662_v23  ;;  %v696_v23 = vperm.slane %v603_v19, 1 }
 0x1f8   :  { %10761 = vrsqrt.f32 %v664_v33  ;;  %vm672_vm6 = vweird.f32 %v664_v33 }
 0x1fb   :  { %v661_v55 = vpop.xlane.xlu1 %660 }
 0x1fc   :  { %v663_v56 = vmul.f32 %v661_v55, %v11656_v30 }
 0x1fe   :  { %v10762_v62 = vpop.eup %10761  ;;  %v665_v63 = vadd.f32 1e-05, %v663_v56 }
 0x1ff   :  { %v667_v3 = vmul.f32 %v10762_v62, %v664_v33  ;;  %vm673_vm5 = vweird.f32 %v10762_v62 }
 0x200   :  { %10763 = vrsqrt.f32 %v665_v63  ;;  %vm674_vm7 = vmor %vm672_vm6, %vm673_vm5  ;;  %vm682_vm9 = vweird.f32 %v665_v63 }
 0x201   :  { %v668_v4 = vmul.f32 %v10762_v62, %v667_v3 }
 0x203   :  { %v669_v11 = vmul.f32 0.5, %v668_v4 }
 0x205   :  { %v670_v12 = vsub.f32 1.5, %v669_v11  ;;  %v8618_v11 = vld [vmem:[#allocation13 + $0x908] sm:$0xf] }
 0x206   :  { %v10764_v15 = vpop.eup %10763 }
 0x207   :  { %v671_v17 = vmul.f32 %v10762_v62, %v670_v12  ;;  %v677_v18 = vmul.f32 %v10764_v15, %v665_v63  ;;  %vm683_vm8 = vweird.f32 %v10764_v15  ;;  %v7803_v12 = vor.u32 %v10165_v57, %v7802_v48  ;;  %v10117_v48 = vld [vmem:[#allocation13 + $0x154] sm:$0xf0] }
 0x208   :  { %vm684_vm10 = vmor %vm682_vm9, %vm683_vm8  ;;  %v10309_v57 = vld [vmem:[#allocation13 + $0x754] sm:$0xf0] }
 0x209   :  { %v675_v20 = vsel %vm674_vm7, %v10762_v62, %v671_v17  ;;  %v678_v21 = vmul.f32 %v10764_v15, %v677_v18  ;;  %v10261_v62 = vld [vmem:[#allocation13 + $0x5d4] sm:$0xf0]  ;;  %v7754_v18 = vld [vmem:[#allocation13 + $0x248] sm:$0xf] }
 0x20a   :  { %v686_v28 = vmul.f32 %v675_v20, %v11667_v49  ;;  %v687_v29 = vmul.f32 %v675_v20, %v11670_v50  ;;  %v688_v31 = vmul.f32 %v675_v20, %v11673_v51  ;;  %v689_v32 = vmul.f32 %v675_v20, %v11676_v52  ;;  %v10153_v20 = vld [vmem:[#allocation13 + $0x274] sm:$0xf0] }
 0x20b   :  { %v679_v24 = vmul.f32 0.5, %v678_v21  ;;  %v8187_v13 = vor.u32 %v10261_v62, %v8186_v58  ;;  %v8138_v21 = vld [vmem:[#allocation13 + $0x548] sm:$0xf]  ;;  %v10159_v58 = vld [vmem:[#allocation13 + $0x2ac] sm:$0xf] }
 0x20c   :  { %v703_v39 = vmul.f32 %v695_v22, %v686_v28  ;;  %v704_v42 = vmul.f32 %v696_v23, %v687_v29  ;;  %v705_v43 = vmul.f32 %v697_v26, %v688_v31  ;;  %v706_v46 = vmul.f32 %v698_v27, %v689_v32  ;;  %v7706_v28 = vld [vmem:[#allocation13 + $0x1e8] sm:$0xf]  ;;  %v10141_v31 = vld [vmem:[#allocation13 + $0x214] sm:$0xf0]  ;;  %v7804_v62 = vld [vmem:[#allocation13 + $0x2d8] sm:$0xf0] }
 0x20d   :  { %v680_v33 = vsub.f32 1.5, %v679_v24  ;;  %v8522_v24 = vld [vmem:[#allocation13 + $0x848] sm:$0xf] }
 0x20e   :  { %v720_v63 = vadd.f32 %v712_v34, %v703_v39  ;;  %v721_v2 = vadd.f32 %v713_v36, %v704_v42  ;;  %v722_v3 = vadd.f32 %v714_v37, %v705_v43  ;;  %v723_v4 = vadd.f32 %v715_v38, %v706_v46  ;;  %v8090_v32 = vld [vmem:[#allocation13 + $0x4e8] sm:$0xf]  ;;  %v10129_v42 = vld [vmem:[#allocation13 + $0x1b4] sm:$0xf0] }
 0x20f   :  { %v681_v35 = vmul.f32 %v10764_v15, %v680_v33  ;;  %v8523_v29 = vor.u32 %v10345_v25, %v8522_v24  ;;  %v10237_v33 = vld [vmem:[#allocation13 + $0x514] sm:$0xf0]  ;;  %v8042_v43 = vld [vmem:[#allocation13 + $0x488] sm:$0xf] }
 0x210   :  { %v10225_v46 = vld [vmem:[#allocation13 + $0x4b4] sm:$0xf0]  ;;  %v8282_v24 = vld [vmem:[#allocation13 + $0x668] sm:$0xf] }
 0x211   :  { %v685_v49 = vsel %vm684_vm10, %v10764_v15, %v681_v35  ;;  %v10333_v35 = vld [vmem:[#allocation13 + $0x814] sm:$0xf0] }
 0x212   :  { %v690_v47 = vmul.f32 %v685_v49, %v11660_v40  ;;  %v691_v50 = vmul.f32 %v685_v49, %v11663_v41  ;;  %v692_v51 = vmul.f32 %v685_v49, %v11689_v59  ;;  %v693_v52 = vmul.f32 %v685_v49, %v11697_v6  ;;  %v10357_v59 = vld [vmem:[#allocation13 + $0x8d4] sm:$0xf0]  ;;  %v8426_v49 = vld [vmem:[#allocation13 + $0x788] sm:$0xf] }
 0x213   :  { %v10369_v6 = vld [vmem:[#allocation13 + $0x934] sm:$0xf0]  ;;  %v8571_v19 = vor.u32 %v10357_v59, %v8570_v5 }
 0x214   :  { %v707_v53 = vmul.f32 %v695_v22, %v690_v47  ;;  %v708_v54 = vmul.f32 %v696_v23, %v691_v50  ;;  %v709_v55 = vmul.f32 %v697_v26, %v692_v51  ;;  %v710_v56 = vmul.f32 %v698_v27, %v693_v52  ;;  %v10249_v22 = vld [vmem:[#allocation13 + $0x574] sm:$0xf0]  ;;  %v7610_v52 = vld [vmem:[#allocation13 + $0x128] sm:$0xf] }
 0x215   :  { %v8619_v23 = vor.u32 %v10369_v6, %v8618_v11  ;;  %v7755_v26 = vor.u32 %v10153_v20, %v7754_v18  ;;  %v8139_v27 = vor.u32 %v10249_v22, %v8138_v21  ;;  %v10321_v47 = vld [vmem:[#allocation13 + $0x7b4] sm:$0xf0]  ;;  %v8043_v51 = vor.u32 %v10225_v46, %v8042_v43  ;;  %v10147_v11 = vld [vmem:[#allocation13 + $0x24c] sm:$0xf]  ;;  %v7756_v6 = vld [vmem:[#allocation13 + $0x278] sm:$0xf0] }
 0x216   :  { %v724_v40 = vadd.f32 %v712_v34, %v707_v53  ;;  %v725_v7 = vadd.f32 %v713_v36, %v708_v54  ;;  %v726_v41 = vadd.f32 %v714_v37, %v709_v55  ;;  %v727_v8 = vadd.f32 %v715_v38, %v710_v56  ;;  %v8474_v34 = vld [vmem:[#allocation13 + $0x7e8] sm:$0xf]  ;;  %v10213_v55 = vld [vmem:[#allocation13 + $0x454] sm:$0xf0]  ;;  %v10255_v43 = vld [vmem:[#allocation13 + $0x5ac] sm:$0xf] }
 0x217   :  { %v7707_v36 = vor.u32 %v10141_v31, %v7706_v28  ;;  %v8091_v37 = vor.u32 %v10237_v33, %v8090_v32  ;;  %v7658_v38 = vld [vmem:[#allocation13 + $0x188] sm:$0xf]  ;;  %v8475_v39 = vor.u32 %v10333_v35, %v8474_v34  ;;  %v8427_v53 = vor.u32 %v10321_v47, %v8426_v49  ;;  %v10297_v59 = vld [vmem:[#allocation13 + $0x6f4] sm:$0xf0]  ;;  %v8188_v46 = vld [vmem:[#allocation13 + $0x5d8] sm:$0xf0] }
 0x218   :  { %v11715_v14 = vpack.c.bf16 %v724_v40, %v720_v63  ;;  %v11717_v15 = vpack.c.bf16 %v725_v7, %v721_v2  ;;  %v11719_v16 = vpack.c.bf16 %v726_v41, %v722_v3  ;;  %v11721_v17 = vpack.c.bf16 %v727_v8, %v723_v4  ;;  %v7994_v54 = vld [vmem:[#allocation13 + $0x428] sm:$0xf]  ;;  %v10105_v4 = vld [vmem:[#allocation13 + $0xf4] sm:$0xf0]  ;;  %v10351_v49 = vld [vmem:[#allocation13 + $0x8ac] sm:$0xf] }
 0x219   :  { %v7659_v50 = vor.u32 %v10129_v42, %v7658_v38  ;;  %v8378_v56 = vld [vmem:[#allocation13 + $0x728] sm:$0xf]  ;;  %v7611_v63 = vor.u32 %v10117_v48, %v7610_v52  ;;  %v7995_v2 = vor.u32 %v10213_v55, %v7994_v54  ;;  %v7807_v40 = vor.u32 %v10159_v58, %v7804_v62  ;;  %v10201_v41 = vld [vmem:[#allocation13 + $0x3f4] sm:$0xf0]  ;;  %v7660_v42 = vld [vmem:[#allocation13 + $0x1b8] sm:$0xf0] }
 0x21a   :  { %2543 = vmatmul.bf16.vlgmr.msrb.gmra.mxu0 %v11715_v14  ;;  %2557 = vmatmul.bf16.vlgmr.msrb.gmra.mxu1 %v11717_v15  ;;  %v7562_v3 = vld [vmem:[#allocation13 + $0xc8] sm:$0xf]  ;;  %v8379_v5 = vor.u32 %v10309_v57, %v8378_v56  ;;  %v7759_v21 = vor.u32 %v10147_v11, %v7756_v6  ;;  %v10285_v25 = vld [vmem:[#allocation13 + $0x694] sm:$0xf0]  ;;  %v8572_v47 = vld [vmem:[#allocation13 + $0x8d8] sm:$0xf0]  ;;  %v8191_v55 = vor.u32 %v10255_v43, %v8188_v46 }
 0x21b   :  { %2571 = vmatmul.bf16.vlgmr.msrb.gmra.mxu2 %v11719_v16  ;;  %8656 = vmatmul.msk.bf16.vlgmr.msrb.gmra.mxu3 %vm13233_vm3, %v11721_v17  ;;  %v7946_v7 = vld [vmem:[#allocation13 + $0x3c8] sm:$0xf]  ;;  %v10081_v32 = vld [vmem:[#allocation13 + $0x34] sm:$0xf0]  ;;  %v8283_v34 = vor.u32 %v10285_v25, %v8282_v24  ;;  %v10363_v52 = vld [vmem:[#allocation13 + $0x90c] sm:$0xf]  ;;  %v8575_v56 = vor.u32 %v10351_v49, %v8572_v47 }
 0x21c   :  { %2647 = vmatpush.bf16.msrb.mxu2 %v7803_v12  ;;  %2661 = vmatpush.bf16.msrb.mxu3 %v8187_v13  ;;  %v8330_v8 = vld [vmem:[#allocation13 + $0x6c8] sm:$0xf]  ;;  %v7563_v12 = vor.u32 %v10105_v4, %v7562_v3  ;;  %v7947_v13 = vor.u32 %v10201_v41, %v7946_v7  ;;  %v10273_v38 = vld [vmem:[#allocation13 + $0x634] sm:$0xf0]  ;;  %v8620_v48 = vld [vmem:[#allocation13 + $0x938] sm:$0xf0] }
 0x21d   :  { %2675 = vmatpush.bf16.msrb.mxu0 %v8571_v19  ;;  %2696 = vmatpush.bf16.msrb.mxu1 %v8619_v23  ;;  %v7514_v18 = vld [vmem:[#allocation13 + $0x68] sm:$0xf]  ;;  %v10093_v19 = vld [vmem:[#allocation13 + $0x94] sm:$0xf0]  ;;  %v8331_v20 = vor.u32 %v10297_v59, %v8330_v8  ;;  %v10111_v57 = vld [vmem:[#allocation13 + $0x12c] sm:$0xf] }
 0x21e   :  { %v7898_v22 = vld [vmem:[#allocation13 + $0x368] sm:$0xf]  ;;  %v10189_v23 = vld [vmem:[#allocation13 + $0x394] sm:$0xf0]  ;;  %v7515_v28 = vor.u32 %v10093_v19, %v7514_v18  ;;  %v7810_v58 = vld [vmem:[#allocation13 + $0x2b0] sm:$0xf] }
 0x21f   :  { %v7466_v31 = vld [vmem:[#allocation13 + $0x8] sm:$0xf]  ;;  %v10166_v62 = vld [vmem:[#allocation13 + $0x2dc] sm:$0xf0]  ;;  %v10243_v3 = vld [vmem:[#allocation13 + $0x54c] sm:$0xf] }
 0x220   :  { %2648 = vmatpush.bf16.msrb.mxu2 %v7755_v26  ;;  %2662 = vmatpush.bf16.msrb.mxu3 %v8139_v27  ;;  %v10135_v26 = vld [vmem:[#allocation13 + $0x1ec] sm:$0xf]  ;;  %v7708_v27 = vld [vmem:[#allocation13 + $0x218] sm:$0xf0]  ;;  %v7850_v33 = vld [vmem:[#allocation13 + $0x308] sm:$0xf]  ;;  %v7811_v7 = vor.u32 %v10166_v62, %v7810_v58 }
 0x221   :  { %2676 = vmatpush.bf16.msrb.mxu0 %v8523_v29  ;;  %v7899_v29 = vor.u32 %v10189_v23, %v7898_v22  ;;  %v7711_v35 = vor.u32 %v10135_v26, %v7708_v27  ;;  %v8140_v4 = vld [vmem:[#allocation13 + $0x578] sm:$0xf0]  ;;  %v10099_v59 = vld [vmem:[#allocation13 + $0xcc] sm:$0xf]  ;;  %v7762_v11 = vld [vmem:[#allocation13 + $0x250] sm:$0xf] }
 0x222   :  { %v8143_v8 = vor.u32 %v10243_v3, %v8140_v4  ;;  %v10154_v6 = vld [vmem:[#allocation13 + $0x27c] sm:$0xf0]  ;;  %v10231_v18 = vld [vmem:[#allocation13 + $0x4ec] sm:$0xf]  ;;  %v8092_v19 = vld [vmem:[#allocation13 + $0x518] sm:$0xf0] }
 0x223   :  { %v7763_v22 = vor.u32 %v10154_v6, %v7762_v11  ;;  %v8095_v24 = vor.u32 %v10231_v18, %v8092_v19  ;;  %v10087_v25 = vld [vmem:[#allocation13 + $0x6c] sm:$0xf]  ;;  %v7714_v26 = vld [vmem:[#allocation13 + $0x1f0] sm:$0xf]  ;;  %v10142_v27 = vld [vmem:[#allocation13 + $0x21c] sm:$0xf0] }
 0x224   :  { %2649 = vmatpush.bf16.msrb.mxu2 %v7707_v36  ;;  %2663 = vmatpush.bf16.msrb.mxu3 %v8091_v37  ;;  %v10177_v36 = vld [vmem:[#allocation13 + $0x334] sm:$0xf0]  ;;  %v8234_v37 = vld [vmem:[#allocation13 + $0x608] sm:$0xf]  ;;  %v10130_v43 = vld [vmem:[#allocation13 + $0x1bc] sm:$0xf0] }
 0x225   :  { %2677 = vmatpush.bf16.msrb.mxu0 %v8475_v39  ;;  %v10123_v39 = vld [vmem:[#allocation13 + $0x18c] sm:$0xf]  ;;  %v7996_v47 = vld [vmem:[#allocation13 + $0x458] sm:$0xf0] }
 0x226   :  { %v7663_v54 = vor.u32 %v10123_v39, %v7660_v42  ;;  %v7468_v39 = vld [vmem:[#allocation13 + $0x38] sm:$0xf0]  ;;  %v7666_v42 = vld [vmem:[#allocation13 + $0x190] sm:$0xf]  ;;  %v10207_v49 = vld [vmem:[#allocation13 + $0x42c] sm:$0xf] }
 0x227   :  { %v10291_v3 = vld [vmem:[#allocation13 + $0x6cc] sm:$0xf]  ;;  %v8332_v4 = vld [vmem:[#allocation13 + $0x6f8] sm:$0xf0] }
 0x228   :  { %2650 = vmatpush.bf16.msrb.mxu2 %v7659_v50  ;;  %2664 = vmatpush.bf16.msrb.mxu3 %v8043_v51  ;;  %v7467_v50 = vor.u32 %v10081_v32, %v7466_v31  ;;  %v7851_v51 = vor.u32 %v10177_v36, %v7850_v33  ;;  %v10219_v31 = vld [vmem:[#allocation13 + $0x48c] sm:$0xf]  ;;  %v8044_v32 = vld [vmem:[#allocation13 + $0x4b8] sm:$0xf0]  ;;  %v8335_v11 = vor.u32 %v10291_v3, %v8332_v4  ;;  %v7954_v4 = vld [vmem:[#allocation13 + $0x3d0] sm:$0xf] }
 0x229   :  { %2678 = vmatpush.bf16.msrb.mxu0 %v8427_v53  ;;  %v8235_v53 = vor.u32 %v10273_v38, %v8234_v37  ;;  %v10315_v33 = vld [vmem:[#allocation13 + $0x78c] sm:$0xf]  ;;  %v8047_v38 = vor.u32 %v10219_v31, %v8044_v32  ;;  %v8284_v19 = vld [vmem:[#allocation13 + $0x698] sm:$0xf0] }
 0x22a   :  { %2613 = vmatmul.bf16.vlgmr.msra.gmra.mxu0 %v11717_v15  ;;  %2627 = vmatmul.bf16.vlgmr.msra.gmra.mxu1 %v11719_v16  ;;  %v10075_v36 = vld [vmem:[#allocation13 + $0xc] sm:$0xf]  ;;  %v8236_v32 = vld [vmem:[#allocation13 + $0x638] sm:$0xf0] }
 0x22b   :  { %2599 = vmatmul.bf16.vlgmr.msra.gmra.mxu3 %v11715_v14  ;;  %8657 = vmatmul.msk.bf16.vlgmr.msra.gmra.mxu2 %vm13233_vm3, %v11721_v17  ;;  %v10279_v18 = vld [vmem:[#allocation13 + $0x66c] sm:$0xf] }
 0x22c   :  { %2651 = vmatpush.bf16.msrb.mxu2 %v7611_v63  ;;  %2665 = vmatpush.bf16.msrb.mxu3 %v7995_v2  ;;  %v8623_v63 = vor.u32 %v10363_v52, %v8620_v48  ;;  %v7612_v2 = vld [vmem:[#allocation13 + $0x158] sm:$0xf0]  ;;  %v8194_v52 = vld [vmem:[#allocation13 + $0x5b0] sm:$0xf]  ;;  %v10262_v48 = vld [vmem:[#allocation13 + $0x5dc] sm:$0xf0] }
 0x22d   :  { %2679 = vmatpush.bf16.msrb.mxu0 %v8379_v5  ;;  %2703 = vmatpush.bf16.msra.mxu1 %v7807_v40  ;;  %v10339_v5 = vld [vmem:[#allocation13 + $0x84c] sm:$0xf]  ;;  %v8524_v40 = vld [vmem:[#allocation13 + $0x878] sm:$0xf0]  ;;  %v7615_v41 = vor.u32 %v10111_v57, %v7612_v2  ;;  %v10118_v57 = vld [vmem:[#allocation13 + $0x15c] sm:$0xf0]  ;;  %v8195_v62 = vor.u32 %v10262_v48, %v8194_v52 }
 0x22e   :  { %v7948_v2 = vld [vmem:[#allocation13 + $0x3f8] sm:$0xf0]  ;;  %v10267_v31 = vld [vmem:[#allocation13 + $0x60c] sm:$0xf]  ;;  %v8196_v52 = vld [vmem:[#allocation13 + $0x5e0] sm:$0xf0] }
 0x230   :  { %2652 = vmatpush.bf16.msrb.mxu2 %v7563_v12  ;;  %2666 = vmatpush.bf16.msrb.mxu3 %v7947_v13  ;;  %v8527_v12 = vor.u32 %v10339_v5, %v8524_v40  ;;  %v7564_v13 = vld [vmem:[#allocation13 + $0xf8] sm:$0xf0]  ;;  %v8146_v5 = vld [vmem:[#allocation13 + $0x550] sm:$0xf]  ;;  %v10250_v40 = vld [vmem:[#allocation13 + $0x57c] sm:$0xf0] }
 0x231   :  { %2680 = vmatpush.bf16.msrb.mxu0 %v8331_v20  ;;  %2704 = vmatpush.bf16.msra.mxu1 %v7759_v21  ;;  %v10327_v20 = vld [vmem:[#allocation13 + $0x7ec] sm:$0xf]  ;;  %v8476_v21 = vld [vmem:[#allocation13 + $0x818] sm:$0xf0]  ;;  %v7567_v23 = vor.u32 %v10099_v59, %v7564_v13  ;;  %v10106_v59 = vld [vmem:[#allocation13 + $0xfc] sm:$0xf0]  ;;  %v8147_v6 = vor.u32 %v10250_v40, %v8146_v5 }
 0x232   :  { %v7900_v13 = vld [vmem:[#allocation13 + $0x398] sm:$0xf0]  ;;  %v10244_v5 = vld [vmem:[#allocation13 + $0x554] sm:$0xf]  ;;  %v8148_v40 = vld [vmem:[#allocation13 + $0x580] sm:$0xf0] }
 0x234   :  { %2653 = vmatpush.bf16.msrb.mxu2 %v7515_v28  ;;  %2667 = vmatpush.bf16.msrb.mxu3 %v7899_v29  ;;  %v8479_v28 = vor.u32 %v10327_v20, %v8476_v21  ;;  %v7516_v29 = vld [vmem:[#allocation13 + $0x98] sm:$0xf0]  ;;  %v8098_v20 = vld [vmem:[#allocation13 + $0x4f0] sm:$0xf]  ;;  %v10238_v21 = vld [vmem:[#allocation13 + $0x51c] sm:$0xf0] }
 0x235   :  { %2681 = vmatpush.bf16.msrb.mxu0 %v8283_v34  ;;  %2705 = vmatpush.bf16.msra.mxu1 %v7711_v35  ;;  %v8428_v34 = vld [vmem:[#allocation13 + $0x7b8] sm:$0xf0]  ;;  %v7715_v35 = vor.u32 %v10142_v27, %v7714_v26  ;;  %v7519_v37 = vor.u32 %v10087_v25, %v7516_v29  ;;  %v10094_v25 = vld [vmem:[#allocation13 + $0x9c] sm:$0xf0]  ;;  %v10171_v26 = vld [vmem:[#allocation13 + $0x30c] sm:$0xf]  ;;  %v8287_v27 = vor.u32 %v10279_v18, %v8284_v19 }
 0x236   :  { %v8431_v46 = vor.u32 %v10315_v33, %v8428_v34  ;;  %v7852_v29 = vld [vmem:[#allocation13 + $0x338] sm:$0xf0]  ;;  %v8050_v33 = vld [vmem:[#allocation13 + $0x490] sm:$0xf]  ;;  %v10226_v34 = vld [vmem:[#allocation13 + $0x4bc] sm:$0xf0] }
 0x237   :  { %v7906_v19 = vld [vmem:[#allocation13 + $0x370] sm:$0xf] }
 0x238   :  { %2654 = vmatpush.bf16.msrb.mxu2 %v7467_v50  ;;  %2668 = vmatpush.bf16.msrb.mxu3 %v7851_v51  ;;  %v10303_v50 = vld [vmem:[#allocation13 + $0x72c] sm:$0xf]  ;;  %v8380_v51 = vld [vmem:[#allocation13 + $0x758] sm:$0xf0] }
 0x239   :  { %2682 = vmatpush.bf16.msrb.mxu0 %v8235_v53  ;;  %2706 = vmatpush.bf16.msra.mxu1 %v7663_v54  ;;  %v7667_v53 = vor.u32 %v10130_v43, %v7666_v42  ;;  %v7471_v54 = vor.u32 %v10075_v36, %v7468_v39  ;;  %v8383_v58 = vor.u32 %v10303_v50, %v8380_v51  ;;  %v10370_v39 = vld [vmem:[#allocation13 + $0x93c] sm:$0xf0]  ;;  %v7474_v43 = vld [vmem:[#allocation13 + $0x10] sm:$0xf]  ;;  %v10256_v51 = vld [vmem:[#allocation13 + $0x5b4] sm:$0xf] }
 0x23a   :  { %8658 = vmatmul.msk.bf16.vlgmr.msrb.gmra.mxu1 %vm13233_vm3, %v11721_v17  ;;  %v7855_v42 = vor.u32 %v10171_v26, %v7852_v29  ;;  %v8002_v50 = vld [vmem:[#allocation13 + $0x430] sm:$0xf] }
 0x23b   :  { %2655 = vmatmul.bf16.vlgmr.msrb.gmra.mxu2 %v11715_v14  ;;  %2669 = vmatmul.bf16.vlgmr.msrb.gmra.mxu3 %v11717_v15  ;;  %v8434_v26 = vld [vmem:[#allocation13 + $0x790] sm:$0xf] }
 0x23c   :  { %2717 = vmatpush.bf16.msra.mxu2 %v8191_v55  ;;  %2731 = vmatpush.bf16.msra.mxu3 %v8575_v56  ;;  %v7999_v55 = vor.u32 %v10207_v49, %v7996_v47  ;;  %v7618_v56 = vld [vmem:[#allocation13 + $0x130] sm:$0xf]  ;;  %v8239_v49 = vor.u32 %v10267_v31, %v8236_v32  ;;  %v8051_v47 = vor.u32 %v10226_v34, %v8050_v33  ;;  %v10178_v33 = vld [vmem:[#allocation13 + $0x33c] sm:$0xf0]  ;;  %v10220_v34 = vld [vmem:[#allocation13 + $0x494] sm:$0xf] }
 0x23d   :  { %2752 = vmatpush.bf16.msra.mxu0 %v8623_v63  ;;  %2707 = vmatpush.bf16.msra.mxu1 %v7615_v41  ;;  %v10195_v63 = vld [vmem:[#allocation13 + $0x3cc] sm:$0xf]  ;;  %v7858_v29 = vld [vmem:[#allocation13 + $0x310] sm:$0xf] }
 0x23e   :  { %2683 = vmatmul.bf16.vlgmr.msrb.gmra.mxu0 %v11719_v16  ;;  %v7951_v41 = vor.u32 %v10195_v63, %v7948_v2  ;;  %v8199_v63 = vor.u32 %v10256_v51, %v8196_v52  ;;  %v10112_v51 = vld [vmem:[#allocation13 + $0x134] sm:$0xf]  ;;  %v7620_v52 = vld [vmem:[#allocation13 + $0x160] sm:$0xf0] }
 0x240   :  { %2718 = vmatpush.bf16.msra.mxu2 %v8143_v8  ;;  %2732 = vmatpush.bf16.msra.mxu3 %v8527_v12  ;;  %v7570_v8 = vld [vmem:[#allocation13 + $0xd0] sm:$0xf]  ;;  %v10183_v12 = vld [vmem:[#allocation13 + $0x36c] sm:$0xf] }
 0x241   :  { %2759 = vmatpush.bf16.msrb.mxu0 %v7811_v7  ;;  %2708 = vmatpush.bf16.msra.mxu1 %v7567_v23  ;;  %v7619_v7 = vor.u32 %v10118_v57, %v7618_v56  ;;  %v7903_v23 = vor.u32 %v10183_v12, %v7900_v13  ;;  %v7812_v56 = vld [vmem:[#allocation13 + $0x2e0] sm:$0xf0]  ;;  %v8151_v12 = vor.u32 %v10244_v5, %v8148_v40 }
 0x244   :  { %2719 = vmatpush.bf16.msra.mxu2 %v8095_v24  ;;  %2733 = vmatpush.bf16.msra.mxu3 %v8479_v28  ;;  %v7522_v24 = vld [vmem:[#allocation13 + $0x70] sm:$0xf]  ;;  %v8099_v28 = vor.u32 %v10238_v21, %v8098_v20  ;;  %v10232_v20 = vld [vmem:[#allocation13 + $0x4f4] sm:$0xf]  ;;  %v8100_v21 = vld [vmem:[#allocation13 + $0x520] sm:$0xf0] }
 0x245   :  { %2760 = vmatpush.bf16.msrb.mxu0 %v7763_v22  ;;  %2709 = vmatpush.bf16.msra.mxu1 %v7519_v37  ;;  %v7571_v22 = vor.u32 %v10106_v59, %v7570_v8  ;;  %v7523_v36 = vor.u32 %v10094_v25, %v7522_v24  ;;  %v10358_v37 = vld [vmem:[#allocation13 + $0x8dc] sm:$0xf0]  ;;  %v10148_v8 = vld [vmem:[#allocation13 + $0x254] sm:$0xf]  ;;  %v7764_v59 = vld [vmem:[#allocation13 + $0x280] sm:$0xf0] }
 0x246   :  { %v7767_v18 = vor.u32 %v10148_v8, %v7764_v59  ;;  %v10136_v24 = vld [vmem:[#allocation13 + $0x1f4] sm:$0xf]  ;;  %v7716_v25 = vld [vmem:[#allocation13 + $0x220] sm:$0xf0]  ;;  %v8290_v8 = vld [vmem:[#allocation13 + $0x670] sm:$0xf] }
 0x247   :  { %v7719_v32 = vor.u32 %v10136_v24, %v7716_v25  ;;  %v10286_v59 = vld [vmem:[#allocation13 + $0x69c] sm:$0xf0]  ;;  %v8242_v24 = vld [vmem:[#allocation13 + $0x610] sm:$0xf] }
 0x248   :  { %2720 = vmatpush.bf16.msra.mxu2 %v8047_v38  ;;  %2734 = vmatpush.bf16.msra.mxu3 %v8431_v46  ;;  %v8626_v38 = vld [vmem:[#allocation13 + $0x910] sm:$0xf]  ;;  %v10082_v46 = vld [vmem:[#allocation13 + $0x3c] sm:$0xf0] }
 0x249   :  { %2761 = vmatpush.bf16.msrb.mxu0 %v7715_v35  ;;  %2710 = vmatpush.bf16.msra.mxu1 %v7471_v54  ;;  %v8578_v35 = vld [vmem:[#allocation13 + $0x8b0] sm:$0xf]  ;;  %v10214_v54 = vld [vmem:[#allocation13 + $0x45c] sm:$0xf0]  ;;  %v7475_v57 = vor.u32 %v10082_v46, %v7474_v43  ;;  %v10352_v43 = vld [vmem:[#allocation13 + $0x8b4] sm:$0xf] }
 0x24a   :  { %v8579_v48 = vor.u32 %v10358_v37, %v8578_v35  ;;  %v8003_v2 = vor.u32 %v10214_v54, %v8002_v50  ;;  %v8052_v35 = vld [vmem:[#allocation13 + $0x4c0] sm:$0xf0]  ;;  %v10124_v37 = vld [vmem:[#allocation13 + $0x194] sm:$0xf]  ;;  %v10274_v25 = vld [vmem:[#allocation13 + $0x63c] sm:$0xf0] }
 0x24b   :  { %v8580_v46 = vld [vmem:[#allocation13 + $0x8e0] sm:$0xf0]  ;;  %v10208_v54 = vld [vmem:[#allocation13 + $0x434] sm:$0xf] }
 0x24c   :  { %2721 = vmatpush.bf16.msra.mxu2 %v7999_v55  ;;  %2735 = vmatpush.bf16.msra.mxu3 %v8383_v58  ;;  %v10160_v55 = vld [vmem:[#allocation13 + $0x2b4] sm:$0xf]  ;;  %v8530_v58 = vld [vmem:[#allocation13 + $0x850] sm:$0xf] }
 0x24d   :  { %2762 = vmatpush.bf16.msrb.mxu0 %v7667_v53  ;;  %2773 = vmatpush.bf16.msrb.mxu1 %v8195_v62  ;;  %v8627_v53 = vor.u32 %v10370_v39, %v8626_v38  ;;  %v10346_v62 = vld [vmem:[#allocation13 + $0x87c] sm:$0xf0]  ;;  %v7815_v3 = vor.u32 %v10160_v55, %v7812_v56  ;;  %v7668_v38 = vld [vmem:[#allocation13 + $0x1c0] sm:$0xf0]  ;;  %v8386_v39 = vld [vmem:[#allocation13 + $0x730] sm:$0xf] }
 0x24e   :  { %8659 = vmatmul.msk.bf16.vlgmr.msra.gmra.mxu0 %vm13233_vm3, %v11721_v17  ;;  %2711 = vmatmul.bf16.vlgmr.msra.gmra.mxu1 %v11715_v14  ;;  %v7671_v50 = vor.u32 %v10124_v37, %v7668_v38  ;;  %v8004_v55 = vld [vmem:[#allocation13 + $0x460] sm:$0xf0]  ;;  %v8338_v56 = vld [vmem:[#allocation13 + $0x6d0] sm:$0xf]  ;;  %v10172_v37 = vld [vmem:[#allocation13 + $0x314] sm:$0xf] }
 0x24f   :  { %v7860_v38 = vld [vmem:[#allocation13 + $0x340] sm:$0xf0] }
 0x250   :  { %2722 = vmatpush.bf16.msra.mxu2 %v7951_v41  ;;  %2736 = vmatpush.bf16.msra.mxu3 %v8335_v11  ;;  %v10202_v41 = vld [vmem:[#allocation13 + $0x3fc] sm:$0xf0]  ;;  %v8482_v11 = vld [vmem:[#allocation13 + $0x7f0] sm:$0xf] }
 0x251   :  { %2763 = vmatpush.bf16.msrb.mxu0 %v7619_v7  ;;  %2774 = vmatpush.bf16.msrb.mxu1 %v8147_v6  ;;  %v8531_v7 = vor.u32 %v10346_v62, %v8530_v58  ;;  %v10334_v6 = vld [vmem:[#allocation13 + $0x81c] sm:$0xf0]  ;;  %v7955_v13 = vor.u32 %v10202_v41, %v7954_v4  ;;  %v10340_v58 = vld [vmem:[#allocation13 + $0x854] sm:$0xf]  ;;  %v8532_v62 = vld [vmem:[#allocation13 + $0x880] sm:$0xf0] }
 0x252   :  { %v7572_v4 = vld [vmem:[#allocation13 + $0x100] sm:$0xf0]  ;;  %v8535_v40 = vor.u32 %v10340_v58, %v8532_v62  ;;  %v7770_v62 = vld [vmem:[#allocation13 + $0x258] sm:$0xf] }
 0x253   :  { %v7956_v41 = vld [vmem:[#allocation13 + $0x400] sm:$0xf0] }
 0x254   :  { %2723 = vmatpush.bf16.msra.mxu2 %v7903_v23  ;;  %2737 = vmatpush.bf16.msra.mxu3 %v8287_v27  ;;  %v10190_v23 = vld [vmem:[#allocation13 + $0x39c] sm:$0xf0]  ;;  %v8340_v58 = vld [vmem:[#allocation13 + $0x700] sm:$0xf0] }
 0x255   :  { %2764 = vmatpush.bf16.msrb.mxu0 %v7571_v22  ;;  %2775 = vmatpush.bf16.msrb.mxu1 %v8099_v28  ;;  %v8483_v22 = vor.u32 %v10334_v6, %v8482_v11  ;;  %v10322_v27 = vld [vmem:[#allocation13 + $0x7bc] sm:$0xf0]  ;;  %v8103_v28 = vor.u32 %v10232_v20, %v8100_v21  ;;  %v7907_v31 = vor.u32 %v10190_v23, %v7906_v19  ;;  %v10328_v11 = vld [vmem:[#allocation13 + $0x7f4] sm:$0xf]  ;;  %v8484_v6 = vld [vmem:[#allocation13 + $0x820] sm:$0xf0] }
 0x256   :  { %v7524_v19 = vld [vmem:[#allocation13 + $0xa0] sm:$0xf0]  ;;  %v8291_v20 = vor.u32 %v10286_v59, %v8290_v8  ;;  %v8487_v21 = vor.u32 %v10328_v11, %v8484_v6  ;;  %v10280_v59 = vld [vmem:[#allocation13 + $0x674] sm:$0xf]  ;;  %v7722_v6 = vld [vmem:[#allocation13 + $0x1f8] sm:$0xf] }
 0x257   :  { %v7908_v23 = vld [vmem:[#allocation13 + $0x3a0] sm:$0xf0] }
 0x258   :  { %2724 = vmatpush.bf16.msra.mxu2 %v7855_v42  ;;  %2738 = vmatpush.bf16.msra.mxu3 %v8239_v49  ;;  %v10310_v42 = vld [vmem:[#allocation13 + $0x75c] sm:$0xf0]  ;;  %v8055_v49 = vor.u32 %v10220_v34, %v8052_v35  ;;  %v8243_v34 = vor.u32 %v10274_v25, %v8242_v24  ;;  %v8292_v11 = vld [vmem:[#allocation13 + $0x6a0] sm:$0xf0] }
 0x259   :  { %2765 = vmatpush.bf16.msrb.mxu0 %v7523_v36  ;;  %2776 = vmatpush.bf16.msrb.mxu1 %v8051_v47  ;;  %v8435_v36 = vor.u32 %v10322_v27, %v8434_v26  ;;  %v7859_v47 = vor.u32 %v10178_v33, %v7858_v29  ;;  %v10316_v26 = vld [vmem:[#allocation13 + $0x794] sm:$0xf]  ;;  %v8436_v27 = vld [vmem:[#allocation13 + $0x7c0] sm:$0xf0] }
 0x25a   :  { %v8628_v29 = vld [vmem:[#allocation13 + $0x940] sm:$0xf0]  ;;  %v10076_v33 = vld [vmem:[#allocation13 + $0x14] sm:$0xf]  ;;  %v8439_v35 = vor.u32 %v10316_v26, %v8436_v27  ;;  %v7674_v27 = vld [vmem:[#allocation13 + $0x198] sm:$0xf] }
 0x25b   :  { %2725 = vmatmul.bf16.vlgmr.msra.gmra.mxu2 %v11717_v15  ;;  %2739 = vmatmul.bf16.vlgmr.msra.gmra.mxu3 %v11719_v16  ;;  %v8244_v26 = vld [vmem:[#allocation13 + $0x640] sm:$0xf0] }
 0x25c   :  { %2787 = vmatpush.bf16.msrb.mxu2 %v8579_v48  ;;  %2808 = vmatpush.bf16.msrb.mxu3 %v8627_v53  ;;  %v8387_v48 = vor.u32 %v10310_v42, %v8386_v39  ;;  %v8583_v53 = vor.u32 %v10352_v43, %v8580_v46  ;;  %v10304_v42 = vld [vmem:[#allocation13 + $0x734] sm:$0xf]  ;;  %v8388_v43 = vld [vmem:[#allocation13 + $0x760] sm:$0xf0]  ;;  %v7818_v46 = vld [vmem:[#allocation13 + $0x2b8] sm:$0xf] }
 0x25d   :  { %2766 = vmatpush.bf16.msrb.mxu0 %v7475_v57  ;;  %2777 = vmatpush.bf16.msrb.mxu1 %v8003_v2  ;;  %v10298_v57 = vld [vmem:[#allocation13 + $0x6fc] sm:$0xf0]  ;;  %v8007_v2 = vor.u32 %v10208_v54, %v8004_v55  ;;  %v8391_v54 = vor.u32 %v10304_v42, %v8388_v43  ;;  %v7626_v42 = vld [vmem:[#allocation13 + $0x138] sm:$0xf]  ;;  %v10161_v43 = vld [vmem:[#allocation13 + $0x2bc] sm:$0xf] }
 0x25e   :  { %v8339_v5 = vor.u32 %v10298_v57, %v8338_v56  ;;  %v10292_v57 = vld [vmem:[#allocation13 + $0x6d4] sm:$0xf] }
 0x260   :  { %2815 = vmatpush.bf16.msra.mxu3 %v7815_v3  ;;  %2788 = vmatpush.bf16.msrb.mxu2 %v8531_v7  ;;  %v10100_v3 = vld [vmem:[#allocation13 + $0xd4] sm:$0xf] }
 0x261   :  { %2829 = vmatpush.bf16.msra.mxu0 %v8199_v63  ;;  %2778 = vmatpush.bf16.msrb.mxu1 %v7955_v13  ;;  %v7623_v63 = vor.u32 %v10112_v51, %v7620_v52  ;;  %v10196_v7 = vld [vmem:[#allocation13 + $0x3d4] sm:$0xf]  ;;  %v8586_v52 = vld [vmem:[#allocation13 + $0x8b8] sm:$0xf] }
 0x262   :  { %2767 = vmatmul.bf16.vlgmr.msrb.gmra.mxu0 %v11715_v14  ;;  %v7959_v13 = vor.u32 %v10196_v7, %v7956_v41  ;;  %v8343_v7 = vor.u32 %v10292_v57, %v8340_v58  ;;  %v7578_v57 = vld [vmem:[#allocation13 + $0xd8] sm:$0xf]  ;;  %v10149_v58 = vld [vmem:[#allocation13 + $0x25c] sm:$0xf] }
 0x264   :  { %2816 = vmatpush.bf16.msra.mxu3 %v7767_v18  ;;  %2789 = vmatpush.bf16.msrb.mxu2 %v8483_v22  ;;  %v10088_v18 = vld [vmem:[#allocation13 + $0x74] sm:$0xf] }
 0x265   :  { %2830 = vmatpush.bf16.msra.mxu0 %v8151_v12  ;;  %2779 = vmatpush.bf16.msrb.mxu1 %v7907_v31  ;;  %v7575_v12 = vor.u32 %v10100_v3, %v7572_v4  ;;  %v10184_v22 = vld [vmem:[#allocation13 + $0x374] sm:$0xf]  ;;  %v7527_v31 = vor.u32 %v10088_v18, %v7524_v19  ;;  %v8154_v3 = vld [vmem:[#allocation13 + $0x558] sm:$0xf]  ;;  %v10251_v4 = vld [vmem:[#allocation13 + $0x584] sm:$0xf0] }
 0x266   :  { %v8155_v8 = vor.u32 %v10251_v4, %v8154_v3  ;;  %v8106_v18 = vld [vmem:[#allocation13 + $0x4f8] sm:$0xf]  ;;  %v10239_v19 = vld [vmem:[#allocation13 + $0x524] sm:$0xf0] }
 0x267   :  { %v8107_v25 = vor.u32 %v10239_v19, %v8106_v18  ;;  %v7962_v3 = vld [vmem:[#allocation13 + $0x3d8] sm:$0xf]  ;;  %v10203_v4 = vld [vmem:[#allocation13 + $0x404] sm:$0xf0] }
 0x268   :  { %2817 = vmatpush.bf16.msra.mxu3 %v7719_v32  ;;  %2790 = vmatpush.bf16.msrb.mxu2 %v8435_v36  ;;  %v7911_v32 = vor.u32 %v10184_v22, %v7908_v23  ;;  %v7476_v36 = vld [vmem:[#allocation13 + $0x40] sm:$0xf0]  ;;  %v8295_v22 = vor.u32 %v10280_v59, %v8292_v11  ;;  %v10268_v23 = vld [vmem:[#allocation13 + $0x614] sm:$0xf]  ;;  %v7530_v59 = vld [vmem:[#allocation13 + $0x78] sm:$0xf] }
 0x269   :  { %2831 = vmatpush.bf16.msra.mxu0 %v8103_v28  ;;  %2780 = vmatpush.bf16.msrb.mxu1 %v7859_v47  ;;  %v10364_v28 = vld [vmem:[#allocation13 + $0x914] sm:$0xf]  ;;  %v8202_v47 = vld [vmem:[#allocation13 + $0x5b8] sm:$0xf]  ;;  %v7479_v51 = vor.u32 %v10076_v33, %v7476_v36  ;;  %v10371_v36 = vld [vmem:[#allocation13 + $0x944] sm:$0xf0] }
 0x26a   :  { %v8631_v39 = vor.u32 %v10364_v28, %v8628_v29  ;;  %v10131_v28 = vld [vmem:[#allocation13 + $0x1c4] sm:$0xf0]  ;;  %v8442_v33 = vld [vmem:[#allocation13 + $0x798] sm:$0xf]  ;;  %v10137_v11 = vld [vmem:[#allocation13 + $0x1fc] sm:$0xf] }
 0x26b   :  { %8660 = vmatmul.msk.bf16.vlgmr.msrb.gmra.mxu3 %vm13233_vm3, %v11721_v17  ;;  %v7914_v18 = vld [vmem:[#allocation13 + $0x378] sm:$0xf]  ;;  %v10191_v19 = vld [vmem:[#allocation13 + $0x3a4] sm:$0xf0] }
 0x26c   :  { %2818 = vmatpush.bf16.msra.mxu3 %v7671_v50  ;;  %2791 = vmatpush.bf16.msrb.mxu2 %v8387_v48  ;;  %v10263_v50 = vld [vmem:[#allocation13 + $0x5e4] sm:$0xf0] }
 0x26d   :  { %2832 = vmatpush.bf16.msra.mxu0 %v8055_v49  ;;  %2843 = vmatpush.bf16.msra.mxu1 %v8583_v53  ;;  %v10167_v49 = vld [vmem:[#allocation13 + $0x2e4] sm:$0xf0]  ;;  %v7863_v53 = vor.u32 %v10172_v37, %v7860_v38  ;;  %v8203_v56 = vor.u32 %v10263_v50, %v8202_v47  ;;  %v8247_v37 = vor.u32 %v10268_v23, %v8244_v26  ;;  %v7482_v23 = vld [vmem:[#allocation13 + $0x18] sm:$0xf] }
 0x26e   :  { %2781 = vmatmul.bf16.vlgmr.msrb.gmra.mxu1 %v11717_v15  ;;  %v10359_v48 = vld [vmem:[#allocation13 + $0x8e4] sm:$0xf0]  ;;  %v7819_v55 = vor.u32 %v10167_v49, %v7818_v46  ;;  %v7675_v38 = vor.u32 %v10131_v28, %v7674_v27  ;;  %v7820_v46 = vld [vmem:[#allocation13 + $0x2e8] sm:$0xf0]  ;;  %v10125_v27 = vld [vmem:[#allocation13 + $0x19c] sm:$0xf] }
 0x26f   :  { %v10119_v50 = vld [vmem:[#allocation13 + $0x164] sm:$0xf0]  ;;  %v7676_v28 = vld [vmem:[#allocation13 + $0x1c8] sm:$0xf0] }
 0x270   :  { %2819 = vmatpush.bf16.msra.mxu3 %v7623_v63  ;;  %2792 = vmatpush.bf16.msrb.mxu2 %v8339_v5  ;;  %v8587_v63 = vor.u32 %v10359_v48, %v8586_v52  ;;  %v8538_v5 = vld [vmem:[#allocation13 + $0x858] sm:$0xf]  ;;  %v10215_v52 = vld [vmem:[#allocation13 + $0x464] sm:$0xf0] }
 0x271   :  { %2833 = vmatpush.bf16.msra.mxu0 %v8007_v2  ;;  %2844 = vmatpush.bf16.msra.mxu1 %v8535_v40  ;;  %v10155_v2 = vld [vmem:[#allocation13 + $0x284] sm:$0xf0]  ;;  %v8394_v48 = vld [vmem:[#allocation13 + $0x738] sm:$0xf] }
 0x272   :  { %v10347_v40 = vld [vmem:[#allocation13 + $0x884] sm:$0xf0]  ;;  %v7771_v41 = vor.u32 %v10155_v2, %v7770_v62  ;;  %v7772_v62 = vld [vmem:[#allocation13 + $0x288] sm:$0xf0] }
 0x273   :  { %v10107_v2 = vld [vmem:[#allocation13 + $0x104] sm:$0xf0] }
 0x274   :  { %2820 = vmatpush.bf16.msra.mxu3 %v7575_v12  ;;  %2793 = vmatpush.bf16.msrb.mxu2 %v8291_v20  ;;  %v8539_v12 = vor.u32 %v10347_v40, %v8538_v5  ;;  %v8490_v20 = vld [vmem:[#allocation13 + $0x7f8] sm:$0xf]  ;;  %v10299_v40 = vld [vmem:[#allocation13 + $0x704] sm:$0xf0] }
 0x275   :  { %2834 = vmatpush.bf16.msra.mxu0 %v7959_v13  ;;  %2845 = vmatpush.bf16.msra.mxu1 %v8487_v21  ;;  %v10143_v13 = vld [vmem:[#allocation13 + $0x224] sm:$0xf0]  ;;  %v8346_v5 = vld [vmem:[#allocation13 + $0x6d8] sm:$0xf] }
 0x276   :  { %v10335_v21 = vld [vmem:[#allocation13 + $0x824] sm:$0xf0]  ;;  %v7723_v24 = vor.u32 %v10143_v13, %v7722_v6  ;;  %v7724_v6 = vld [vmem:[#allocation13 + $0x228] sm:$0xf0] }
 0x277   :  { %v8491_v29 = vor.u32 %v10335_v21, %v8490_v20  ;;  %v10095_v13 = vld [vmem:[#allocation13 + $0xa4] sm:$0xf0]  ;;  %v8298_v20 = vld [vmem:[#allocation13 + $0x678] sm:$0xf] }
 0x278   :  { %2821 = vmatpush.bf16.msra.mxu3 %v7527_v31  ;;  %2794 = vmatpush.bf16.msrb.mxu2 %v8243_v34  ;;  %v8058_v31 = vld [vmem:[#allocation13 + $0x498] sm:$0xf]  ;;  %v10323_v34 = vld [vmem:[#allocation13 + $0x7c4] sm:$0xf0] }
 0x279   :  { %2835 = vmatpush.bf16.msra.mxu0 %v7911_v32  ;;  %2846 = vmatpush.bf16.msra.mxu1 %v8439_v35  ;;  %v10227_v32 = vld [vmem:[#allocation13 + $0x4c4] sm:$0xf0]  ;;  %v8634_v35 = vld [vmem:[#allocation13 + $0x918] sm:$0xf]  ;;  %v8443_v49 = vor.u32 %v10323_v34, %v8442_v33 }
 0x27a   :  { %v8635_v47 = vor.u32 %v10371_v36, %v8634_v35  ;;  %v10287_v21 = vld [vmem:[#allocation13 + $0x6a4] sm:$0xf0]  ;;  %v8250_v33 = vld [vmem:[#allocation13 + $0x618] sm:$0xf]  ;;  %v10257_v35 = vld [vmem:[#allocation13 + $0x5bc] sm:$0xf] }
 0x27b   :  { %2795 = vmatmul.bf16.vlgmr.msrb.gmra.mxu2 %v11719_v16  ;;  %v10083_v26 = vld [vmem:[#allocation13 + $0x44] sm:$0xf0]  ;;  %v8204_v36 = vld [vmem:[#allocation13 + $0x5e8] sm:$0xf0] }
 0x27c   :  { %2864 = vmatpush.bf16.msra.mxu2 %v8631_v39  ;;  %2822 = vmatpush.bf16.msra.mxu3 %v7479_v51  ;;  %v8059_v39 = vor.u32 %v10227_v32, %v8058_v31  ;;  %v8010_v51 = vld [vmem:[#allocation13 + $0x438] sm:$0xf]  ;;  %v10179_v32 = vld [vmem:[#allocation13 + $0x344] sm:$0xf0] }
 0x27d   :  { %2836 = vmatpush.bf16.msra.mxu0 %v7863_v53  ;;  %2847 = vmatpush.bf16.msra.mxu1 %v8391_v54  ;;  %v10311_v53 = vld [vmem:[#allocation13 + $0x764] sm:$0xf0]  ;;  %v7823_v54 = vor.u32 %v10161_v43, %v7820_v46  ;;  %v7866_v31 = vld [vmem:[#allocation13 + $0x318] sm:$0xf]  ;;  %v10365_v46 = vld [vmem:[#allocation13 + $0x91c] sm:$0xf] }
 0x27e   :  { %v10275_v34 = vld [vmem:[#allocation13 + $0x644] sm:$0xf0]  ;;  %v7867_v43 = vor.u32 %v10179_v32, %v7866_v31 }
 0x27f   :  { %2823 = vmatmul.bf16.vlgmr.msra.gmra.mxu3 %v11715_v14 }
 0x280   :  { %2871 = vmatpush.bf16.msrb.mxu2 %v7819_v55  ;;  %2885 = vmatpush.bf16.msrb.mxu3 %v8203_v56  ;;  %v7627_v55 = vor.u32 %v10119_v50, %v7626_v42  ;;  %v8011_v56 = vor.u32 %v10215_v52, %v8010_v51  ;;  %v7483_v42 = vor.u32 %v10083_v26, %v7482_v23  ;;  %v8636_v50 = vld [vmem:[#allocation13 + $0x948] sm:$0xf0]  ;;  %v10113_v51 = vld [vmem:[#allocation13 + $0x13c] sm:$0xf] }
 0x281   :  { %2899 = vmatpush.bf16.msrb.mxu0 %v8587_v63  ;;  %2848 = vmatpush.bf16.msra.mxu1 %v8343_v7  ;;  %v8395_v63 = vor.u32 %v10311_v53, %v8394_v48  ;;  %v7775_v7 = vor.u32 %v10149_v58, %v7772_v62  ;;  %v7628_v52 = vld [vmem:[#allocation13 + $0x168] sm:$0xf0]  ;;  %v7826_v53 = vld [vmem:[#allocation13 + $0x2c0] sm:$0xf] }
 0x282   :  { %2837 = vmatmul.bf16.vlgmr.msra.gmra.mxu0 %v11717_v15  ;;  %v8540_v58 = vld [vmem:[#allocation13 + $0x888] sm:$0xf0]  ;;  %v7631_v62 = vor.u32 %v10113_v51, %v7628_v52  ;;  %v10132_v51 = vld [vmem:[#allocation13 + $0x1cc] sm:$0xf0]  ;;  %v10305_v52 = vld [vmem:[#allocation13 + $0x73c] sm:$0xf] }
 0x283   :  { %v8060_v26 = vld [vmem:[#allocation13 + $0x4c8] sm:$0xf0] }
 0x284   :  { %2872 = vmatpush.bf16.msrb.mxu2 %v7771_v41  ;;  %2886 = vmatpush.bf16.msrb.mxu3 %v8155_v8  ;;  %v7579_v41 = vor.u32 %v10107_v2, %v7578_v57  ;;  %v7963_v8 = vor.u32 %v10203_v4, %v7962_v3  ;;  %v10341_v57 = vld [vmem:[#allocation13 + $0x85c] sm:$0xf]  ;;  %v7580_v4 = vld [vmem:[#allocation13 + $0x108] sm:$0xf0] }
 0x285   :  { %2900 = vmatpush.bf16.msrb.mxu0 %v8539_v12  ;;  %2849 = vmatpush.bf16.msra.mxu1 %v8295_v22  ;;  %v8347_v12 = vor.u32 %v10299_v40, %v8346_v5  ;;  %v7727_v22 = vor.u32 %v10137_v11, %v7724_v6  ;;  %v10101_v3 = vld [vmem:[#allocation13 + $0xdc] sm:$0xf]  ;;  %v8543_v40 = vor.u32 %v10341_v57, %v8540_v58  ;;  %v10156_v6 = vld [vmem:[#allocation13 + $0x28c] sm:$0xf0] }
 0x288   :  { %2873 = vmatpush.bf16.msrb.mxu2 %v7723_v24  ;;  %2887 = vmatpush.bf16.msrb.mxu3 %v8107_v25  ;;  %v7531_v24 = vor.u32 %v10095_v13, %v7530_v59  ;;  %v7915_v25 = vor.u32 %v10191_v19, %v7914_v18  ;;  %v8108_v59 = vld [vmem:[#allocation13 + $0x528] sm:$0xf0]  ;;  %v7583_v18 = vor.u32 %v10101_v3, %v7580_v4 }
 0x289   :  { %2901 = vmatpush.bf16.msrb.mxu0 %v8491_v29  ;;  %2850 = vmatpush.bf16.msra.mxu1 %v8247_v37  ;;  %v8299_v29 = vor.u32 %v10287_v21, %v8298_v20  ;;  %v7679_v37 = vor.u32 %v10125_v27, %v7676_v28  ;;  %v8492_v13 = vld [vmem:[#allocation13 + $0x828] sm:$0xf0]  ;;  %v10089_v20 = vld [vmem:[#allocation13 + $0x7c] sm:$0xf]  ;;  %v10144_v27 = vld [vmem:[#allocation13 + $0x22c] sm:$0xf0] }
 0x28a   :  { %v7532_v21 = vld [vmem:[#allocation13 + $0xa8] sm:$0xf0]  ;;  %v10317_v28 = vld [vmem:[#allocation13 + $0x79c] sm:$0xf] }
 0x28b   :  { %8661 = vmatmul.msk.bf16.vlgmr.msra.gmra.mxu2 %vm13233_vm3, %v11721_v17  ;;  %v7535_v32 = vor.u32 %v10089_v20, %v7532_v21  ;;  %v7964_v4 = vld [vmem:[#allocation13 + $0x408] sm:$0xf0] }
 0x28c   :  { %2874 = vmatpush.bf16.msrb.mxu2 %v7675_v38  ;;  %2888 = vmatpush.bf16.msrb.mxu3 %v8059_v39  ;;  %v10353_v38 = vld [vmem:[#allocation13 + $0x8bc] sm:$0xf]  ;;  %v8588_v39 = vld [vmem:[#allocation13 + $0x8e8] sm:$0xf0] }
 0x28d   :  { %2902 = vmatpush.bf16.msrb.mxu0 %v8443_v49  ;;  %2920 = vmatpush.bf16.msrb.mxu1 %v8635_v47  ;;  %v8251_v49 = vor.u32 %v10275_v34, %v8250_v33  ;;  %v8207_v47 = vor.u32 %v10257_v35, %v8204_v36  ;;  %v8591_v48 = vor.u32 %v10353_v38, %v8588_v39  ;;  %v10077_v33 = vld [vmem:[#allocation13 + $0x1c] sm:$0xf]  ;;  %v7682_v38 = vld [vmem:[#allocation13 + $0x1a0] sm:$0xf] }
 0x28e   :  { %2851 = vmatmul.bf16.vlgmr.msra.gmra.mxu1 %v11719_v16  ;;  %v10209_v39 = vld [vmem:[#allocation13 + $0x43c] sm:$0xf] }
 0x290   :  { %2875 = vmatpush.bf16.msrb.mxu2 %v7627_v55  ;;  %2889 = vmatpush.bf16.msrb.mxu3 %v8011_v56  ;;  %v8156_v55 = vld [vmem:[#allocation13 + $0x588] sm:$0xf0]  ;;  %v10168_v56 = vld [vmem:[#allocation13 + $0x2ec] sm:$0xf0] }
 0x291   :  { %2927 = vmatpush.bf16.msra.mxu1 %v7823_v54  ;;  %2903 = vmatpush.bf16.msrb.mxu0 %v8395_v63  ;;  %v10245_v54 = vld [vmem:[#allocation13 + $0x55c] sm:$0xf]  ;;  %v8639_v63 = vor.u32 %v10365_v46, %v8636_v50  ;;  %v7827_v5 = vor.u32 %v10168_v56, %v7826_v53  ;;  %v10264_v50 = vld [vmem:[#allocation13 + $0x5ec] sm:$0xf0] }
 0x292   :  { %v8159_v2 = vor.u32 %v10245_v54, %v8156_v55 }
 0x294   :  { %2876 = vmatpush.bf16.msrb.mxu2 %v7579_v41  ;;  %2890 = vmatpush.bf16.msrb.mxu3 %v7963_v8  ;;  %v7778_v41 = vld [vmem:[#allocation13 + $0x260] sm:$0xf]  ;;  %v10233_v8 = vld [vmem:[#allocation13 + $0x4fc] sm:$0xf] }
 0x295   :  { %2928 = vmatpush.bf16.msra.mxu1 %v7775_v7  ;;  %2904 = vmatpush.bf16.msrb.mxu0 %v8347_v12  ;;  %v10329_v12 = vld [vmem:[#allocation13 + $0x7fc] sm:$0xf]  ;;  %v8111_v19 = vor.u32 %v10233_v8, %v8108_v59  ;;  %v8348_v8 = vld [vmem:[#allocation13 + $0x708] sm:$0xf0] }
 0x296   :  { %v8495_v23 = vor.u32 %v10329_v12, %v8492_v13 }
 0x297   :  { %v2544_v7 = vpop.f32.mrf.mxu0  ;;  %v2558_v11 = vpop.f32.mrf.mxu1 }
 0x298   :  { %2877 = vmatpush.bf16.msrb.mxu2 %v7531_v24  ;;  %2891 = vmatpush.bf16.msrb.mxu3 %v7915_v25  ;;  %v7730_v24 = vld [vmem:[#allocation13 + $0x200] sm:$0xf]  ;;  %v10221_v25 = vld [vmem:[#allocation13 + $0x49c] sm:$0xf]  ;;  %v2559_v31 = vadd.f32 %v2558_v11, %v2544_v7  ;;  %v10120_v7 = vld [vmem:[#allocation13 + $0x16c] sm:$0xf0] }
 0x299   :  { %2929 = vmatpush.bf16.msra.mxu1 %v7727_v22  ;;  %2905 = vmatpush.bf16.msrb.mxu0 %v8299_v29  ;;  %v7779_v22 = vor.u32 %v10156_v6, %v7778_v41  ;;  %v8444_v29 = vld [vmem:[#allocation13 + $0x7c8] sm:$0xf0]  ;;  %v8063_v36 = vor.u32 %v10221_v25, %v8060_v26  ;;  %v10293_v41 = vld [vmem:[#allocation13 + $0x6dc] sm:$0xf]  ;;  %v10240_v25 = vld [vmem:[#allocation13 + $0x52c] sm:$0xf0] }
 0x29a   :  { %v8447_v46 = vor.u32 %v10317_v28, %v8444_v29  ;;  %v10108_v26 = vld [vmem:[#allocation13 + $0x10c] sm:$0xf0]  ;;  %v8300_v28 = vld [vmem:[#allocation13 + $0x6a8] sm:$0xf0] }
 0x29c   :  { %2878 = vmatpush.bf16.msrb.mxu2 %v7483_v42  ;;  %2892 = vmatpush.bf16.msrb.mxu3 %v7867_v43  ;;  %v7731_v42 = vor.u32 %v10144_v27, %v7730_v24  ;;  %v8114_v24 = vld [vmem:[#allocation13 + $0x500] sm:$0xf]  ;;  %v10281_v27 = vld [vmem:[#allocation13 + $0x67c] sm:$0xf] }
 0x29d   :  { %2930 = vmatpush.bf16.msra.mxu1 %v7679_v37  ;;  %2906 = vmatpush.bf16.msrb.mxu0 %v8251_v49  ;;  %v7484_v37 = vld [vmem:[#allocation13 + $0x48] sm:$0xf0] }
 0x29e   :  { %8662 = vmatmul.msk.bf16.vlgmr.msrb.gmra.mxu1 %vm13233_vm3, %v11721_v17  ;;  %v2572_v34 = vpop.f32.mrf.mxu2  ;;  %v2586_v35 = vpop.f32.mrf.mxu3  ;;  %v8012_v49 = vld [vmem:[#allocation13 + $0x468] sm:$0xf0]  ;;  %v7487_v54 = vor.u32 %v10077_v33, %v7484_v37  ;;  %v7538_v33 = vld [vmem:[#allocation13 + $0x80] sm:$0xf] }
 0x29f   :  { %2879 = vmatmul.bf16.vlgmr.msrb.gmra.mxu2 %v11715_v14  ;;  %2893 = vmatmul.bf16.vlgmr.msrb.gmra.mxu3 %v11717_v15  ;;  %v2573_v43 = vadd.f32 %v2572_v34, %v2559_v31  ;;  %v2546_v53 = vpop.f32.mrf.mxu0  ;;  %v2560_v56 = vpop.f32.mrf.mxu1  ;;  %v8015_v57 = vor.u32 %v10209_v39, %v8012_v49  ;;  %v10096_v34 = vld [vmem:[#allocation13 + $0xac] sm:$0xf0]  ;;  %v7868_v39 = vld [vmem:[#allocation13 + $0x348] sm:$0xf0] }
 0x2a0   :  { %2941 = vmatpush.bf16.msra.mxu2 %v8207_v47  ;;  %2955 = vmatpush.bf16.msra.mxu3 %v8591_v48  ;;  %v8210_v47 = vld [vmem:[#allocation13 + $0x5c0] sm:$0xf]  ;;  %v8396_v48 = vld [vmem:[#allocation13 + $0x768] sm:$0xf0]  ;;  %v2561_v59 = vadd.f32 %v2560_v56, %v2546_v53 }
 0x2a1   :  { %2907 = vmatmul.bf16.vlgmr.msrb.gmra.mxu0 %v11719_v16  ;;  %2931 = vmatpush.bf16.msra.mxu1 %v7631_v62  ;;  %v11758_v55 = vadd.f32 %v2586_v35, %v2573_v43  ;;  %v8211_v58 = vor.u32 %v10264_v50, %v8210_v47  ;;  %v7634_v62 = vld [vmem:[#allocation13 + $0x140] sm:$0xf]  ;;  %v8399_v3 = vor.u32 %v10305_v52, %v8396_v48  ;;  %v10173_v35 = vld [vmem:[#allocation13 + $0x31c] sm:$0xf]  ;;  %v10228_v43 = vld [vmem:[#allocation13 + $0x4cc] sm:$0xf0] }
 0x2a2   :  { %2976 = vmatpush.bf16.msra.mxu0 %v8639_v63  ;;  %v10197_v63 = vld [vmem:[#allocation13 + $0x3dc] sm:$0xf]  ;;  %v7635_v20 = vor.u32 %v10120_v7, %v7634_v62  ;;  %v8252_v49 = vld [vmem:[#allocation13 + $0x648] sm:$0xf0]  ;;  %v8594_v47 = vld [vmem:[#allocation13 + $0x8c0] sm:$0xf]  ;;  %v7871_v56 = vor.u32 %v10173_v35, %v7868_v39  ;;  %v7539_v62 = vor.u32 %v10096_v34, %v7538_v33 }
 0x2a3   :  { %3329 = vrot.lane.b32.xlu0 %v11758_v55, %s11274_s7  ;;  %v7967_v12 = vor.u32 %v10197_v63, %v7964_v4  ;;  %v8642_v52 = vld [vmem:[#allocation13 + $0x920] sm:$0xf]  ;;  %v10372_v48 = vld [vmem:[#allocation13 + $0x94c] sm:$0xf0]  ;;  %v10162_v7 = vld [vmem:[#allocation13 + $0x2c4] sm:$0xf] }
 0x2a4   :  { %2942 = vmatpush.bf16.msra.mxu2 %v8159_v2  ;;  %2956 = vmatpush.bf16.msra.mxu3 %v8543_v40  ;;  %v7683_v2 = vor.u32 %v10132_v51, %v7682_v38  ;;  %v10252_v40 = vld [vmem:[#allocation13 + $0x58c] sm:$0xf0]  ;;  %v8303_v38 = vor.u32 %v10281_v27, %v8300_v28  ;;  %v8164_v27 = vld [vmem:[#allocation13 + $0x590] sm:$0xf0]  ;;  %v8498_v28 = vld [vmem:[#allocation13 + $0x800] sm:$0xf] }
 0x2a5   :  { %2932 = vmatpush.bf16.msra.mxu1 %v7583_v18  ;;  %v7586_v18 = vld [vmem:[#allocation13 + $0xe0] sm:$0xf]  ;;  %v10360_v51 = vld [vmem:[#allocation13 + $0x8ec] sm:$0xf0] }
 0x2a6   :  { %2983 = vmatpush.bf16.msrb.mxu0 %v7827_v5  ;;  %v8162_v5 = vld [vmem:[#allocation13 + $0x560] sm:$0xf]  ;;  %v2574_v11 = vpop.f32.mrf.mxu2  ;;  %v2588_v6 = vpop.f32.mrf.mxu3  ;;  %v7587_v37 = vor.u32 %v10108_v26, %v7586_v18  ;;  %v10216_v4 = vld [vmem:[#allocation13 + $0x46c] sm:$0xf0] }
 0x2a7   :  { %v8163_v13 = vor.u32 %v10252_v40, %v8162_v5  ;;  %v2575_v21 = vadd.f32 %v2574_v11, %v2561_v59  ;;  %v11771_v50 = vpop.f32.mrf.mxu1  ;;  %v8595_v5 = vor.u32 %v10360_v51, %v8594_v47  ;;  %v8643_v40 = vor.u32 %v10372_v48, %v8642_v52  ;;  %v8212_v59 = vld [vmem:[#allocation13 + $0x5f0] sm:$0xf0]  ;;  %v8546_v11 = vld [vmem:[#allocation13 + $0x860] sm:$0xf]  ;;  %v10192_v39 = vld [vmem:[#allocation13 + $0x3ac] sm:$0xf0] }
 0x2a8   :  { %2943 = vmatpush.bf16.msra.mxu2 %v8111_v19  ;;  %2957 = vmatpush.bf16.msra.mxu3 %v8495_v23  ;;  %v10185_v19 = vld [vmem:[#allocation13 + $0x37c] sm:$0xf]  ;;  %v7916_v23 = vld [vmem:[#allocation13 + $0x3a8] sm:$0xf0]  ;;  %v7732_v47 = vld [vmem:[#allocation13 + $0x230] sm:$0xf0] }
 0x2a9   :  { %2933 = vmatpush.bf16.msra.mxu1 %v7535_v32  ;;  %v11765_v29 = vadd.f32 %v2588_v6, %v2575_v21  ;;  %v7919_v31 = vor.u32 %v10185_v19, %v7916_v23  ;;  %v8115_v32 = vor.u32 %v10240_v25, %v8114_v24  ;;  %v10348_v6 = vld [vmem:[#allocation13 + $0x88c] sm:$0xf0]  ;;  %v7970_v19 = vld [vmem:[#allocation13 + $0x3e0] sm:$0xf]  ;;  %v10150_v23 = vld [vmem:[#allocation13 + $0x264] sm:$0xf] }
 0x2aa   :  { %2984 = vmatpush.bf16.msrb.mxu0 %v7779_v22  ;;  %v8351_v22 = vor.u32 %v10293_v41, %v8348_v8  ;;  %v7828_v41 = vld [vmem:[#allocation13 + $0x2f0] sm:$0xf0]  ;;  %v10258_v8 = vld [vmem:[#allocation13 + $0x5c4] sm:$0xf]  ;;  %v8450_v48 = vld [vmem:[#allocation13 + $0x7a0] sm:$0xf] }
 0x2ab   :  { %3331 = vrot.lane.b32.xlu1 %v11765_v29, %s11274_s7  ;;  %v7831_v18 = vor.u32 %v10162_v7, %v7828_v41  ;;  %v8215_v21 = vor.u32 %v10258_v8, %v8212_v59  ;;  %v7780_v24 = vld [vmem:[#allocation13 + $0x290] sm:$0xf0]  ;;  %v10246_v25 = vld [vmem:[#allocation13 + $0x564] sm:$0xf] }
 0x2ac   :  { %2944 = vmatpush.bf16.msra.mxu2 %v8063_v36  ;;  %2958 = vmatpush.bf16.msra.mxu3 %v8447_v46  ;;  %v11767_v36 = vpop.f32.mrf.mxu0  ;;  %v10269_v46 = vld [vmem:[#allocation13 + $0x61c] sm:$0xf]  ;;  %v10234_v51 = vld [vmem:[#allocation13 + $0x504] sm:$0xf]  ;;  %v8116_v52 = vld [vmem:[#allocation13 + $0x530] sm:$0xf0] }
 0x2ad   :  { %2934 = vmatpush.bf16.msra.mxu1 %v7487_v54  ;;  %v8255_v63 = vor.u32 %v10269_v46, %v8252_v49  ;;  %v10138_v49 = vld [vmem:[#allocation13 + $0x204] sm:$0xf]  ;;  %v8596_v59 = vld [vmem:[#allocation13 + $0x8f0] sm:$0xf0] }
 0x2ae   :  { %2985 = vmatpush.bf16.msrb.mxu0 %v7731_v42  ;;  %v8066_v42 = vld [vmem:[#allocation13 + $0x4a0] sm:$0xf]  ;;  %v11773_v53 = vpop.f32.mrf.mxu3  ;;  %v11775_v54 = vpop.f32.mrf.mxu2  ;;  %v10222_v41 = vld [vmem:[#allocation13 + $0x4a4] sm:$0xf] }
 0x2af   :  { %v10354_v8 = vld [vmem:[#allocation13 + $0x8c4] sm:$0xf] }
 0x2b0   :  { %2945 = vmatpush.bf16.msra.mxu2 %v8015_v57  ;;  %2959 = vmatpush.bf16.msra.mxu3 %v8399_v3  ;;  %v8067_v57 = vor.u32 %v10228_v43, %v8066_v42  ;;  %v8018_v3 = vld [vmem:[#allocation13 + $0x440] sm:$0xf]  ;;  %v2630_v42 = vpop.f32.mrf.mxu1  ;;  %v8167_v43 = vor.u32 %v10246_v25, %v8164_v27  ;;  %v10210_v27 = vld [vmem:[#allocation13 + $0x444] sm:$0xf] }
 0x2b1   :  { %2997 = vmatpush.bf16.msrb.mxu1 %v8211_v58  ;;  %8663 = vmatmul.msk.bf16.vlgmr.msra.gmra.mxu0 %vm13233_vm3, %v11721_v17  ;;  %v7490_v58 = vld [vmem:[#allocation13 + $0x20] sm:$0xf] }
 0x2b2   :  { %2986 = vmatpush.bf16.msrb.mxu0 %v7683_v2  ;;  %2935 = vmatmul.bf16.vlgmr.msra.gmra.mxu1 %v11715_v14  ;;  %v10084_v2 = vld [vmem:[#allocation13 + $0x4c] sm:$0xf0] }
 0x2b4   :  { %2946 = vmatpush.bf16.msra.mxu2 %v7967_v12  ;;  %2960 = vmatpush.bf16.msra.mxu3 %v8351_v22  ;;  %v8019_v12 = vor.u32 %v10216_v4, %v8018_v3  ;;  %v8547_v22 = vor.u32 %v10348_v6, %v8546_v11  ;;  %v2616_v26 = vpop.f32.mrf.mxu0  ;;  %v10180_v3 = vld [vmem:[#allocation13 + $0x34c] sm:$0xf0]  ;;  %v10126_v4 = vld [vmem:[#allocation13 + $0x1a4] sm:$0xf]  ;;  %v8068_v11 = vld [vmem:[#allocation13 + $0x4d0] sm:$0xf0] }
 0x2b5   :  { %2998 = vmatpush.bf16.msrb.mxu1 %v8163_v13  ;;  %v7491_v13 = vor.u32 %v10084_v2, %v7490_v58  ;;  %v8402_v6 = vld [vmem:[#allocation13 + $0x740] sm:$0xf]  ;;  %v8071_v25 = vor.u32 %v10222_v41, %v8068_v11  ;;  %v10186_v41 = vld [vmem:[#allocation13 + $0x384] sm:$0xf]  ;;  %v7924_v11 = vld [vmem:[#allocation13 + $0x3b0] sm:$0xf0] }
 0x2b6   :  { %2987 = vmatpush.bf16.msrb.mxu0 %v7635_v20  ;;  %v10204_v20 = vld [vmem:[#allocation13 + $0x40c] sm:$0xf0]  ;;  %v2644_v33 = vpop.f32.mrf.mxu2 }
 0x2b7   :  { %v7971_v34 = vor.u32 %v10204_v20, %v7970_v19 }
 0x2b8   :  { %2947 = vmatpush.bf16.msra.mxu2 %v7919_v31  ;;  %2961 = vmatpush.bf16.msra.mxu3 %v8303_v38  ;;  %v10336_v31 = vld [vmem:[#allocation13 + $0x82c] sm:$0xf0]  ;;  %v7922_v38 = vld [vmem:[#allocation13 + $0x380] sm:$0xf] }
 0x2b9   :  { %2999 = vmatpush.bf16.msrb.mxu1 %v8115_v32  ;;  %v2602_v32 = vpop.f32.mrf.mxu3  ;;  %v8499_v46 = vor.u32 %v10336_v31, %v8498_v28  ;;  %v7923_v58 = vor.u32 %v10192_v39, %v7922_v38  ;;  %v10342_v28 = vld [vmem:[#allocation13 + $0x864] sm:$0xf]  ;;  %v8548_v31 = vld [vmem:[#allocation13 + $0x890] sm:$0xf0]  ;;  %v2698_v38 = vpop.f32.mrf.mxu1 }
 0x2ba   :  { %2988 = vmatpush.bf16.msrb.mxu0 %v7587_v37  ;;  %v2617_v35 = vadd.f32 %v2616_v26, %v2602_v32  ;;  %v7783_v37 = vor.u32 %v10150_v23, %v7780_v24  ;;  %v7636_v23 = vld [vmem:[#allocation13 + $0x170] sm:$0xf0] }
 0x2bc   :  { %2948 = vmatpush.bf16.msra.mxu2 %v7871_v56  ;;  %2962 = vmatpush.bf16.msra.mxu3 %v8255_v63  ;;  %v10324_v56 = vld [vmem:[#allocation13 + $0x7cc] sm:$0xf0]  ;;  %v7735_v63 = vor.u32 %v10138_v49, %v7732_v47  ;;  %v2684_v32 = vpop.f32.mrf.mxu0 }
 0x2bd   :  { %3000 = vmatpush.bf16.msrb.mxu1 %v8067_v57  ;;  %v2631_v57 = vadd.f32 %v2630_v42, %v2617_v35  ;;  %v8451_v7 = vor.u32 %v10324_v56, %v8450_v48  ;;  %v10300_v35 = vld [vmem:[#allocation13 + $0x70c] sm:$0xf0]  ;;  %v8551_v42 = vor.u32 %v10342_v28, %v8548_v31  ;;  %v10330_v48 = vld [vmem:[#allocation13 + $0x804] sm:$0xf]  ;;  %v8500_v56 = vld [vmem:[#allocation13 + $0x830] sm:$0xf0] }
 0x2be   :  { %2989 = vmatpush.bf16.msrb.mxu0 %v7539_v62  ;;  %v7874_v62 = vld [vmem:[#allocation13 + $0x320] sm:$0xf]  ;;  %v10306_v28 = vld [vmem:[#allocation13 + $0x744] sm:$0xf]  ;;  %v8404_v31 = vld [vmem:[#allocation13 + $0x770] sm:$0xf0] }
 0x2bf   :  { %2949 = vmatmul.bf16.vlgmr.msra.gmra.mxu2 %v11717_v15  ;;  %2963 = vmatmul.bf16.vlgmr.msra.gmra.mxu3 %v11719_v16  ;;  %v11780_v2 = vadd.f32 %v2644_v33, %v2631_v57  ;;  %v8020_v33 = vld [vmem:[#allocation13 + $0x470] sm:$0xf0] }
 0x2c0   :  { %3011 = vmatpush.bf16.msrb.mxu2 %v8595_v5  ;;  %3032 = vmatpush.bf16.msrb.mxu3 %v8643_v40  ;;  %v7684_v5 = vld [vmem:[#allocation13 + $0x1d0] sm:$0xf0]  ;;  %v8119_v40 = vor.u32 %v10234_v51, %v8116_v52  ;;  %v8023_v49 = vor.u32 %v10210_v27, %v8020_v33  ;;  %v10198_v52 = vld [vmem:[#allocation13 + $0x3e4] sm:$0xf]  ;;  %v10169_v33 = vld [vmem:[#allocation13 + $0x2f4] sm:$0xf0] }
 0x2c1   :  { %3001 = vmatpush.bf16.msrb.mxu1 %v8019_v12  ;;  %3578 = vrot.lane.b32.xlu0 %v11780_v2, %s11274_s7  ;;  %v10312_v12 = vld [vmem:[#allocation13 + $0x76c] sm:$0xf0]  ;;  %v2670_v19 = vpop.f32.mrf.mxu3  ;;  %v7687_v20 = vor.u32 %v10126_v4, %v7684_v5  ;;  %v7972_v57 = vld [vmem:[#allocation13 + $0x410] sm:$0xf0]  ;;  %v10090_v4 = vld [vmem:[#allocation13 + $0x84] sm:$0xf] }
 0x2c2   :  { %2990 = vmatpush.bf16.msrb.mxu0 %v7491_v13  ;;  %v2656_v13 = vpop.f32.mrf.mxu2  ;;  %v8403_v26 = vor.u32 %v10312_v12, %v8402_v6  ;;  %v7540_v5 = vld [vmem:[#allocation13 + $0xb0] sm:$0xf0]  ;;  %v8258_v6 = vld [vmem:[#allocation13 + $0x620] sm:$0xf]  ;;  %v10276_v12 = vld [vmem:[#allocation13 + $0x64c] sm:$0xf0] }
 0x2c3   :  { %v2671_v24 = vadd.f32 %v2670_v19, %v2656_v13  ;;  %v10366_v13 = vld [vmem:[#allocation13 + $0x924] sm:$0xf]  ;;  %v7543_v19 = vor.u32 %v10090_v4, %v7540_v5  ;;  %v10349_v4 = vld [vmem:[#allocation13 + $0x894] sm:$0xf0] }
 0x2c4   :  { %3039 = vmatpush.bf16.msra.mxu3 %v7831_v18  ;;  %3012 = vmatpush.bf16.msrb.mxu2 %v8547_v22  ;;  %v7875_v18 = vor.u32 %v10180_v3, %v7874_v62  ;;  %v10114_v22 = vld [vmem:[#allocation13 + $0x144] sm:$0xf]  ;;  %v10288_v62 = vld [vmem:[#allocation13 + $0x6ac] sm:$0xf0]  ;;  %v8503_v3 = vor.u32 %v10330_v48, %v8500_v56  ;;  %v7786_v48 = vld [vmem:[#allocation13 + $0x268] sm:$0xf] }
 0x2c5   :  { %2991 = vmatmul.bf16.vlgmr.msrb.gmra.mxu0 %v11715_v14  ;;  %3002 = vmatpush.bf16.msrb.mxu1 %v7971_v34  ;;  %v8354_v34 = vld [vmem:[#allocation13 + $0x6e0] sm:$0xf]  ;;  %v7639_v39 = vor.u32 %v10114_v22, %v7636_v23  ;;  %v7927_v22 = vor.u32 %v10186_v41, %v7924_v11  ;;  %v8259_v23 = vor.u32 %v10276_v12, %v8258_v6  ;;  %v7738_v11 = vld [vmem:[#allocation13 + $0x208] sm:$0xf]  ;;  %v11796_v6 = vpop.f32.mrf.mxu1 }
 0x2c6   :  { %3053 = vmatpush.bf16.msra.mxu0 %v8215_v21  ;;  %v8599_v21 = vor.u32 %v10354_v8, %v8596_v59  ;;  %v8355_v47 = vor.u32 %v10300_v35, %v8354_v34  ;;  %v10318_v8 = vld [vmem:[#allocation13 + $0x7a4] sm:$0xf]  ;;  %v8452_v59 = vld [vmem:[#allocation13 + $0x7d0] sm:$0xf0]  ;;  %v8218_v34 = vld [vmem:[#allocation13 + $0x5c8] sm:$0xf] }
 0x2c7   :  { %v10265_v35 = vld [vmem:[#allocation13 + $0x5f4] sm:$0xf0] }
 0x2c8   :  { %3040 = vmatpush.bf16.msra.mxu3 %v7783_v37  ;;  %3013 = vmatpush.bf16.msrb.mxu2 %v8499_v46  ;;  %v2685_v37 = vadd.f32 %v2684_v32, %v2671_v24  ;;  %v7588_v46 = vld [vmem:[#allocation13 + $0x110] sm:$0xf0]  ;;  %v7834_v32 = vld [vmem:[#allocation13 + $0x2c8] sm:$0xf] }
 0x2c9   :  { %3003 = vmatpush.bf16.msrb.mxu1 %v7923_v58  ;;  %v8306_v58 = vld [vmem:[#allocation13 + $0x680] sm:$0xf]  ;;  %v7492_v24 = vld [vmem:[#allocation13 + $0x50] sm:$0xf0] }
 0x2ca   :  { %3054 = vmatpush.bf16.msra.mxu0 %v8167_v43  ;;  %v10102_v43 = vld [vmem:[#allocation13 + $0xe4] sm:$0xf]  ;;  %v11784_v51 = vadd.f32 %v2698_v38, %v2685_v37  ;;  %v8602_v38 = vld [vmem:[#allocation13 + $0x8c8] sm:$0xf] }
 0x2cc   :  { %3041 = vmatpush.bf16.msra.mxu3 %v7735_v63  ;;  %3014 = vmatpush.bf16.msrb.mxu2 %v8451_v7  ;;  %v7591_v63 = vor.u32 %v10102_v43, %v7588_v46  ;;  %v8307_v7 = vor.u32 %v10288_v62, %v8306_v58  ;;  %v8407_v43 = vor.u32 %v10306_v28, %v8404_v31  ;;  %v8170_v58 = vld [vmem:[#allocation13 + $0x568] sm:$0xf]  ;;  %v10253_v62 = vld [vmem:[#allocation13 + $0x594] sm:$0xf0] }
 0x2cd   :  { %3004 = vmatpush.bf16.msrb.mxu1 %v7875_v18  ;;  %3823 = vrot.lane.b32.xlu0 %v11784_v51, %s11274_s7  ;;  %v8644_v18 = vld [vmem:[#allocation13 + $0x950] sm:$0xf0]  ;;  %v7835_v46 = vor.u32 %v10169_v33, %v7834_v32  ;;  %v8171_v41 = vor.u32 %v10253_v62, %v8170_v58  ;;  %v10133_v28 = vld [vmem:[#allocation13 + $0x1d4] sm:$0xf0]  ;;  %v8074_v32 = vld [vmem:[#allocation13 + $0x4a8] sm:$0xf] }
 0x2ce   :  { %3055 = vmatpush.bf16.msra.mxu0 %v8119_v40  ;;  %v7975_v40 = vor.u32 %v10198_v52, %v7972_v57  ;;  %v8647_v27 = vor.u32 %v10366_v13, %v8644_v18  ;;  %v8356_v52 = vld [vmem:[#allocation13 + $0x710] sm:$0xf0]  ;;  %v10157_v57 = vld [vmem:[#allocation13 + $0x294] sm:$0xf0]  ;;  %v8122_v18 = vld [vmem:[#allocation13 + $0x508] sm:$0xf] }
 0x2cf   :  { %8664 = vmatmul.msk.bf16.vlgmr.msrb.gmra.mxu3 %vm13233_vm3, %v11721_v17  ;;  %v10145_v13 = vld [vmem:[#allocation13 + $0x234] sm:$0xf0]  ;;  %v8026_v62 = vld [vmem:[#allocation13 + $0x448] sm:$0xf] }
 0x2d0   :  { %3042 = vmatpush.bf16.msra.mxu3 %v7687_v20  ;;  %3015 = vmatpush.bf16.msrb.mxu2 %v8403_v26  ;;  %v8455_v20 = vor.u32 %v10318_v8, %v8452_v59  ;;  %v7876_v26 = vld [vmem:[#allocation13 + $0x350] sm:$0xf0]  ;;  %v10282_v8 = vld [vmem:[#allocation13 + $0x684] sm:$0xf]  ;;  %v10229_v33 = vld [vmem:[#allocation13 + $0x4d4] sm:$0xf0] }
 0x2d1   :  { %3067 = vmatpush.bf16.msra.mxu1 %v8599_v21  ;;  %v10078_v21 = vld [vmem:[#allocation13 + $0x24] sm:$0xf]  ;;  %v8308_v59 = vld [vmem:[#allocation13 + $0x6b0] sm:$0xf0]  ;;  %v10121_v58 = vld [vmem:[#allocation13 + $0x174] sm:$0xf0] }
 0x2d2   :  { %3056 = vmatpush.bf16.msra.mxu0 %v8071_v25  ;;  %3005 = vmatmul.bf16.vlgmr.msrb.gmra.mxu1 %v11717_v15  ;;  %v10174_v25 = vld [vmem:[#allocation13 + $0x324] sm:$0xf]  ;;  %v7495_v37 = vor.u32 %v10078_v21, %v7492_v24  ;;  %v10337_v21 = vld [vmem:[#allocation13 + $0x834] sm:$0xf0]  ;;  %v7739_v24 = vor.u32 %v10145_v13, %v7738_v11  ;;  %v10151_v13 = vld [vmem:[#allocation13 + $0x26c] sm:$0xf] }
 0x2d4   :  { %3043 = vmatpush.bf16.msra.mxu3 %v7639_v39  ;;  %3016 = vmatpush.bf16.msrb.mxu2 %v8355_v47  ;;  %v10361_v39 = vld [vmem:[#allocation13 + $0x8f4] sm:$0xf0]  ;;  %v10294_v47 = vld [vmem:[#allocation13 + $0x6e4] sm:$0xf] }
 0x2d5   :  { %3068 = vmatpush.bf16.msra.mxu1 %v8551_v42  ;;  %v7879_v42 = vor.u32 %v10174_v25, %v7876_v26  ;;  %v8603_v56 = vor.u32 %v10361_v39, %v8602_v38  ;;  %v8359_v5 = vor.u32 %v10294_v47, %v8356_v52  ;;  %v8260_v26 = vld [vmem:[#allocation13 + $0x650] sm:$0xf0]  ;;  %v10373_v38 = vld [vmem:[#allocation13 + $0x954] sm:$0xf0]  ;;  %v7642_v47 = vld [vmem:[#allocation13 + $0x148] sm:$0xf] }
 0x2d6   :  { %3057 = vmatpush.bf16.msra.mxu0 %v8023_v49  ;;  %v8219_v49 = vor.u32 %v10265_v35, %v8218_v34  ;;  %v8458_v34 = vld [vmem:[#allocation13 + $0x7a8] sm:$0xf]  ;;  %v10325_v35 = vld [vmem:[#allocation13 + $0x7d4] sm:$0xf0]  ;;  %v10163_v52 = vld [vmem:[#allocation13 + $0x2cc] sm:$0xf] }
 0x2d8   :  { %3044 = vmatpush.bf16.msra.mxu3 %v7591_v63  ;;  %3017 = vmatpush.bf16.msrb.mxu2 %v8307_v7  ;;  %v11791_v63 = vpop.f32.mrf.mxu0  ;;  %v7787_v7 = vor.u32 %v10157_v57, %v7786_v48  ;;  %v7836_v48 = vld [vmem:[#allocation13 + $0x2f8] sm:$0xf0] }
 0x2d9   :  { %3069 = vmatpush.bf16.msra.mxu1 %v8503_v3  ;;  %v8554_v3 = vld [vmem:[#allocation13 + $0x868] sm:$0xf] }
 0x2da   :  { %3058 = vmatpush.bf16.msra.mxu0 %v7975_v40  ;;  %v11794_v40 = vpop.f32.mrf.mxu3  ;;  %v8555_v12 = vor.u32 %v10349_v4, %v8554_v3  ;;  %v10217_v3 = vld [vmem:[#allocation13 + $0x474] sm:$0xf0]  ;;  %v8410_v4 = vld [vmem:[#allocation13 + $0x748] sm:$0xf] }
 0x2db   :  { %v8027_v11 = vor.u32 %v10217_v3, %v8026_v62  ;;  %v10127_v62 = vld [vmem:[#allocation13 + $0x1ac] sm:$0xf]  ;;  %v7692_v3 = vld [vmem:[#allocation13 + $0x1d8] sm:$0xf0] }
 0x2dc   :  { %3045 = vmatpush.bf16.msra.mxu3 %v7543_v19  ;;  %3018 = vmatpush.bf16.msrb.mxu2 %v8259_v23  ;;  %v10241_v19 = vld [vmem:[#allocation13 + $0x534] sm:$0xf0]  ;;  %v10270_v23 = vld [vmem:[#allocation13 + $0x624] sm:$0xf] }
 0x2dd   :  { %3070 = vmatpush.bf16.msra.mxu1 %v8455_v20  ;;  %v8506_v20 = vld [vmem:[#allocation13 + $0x808] sm:$0xf]  ;;  %v8123_v25 = vor.u32 %v10241_v19, %v8122_v18  ;;  %v8263_v39 = vor.u32 %v10270_v23, %v8260_v26  ;;  %v7788_v18 = vld [vmem:[#allocation13 + $0x298] sm:$0xf0] }
 0x2de   :  { %3059 = vmatpush.bf16.msra.mxu0 %v7927_v22  ;;  %v8311_v22 = vor.u32 %v10282_v8, %v8308_v59  ;;  %v8507_v31 = vor.u32 %v10337_v21, %v8506_v20  ;;  %v7839_v8 = vor.u32 %v10163_v52, %v7836_v48  ;;  %v7643_v59 = vor.u32 %v10121_v58, %v7642_v47  ;;  %v10109_v20 = vld [vmem:[#allocation13 + $0x114] sm:$0xf0]  ;;  %v7978_v21 = vld [vmem:[#allocation13 + $0x3e8] sm:$0xf] }
 0x2df   :  { %3019 = vmatmul.bf16.vlgmr.msrb.gmra.mxu2 %v11719_v16  ;;  %v8362_v23 = vld [vmem:[#allocation13 + $0x6e8] sm:$0xf]  ;;  %v10085_v58 = vld [vmem:[#allocation13 + $0x54] sm:$0xf0] }
 0x2e0   :  { %3088 = vmatpush.bf16.msra.mxu2 %v8647_v27  ;;  %3046 = vmatpush.bf16.msra.mxu3 %v7495_v37  ;;  %v7690_v27 = vld [vmem:[#allocation13 + $0x1a8] sm:$0xf] }
 0x2e1   :  { %3071 = vmatpush.bf16.msra.mxu1 %v8407_v43  ;;  %v8650_v37 = vld [vmem:[#allocation13 + $0x928] sm:$0xf] }
 0x2e2   :  { %3060 = vmatpush.bf16.msra.mxu0 %v7879_v42  ;;  %v11800_v42 = vpop.f32.mrf.mxu0  ;;  %v11802_v43 = vpop.f32.mrf.mxu3  ;;  %v8651_v57 = vor.u32 %v10373_v38, %v8650_v37  ;;  %v7930_v37 = vld [vmem:[#allocation13 + $0x388] sm:$0xf]  ;;  %v10193_v38 = vld [vmem:[#allocation13 + $0x3b4] sm:$0xf0] }
 0x2e3   :  { %3047 = vmatmul.bf16.vlgmr.msra.gmra.mxu3 %v11715_v14  ;;  %v7498_v48 = vld [vmem:[#allocation13 + $0x28] sm:$0xf] }
 0x2e4   :  { %3095 = vmatpush.bf16.msrb.mxu2 %v7835_v46  ;;  %3109 = vmatpush.bf16.msrb.mxu3 %v8219_v49  ;;  %v7691_v46 = vor.u32 %v10133_v28, %v7690_v27  ;;  %v8075_v49 = vor.u32 %v10229_v33, %v8074_v32  ;;  %v10139_v32 = vld [vmem:[#allocation13 + $0x20c] sm:$0xf]  ;;  %v7740_v33 = vld [vmem:[#allocation13 + $0x238] sm:$0xf0] }
 0x2e5   :  { %3061 = vmatmul.bf16.vlgmr.msra.gmra.mxu0 %v11717_v15  ;;  %3072 = vmatpush.bf16.msra.mxu1 %v8359_v5  ;;  %v10313_v5 = vld [vmem:[#allocation13 + $0x774] sm:$0xf0]  ;;  %v7743_v52 = vor.u32 %v10139_v32, %v7740_v33  ;;  %v10247_v32 = vld [vmem:[#allocation13 + $0x56c] sm:$0xf] }
 0x2e6   :  { %3123 = vmatpush.bf16.msrb.mxu0 %v8603_v56  ;;  %v8459_v56 = vor.u32 %v10325_v35, %v8458_v34  ;;  %v8411_v19 = vor.u32 %v10313_v5, %v8410_v4  ;;  %v10097_v35 = vld [vmem:[#allocation13 + $0xb4] sm:$0xf0] }
 0x2e8   :  { %3096 = vmatpush.bf16.msrb.mxu2 %v7787_v7  ;;  %3110 = vmatpush.bf16.msrb.mxu3 %v8171_v41  ;;  %v11804_v7 = vpop.f32.mrf.mxu2  ;;  %v11806_v41 = vpop.f32.mrf.mxu1 }
 0x2e9   :  { %3073 = vmatpush.bf16.msra.mxu1 %v8311_v22  ;;  %v10205_v22 = vld [vmem:[#allocation13 + $0x414] sm:$0xf0] }
 0x2ea   :  { %3124 = vmatpush.bf16.msrb.mxu0 %v8555_v12  ;;  %v7594_v12 = vld [vmem:[#allocation13 + $0xe8] sm:$0xf]  ;;  %v11811_v26 = vpop.f32.mrf.mxu3  ;;  %v7979_v28 = vor.u32 %v10205_v22, %v7978_v21  ;;  %v8604_v21 = vld [vmem:[#allocation13 + $0x8f8] sm:$0xf0]  ;;  %v7499_v22 = vor.u32 %v10085_v58, %v7498_v48  ;;  %v10103_v58 = vld [vmem:[#allocation13 + $0xec] sm:$0xf] }
 0x2eb   :  { %v7595_v27 = vor.u32 %v10109_v20, %v7594_v12  ;;  %v10277_v12 = vld [vmem:[#allocation13 + $0x654] sm:$0xf0]  ;;  %v10355_v20 = vld [vmem:[#allocation13 + $0x8cc] sm:$0xf] }
 0x2ec   :  { %3097 = vmatpush.bf16.msrb.mxu2 %v7739_v24  ;;  %3111 = vmatpush.bf16.msrb.mxu3 %v8123_v25  ;;  %v10301_v24 = vld [vmem:[#allocation13 + $0x714] sm:$0xf0]  ;;  %v7791_v25 = vor.u32 %v10151_v13, %v7788_v18  ;;  %v10259_v13 = vld [vmem:[#allocation13 + $0x5cc] sm:$0xf]  ;;  %v8220_v18 = vld [vmem:[#allocation13 + $0x5f8] sm:$0xf0]  ;;  %v8607_v33 = vor.u32 %v10355_v20, %v8604_v21 }
 0x2ed   :  { %3074 = vmatpush.bf16.msra.mxu1 %v8263_v39  ;;  %v8363_v34 = vor.u32 %v10301_v24, %v8362_v23  ;;  %v11813_v39 = vpop.f32.mrf.mxu0  ;;  %v7548_v20 = vld [vmem:[#allocation13 + $0xb8] sm:$0xf0] }
 0x2ee   :  { %3125 = vmatpush.bf16.msrb.mxu0 %v8507_v31  ;;  %v7546_v31 = vld [vmem:[#allocation13 + $0x88] sm:$0xf] }
 0x2ef   :  { %8665 = vmatmul.msk.bf16.vlgmr.msra.gmra.mxu2 %vm13233_vm3, %v11721_v17 }
 0x2f0   :  { %3098 = vmatpush.bf16.msrb.mxu2 %v7691_v46  ;;  %3112 = vmatpush.bf16.msrb.mxu3 %v8075_v49  ;;  %v8314_v46 = vld [vmem:[#allocation13 + $0x688] sm:$0xf]  ;;  %v10289_v49 = vld [vmem:[#allocation13 + $0x6b4] sm:$0xf0]  ;;  %v11815_v47 = vpop.f32.mrf.mxu2  ;;  %v11817_v4 = vpop.f32.mrf.mxu1 }
 0x2f1   :  { %3144 = vmatpush.bf16.msrb.mxu1 %v8651_v57  ;;  %v7931_v57 = vor.u32 %v10193_v38, %v7930_v37  ;;  %v8315_v5 = vor.u32 %v10289_v49, %v8314_v46  ;;  %v8652_v37 = vld [vmem:[#allocation13 + $0x958] sm:$0xf0]  ;;  %v10343_v38 = vld [vmem:[#allocation13 + $0x86c] sm:$0xf] }
 0x2f2   :  { %3126 = vmatpush.bf16.msrb.mxu0 %v8459_v56  ;;  %3075 = vmatmul.bf16.vlgmr.msra.gmra.mxu1 %v11719_v16  ;;  %v7547_v56 = vor.u32 %v10097_v35, %v7546_v31  ;;  %v11819_v24 = vpop.f32.mrf.mxu3  ;;  %v7644_v31 = vld [vmem:[#allocation13 + $0x178] sm:$0xf0]  ;;  %v10367_v35 = vld [vmem:[#allocation13 + $0x92c] sm:$0xf] }
 0x2f3   :  { %v8556_v46 = vld [vmem:[#allocation13 + $0x898] sm:$0xf0] }
 0x2f4   :  { %3099 = vmatpush.bf16.msrb.mxu2 %v7643_v59  ;;  %3113 = vmatpush.bf16.msrb.mxu3 %v8027_v11  ;;  %v10181_v59 = vld [vmem:[#allocation13 + $0x354] sm:$0xf0]  ;;  %v8266_v11 = vld [vmem:[#allocation13 + $0x628] sm:$0xf] }
 0x2f5   :  { %3151 = vmatpush.bf16.msra.mxu1 %v7839_v8  ;;  %v7882_v8 = vld [vmem:[#allocation13 + $0x328] sm:$0xf]  ;;  %v2768_v49 = vpop.f32.mrf.mxu0 }
 0x2f6   :  { %3127 = vmatpush.bf16.msrb.mxu0 %v8411_v19  ;;  %v7695_v19 = vor.u32 %v10127_v62, %v7692_v3  ;;  %v7883_v23 = vor.u32 %v10181_v59, %v7882_v8  ;;  %v7596_v62 = vld [vmem:[#allocation13 + $0x118] sm:$0xf0]  ;;  %v8655_v3 = vor.u32 %v10367_v35, %v8652_v37  ;;  %v10235_v8 = vld [vmem:[#allocation13 + $0x50c] sm:$0xf] }
 0x2f7   :  { %v8124_v59 = vld [vmem:[#allocation13 + $0x538] sm:$0xf0]  ;;  %v10079_v35 = vld [vmem:[#allocation13 + $0x2c] sm:$0xf] }
 0x2f8   :  { %3100 = vmatpush.bf16.msrb.mxu2 %v7595_v27  ;;  %3114 = vmatpush.bf16.msrb.mxu3 %v7979_v28  ;;  %v8223_v27 = vor.u32 %v10259_v13, %v8220_v18  ;;  %v10115_v28 = vld [vmem:[#allocation13 + $0x14c] sm:$0xf]  ;;  %v11821_v48 = vpop.f32.mrf.mxu2  ;;  %v7599_v13 = vor.u32 %v10103_v58, %v7596_v62  ;;  %v8127_v18 = vor.u32 %v10235_v8, %v8124_v59  ;;  %v7500_v37 = vld [vmem:[#allocation13 + $0x58] sm:$0xf0] }
 0x2f9   :  { %3152 = vmatpush.bf16.msra.mxu1 %v7791_v25  ;;  %v8267_v25 = vor.u32 %v10277_v12, %v8266_v11  ;;  %v10331_v11 = vld [vmem:[#allocation13 + $0x80c] sm:$0xf]  ;;  %v8508_v12 = vld [vmem:[#allocation13 + $0x838] sm:$0xf0]  ;;  %v7503_v8 = vor.u32 %v10079_v35, %v7500_v37 }
 0x2fa   :  { %3128 = vmatpush.bf16.msrb.mxu0 %v8363_v34  ;;  %v8172_v34 = vld [vmem:[#allocation13 + $0x598] sm:$0xf0]  ;;  %v8511_v21 = vor.u32 %v10331_v11, %v8508_v12  ;;  %v10199_v11 = vld [vmem:[#allocation13 + $0x3ec] sm:$0xf] }
 0x2fb   :  { %v7980_v12 = vld [vmem:[#allocation13 + $0x418] sm:$0xf0] }
 0x2fc   :  { %3101 = vmatpush.bf16.msrb.mxu2 %v7547_v56  ;;  %3115 = vmatpush.bf16.msrb.mxu3 %v7931_v57  ;;  %v2782_v56 = vpop.f32.mrf.mxu1  ;;  %v8175_v57 = vor.u32 %v10247_v32, %v8172_v34 }
 0x2fd   :  { %3153 = vmatpush.bf16.msra.mxu1 %v7743_v52  ;;  %v7647_v52 = vor.u32 %v10115_v28, %v7644_v31  ;;  %v8460_v28 = vld [vmem:[#allocation13 + $0x7d8] sm:$0xf0]  ;;  %v2783_v31 = vadd.f32 %v2782_v56, %v2768_v49  ;;  %v2770_v58 = vpop.f32.mrf.mxu0 }
 0x2fe   :  { %3129 = vmatpush.bf16.msrb.mxu0 %v8315_v5  ;;  %v8559_v5 = vor.u32 %v10343_v38, %v8556_v46 }
 0x300   :  { %3102 = vmatpush.bf16.msrb.mxu2 %v7499_v22  ;;  %3116 = vmatpush.bf16.msrb.mxu3 %v7883_v23  ;;  %v10223_v22 = vld [vmem:[#allocation13 + $0x4ac] sm:$0xf]  ;;  %v8076_v23 = vld [vmem:[#allocation13 + $0x4d8] sm:$0xf0] }
 0x301   :  { %3154 = vmatpush.bf16.msra.mxu1 %v7695_v19  ;;  %v10091_v19 = vld [vmem:[#allocation13 + $0x8c] sm:$0xf]  ;;  %v8079_v34 = vor.u32 %v10223_v22, %v8076_v23  ;;  %v7983_v22 = vor.u32 %v10199_v11, %v7980_v12 }
 0x302   :  { %3130 = vmatpush.bf16.msrb.mxu0 %v8267_v25  ;;  %8666 = vmatmul.msk.bf16.vlgmr.msrb.gmra.mxu1 %vm13233_vm3, %v11721_v17  ;;  %v2812_v25 = vpop.f32.mrf.mxu3  ;;  %v7551_v32 = vor.u32 %v10091_v19, %v7548_v20 }
 0x303   :  { %3103 = vmatmul.bf16.vlgmr.msrb.gmra.mxu2 %v11715_v14  ;;  %3117 = vmatmul.bf16.vlgmr.msrb.gmra.mxu3 %v11717_v15 }
 0x304   :  { %3165 = vmatpush.bf16.msra.mxu2 %v8223_v27  ;;  %3179 = vmatpush.bf16.msra.mxu3 %v8607_v33  ;;  %v10319_v27 = vld [vmem:[#allocation13 + $0x7ac] sm:$0xf]  ;;  %v2796_v33 = vpop.f32.mrf.mxu2  ;;  %v2784_v62 = vpop.f32.mrf.mxu1 }
 0x305   :  { %3131 = vmatmul.bf16.vlgmr.msrb.gmra.mxu0 %v11719_v16  ;;  %3155 = vmatpush.bf16.msra.mxu1 %v7647_v52  ;;  %v2797_v38 = vadd.f32 %v2796_v33, %v2783_v31  ;;  %v8463_v46 = vor.u32 %v10319_v27, %v8460_v28  ;;  %v10211_v52 = vld [vmem:[#allocation13 + $0x44c] sm:$0xf]  ;;  %v2785_v19 = vadd.f32 %v2784_v62, %v2770_v58  ;;  %v7932_v28 = vld [vmem:[#allocation13 + $0x3b8] sm:$0xf0]  ;;  %v2838_v31 = vpop.f32.mrf.mxu0 }
 0x306   :  { %3200 = vmatpush.bf16.msra.mxu0 %v8655_v3  ;;  %v10307_v3 = vld [vmem:[#allocation13 + $0x74c] sm:$0xf] }
 0x307   :  { %v2811_v49 = vadd.f32 %v11819_v24, %v2797_v38  ;;  %v10187_v24 = vld [vmem:[#allocation13 + $0x38c] sm:$0xf] }
 0x308   :  { %3166 = vmatpush.bf16.msra.mxu2 %v8175_v57  ;;  %3180 = vmatpush.bf16.msra.mxu3 %v8559_v5  ;;  %v8028_v57 = vld [vmem:[#allocation13 + $0x478] sm:$0xf0]  ;;  %v10283_v33 = vld [vmem:[#allocation13 + $0x68c] sm:$0xf]  ;;  %v7935_v37 = vor.u32 %v10187_v24, %v7932_v28 }
 0x309   :  { %3156 = vmatpush.bf16.msra.mxu1 %v7599_v13  ;;  %v8412_v5 = vld [vmem:[#allocation13 + $0x778] sm:$0xf0]  ;;  %v8031_v56 = vor.u32 %v10211_v52, %v8028_v57  ;;  %3333 = vrot.lane.b32.xlu2 %v2811_v49, %s11274_s7  ;;  %v10295_v13 = vld [vmem:[#allocation13 + $0x6ec] sm:$0xf] }
 0x30a   :  { %v8415_v59 = vor.u32 %v10307_v3, %v8412_v5  ;;  %v2824_v20 = vpop.f32.mrf.mxu3  ;;  %v7884_v52 = vld [vmem:[#allocation13 + $0x358] sm:$0xf0]  ;;  %v10271_v57 = vld [vmem:[#allocation13 + $0x62c] sm:$0xf] }
 0x30b   :  { %v2839_v58 = vadd.f32 %v2838_v31, %v2824_v20 }
 0x30c   :  { %3167 = vmatpush.bf16.msra.mxu2 %v8127_v18  ;;  %3181 = vmatpush.bf16.msra.mxu3 %v8511_v21  ;;  %v8364_v18 = vld [vmem:[#allocation13 + $0x718] sm:$0xf0]  ;;  %v2798_v21 = vpop.f32.mrf.mxu2 }
 0x30d   :  { %3157 = vmatpush.bf16.msra.mxu1 %v7551_v32  ;;  %v2799_v23 = vadd.f32 %v2798_v21, %v2785_v19  ;;  %v8367_v27 = vor.u32 %v10295_v13, %v8364_v18  ;;  %v2852_v32 = vpop.f32.mrf.mxu1  ;;  %v2615_v19 = vadd.f32 %v11767_v36, %v11773_v53 }
 0x30e   :  { %v2853_v5 = vadd.f32 %v2852_v32, %v2839_v58  ;;  %v2673_v32 = vadd.f32 %v11794_v40, %v11804_v7 }
 0x30f   :  { %v2813_v35 = vadd.f32 %v2812_v25, %v2799_v23 }
 0x310   :  { %3168 = vmatpush.bf16.msra.mxu2 %v8079_v34  ;;  %3182 = vmatpush.bf16.msra.mxu3 %v8463_v46  ;;  %v8316_v34 = vld [vmem:[#allocation13 + $0x6b8] sm:$0xf0]  ;;  %v10175_v46 = vld [vmem:[#allocation13 + $0x32c] sm:$0xf] }
 0x311   :  { %3158 = vmatpush.bf16.msra.mxu1 %v7503_v8  ;;  %v8319_v38 = vor.u32 %v10283_v33, %v8316_v34  ;;  %3335 = vrot.lane.b32.xlu2 %v2813_v35, %s11274_s7  ;;  %v7887_v3 = vor.u32 %v10175_v46, %v7884_v52  ;;  %v2727_v33 = vadd.f32 %v11815_v47, %v11806_v41 }
 0x312   :  { %8668 = vmatpush.xpose.msk.msrb.mxu0 %vm13235_vm11, %v2813_v35  ;;  %v2826_v25 = vpop.f32.mrf.mxu3 }
 0x313   :  { %v2741_v40 = vadd.f32 %v11802_v43, %v2727_v33 }
 0x314   :  { %3169 = vmatpush.bf16.msra.mxu2 %v8031_v56  ;;  %3183 = vmatpush.bf16.msra.mxu3 %v8415_v59  ;;  %v2866_v62 = vpop.f32.mrf.mxu2  ;;  %v2840_v56 = vpop.f32.mrf.mxu0 }
 0x315   :  { %3159 = vmatmul.bf16.vlgmr.msra.gmra.mxu1 %v11715_v14  ;;  %8667 = vmatmul.msk.bf16.vlgmr.msra.gmra.mxu0 %vm13233_vm3, %v11721_v17  ;;  %v8268_v14 = vld [vmem:[#allocation13 + $0x658] sm:$0xf0]  ;;  %v2867_v8 = vadd.f32 %v2866_v62, %v2853_v5  ;;  %v2854_v59 = vpop.f32.mrf.mxu1  ;;  %v2841_v11 = vadd.f32 %v2840_v56, %v2826_v25 }
 0x316   :  { %v8271_v17 = vor.u32 %v10271_v57, %v8268_v14  ;;  %8669 = vmatpush.xpose.msk.msrb.mxu0 %vm13235_vm11, %v2811_v49  ;;  %v2629_v49 = vadd.f32 %v11771_v50, %v2615_v19 }
 0x317   :  { %v2855_v12 = vadd.f32 %v2854_v59, %v2841_v11 }
 0x318   :  { %3170 = vmatpush.bf16.msra.mxu2 %v7983_v22  ;;  %3184 = vmatpush.bf16.msra.mxu3 %v8367_v27  ;;  %v2643_v36 = vadd.f32 %v11775_v54, %v2629_v49  ;;  %v2687_v54 = vadd.f32 %v11791_v63, %v2673_v32  ;;  %v2755_v63 = vadd.f32 %v11800_v42, %v2741_v40 }
 0x319   :  { %3580 = vrot.lane.b32.xlu2 %v2867_v8, %s11274_s7  ;;  %v2729_v42 = vadd.f32 %v11821_v48, %v11817_v4 }
 0x31a   :  { %v2701_v34 = vadd.f32 %v11796_v6, %v2687_v54 }
 0x31b   :  { %v2743_v58 = vadd.f32 %v11811_v26, %v2729_v42 }
 0x31c   :  { %3171 = vmatpush.bf16.msra.mxu2 %v7935_v37  ;;  %3185 = vmatpush.bf16.msra.mxu3 %v8319_v38  ;;  %v2868_v13 = vpop.f32.mrf.mxu2 }
 0x31d   :  { %v2869_v18 = vadd.f32 %v2868_v13, %v2855_v12  ;;  %v2922_v22 = vpop.f32.mrf.mxu1  ;;  %v3332_v54 = vpop.permute.xlu1 %3331 }
 0x31e   :  { %v2908_v20 = vpop.f32.mrf.mxu0 }
 0x31f   :  { %8682 = vmatpush.xpose.msk.msra.mxu0 %vm13235_vm11, %v2869_v18 }
 0x320   :  { %3172 = vmatpush.bf16.msra.mxu2 %v7887_v3  ;;  %3186 = vmatpush.bf16.msra.mxu3 %v8271_v17  ;;  %v2757_v3 = vadd.f32 %v11813_v39, %v2743_v58 }
 0x321   :  { %3582 = vrot.lane.b32.xlu2 %v2869_v18, %s11274_s7 }
 0x322   :  { %v2894_v21 = vpop.f32.mrf.mxu3 }
 0x323   :  { %3173 = vmatmul.bf16.vlgmr.msra.gmra.mxu2 %v11717_v15  ;;  %3187 = vmatmul.bf16.vlgmr.msra.gmra.mxu3 %v11719_v16 }
 0x324   :  { %8683 = vmatpush.xpose.msk.msra.mxu0 %vm13235_vm11, %v2867_v8  ;;  %v2880_v15 = vpop.f32.mrf.mxu2 }
 0x325   :  { %8670 = vmatmul.msk.f32.vlgmr.msrb.gmra.mxu0 %vm13235_vm11, %v11758_v55  ;;  %v2895_v16 = vadd.f32 %v2894_v21, %v2880_v15  ;;  %v2924_v31 = vpop.f32.mrf.mxu1 }
 0x326   :  { %v2910_v24 = vpop.f32.mrf.mxu0 }
 0x327   :  { %v2909_v53 = vadd.f32 %v2908_v20, %v2895_v16 }
 0x329   :  { %3576 = vrot.lane.b32.xlu2 %v2643_v36, %s11274_s7  ;;  %v2923_v55 = vadd.f32 %v2922_v22, %v2909_v53  ;;  %v3330_v53 = vpop.permute.xlu0 %3329 }
 0x32a   :  { %v2896_v50 = vpop.f32.mrf.mxu3 }
 0x32b   :  { %3827 = vrot.lane.b32.xlu1 %v2923_v55, %s11274_s7 }
 0x32c   :  { %v2882_v23 = vpop.f32.mrf.mxu2 }
 0x32d   :  { %8671 = vmatmul.msk.f32.gmra.mxu0 %vm13235_vm11, %v11765_v29  ;;  %v2897_v27 = vadd.f32 %v2896_v50, %v2882_v23 }
 0x32e   :  { %v2978_v38 = vpop.f32.mrf.mxu0 }
 0x32f   :  { %v2911_v28 = vadd.f32 %v2910_v24, %v2897_v27  ;;  %v2936_v7 = vpop.f32.mrf.mxu1 }
 0x331   :  { %v2925_v29 = vadd.f32 %v2924_v31, %v2911_v28 }
 0x333   :  { %8696 = vmatpush.xpose.msk.msrb.mxu0 %vm13235_vm11, %v2925_v29  ;;  %3829 = vrot.lane.b32.xlu2 %v2925_v29, %s11274_s7 }
 0x335   :  { %8684 = vmatmul.msk.f32.vlgmr.msra.gmra.mxu0 %vm13235_vm11, %v2643_v36 }
 0x336   :  { %v2980_v57 = vpop.f32.mrf.mxu0 }
 0x337   :  { %8697 = vmatpush.xpose.msk.msrb.mxu0 %vm13235_vm11, %v2923_v55  ;;  %v2938_v41 = vpop.f32.mrf.mxu1 }
 0x33b   :  { %3825 = vrot.lane.b32.xlu2 %v2701_v34, %s11274_s7 }
 0x33d   :  { %8685 = vmatmul.msk.f32.gmra.mxu0 %vm13235_vm11, %v11780_v2 }
 0x342   :  { %v2950_v35 = vpop.f32.mrf.mxu2  ;;  %v2964_v2 = vpop.f32.mrf.mxu3 }
 0x343   :  { %v2951_v37 = vadd.f32 %v2950_v35, %v2936_v7  ;;  %4070 = vrot.lane.b32.xlu2 %v2755_v63, %s11274_s7  ;;  %v2992_v5 = vpop.f32.mrf.mxu0 }
 0x345   :  { %8698 = vmatmul.msk.f32.vlgmr.msrb.gmra.mxu0 %vm13235_vm11, %v11784_v51  ;;  %v2965_v46 = vadd.f32 %v2964_v2, %v2951_v37 }
 0x347   :  { %v2979_v6 = vadd.f32 %v2978_v38, %v2965_v46 }
 0x349   :  { %4074 = vrot.lane.b32.xlu0 %v2979_v6, %s11274_s7 }
 0x34a   :  { %v2952_v43 = vpop.f32.mrf.mxu2  ;;  %v2966_v52 = vpop.f32.mrf.mxu3 }
 0x34b   :  { %v2953_v47 = vadd.f32 %v2952_v43, %v2938_v41  ;;  %v2994_v48 = vpop.f32.mrf.mxu0  ;;  %v3579_v43 = vpop.permute.xlu0 %3578 }
 0x34d   :  { %8699 = vmatmul.msk.f32.gmra.mxu0 %vm13235_vm11, %v2701_v34  ;;  %v2967_v51 = vadd.f32 %v2966_v52, %v2953_v47 }
 0x34f   :  { %v2981_v14 = vadd.f32 %v2980_v57, %v2967_v51  ;;  %v3006_v17 = vpop.f32.mrf.mxu1 }
 0x350   :  { %v3007_v59 = vadd.f32 %v3006_v17, %v2992_v5 }
 0x351   :  { %4076 = vrot.lane.b32.xlu1 %v2981_v14, %s11274_s7  ;;  %8710 = vmatpush.xpose.msk.msra.mxu0 %vm13235_vm11, %v2981_v14 }
 0x352   :  { %v3034_v62 = vpop.f32.mrf.mxu3 }
 0x355   :  { %8711 = vmatpush.xpose.msk.msra.mxu0 %vm13235_vm11, %v2979_v6 }
 0x357   :  { %v3008_v8 = vpop.f32.mrf.mxu1 }
 0x358   :  { %8712 = vmatmul.msk.f32.vlgmr.msra.gmra.mxu0 %vm13235_vm11, %v2755_v63  ;;  %v3009_v26 = vadd.f32 %v3008_v8, %v2994_v48  ;;  %v560_v63 = vlaneseq }
 0x359   :  { %4072 = vrot.lane.b32.xlu1 %v2757_v3, %s11274_s7 }
 0x35a   :  { %v3036_v25 = vpop.f32.mrf.mxu3  ;;  %v11898_v46 = vshrl.u32 %v560_v63, 7  ;;  %v11900_v6 = vand.u32 127, %v560_v63 }
 0x35c   :  { %vm567_vm12 = vcmp.ge.s32.totalorder %v11898_v46, 2  ;;  %vm569_vm13 = vcmp.lt.s32.totalorder %v11898_v46, 6  ;;  %vm576_vm14 = vcmp.ge.s32.totalorder %v11900_v6, 2  ;;  %vm577_vm15 = vcmp.lt.s32.totalorder %v11900_v6, 6 }
 0x35d   :  { %vm565_vm4 = vcmp.eq.s32.totalorder %v11898_v46, 0  ;;  %vm571_vm5 = vmand %vm567_vm12, %vm569_vm13  ;;  %vm593_vm6 = vcmp.ge.s32.totalorder %v11900_v6, 6  ;;  %vm594_vm7 = vcmp.lt.s32.totalorder %v11900_v6, 10  ;;  %vm575_vm8 = vcmp.eq.s32.totalorder %v11900_v6, 0 }
 0x35e   :  { %vm578_vm9 = vmand %vm576_vm14, %vm577_vm15  ;;  %vm582_vm0 = vcmp.eq.s32.totalorder %v11898_v46, 1  ;;  %vm584_vm2 = vcmp.ge.s32.totalorder %v11898_v46, 6  ;;  %vm592_vm12 = vcmp.eq.s32.totalorder %v11900_v6, 1 }
 0x35f   :  { %vm11914_vm10 = vmor %vm565_vm4, %vm571_vm5 }
 0x360   :  { %8713 = vmatmul.msk.f32.gmra.mxu0 %vm13235_vm11, %v2757_v3  ;;  %vm595_vm13 = vmand %vm593_vm6, %vm594_vm7  ;;  %v562_v3 = vadd.s32 8, %v11898_v46  ;;  %vm3251_vm6 = vcmask 74752  }
 0x361   :  { %vm579_vm3 = vmor %vm575_vm8, %vm578_vm9 }
 0x362   :  { %v3020_v4 = vpop.f32.mrf.mxu2  ;;  %v3062_v39 = vpop.f32.mrf.mxu0  ;;  %vm580_vm14 = vmand %vm11914_vm10, %vm579_vm3 }
 0x363   :  { %v3334_v56 = vpop.permute.xlu2 %3333  ;;  %v3021_v13 = vadd.f32 %v3020_v4, %v3007_v59 }
 0x365   :  { %v3035_v15 = vadd.f32 %v3034_v62, %v3021_v13  ;;  %v3824_v13 = vpop.permute.xlu0 %3823 }
 0x366   :  { %v3048_v11 = vpop.f32.mrf.mxu3 }
 0x367   :  { %v3063_v21 = vadd.f32 %v3062_v39, %v3048_v11 }
 0x36a   :  { %v3022_v12 = vpop.f32.mrf.mxu2  ;;  %v3064_v27 = vpop.f32.mrf.mxu0 }
 0x36b   :  { %v3023_v18 = vadd.f32 %v3022_v12, %v3009_v26  ;;  %v3336_v20 = vpop.permute.xlu2 %3335 }
 0x36c   :  { %8675 = vmatpush.xpose.msk.msrb.mxu2 %vm13235_vm11, %v3336_v20 }
 0x36d   :  { %v3037_v49 = vadd.f32 %v3036_v25, %v3023_v18  ;;  %v11284_v25 = vmov -1e+30  }
 0x36e   :  { %v3050_v55 = vpop.f32.mrf.mxu3 }
 0x36f   :  { %v3076_v19 = vpop.f32.mrf.mxu1  ;;  %8672 = vmatpush.msk.msrb.mxu1 %vm13234_vm1, %v3037_v49  ;;  %3423 = vrot.lane.b32.xlu1 %v3037_v49, %s11274_s7  ;;  %v3065_v28 = vadd.f32 %v3064_v27, %v3050_v55 }
 0x370   :  { %v3077_v16 = vadd.f32 %v3076_v19, %v3063_v21  ;;  %8676 = vmatpush.xpose.msk.msrb.mxu2 %vm13235_vm11, %v3334_v56 }
 0x371   :  { %3321 = vmatpush.msrb.mxu1 %v3035_v15 }
 0x372   :  { %v3090_v22 = vpop.f32.mrf.mxu2 }
 0x373   :  { %v3091_v36 = vadd.f32 %v3090_v22, %v3077_v16  ;;  %8677 = vmatmul.msk.f32.vlgmr.msrb.gmra.mxu2 %vm13235_vm11, %v3330_v53  ;;  %v3581_v23 = vpop.permute.xlu2 %3580 }
 0x375   :  { %v10734_v50 = vpack.i.bf16 %v3091_v36, %v3035_v15 }
 0x377   :  { %v3078_v24 = vpop.f32.mrf.mxu1  ;;  %10735 = vrot.lane.b32.xlu2 %v10734_v50, %s11274_s7 }
 0x378   :  { %v3079_v31 = vadd.f32 %v3078_v24, %v3065_v28 }
 0x37a   :  { %v3092_v32 = vpop.f32.mrf.mxu2 }
 0x37b   :  { %v3093_v29 = vadd.f32 %v3092_v32, %v3079_v31  ;;  %v3583_v33 = vpop.permute.xlu2 %3582  ;;  %8678 = vmatmul.msk.f32.gmra.mxu2 %vm13235_vm11, %v3332_v54 }
 0x37c   :  { %8689 = vmatpush.xpose.msk.msra.mxu2 %vm13235_vm11, %v3583_v33 }
 0x37d   :  { %8686 = vmatpush.msk.msra.mxu1 %vm13234_vm1, %v3093_v29  ;;  %3670 = vrot.lane.b32.xlu0 %v3093_v29, %s11274_s7  ;;  %vm590_vm1 = vmor %vm582_vm0, %vm584_vm2  ;;  %vm587_vm0 = vcmp.lt.s32.totalorder %v562_v3, 10  ;;  %vm13245_vm2 = vcmask 523264  }
 0x37e   :  { %vm13246_vm5 = vmmov %vm13245_vm2 }
 0x37f   :  { %3568 = vmatpush.msra.mxu1 %v3091_v36  ;;  %v11902_v41 = vpop.f32.mrf.mxu1  ;;  %vm13247_vm7 = vmmov %vm13245_vm2 }
 0x380   :  { %8690 = vmatpush.xpose.msk.msra.mxu2 %vm13235_vm11, %v3581_v23  ;;  %vm13249_vm8 = vmmov %vm13245_vm2 }
 0x381   :  { %vm13250_vm9 = vmmov %vm13245_vm2 }
 0x382   :  { %v3132_v34 = vpop.f32.mrf.mxu0  ;;  %vm13251_vm10 = vmmov %vm13245_vm2 }
 0x383   :  { %v3577_v37 = vpop.permute.xlu2 %3576 }
 0x384   :  { %8691 = vmatmul.msk.f32.vlgmr.msra.gmra.mxu2 %vm13235_vm11, %v3577_v37 }
 0x386   :  { %v3104_v40 = vpop.f32.mrf.mxu2  ;;  %v3118_v7 = vpop.f32.mrf.mxu3 }
 0x387   :  { %v3119_v35 = vadd.f32 %v3118_v7, %v3104_v40  ;;  %v11921_v57 = vpop.f32.mrf.mxu1 }
 0x389   :  { %v11893_v2 = vadd.f32 %v3132_v34, %v3119_v35 }
 0x38a   :  { %v11895_v38 = vpop.f32.mrf.mxu0 }
 0x38c   :  { %8692 = vmatmul.msk.f32.gmra.mxu2 %vm13235_vm11, %v3579_v43 }
 0x38d   :  { %v3830_v52 = vpop.permute.xlu2 %3829 }
 0x38e   :  { %8703 = vmatpush.xpose.msk.msrb.mxu2 %vm13235_vm11, %v3830_v52  ;;  %vm11925_vm11 = vmor %vm592_vm12, %vm595_vm13  ;;  %v11929_v58 = vpop.f32.mrf.mxu2  ;;  %v11935_v62 = vpop.f32.mrf.mxu3  ;;  %vm13252_vm12 = vcmask 1041408  }
 0x38f   :  { %vm597_vm15 = vmand %vm590_vm1, %vm11925_vm11  ;;  %vm3247_vm1 = vcmask 80896  }
 0x390   :  { %vm599_vm4 = vmor %vm580_vm14, %vm597_vm15 }
 0x391   :  { %v11938_v4 = vsel %vm599_vm4, 0.0, %v11284_v25  ;;  %vm598_vm3 = vmand %vm587_vm0, %vm11925_vm11 }
 0x392   :  { %v3202_v47 = vpop.f32.mrf.mxu0  ;;  %v3160_v48 = vpop.f32.mrf.mxu1  ;;  %v11951_v20 = vsel %vm598_vm3, 0.0, %v11284_v25  ;;  %vm13248_vm11 = vmmov %vm13245_vm2 }
 0x393   :  { %vm13253_vm13 = vmmov %vm13252_vm12 }
 0x395   :  { %v3826_v21 = vpop.permute.xlu2 %3825 }
 0x39a   :  { %v11923_v42 = vpop.f32.mrf.mxu0 }
 0x39d   :  { %v3828_v59 = vpop.permute.xlu1 %3827  ;;  %v4071_v63 = vpop.permute.xlu2 %4070 }
 0x39e   :  { %8704 = vmatpush.xpose.msk.msrb.mxu2 %vm13245_vm2, %v3828_v59  ;;  %vm13254_vm2 = vmmov %vm13252_vm12 }
 0x3a1   :  { %8705 = vmatmul.msk.f32.vlgmr.msrb.gmra.mxu2 %vm13246_vm5, %v3824_v13 }
 0x3a2   :  { %v3237_v5 = vpop.f32.mrf.mxu0 }
 0x3a3   :  { %v3243_v17 = vmul.f32 0.05, %v3237_v5 }
 0x3a5   :  { %v11942_v11 = vadd.f32 %v3243_v17, %v11938_v4 }
 0x3a6   :  { %v3174_v8 = vpop.f32.mrf.mxu2  ;;  %v3188_v26 = vpop.f32.mrf.mxu3 }
 0x3a7   :  { %v3175_v56 = vadd.f32 %v3174_v8, %v3160_v48  ;;  %v3248_v19 = vsel %vm3247_vm1, %v11942_v11, -inf }
 0x3a8   :  { %3249 = vmax.xlane.f32.xlu0 %v3248_v19 }
 0x3a9   :  { %v3189_v12 = vadd.f32 %v3188_v26, %v3175_v56  ;;  %8706 = vmatmul.msk.f32.gmra.mxu2 %vm13247_vm7, %v3826_v21 }
 0x3aa   :  { %v3240_v39 = vpop.f32.mrf.mxu0 }
 0x3ab   :  { %v11947_v18 = vadd.f32 %v3202_v47, %v3189_v12  ;;  %v3244_v49 = vmul.f32 0.05, %v3240_v39 }
 0x3ad   :  { %v11954_v15 = vadd.f32 %v3244_v49, %v11951_v20 }
 0x3ae   :  { %v11989_v25 = vpop.f32.mrf.mxu2 }
 0x3af   :  { %v3252_v22 = vsel %vm3251_vm6, %v11954_v15, -inf }
 0x3b0   :  { %3253 = vmax.xlane.f32.xlu0 %v3252_v22 }
 0x3b2   :  { %v3486_v16 = vpop.f32.mrf.mxu0 }
 0x3b3   :  { %v3492_v36 = vmul.f32 0.05, %v3486_v16 }
 0x3b5   :  { %v11960_v53 = vadd.f32 %v3492_v36, %v11938_v4 }
 0x3b7   :  { %v3496_v23 = vsel %vm3247_vm1, %v11960_v53, -inf }
 0x3b8   :  { %3497 = vmax.xlane.f32.xlu0 %v3496_v23 }
 0x3ba   :  { %v3489_v55 = vpop.f32.mrf.mxu0 }
 0x3bb   :  { %v3493_v50 = vmul.f32 0.05, %v3489_v55  ;;  %v4075_v40 = vpop.permute.xlu0 %4074 }
 0x3bd   :  { %v11965_v27 = vadd.f32 %v3493_v50, %v11951_v20 }
 0x3bf   :  { %v3499_v28 = vsel %vm3251_vm6, %v11965_v27, -inf }
 0x3c0   :  { %3500 = vmax.xlane.f32.xlu0 %v3499_v28 }
 0x3c2   :  { %v3733_v24 = vpop.f32.mrf.mxu0 }
 0x3c3   :  { %v3739_v31 = vmul.f32 0.05, %v3733_v24  ;;  %v4077_v29 = vpop.permute.xlu1 %4076 }
 0x3c4   :  { %8717 = vmatpush.xpose.msk.msra.mxu2 %vm13248_vm11, %v4077_v29 }
 0x3c5   :  { %v11970_v32 = vadd.f32 %v3739_v31, %v11938_v4 }
 0x3c7   :  { %v3743_v33 = vsel %vm3247_vm1, %v11970_v32, -inf }
 0x3c8   :  { %3744 = vmax.xlane.f32.xlu0 %v3743_v33  ;;  %8718 = vmatpush.xpose.msk.msra.mxu2 %vm13249_vm8, %v4075_v40  ;;  %v12010_v40 = vadd.f32 %v11902_v41, %v11893_v2 }
 0x3ca   :  { %v3736_v54 = vpop.f32.mrf.mxu0 }
 0x3cb   :  { %v3740_v34 = vmul.f32 0.05, %v3736_v54  ;;  %8719 = vmatmul.msk.f32.vlgmr.msra.gmra.mxu2 %vm13250_vm9, %v4071_v63  ;;  %v4073_v37 = vpop.permute.xlu1 %4072 }
 0x3cd   :  { %v11976_v7 = vadd.f32 %v3740_v34, %v11951_v20 }
 0x3cf   :  { %v3746_v35 = vsel %vm3251_vm6, %v11976_v7, -inf }
 0x3d0   :  { %3747 = vmax.xlane.f32.xlu2 %v3746_v35 }
 0x3d1   :  { %v10736_v14 = vpop.permute.xlu2 %10735 }
 0x3d2   :  { %v10737_v5 = vunpack.i.l.bf16 %v10736_v14  ;;  %v10738_v48 = vunpack.i.h.bf16 %v10736_v14 }
 0x3d3   :  { %8720 = vmatmul.msk.f32.gmra.mxu2 %vm13251_vm10, %v4073_v37 }
 0x3d5   :  { %v3980_v43 = vpop.f32.mrf.mxu0 }
 0x3d6   :  { %v3986_v47 = vmul.f32 0.05, %v3980_v43 }
 0x3d8   :  { %v11984_v52 = vadd.f32 %v3986_v47, %v11938_v4 }
 0x3da   :  { %v3990_v51 = vsel %vm3247_vm1, %v11984_v52, -inf }
 0x3db   :  { %3991 = vmax.xlane.f32.xlu1 %v3990_v51 }
 0x3e1   :  { %v3424_v3 = vpop.permute.xlu1 %3423 }
 0x3e2   :  { %8679 = vmatpush.msk.msrb.mxu3 %vm13252_vm12, %v3424_v3  ;;  %vm13257_vm12 = vmmov %vm13254_vm2 }
 0x3e4   :  { %3449 = vmatpush.msrb.mxu3 %v10737_v5 }
 0x3ef   :  { %v3671_v17 = vpop.permute.xlu0 %3670 }
 0x3f0   :  { %8693 = vmatpush.msk.msra.mxu3 %vm13253_vm13, %v3671_v17 }
 0x3f2   :  { %3696 = vmatpush.msra.mxu3 %v10738_v48 }
 0x3f6   :  { %v3362_v8 = vpop.f32.mrf.mxu2 }
 0x3f7   :  { %v3368_v56 = vmul.f32 0.05, %v3362_v8 }
 0x3f9   :  { %v3370_v59 = vadd.f32 %v3368_v56, %v11938_v4 }
 0x3fb   :  { %v3372_v26 = vsel %vm3247_vm1, %v3370_v59, -inf }
 0x3fc   :  { %3373 = vmax.xlane.f32.xlu0 %v3372_v26 }
 0x3fe   :  { %v3365_v12 = vpop.f32.mrf.mxu2 }
 0x3ff   :  { %v3369_v13 = vmul.f32 0.05, %v3365_v12 }
 0x401   :  { %v3371_v39 = vadd.f32 %v3369_v13, %v11951_v20 }
 0x403   :  { %v3375_v19 = vsel %vm3251_vm6, %v3371_v39, -inf }
 0x404   :  { %3376 = vmax.xlane.f32.xlu2 %v3375_v19 }
 0x407   :  { %v3609_v49 = vpop.f32.mrf.mxu2 }
 0x408   :  { %v3615_v21 = vmul.f32 0.05, %v3609_v49 }
 0x40a   :  { %v3617_v16 = vadd.f32 %v3615_v21, %v11938_v4 }
 0x40c   :  { %v3619_v22 = vsel %vm3247_vm1, %v3617_v16, -inf }
 0x40d   :  { %3620 = vmax.xlane.f32.xlu1 %v3619_v22 }
 0x40f   :  { %v3612_v36 = vpop.f32.mrf.mxu2 }
 0x410   :  { %v3616_v55 = vmul.f32 0.05, %v3612_v36 }
 0x412   :  { %v11999_v23 = vadd.f32 %v3616_v55, %v11951_v20 }
 0x414   :  { %v3622_v50 = vsel %vm3251_vm6, %v11999_v23, -inf }
 0x415   :  { %3623 = vmax.xlane.f32.xlu0 %v3622_v50 }
 0x41b   :  { %v3250_v24 = vpop.xlane.xlu0 %3249 }
 0x41c   :  { %v3255_v28 = vsub.f32 %v11942_v11, %v3250_v24 }
 0x41e   :  { %v3257_v31 = vmul.f32 1.442695, %v3255_v28 }
 0x420   :  { %10765 = vpow2.f32 %v3257_v31  ;;  %v3983_v31 = vpop.f32.mrf.mxu0 }
 0x423   :  { %v3254_v2 = vpop.xlane.xlu0 %3253 }
 0x424   :  { %v3856_v33 = vpop.f32.mrf.mxu2 }
 0x425   :  { %v3862_v34 = vmul.f32 0.05, %v3856_v33 }
 0x426   :  { %v12004_v29 = vpop.eup %10765 }
 0x427   :  { %v3261_v54 = vsel %vm3247_vm1, %v12004_v29, 0.0  ;;  %v12015_v35 = vadd.f32 %v3862_v34, %v11938_v4 }
 0x428   :  { %3262 = vadd.xlane.f32.xlu2 %v3261_v54 }
 0x429   :  { %3915 = vrot.lane.b32.xlu0 %v12010_v40, %s11274_s7  ;;  %v3866_v11 = vsel %vm3247_vm1, %v12015_v35, -inf }
 0x42b   :  { %v12027_v3 = vpop.xlane.xlu0 %3497 }
 0x42c   :  { %v3859_v63 = vpop.f32.mrf.mxu2 }
 0x42d   :  { %v3863_v37 = vmul.f32 0.05, %v3859_v63 }
 0x42f   :  { %v12020_v43 = vadd.f32 %v3863_v37, %v11951_v20 }
 0x430   :  { %3867 = vmax.xlane.f32.xlu2 %v3866_v11  ;;  %v3987_v11 = vmul.f32 0.05, %v3983_v31 }
 0x431   :  { %v3869_v47 = vsel %vm3251_vm6, %v12020_v43, -inf }
 0x432   :  { %3870 = vmax.xlane.f32.xlu1 %v3869_v47  ;;  %v12054_v47 = vadd.f32 %v3987_v11, %v11951_v20 }
 0x433   :  { %v12036_v26 = vpop.xlane.xlu0 %3500 }
 0x43b   :  { %v12038_v12 = vpop.xlane.xlu0 %3744 }
 0x443   :  { %v12040_v13 = vpop.xlane.xlu2 %3747 }
 0x44e   :  { %v4103_v41 = vpop.f32.mrf.mxu2  ;;  %v12042_v21 = vpop.xlane.xlu1 %3991 }
 0x44f   :  { %v4109_v51 = vmul.f32 0.05, %v4103_v41 }
 0x451   :  { %v12025_v14 = vadd.f32 %v4109_v51, %v11938_v4 }
 0x453   :  { %v4113_v5 = vsel %vm3247_vm1, %v12025_v14, -inf }
 0x454   :  { %4114 = vmax.xlane.f32.xlu2 %v4113_v5 }
 0x456   :  { %v4106_v17 = vpop.f32.mrf.mxu2 }
 0x457   :  { %v4110_v48 = vmul.f32 0.05, %v4106_v17 }
 0x459   :  { %v12032_v8 = vadd.f32 %v4110_v48, %v11951_v20 }
 0x45b   :  { %v4116_v56 = vsel %vm3251_vm6, %v12032_v8, -inf }
 0x45c   :  { %4117 = vmax.xlane.f32.xlu2 %v4116_v56  ;;  %v3121_v56 = vadd.f32 %v11935_v62, %v11929_v58 }
 0x46f   :  { %v3374_v4 = vpop.xlane.xlu0 %3373 }
 0x470   :  { %v3378_v19 = vsub.f32 %v3370_v59, %v3374_v4  ;;  %v3256_v59 = vsub.f32 %v11954_v15, %v3254_v2  ;;  %v3993_v15 = vsel %vm3251_vm6, %v12054_v47, -inf }
 0x472   :  { %v3380_v49 = vmul.f32 1.442695, %v3378_v19  ;;  %v3259_v63 = vmul.f32 1.442695, %v3256_v59  ;;  %v3135_v19 = vadd.f32 %v11895_v38, %v3121_v56  ;;  %v3996_v56 = vsub.f32 %v11984_v52, %v12042_v21 }
 0x474   :  { %10767 = vpow2.f32 %v3380_v49  ;;  %v3149_v31 = vadd.f32 %v11921_v57, %v3135_v19 }
 0x477   :  { %v3377_v22 = vpop.xlane.xlu2 %3376 }
 0x478   :  { %v3379_v36 = vsub.f32 %v3371_v39, %v3377_v22 }
 0x47a   :  { %v12044_v55 = vpop.eup %10767  ;;  %v3382_v50 = vmul.f32 1.442695, %v3379_v36 }
 0x47b   :  { %v3384_v24 = vsel %vm3247_vm1, %v12044_v55, 0.0 }
 0x47c   :  { %3385 = vadd.xlane.f32.xlu1 %v3384_v24  ;;  %10769 = vpow2.f32 %v3382_v50 }
 0x480   :  { %v3621_v28 = vpop.xlane.xlu1 %3620 }
 0x481   :  { %v3625_v54 = vsub.f32 %v3617_v16, %v3621_v28 }
 0x482   :  { %v12048_v33 = vpop.eup %10769 }
 0x483   :  { %v3627_v34 = vmul.f32 1.442695, %v3625_v54  ;;  %v3387_v39 = vsel %vm3251_vm6, %v12048_v33, 0.0 }
 0x484   :  { %3388 = vadd.xlane.f32.xlu1 %v3387_v39 }
 0x485   :  { %10771 = vpow2.f32 %v3627_v34 }
 0x486   :  { %10773 = vpow2.f32 %v3259_v63 }
 0x488   :  { %v3624_v37 = vpop.xlane.xlu0 %3623 }
 0x489   :  { %v3626_v41 = vsub.f32 %v11999_v23, %v3624_v37 }
 0x48b   :  { %v12057_v51 = vpop.eup %10771  ;;  %v3629_v16 = vmul.f32 1.442695, %v3626_v41 }
 0x48c   :  { %v3631_v2 = vsel %vm3247_vm1, %v12057_v51, 0.0  ;;  %3994 = vmax.xlane.f32.xlu1 %v3993_v15  ;;  %v12063_v5 = vpop.eup %10773  ;;  %v3750_v15 = vsub.f32 %v11976_v7, %v12040_v13  ;;  %v3998_v7 = vmul.f32 1.442695, %v3996_v56 }
 0x48d   :  { %10775 = vpow2.f32 %v3629_v16  ;;  %3632 = vadd.xlane.f32.xlu2 %v3631_v2  ;;  %v3264_v20 = vsel %vm3251_vm6, %v12063_v5, 0.0 }
 0x48e   :  { %v3753_v2 = vmul.f32 1.442695, %v3750_v15 }
 0x493   :  { %v12065_v17 = vpop.eup %10775 }
 0x494   :  { %v3634_v23 = vsel %vm3251_vm6, %v12065_v17, 0.0  ;;  %3265 = vadd.xlane.f32.xlu1 %v3264_v20 }
 0x495   :  { %3635 = vadd.xlane.f32.xlu0 %v3634_v23 }
 0x49b   :  { %v3263_v48 = vpop.xlane.xlu2 %3262 }
 0x49c   :  { %10777 = vrcp.f32 %v3263_v48  ;;  %v3278_v24 = vand.u32 2147483648, %v3263_v48  ;;  %v3276_v59 = vand.u32 2147483647, %v3263_v48  ;;  %vm3272_vm15 = vweird.f32 %v3263_v48 }
 0x49e   :  { %v3279_v58 = vor.u32 1.1754944e-38, %v3278_v24  ;;  %vm3277_vm0 = vcmp.eq.f32.partialorder %v3276_v59, 8.507059e+37  ;;  %v3190_v59 = vpop.f32.mrf.mxu3 }
 0x4a2   :  { %v10778_v4 = vpop.eup %10777 }
 0x4a3   :  { %v3268_v49 = vmul.f32 %v10778_v4, %v3263_v48  ;;  %v3868_v22 = vpop.xlane.xlu2 %3867  ;;  %vm3273_vm14 = vweird.f32 %v10778_v4 }
 0x4a4   :  { %v3872_v36 = vsub.f32 %v12015_v35, %v3868_v22  ;;  %vm3274_vm4 = vmor %vm3272_vm15, %vm3273_vm14 }
 0x4a5   :  { %v3269_v50 = vsub.f32 1.0, %v3268_v49  ;;  %3917 = vrot.lane.b32.xlu2 %v3149_v31, %s11274_s7  ;;  %v3871_v38 = vpop.xlane.xlu1 %3870 }
 0x4a6   :  { %v3874_v28 = vmul.f32 1.442695, %v3872_v36  ;;  %v3873_v35 = vsub.f32 %v12020_v43, %v3871_v38 }
 0x4a7   :  { %v3270_v54 = vmul.f32 %v10778_v4, %v3269_v50  ;;  %v3503_v50 = vsub.f32 %v11965_v27, %v12036_v26 }
 0x4a8   :  { %10779 = vpow2.f32 %v3874_v28  ;;  %v3876_v63 = vmul.f32 1.442695, %v3873_v35  ;;  %v3162_v28 = vpop.f32.mrf.mxu1 }
 0x4a9   :  { %v3271_v34 = vadd.f32 %v10778_v4, %v3270_v54  ;;  %v3506_v24 = vmul.f32 1.442695, %v3503_v50 }
 0x4aa   :  { %10781 = vpow2.f32 %v3876_v63 }
 0x4ab   :  { %v3275_v62 = vsel %vm3274_vm4, %v10778_v4, %v3271_v34 }
 0x4ac   :  { %v3280_v11 = vsel %vm3277_vm0, %v3279_v58, %v3275_v62 }
 0x4ad   :  { %v3281_v39 = vmul.f32 %v12004_v29, %v3280_v11  ;;  %v3502_v29 = vsub.f32 %v11960_v53, %v12027_v3 }
 0x4ae   :  { %v12079_v57 = vpop.eup %10779 }
 0x4af   :  { %8673 = vmatmul.msk.f32.vlgmr.msrb.gmra.mxu1 %vm3247_vm1, %v3281_v39  ;;  %v3878_v37 = vsel %vm3247_vm1, %v12079_v57, 0.0  ;;  %v3504_v16 = vmul.f32 1.442695, %v3502_v29 }
 0x4b0   :  { %8700 = vmatpush.msk.msrb.mxu1 %vm13254_vm2, %v3149_v31  ;;  %3879 = vadd.xlane.f32.xlu1 %v3878_v37  ;;  %v12086_v41 = vpop.eup %10781  ;;  %v3177_v31 = vadd.f32 %v11989_v25, %v3162_v28 }
 0x4b1   :  { %v3881_v43 = vsel %vm3251_vm6, %v12086_v41, 0.0  ;;  %10783 = vpow2.f32 %v3504_v16 }
 0x4b2   :  { %3815 = vmatpush.msrb.mxu1 %v12010_v40  ;;  %3882 = vadd.xlane.f32.xlu0 %v3881_v43  ;;  %10785 = vpow2.f32 %v3753_v2  ;;  %v3191_v34 = vadd.f32 %v3190_v59, %v3177_v31 }
 0x4b4   :  { %v12128_v62 = vadd.f32 %v11923_v42, %v3191_v34 }
 0x4b7   :  { %v12097_v40 = vpop.eup %10783 }
 0x4b8   :  { %v3508_v53 = vsel %vm3247_vm1, %v12097_v40, 0.0 }
 0x4c6   :  { %4162 = vrot.lane.b32.xlu0 %v11947_v18, %s11274_s7 }
 0x4c7   :  { %v4115_v20 = vpop.xlane.xlu2 %4114 }
 0x4c8   :  { %v4119_v23 = vsub.f32 %v12025_v14, %v4115_v20  ;;  %v12104_v14 = vpop.eup %10785 }
 0x4c9   :  { %v3758_v52 = vsel %vm3251_vm6, %v12104_v14, 0.0 }
 0x4ca   :  { %v4121_v48 = vmul.f32 1.442695, %v4119_v23  ;;  %v3916_v23 = vpop.permute.xlu0 %3915 }
 0x4cc   :  { %10787 = vpow2.f32 %v4121_v48 }
 0x4cd   :  { %10789 = vpow2.f32 %v3998_v7 }
 0x4ce   :  { %3509 = vadd.xlane.f32.xlu2 %v3508_v53 }
 0x4cf   :  { %v4118_v3 = vpop.xlane.xlu2 %4117 }
 0x4d0   :  { %v4120_v13 = vsub.f32 %v12032_v8, %v4118_v3 }
 0x4d2   :  { %v12106_v4 = vpop.eup %10787  ;;  %v4123_v19 = vmul.f32 1.442695, %v4120_v13 }
 0x4d3   :  { %v4125_v49 = vsel %vm3247_vm1, %v12106_v4, 0.0  ;;  %v12112_v21 = vpop.eup %10789 }
 0x4d4   :  { %10791 = vpow2.f32 %v4123_v19  ;;  %4126 = vadd.xlane.f32.xlu1 %v4125_v49  ;;  %v4002_v36 = vsel %vm3247_vm1, %v12112_v21, 0.0 }
 0x4d5   :  { %10793 = vpow2.f32 %v3506_v24 }
 0x4d6   :  { %3759 = vadd.xlane.f32.xlu2 %v3758_v52 }
 0x4da   :  { %v12114_v22 = vpop.eup %10791 }
 0x4db   :  { %v4128_v8 = vsel %vm3251_vm6, %v12114_v22, 0.0  ;;  %v12123_v54 = vpop.eup %10793 }
 0x4dc   :  { %4129 = vadd.xlane.f32.xlu1 %v4128_v8  ;;  %v3511_v38 = vsel %vm3251_vm6, %v12123_v54, 0.0 }
 0x4de   :  { %4003 = vadd.xlane.f32.xlu2 %v4002_v36 }
 0x4ef   :  { %v3386_v58 = vpop.xlane.xlu1 %3385 }
 0x4f0   :  { %10795 = vrcp.f32 %v3386_v58  ;;  %3512 = vadd.xlane.f32.xlu0 %v3511_v38  ;;  %v3401_v11 = vand.u32 2147483648, %v3386_v58  ;;  %v3399_v63 = vand.u32 2147483647, %v3386_v58  ;;  %vm3395_vm5 = vweird.f32 %v3386_v58 }
 0x4f2   :  { %v3402_v43 = vor.u32 1.1754944e-38, %v3401_v11  ;;  %vm3400_vm11 = vcmp.eq.f32.partialorder %v3399_v63, 8.507059e+37 }
 0x4f5   :  { %4164 = vrot.lane.b32.xlu1 %v12128_v62, %s11274_s7 }
 0x4f6   :  { %v10796_v27 = vpop.eup %10795 }
 0x4f7   :  { %v3391_v26 = vmul.f32 %v10796_v27, %v3386_v58  ;;  %v3389_v35 = vpop.xlane.xlu1 %3388  ;;  %vm3396_vm3 = vweird.f32 %v10796_v27 }
 0x4f8   :  { %10797 = vrcp.f32 %v3389_v35  ;;  %vm3397_vm7 = vmor %vm3395_vm5, %vm3396_vm3  ;;  %v3416_v13 = vand.u32 2147483648, %v3389_v35  ;;  %vm3410_vm9 = vweird.f32 %v3389_v35  ;;  %v3414_v49 = vand.u32 2147483647, %v3389_v35 }
 0x4f9   :  { %v3392_v25 = vsub.f32 1.0, %v3391_v26 }
 0x4fa   :  { %v3417_v24 = vor.u32 1.1754944e-38, %v3416_v13  ;;  %vm3415_vm13 = vcmp.eq.f32.partialorder %v3414_v49, 8.507059e+37 }
 0x4fb   :  { %v3393_v39 = vmul.f32 %v10796_v27, %v3392_v25  ;;  %v3749_v25 = vsub.f32 %v11970_v32, %v12038_v12 }
 0x4fd   :  { %v3394_v37 = vadd.f32 %v10796_v27, %v3393_v39 }
 0x4fe   :  { %v10798_v29 = vpop.eup %10797 }
 0x4ff   :  { %v3398_v16 = vsel %vm3397_vm7, %v10796_v27, %v3394_v37  ;;  %v3406_v15 = vmul.f32 %v10798_v29, %v3389_v35  ;;  %v3995_v2 = vpop.xlane.xlu1 %3994  ;;  %vm3411_vm8 = vweird.f32 %v10798_v29 }
 0x500   :  { %v3403_v42 = vsel %vm3400_vm11, %v3402_v43, %v3398_v16  ;;  %v3633_v20 = vpop.xlane.xlu2 %3632  ;;  %v3997_v56 = vsub.f32 %v12054_v47, %v3995_v2  ;;  %vm12135_vm10 = vmor %vm3410_vm9, %vm3411_vm8  ;;  %v3751_v16 = vmul.f32 1.442695, %v3749_v25 }
 0x501   :  { %v3404_v48 = vmul.f32 %v12044_v55, %v3403_v42  ;;  %10799 = vrcp.f32 %v3633_v20  ;;  %v3407_v53 = vsub.f32 1.0, %v3406_v15  ;;  %v3646_v34 = vand.u32 2147483647, %v3633_v20 }
 0x502   :  { %v4000_v7 = vmul.f32 1.442695, %v3997_v56  ;;  %v3648_v58 = vand.u32 2147483648, %v3633_v20  ;;  %vm3642_vm15 = vweird.f32 %v3633_v20 }
 0x503   :  { %8680 = vmatmul.msk.f32.vlgmr.msrb.gmra.mxu3 %vm3247_vm1, %v3404_v48  ;;  %v3408_v3 = vmul.f32 %v10798_v29, %v3407_v53  ;;  %vm3647_vm0 = vcmp.eq.f32.partialorder %v3646_v34, 8.507059e+37 }
 0x504   :  { %10801 = vpow2.f32 %v4000_v7  ;;  %v3649_v63 = vor.u32 1.1754944e-38, %v3648_v58 }
 0x505   :  { %v3409_v19 = vadd.f32 %v10798_v29, %v3408_v3 }
 0x507   :  { %v10800_v52 = vpop.eup %10799  ;;  %v3266_v36 = vpop.xlane.xlu1 %3265  ;;  %v3413_v50 = vsel %vm12135_vm10, %v10798_v29, %v3409_v19 }
 0x508   :  { %v3638_v55 = vmul.f32 %v10800_v52, %v3633_v20  ;;  %v3918_v47 = vpop.permute.xlu2 %3917  ;;  %10803 = vrcp.f32 %v3266_v36  ;;  %v3636_v28 = vpop.xlane.xlu0 %3635  ;;  %v3418_v38 = vsel %vm3415_vm13, %v3417_v24, %v3413_v50  ;;  %vm3643_vm14 = vweird.f32 %v10800_v52 }
 0x509   :  { %8707 = vmatpush.msk.msrb.mxu3 %vm13257_vm12, %v3918_v47  ;;  %10805 = vrcp.f32 %v3636_v28  ;;  %v3419_v26 = vmul.f32 %v12048_v33, %v3418_v38  ;;  %vm3644_vm4 = vmor %vm3642_vm15, %vm3643_vm14  ;;  %v3291_v20 = vand.u32 2147483647, %v3266_v36  ;;  %v3663_v48 = vand.u32 2147483648, %v3636_v28 }
 0x50a   :  { %v3639_v31 = vsub.f32 1.0, %v3638_v55  ;;  %v12142_v59 = vpop.eup %10801  ;;  %10807 = vpow2.f32 %v3751_v16  ;;  %v3661_v53 = vand.u32 2147483647, %v3636_v28  ;;  %vm3287_vm3 = vweird.f32 %v3266_v36 }
 0x50b   :  { %3943 = vmatpush.msrb.mxu3 %v3916_v23  ;;  %v4005_v35 = vsel %vm3251_vm6, %v12142_v59, 0.0  ;;  %v3293_v23 = vand.u32 2147483648, %v3266_v36  ;;  %vm3657_vm7 = vweird.f32 %v3636_v28  ;;  %vm3292_vm11 = vcmp.eq.f32.partialorder %v3291_v20, 8.507059e+37 }
 0x50c   :  { %v3640_v27 = vmul.f32 %v10800_v52, %v3639_v31  ;;  %4006 = vadd.xlane.f32.xlu0 %v4005_v35  ;;  %8681 = vmatmul.msk.f32.gmra.mxu3 %vm3247_vm1, %v3419_v26  ;;  %vm3662_vm9 = vcmp.eq.f32.partialorder %v3661_v53, 8.507059e+37 }
 0x50d   :  { %v3294_v3 = vor.u32 1.1754944e-38, %v3293_v23 }
 0x50e   :  { %v3641_v11 = vadd.f32 %v10800_v52, %v3640_v27  ;;  %v10804_v39 = vpop.eup %10803 }
 0x50f   :  { %v10806_v37 = vpop.eup %10805  ;;  %v3283_v29 = vmul.f32 %v10804_v39, %v3266_v36  ;;  %vm3288_vm6 = vweird.f32 %v10804_v39 }
 0x510   :  { %v3645_v43 = vsel %vm3644_vm4, %v10800_v52, %v3641_v11  ;;  %v3653_v42 = vmul.f32 %v10806_v37, %v3636_v28  ;;  %vm3658_vm2 = vweird.f32 %v10806_v37  ;;  %vm3289_vm5 = vmor %vm3287_vm3, %vm3288_vm6  ;;  %v12153_v47 = vpop.eup %10807 }
 0x511   :  { %v3650_v33 = vsel %vm3647_vm0, %v3649_v63, %v3645_v43  ;;  %v3284_v2 = vsub.f32 1.0, %v3283_v29  ;;  %vm3659_vm8 = vmor %vm3657_vm7, %vm3658_vm2  ;;  %v3755_v50 = vsel %vm3247_vm1, %v12153_v47, 0.0 }
 0x512   :  { %v3651_v15 = vmul.f32 %v12057_v51, %v3650_v33  ;;  %v3654_v32 = vsub.f32 1.0, %v3653_v42  ;;  %v3664_v51 = vor.u32 1.1754944e-38, %v3663_v48 }
 0x513   :  { %v3285_v12 = vmul.f32 %v10804_v39, %v3284_v2 }
 0x514   :  { %v3655_v56 = vmul.f32 %v10806_v37, %v3654_v32  ;;  %8694 = vmatmul.msk.f32.vlgmr.msra.gmra.mxu3 %vm3247_vm1, %v3651_v15 }
 0x515   :  { %v3286_v7 = vadd.f32 %v10804_v39, %v3285_v12 }
 0x516   :  { %v3656_v13 = vadd.f32 %v10806_v37, %v3655_v56 }
 0x517   :  { %v3290_v19 = vsel %vm3289_vm5, %v10804_v39, %v3286_v7 }
 0x518   :  { %v3295_v49 = vsel %vm3292_vm11, %v3294_v3, %v3290_v19  ;;  %v3660_v52 = vsel %vm3659_vm8, %v10806_v37, %v3656_v13  ;;  %vm13258_vm11 = vcmask 1041408  }
 0x519   :  { %v3296_v8 = vmul.f32 %v12063_v5, %v3295_v49  ;;  %v3665_v55 = vsel %vm3662_vm9, %v3664_v51, %v3660_v52 }
 0x51a   :  { %v3666_v36 = vmul.f32 %v12065_v17, %v3665_v55 }
 0x51b   :  { %8674 = vmatmul.msk.f32.gmra.mxu1 %vm3247_vm1, %v3296_v8 }
 0x51c   :  { %8695 = vmatmul.msk.f32.gmra.mxu3 %vm3247_vm1, %v3666_v36 }
 0x51f   :  { %3756 = vadd.xlane.f32.xlu1 %v3755_v50 }
 0x523   :  { %v3880_v24 = vpop.xlane.xlu1 %3879 }
 0x524   :  { %10809 = vrcp.f32 %v3880_v24  ;;  %v3895_v58 = vand.u32 2147483648, %v3880_v24  ;;  %v3893_v27 = vand.u32 2147483647, %v3880_v24  ;;  %vm3889_vm12 = vweird.f32 %v3880_v24 }
 0x525   :  { %v3883_v31 = vpop.xlane.xlu0 %3882 }
 0x526   :  { %10811 = vrcp.f32 %v3883_v31  ;;  %v3896_v35 = vor.u32 1.1754944e-38, %v3895_v58  ;;  %vm3894_vm14 = vcmp.eq.f32.partialorder %v3893_v27, 8.507059e+37  ;;  %v3910_v43 = vand.u32 2147483648, %v3883_v31 }
 0x527   :  { %v3908_v16 = vand.u32 2147483647, %v3883_v31  ;;  %vm3904_vm4 = vweird.f32 %v3883_v31 }
 0x528   :  { %v3911_v42 = vor.u32 1.1754944e-38, %v3910_v43 }
 0x529   :  { %vm3909_vm6 = vcmp.eq.f32.partialorder %v3908_v16, 8.507059e+37 }
 0x52a   :  { %v10810_v28 = vpop.eup %10809 }
 0x52b   :  { %v3885_v34 = vmul.f32 %v10810_v28, %v3880_v24  ;;  %vm3890_vm10 = vweird.f32 %v10810_v28 }
 0x52c   :  { %v10812_v17 = vpop.eup %10811  ;;  %vm3891_vm13 = vmor %vm3889_vm12, %vm3890_vm10 }
 0x52d   :  { %v3886_v5 = vsub.f32 1.0, %v3885_v34  ;;  %v3900_v25 = vmul.f32 %v10812_v17, %v3883_v31  ;;  %vm3905_vm15 = vweird.f32 %v10812_v17 }
 0x52e   :  { %vm3906_vm0 = vmor %vm3904_vm4, %vm3905_vm15 }
 0x52f   :  { %v3887_v38 = vmul.f32 %v10810_v28, %v3886_v5  ;;  %v3901_v63 = vsub.f32 1.0, %v3900_v25 }
 0x531   :  { %v3888_v26 = vadd.f32 %v10810_v28, %v3887_v38  ;;  %v3902_v29 = vmul.f32 %v10812_v17, %v3901_v63 }
 0x533   :  { %v3892_v11 = vsel %vm3891_vm13, %v10810_v28, %v3888_v26  ;;  %v3903_v33 = vadd.f32 %v10812_v17, %v3902_v29 }
 0x534   :  { %v3897_v39 = vsel %vm3894_vm14, %v3896_v35, %v3892_v11  ;;  %vm13259_vm14 = vmmov %vm13258_vm11 }
 0x535   :  { %v3898_v37 = vmul.f32 %v12079_v57, %v3897_v39  ;;  %v3907_v15 = vsel %vm3906_vm0, %v10812_v17, %v3903_v33 }
 0x536   :  { %v3912_v2 = vsel %vm3909_vm6, %v3911_v42, %v3907_v15 }
 0x537   :  { %8708 = vmatmul.msk.f32.vlgmr.msrb.gmra.mxu3 %vm3247_vm1, %v3898_v37  ;;  %v3913_v23 = vmul.f32 %v12086_v41, %v3912_v2 }
 0x538   :  { %v4163_v28 = vpop.permute.xlu0 %4162 }
 0x53f   :  { %8709 = vmatmul.msk.f32.gmra.mxu3 %vm3247_vm1, %v3913_v23 }
 0x541   :  { %v3510_v32 = vpop.xlane.xlu2 %3509 }
 0x542   :  { %10813 = vrcp.f32 %v3510_v32  ;;  %v3525_v56 = vand.u32 2147483648, %v3510_v32  ;;  %v3523_v7 = vand.u32 2147483647, %v3510_v32  ;;  %vm3519_vm3 = vweird.f32 %v3510_v32 }
 0x544   :  { %v3526_v19 = vor.u32 1.1754944e-38, %v3525_v56  ;;  %vm3524_vm7 = vcmp.eq.f32.partialorder %v3523_v7, 8.507059e+37 }
 0x547   :  { %v4127_v57 = vpop.xlane.xlu1 %4126 }
 0x548   :  { %v10814_v12 = vpop.eup %10813  ;;  %10815 = vrcp.f32 %v4127_v57  ;;  %v4142_v5 = vand.u32 2147483648, %v4127_v57  ;;  %vm4136_vm9 = vweird.f32 %v4127_v57  ;;  %v4140_v58 = vand.u32 2147483647, %v4127_v57 }
 0x549   :  { %v3515_v20 = vmul.f32 %v10814_v12, %v3510_v32  ;;  %vm3520_vm2 = vweird.f32 %v10814_v12 }
 0x54a   :  { %vm3521_vm5 = vmor %vm3519_vm3, %vm3520_vm2  ;;  %v4143_v27 = vor.u32 1.1754944e-38, %v4142_v5  ;;  %vm4141_vm12 = vcmp.eq.f32.partialorder %v4140_v58, 8.507059e+37 }
 0x54b   :  { %v3516_v48 = vsub.f32 1.0, %v3515_v20 }
 0x54d   :  { %v3517_v53 = vmul.f32 %v10814_v12, %v3516_v48  ;;  %v3760_v48 = vpop.xlane.xlu2 %3759 }
 0x54e   :  { %v10816_v51 = vpop.eup %10815 }
 0x54f   :  { %v3518_v3 = vadd.f32 %v10814_v12, %v3517_v53  ;;  %v4130_v13 = vpop.xlane.xlu1 %4129  ;;  %v4132_v8 = vmul.f32 %v10816_v51, %v4127_v57  ;;  %vm4137_vm8 = vweird.f32 %v10816_v51 }
 0x550   :  { %10817 = vrcp.f32 %v4130_v13  ;;  %vm4138_vm10 = vmor %vm4136_vm9, %vm4137_vm8  ;;  %v4157_v35 = vand.u32 2147483648, %v4130_v13  ;;  %vm4151_vm15 = vweird.f32 %v4130_v13  ;;  %v4155_v11 = vand.u32 2147483647, %v4130_v13 }
 0x551   :  { %v3522_v41 = vsel %vm3521_vm5, %v10814_v12, %v3518_v3  ;;  %v4133_v55 = vsub.f32 1.0, %v4132_v8 }
 0x552   :  { %v3527_v49 = vsel %vm3524_vm7, %v3526_v19, %v3522_v41  ;;  %v4158_v37 = vor.u32 1.1754944e-38, %v4157_v35  ;;  %vm4156_vm0 = vcmp.eq.f32.partialorder %v4155_v11, 8.507059e+37 }
 0x553   :  { %v3528_v52 = vmul.f32 %v12097_v40, %v3527_v49  ;;  %v4134_v50 = vmul.f32 %v10816_v51, %v4133_v55 }
 0x555   :  { %8687 = vmatmul.msk.f32.vlgmr.msra.gmra.mxu1 %vm3247_vm1, %v3528_v52  ;;  %v4135_v31 = vadd.f32 %v10816_v51, %v4134_v50  ;;  %v4004_v7 = vpop.xlane.xlu2 %4003 }
 0x556   :  { %8714 = vmatpush.msk.msra.mxu1 %vm13258_vm11, %v12128_v62  ;;  %v10818_v36 = vpop.eup %10817 }
 0x557   :  { %v4147_v24 = vmul.f32 %v10818_v36, %v4130_v13  ;;  %v4139_v40 = vsel %vm4138_vm10, %v10816_v51, %v4135_v31  ;;  %vm4152_vm13 = vweird.f32 %v10818_v36 }
 0x558   :  { %4062 = vmatpush.msra.mxu1 %v11947_v18  ;;  %v4144_v62 = vsel %vm4141_vm12, %v4143_v27, %v4139_v40  ;;  %vm4153_vm4 = vmor %vm4151_vm15, %vm4152_vm13  ;;  %vm3781_vm12 = vweird.f32 %v3760_v48 }
 0x559   :  { %v4148_v34 = vsub.f32 1.0, %v4147_v24  ;;  %v4145_v25 = vmul.f32 %v12106_v4, %v4144_v62 }
 0x55b   :  { %v4149_v38 = vmul.f32 %v10818_v36, %v4148_v34 }
 0x55d   :  { %v4150_v26 = vadd.f32 %v10818_v36, %v4149_v38  ;;  %v3787_v38 = vand.u32 2147483648, %v3760_v48 }
 0x55f   :  { %v4154_v39 = vsel %vm4153_vm4, %v10818_v36, %v4150_v26  ;;  %v3788_v11 = vor.u32 1.1754944e-38, %v3787_v38  ;;  %vm4013_vm4 = vweird.f32 %v4004_v7  ;;  %v10376_v38 = vld [vmem:[%s13218_s8 + $0xc] sm:$0xf0] }
 0x560   :  { %v4159_v29 = vsel %vm4156_vm0, %v4158_v37, %v4154_v39 }
 0x561   :  { %v4160_v2 = vmul.f32 %v12114_v22, %v4159_v29  ;;  %v4019_v29 = vand.u32 2147483648, %v4004_v7 }
 0x563   :  { %v3513_v17 = vpop.xlane.xlu0 %3512 }
 0x564   :  { %10819 = vrcp.f32 %v3513_v17  ;;  %v3540_v33 = vand.u32 2147483648, %v3513_v17  ;;  %v3538_v15 = vand.u32 2147483647, %v3513_v17  ;;  %vm3534_vm2 = vweird.f32 %v3513_v17 }
 0x565   :  { %10821 = vrcp.f32 %v3760_v48 }
 0x566   :  { %v3541_v23 = vor.u32 1.1754944e-38, %v3540_v33  ;;  %vm3539_vm5 = vcmp.eq.f32.partialorder %v3538_v15, 8.507059e+37  ;;  %v4017_v33 = vand.u32 2147483647, %v4004_v7 }
 0x567   :  { %v4165_v18 = vpop.permute.xlu1 %4164 }
 0x568   :  { %8721 = vmatpush.msk.msra.mxu3 %vm13259_vm14, %v4165_v18 }
 0x56a   :  { %4190 = vmatpush.msra.mxu3 %v4163_v28  ;;  %v10820_v63 = vpop.eup %10819 }
 0x56b   :  { %8722 = vmatmul.msk.f32.vlgmr.msra.gmra.mxu3 %vm3247_vm1, %v4145_v25  ;;  %v3530_v43 = vmul.f32 %v10820_v63, %v3513_v17  ;;  %vm3535_vm6 = vweird.f32 %v10820_v63  ;;  %v10822_v53 = vpop.eup %10821  ;;  %v3785_v17 = vand.u32 2147483647, %v3760_v48 }
 0x56c   :  { %vm3536_vm3 = vmor %vm3534_vm2, %vm3535_vm6  ;;  %v3777_v13 = vmul.f32 %v10822_v53, %v3760_v48  ;;  %vm3782_vm8 = vweird.f32 %v10822_v53  ;;  %vm4018_vm6 = vcmp.eq.f32.partialorder %v4017_v33, 8.507059e+37  ;;  %v10468_v33 = vld [vmem:[%s13218_s8 + $0x2ec] sm:$0xf0] }
 0x56d   :  { %v3531_v16 = vsub.f32 1.0, %v3530_v43  ;;  %vm3783_vm13 = vmor %vm3781_vm12, %vm3782_vm8  ;;  %vm3786_vm14 = vcmp.eq.f32.partialorder %v3785_v17, 8.507059e+37  ;;  %v8838_v43 = vld [vmem:[%s13218_s8 + $0xe0] sm:$0xf]  ;;  %v8840_v17 = vld [vmem:[%s13218_s8 + $0xf0] sm:$0xf0] }
 0x56e   :  { %v3778_v19 = vsub.f32 1.0, %v3777_v13 }
 0x56f   :  { %v3532_v42 = vmul.f32 %v10820_v63, %v3531_v16 }
 0x570   :  { %v3779_v8 = vmul.f32 %v10822_v53, %v3778_v19  ;;  %v10392_v19 = vld [vmem:[%s13218_s8 + $0x8c] sm:$0xf0] }
 0x571   :  { %v3533_v4 = vadd.f32 %v10820_v63, %v3532_v42 }
 0x572   :  { %v3780_v34 = vadd.f32 %v10822_v53, %v3779_v8  ;;  %v10388_v8 = vld [vmem:[%s13218_s8 + $0x6c] sm:$0xf0] }
 0x573   :  { %8723 = vmatmul.msk.f32.gmra.mxu3 %vm3247_vm1, %v4160_v2  ;;  %v3537_v32 = vsel %vm3536_vm3, %v10820_v63, %v3533_v4  ;;  %v4020_v4 = vor.u32 1.1754944e-38, %v4019_v29 }
 0x574   :  { %v3542_v57 = vsel %vm3539_vm5, %v3541_v23, %v3537_v32  ;;  %v3784_v25 = vsel %vm3783_vm13, %v10822_v53, %v3780_v34  ;;  %v10396_v53 = vld [vmem:[%s13218_s8 + $0xac] sm:$0xf0] }
 0x575   :  { %v3543_v12 = vmul.f32 %v12123_v54, %v3542_v57  ;;  %v3789_v39 = vsel %vm3786_vm14, %v3788_v11, %v3784_v25  ;;  %v8966_v25 = vld [vmem:[%s13218_s8 + $0x1e0] sm:$0xf]  ;;  %v10436_v11 = vld [vmem:[%s13218_s8 + $0x1ec] sm:$0xf0] }
 0x576   :  { %v3790_v42 = vmul.f32 %v12104_v14, %v3789_v39  ;;  %v10400_v14 = vld [vmem:[%s13218_s8 + $0xcc] sm:$0xf0]  ;;  %v10398_v39 = vld [vmem:[%s13218_s8 + $0xc4] sm:$0xf] }
 0x577   :  { %8688 = vmatmul.msk.f32.gmra.mxu1 %vm3247_vm1, %v3543_v12  ;;  %v8822_v12 = vld [vmem:[%s13218_s8 + $0xc0] sm:$0xf] }
 0x57f   :  { %v12177_v41 = vpop.xlane.xlu0 %4006 }
 0x580   :  { %v4034_v48 = vand.u32 2147483648, %v12177_v41  ;;  %vm4028_vm3 = vweird.f32 %v12177_v41 }
 0x586   :  { %v3451_v20 = vpop.f32.mrf.mxu3 }
 0x58f   :  { %v3454_v56 = vpop.f32.mrf.mxu3 }
 0x590   :  { %v10749_v22 = vpack.i.bf16 %v3454_v56, %v3451_v20  ;;  %v8806_v20 = vld [vmem:[%s13218_s8 + $0xa0] sm:$0xf]  ;;  %v8823_v56 = vor.u32 %v10400_v14, %v8822_v12  ;;  %v10464_v14 = vld [vmem:[%s13218_s8 + $0x2cc] sm:$0xf0] }
 0x592   :  { %v3757_v3 = vpop.xlane.xlu1 %3756  ;;  %10750 = vrot.lane.b32.xlu1 %v10749_v22, %s11274_s7  ;;  %v4032_v22 = vand.u32 2147483647, %v12177_v41 }
 0x593   :  { %10823 = vrcp.f32 %v3757_v3  ;;  %v3772_v55 = vand.u32 2147483648, %v3757_v3  ;;  %v3770_v24 = vand.u32 2147483647, %v3757_v3  ;;  %vm3766_vm11 = vweird.f32 %v3757_v3 }
 0x594   :  { %10825 = vrcp.f32 %v4004_v7 }
 0x595   :  { %10827 = vrcp.f32 %v12177_v41  ;;  %v3773_v31 = vor.u32 1.1754944e-38, %v3772_v55  ;;  %vm3771_vm10 = vcmp.eq.f32.partialorder %v3770_v24, 8.507059e+37  ;;  %v10384_v24 = vld [vmem:[%s13218_s8 + $0x4c] sm:$0xf0] }
 0x597   :  { %v12181_v26 = vpop.f32.mrf.mxu3 }
 0x599   :  { %v10824_v51 = vpop.eup %10823 }
 0x59a   :  { %v3762_v54 = vmul.f32 %v10824_v51, %v3757_v3  ;;  %v10826_v49 = vpop.eup %10825  ;;  %vm3767_vm7 = vweird.f32 %v10824_v51  ;;  %v8807_v3 = vor.u32 %v10396_v53, %v8806_v20  ;;  %v10390_v20 = vld [vmem:[%s13218_s8 + $0x84] sm:$0xf] }
 0x59b   :  { %v4009_v36 = vmul.f32 %v10826_v49, %v4004_v7  ;;  %vm3768_vm9 = vmor %vm3766_vm11, %vm3767_vm7  ;;  %v10828_v40 = vpop.eup %10827  ;;  %vm4014_vm15 = vweird.f32 %v10826_v49  ;;  %vm4033_vm7 = vcmp.eq.f32.partialorder %v4032_v22, 8.507059e+37  ;;  %v10424_v22 = vld [vmem:[%s13218_s8 + $0x18c] sm:$0xf0] }
 0x59c   :  { %v3763_v52 = vsub.f32 1.0, %v3762_v54  ;;  %v4024_v35 = vmul.f32 %v10828_v40, %v12177_v41  ;;  %vm4015_vm0 = vmor %vm4013_vm4, %vm4014_vm15  ;;  %vm4029_vm2 = vweird.f32 %v10828_v40  ;;  %v4035_v54 = vor.u32 1.1754944e-38, %v4034_v48  ;;  %v8792_v48 = vld [vmem:[%s13218_s8 + $0x90] sm:$0xf0] }
 0x59d   :  { %v4010_v5 = vsub.f32 1.0, %v4009_v36  ;;  %vm4030_vm5 = vmor %vm4028_vm3, %vm4029_vm2  ;;  %v8795_v53 = vor.u32 %v10390_v20, %v8792_v48  ;;  %v8982_v20 = vld [vmem:[%s13218_s8 + $0x200] sm:$0xf]  ;;  %v10440_v48 = vld [vmem:[%s13218_s8 + $0x20c] sm:$0xf0]  ;;  %vm13268_vm15 = vcmask 130048  }
 0x59e   :  { %v3764_v50 = vmul.f32 %v10824_v51, %v3763_v52  ;;  %v4025_v37 = vsub.f32 1.0, %v4024_v35  ;;  %v8774_v52 = vld [vmem:[%s13218_s8 + $0x60] sm:$0xf]  ;;  %vm13269_vm4 = vcmask 1041408   ;;  %vm13272_vm2 = vcmask 123904   ;;  %vm13273_vm3 = vmmov %vm13268_vm15 }
 0x59f   :  { %v4011_v18 = vmul.f32 %v10826_v49, %v4010_v5  ;;  %v3701_v23 = vpop.f32.mrf.mxu3  ;;  %v8775_v36 = vor.u32 %v10388_v8, %v8774_v52  ;;  %v10380_v5 = vld [vmem:[%s13218_s8 + $0x2c] sm:$0xf0]  ;;  %v9046_v8 = vld [vmem:[%s13218_s8 + $0x280] sm:$0xf] }
 0x5a0   :  { %v3765_v28 = vadd.f32 %v10824_v51, %v3764_v50  ;;  %v4026_v2 = vmul.f32 %v10828_v40, %v4025_v37  ;;  %v8758_v50 = vld [vmem:[%s13218_s8 + $0x40] sm:$0xf] }
 0x5a1   :  { %v4012_v63 = vadd.f32 %v10826_v49, %v4011_v18  ;;  %v8759_v34 = vor.u32 %v10384_v24, %v8758_v50  ;;  %v8950_v37 = vld [vmem:[%s13218_s8 + $0x1c0] sm:$0xf]  ;;  %v10382_v50 = vld [vmem:[%s13218_s8 + $0x44] sm:$0xf]  ;;  %v8760_v24 = vld [vmem:[%s13218_s8 + $0x50] sm:$0xf0] }
 0x5a2   :  { %v3769_v58 = vsel %vm3768_vm9, %v10824_v51, %v3765_v28  ;;  %v4027_v57 = vadd.f32 %v10828_v40, %v4026_v2  ;;  %v8790_v51 = vld [vmem:[%s13218_s8 + $0x80] sm:$0xf]  ;;  %v8808_v2 = vld [vmem:[%s13218_s8 + $0xb0] sm:$0xf0] }
 0x5a3   :  { %v3774_v27 = vsel %vm3771_vm10, %v3773_v31, %v3769_v58  ;;  %v4016_v15 = vsel %vm4015_vm0, %v10826_v49, %v4012_v63  ;;  %v8791_v41 = vor.u32 %v10392_v19, %v8790_v51  ;;  %v8824_v63 = vld [vmem:[%s13218_s8 + $0xd0] sm:$0xf0]  ;;  %v10460_v51 = vld [vmem:[%s13218_s8 + $0x2ac] sm:$0xf0]  ;;  %v10386_v19 = vld [vmem:[%s13218_s8 + $0x64] sm:$0xf] }
 0x5a4   :  { %v3775_v62 = vmul.f32 %v12153_v47, %v3774_v27  ;;  %v10404_v47 = vld [vmem:[%s13218_s8 + $0xec] sm:$0xf0]  ;;  %v4021_v32 = vsel %vm4018_vm6, %v4020_v4, %v4016_v15  ;;  %v4031_v13 = vsel %vm4030_vm5, %v10828_v40, %v4027_v57  ;;  %v8726_v40 = vld [vmem:[%s13218_s8] sm:$0xf]  ;;  %v10402_v27 = vld [vmem:[%s13218_s8 + $0xe4] sm:$0xf] }
 0x5a5   :  { %v8839_v16 = vor.u32 %v10404_v47, %v8838_v43  ;;  %v4022_v7 = vmul.f32 %v12112_v21, %v4021_v32  ;;  %v4036_v49 = vsel %vm4033_vm7, %v4035_v54, %v4031_v13  ;;  %v8727_v18 = vor.u32 %v10376_v38, %v8726_v40  ;;  %v10432_v43 = vld [vmem:[%s13218_s8 + $0x1cc] sm:$0xf0]  ;;  %v9078_v57 = vld [vmem:[%s13218_s8 + $0x2c0] sm:$0xf]  ;;  %v8776_v54 = vld [vmem:[%s13218_s8 + $0x70] sm:$0xf0] }
 0x5a6   :  { %8701 = vmatmul.msk.f32.vlgmr.msrb.gmra.mxu1 %vm3247_vm1, %v3775_v62  ;;  %v4037_v55 = vmul.f32 %v12142_v59, %v4036_v49  ;;  %v8742_v59 = vld [vmem:[%s13218_s8 + $0x20] sm:$0xf]  ;;  %v10754_v62 = vpack.i.bf16 %v3701_v23, %v12181_v26  ;;  %v8843_v35 = vor.u32 %v10402_v27, %v8840_v17  ;;  %v8967_v26 = vor.u32 %v10436_v11, %v8966_v25  ;;  %v10428_v32 = vld [vmem:[%s13218_s8 + $0x1ac] sm:$0xf0]  ;;  %v10378_v38 = vld [vmem:[%s13218_s8 + $0x24] sm:$0xf] }
 0x5a7   :  { %5010 = vmatpush.bf16.msrb.mxu0 %v8839_v16  ;;  %v8743_v58 = vor.u32 %v10380_v5, %v8742_v59  ;;  %v8827_v47 = vor.u32 %v10398_v39, %v8824_v63  ;;  %v8951_v29 = vor.u32 %v10432_v43, %v8950_v37  ;;  %v9094_v16 = vld [vmem:[%s13218_s8 + $0x2e0] sm:$0xf]  ;;  %v10420_v49 = vld [vmem:[%s13218_s8 + $0x16c] sm:$0xf0]  ;;  %v8779_v52 = vor.u32 %v10386_v19, %v8776_v54  ;;  %v8744_v17 = vld [vmem:[%s13218_s8 + $0x30] sm:$0xf0] }
 0x5a8   :  { %5024 = vmatpush.bf16.msrb.mxu1 %v8967_v26  ;;  %v9095_v15 = vor.u32 %v10468_v33, %v9094_v16  ;;  %v8934_v23 = vld [vmem:[%s13218_s8 + $0x1a0] sm:$0xf]  ;;  %v8763_v59 = vor.u32 %v10382_v50, %v8760_v24  ;;  %v10452_v40 = vld [vmem:[%s13218_s8 + $0x26c] sm:$0xf0]  ;;  %v10374_v26 = vld [vmem:[%s13218_s8 + $0x4] sm:$0xf] }
 0x5a9   :  { %v8935_v12 = vor.u32 %v10428_v32, %v8934_v23  ;;  %v9014_v11 = vld [vmem:[%s13218_s8 + $0x240] sm:$0xf]  ;;  %v10448_v39 = vld [vmem:[%s13218_s8 + $0x24c] sm:$0xf0]  ;;  %v8728_v37 = vld [vmem:[%s13218_s8 + $0x10] sm:$0xf0] }
 0x5aa   :  { %5038 = vmatpush.bf16.msrb.mxu2 %v9095_v15  ;;  %v9015_v63 = vor.u32 %v10448_v39, %v9014_v11  ;;  %v8731_v43 = vor.u32 %v10374_v26, %v8728_v37  ;;  %v10434_v33 = vld [vmem:[%s13218_s8 + $0x1e4] sm:$0xf]  ;;  %v9080_v54 = vld [vmem:[%s13218_s8 + $0x2d0] sm:$0xf0]  ;;  %v8846_v39 = vld [vmem:[%s13218_s8 + $0xe8] sm:$0xf] }
 0x5ab   :  { %5011 = vmatpush.bf16.msrb.mxu0 %v8823_v56  ;;  %v9079_v56 = vor.u32 %v10464_v14, %v9078_v57  ;;  %v10430_v57 = vld [vmem:[%s13218_s8 + $0x1c4] sm:$0xf]  ;;  %v9064_v50 = vld [vmem:[%s13218_s8 + $0x2b0] sm:$0xf0]  ;;  %v10405_v37 = vld [vmem:[%s13218_s8 + $0xf4] sm:$0xf0] }
 0x5ac   :  { %5025 = vmatpush.bf16.msrb.mxu1 %v8951_v29  ;;  %v10408_v29 = vld [vmem:[%s13218_s8 + $0x10c] sm:$0xf0]  ;;  %v10462_v19 = vld [vmem:[%s13218_s8 + $0x2c4] sm:$0xf]  ;;  %v8872_v11 = vld [vmem:[%s13218_s8 + $0x130] sm:$0xf0] }
 0x5ad   :  { %vm13270_vm0 = vmmov %vm13269_vm4 }
 0x5ae   :  { %8702 = vmatmul.msk.f32.gmra.mxu1 %vm3247_vm1, %v3790_v42  ;;  %v10394_v42 = vld [vmem:[%s13218_s8 + $0xa4] sm:$0xf]  ;;  %5039 = vmatpush.bf16.msrb.mxu2 %v9079_v56  ;;  %vm13271_vm6 = vmmov %vm13270_vm0 }
 0x5af   :  { %5012 = vmatpush.bf16.msrb.mxu0 %v8807_v3  ;;  %v8811_v4 = vor.u32 %v10394_v42, %v8808_v2  ;;  %v9062_v3 = vld [vmem:[%s13218_s8 + $0x2a0] sm:$0xf]  ;;  %v8968_v42 = vld [vmem:[%s13218_s8 + $0x1f0] sm:$0xf0]  ;;  %v10466_v56 = vld [vmem:[%s13218_s8 + $0x2e4] sm:$0xf] }
 0x5b0   :  { %5026 = vmatpush.bf16.msrb.mxu1 %v8935_v12  ;;  %v8971_v15 = vor.u32 %v10434_v33, %v8968_v42  ;;  %v8998_v2 = vld [vmem:[%s13218_s8 + $0x220] sm:$0xf]  ;;  %v8952_v12 = vld [vmem:[%s13218_s8 + $0x1d0] sm:$0xf0]  ;;  %vm13274_vm5 = vmmov %vm13270_vm0 }
 0x5b1   :  { %v8955_v14 = vor.u32 %v10430_v57, %v8952_v12  ;;  %v8830_v57 = vld [vmem:[%s13218_s8 + $0xc8] sm:$0xf]  ;;  %vm13275_vm7 = vmmov %vm13270_vm0 }
 0x5b3   :  { %5013 = vmatpush.bf16.msrb.mxu0 %v8791_v41  ;;  %v9063_v41 = vor.u32 %v10460_v51, %v9062_v3  ;;  %v10426_v3 = vld [vmem:[%s13218_s8 + $0x1a4] sm:$0xf] }
 0x5b5   :  { %5040 = vmatpush.bf16.msrb.mxu2 %v9063_v41 }
 0x5b6   :  { %8715 = vmatmul.msk.f32.vlgmr.msra.gmra.mxu1 %vm3247_vm1, %v4022_v7  ;;  %v8918_v7 = vld [vmem:[%s13218_s8 + $0x180] sm:$0xf] }
 0x5b7   :  { %5014 = vmatpush.bf16.msrb.mxu0 %v8775_v36  ;;  %v8919_v13 = vor.u32 %v10424_v22, %v8918_v7  ;;  %v9096_v7 = vld [vmem:[%s13218_s8 + $0x2f0] sm:$0xf0] }
 0x5b8   :  { %v9099_v22 = vor.u32 %v10466_v56, %v9096_v7  ;;  %v9000_v56 = vld [vmem:[%s13218_s8 + $0x230] sm:$0xf0] }
 0x5b9   :  { %5027 = vmatpush.bf16.msrb.mxu1 %v8919_v13  ;;  %v8936_v13 = vld [vmem:[%s13218_s8 + $0x1b0] sm:$0xf0] }
 0x5ba   :  { %v3945_v21 = vpop.f32.mrf.mxu3  ;;  %v8939_v51 = vor.u32 %v10426_v3, %v8936_v13  ;;  %v10397_v3 = vld [vmem:[%s13218_s8 + $0xb4] sm:$0xf0]  ;;  %v10438_v13 = vld [vmem:[%s13218_s8 + $0x204] sm:$0xf] }
 0x5bb   :  { %5015 = vmatpush.bf16.msrb.mxu0 %v8759_v34 }
 0x5be   :  { %8716 = vmatmul.msk.f32.gmra.mxu1 %vm3247_vm1, %v4037_v55  ;;  %v10456_v55 = vld [vmem:[%s13218_s8 + $0x28c] sm:$0xf0]  ;;  %vm13260_vm1 = vcmask 523264  }
 0x5bf   :  { %5016 = vmatpush.bf16.msrb.mxu0 %v8743_v58  ;;  %v9047_v34 = vor.u32 %v10456_v55, %v9046_v8  ;;  %v9030_v58 = vld [vmem:[%s13218_s8 + $0x260] sm:$0xf]  ;;  %v8920_v8 = vld [vmem:[%s13218_s8 + $0x190] sm:$0xf0]  ;;  %vm13261_vm11 = vmmov %vm13260_vm1 }
 0x5c0   :  { %v9031_v27 = vor.u32 %v10452_v40, %v9030_v58  ;;  %v3323_v40 = vpop.f32.mrf.mxu1  ;;  %vm13262_vm8 = vmmov %vm13260_vm1 }
 0x5c1   :  { %5041 = vmatpush.bf16.msrb.mxu2 %v9047_v34  ;;  %vm13263_vm9 = vmmov %vm13260_vm1 }
 0x5c2   :  { %v3948_v28 = vpop.f32.mrf.mxu3  ;;  %vm13264_vm10 = vmmov %vm13260_vm1 }
 0x5c3   :  { %v10739_v31 = vpack.i.bf16 %v3948_v28, %v3945_v21  ;;  %5017 = vmatpush.bf16.msrb.mxu0 %v8727_v18  ;;  %v8902_v21 = vld [vmem:[%s13218_s8 + $0x160] sm:$0xf]  ;;  %vm13265_vm12 = vmmov %vm13260_vm1 }
 0x5c4   :  { %v8903_v36 = vor.u32 %v10420_v49, %v8902_v21  ;;  %v8886_v28 = vld [vmem:[%s13218_s8 + $0x140] sm:$0xf]  ;;  %v9083_v49 = vor.u32 %v10462_v19, %v9080_v54  ;;  %vm13266_vm13 = vmmov %vm13260_vm1 }
 0x5c5   :  { %10740 = vrot.lane.b32.xlu2 %v10739_v31, %s11274_s7  ;;  %v10416_v31 = vld [vmem:[%s13218_s8 + $0x14c] sm:$0xf0]  ;;  %v8870_v18 = vld [vmem:[%s13218_s8 + $0x120] sm:$0xf]  ;;  %5042 = vmatpush.bf16.msrb.mxu2 %v9031_v27  ;;  %v8888_v27 = vld [vmem:[%s13218_s8 + $0x150] sm:$0xf0] }
 0x5c6   :  { %5028 = vmatpush.bf16.msrb.mxu1 %v8903_v36  ;;  %v8887_v5 = vor.u32 %v10416_v31, %v8886_v28  ;;  %v10458_v36 = vld [vmem:[%s13218_s8 + $0x2a4] sm:$0xf]  ;;  %v8904_v31 = vld [vmem:[%s13218_s8 + $0x170] sm:$0xf0]  ;;  %vm13267_vm14 = vmmov %vm13260_vm1 }
 0x5c7   :  { %5066 = vmatpush.bf16.msra.mxu0 %v8843_v35  ;;  %v10412_v35 = vld [vmem:[%s13218_s8 + $0x12c] sm:$0xf0]  ;;  %v9067_v24 = vor.u32 %v10458_v36, %v9064_v50  ;;  %v10418_v28 = vld [vmem:[%s13218_s8 + $0x164] sm:$0xf]  ;;  %v9222_v36 = vld [vmem:[%s13218_s8 + $0x3e0] sm:$0xf] }
 0x5c8   :  { %v8871_v25 = vor.u32 %v10412_v35, %v8870_v18  ;;  %v8907_v34 = vor.u32 %v10418_v28, %v8904_v31  ;;  %v9032_v18 = vld [vmem:[%s13218_s8 + $0x270] sm:$0xf0]  ;;  %v3326_v42 = vpop.f32.mrf.mxu1  ;;  %v10500_v50 = vld [vmem:[%s13218_s8 + $0x3ec] sm:$0xf0]  ;;  %v8766_v31 = vld [vmem:[%s13218_s8 + $0x48] sm:$0xf] }
 0x5c9   :  { %5043 = vmatpush.bf16.msrb.mxu2 %v9015_v63 }
 0x5ca   :  { %5029 = vmatpush.bf16.msrb.mxu1 %v8887_v5  ;;  %v9048_v5 = vld [vmem:[%s13218_s8 + $0x290] sm:$0xf0] }
 0x5cb   :  { %5067 = vmatpush.bf16.msra.mxu0 %v8827_v47  ;;  %v8854_v47 = vld [vmem:[%s13218_s8 + $0x100] sm:$0xf] }
 0x5cc   :  { %v8855_v16 = vor.u32 %v10408_v29, %v8854_v47  ;;  %v9016_v47 = vld [vmem:[%s13218_s8 + $0x250] sm:$0xf0] }
 0x5cd   :  { %10755 = vrot.lane.b32.xlu2 %v10754_v62, %s11274_s7  ;;  %v8747_v62 = vor.u32 %v10378_v38, %v8744_v17  ;;  %v10414_v38 = vld [vmem:[%s13218_s8 + $0x144] sm:$0xf] }
 0x5ce   :  { %5030 = vmatpush.bf16.msrb.mxu1 %v8871_v25  ;;  %v8891_v17 = vor.u32 %v10414_v38, %v8888_v27  ;;  %v10410_v25 = vld [vmem:[%s13218_s8 + $0x124] sm:$0xf] }
 0x5cf   :  { %5068 = vmatpush.bf16.msra.mxu0 %v8811_v4  ;;  %v10444_v4 = vld [vmem:[%s13218_s8 + $0x22c] sm:$0xf0]  ;;  %v8875_v26 = vor.u32 %v10410_v25, %v8872_v11 }
 0x5d0   :  { %v8999_v32 = vor.u32 %v10444_v4, %v8998_v2  ;;  %v8856_v2 = vld [vmem:[%s13218_s8 + $0x110] sm:$0xf0] }
 0x5d2   :  { %5031 = vmatpush.bf16.msrb.mxu1 %v8855_v16  ;;  %5044 = vmatpush.bf16.msrb.mxu2 %v8999_v32  ;;  %v8847_v32 = vor.u32 %v10405_v37, %v8846_v39  ;;  %v8734_v39 = vld [vmem:[%s13218_s8 + $0x8] sm:$0xf] }
 0x5d3   :  { %5069 = vmatpush.bf16.msra.mxu0 %v8795_v53  ;;  %v8983_v53 = vor.u32 %v10440_v48, %v8982_v20  ;;  %v10401_v20 = vld [vmem:[%s13218_s8 + $0xd4] sm:$0xf0]  ;;  %v10442_v48 = vld [vmem:[%s13218_s8 + $0x224] sm:$0xf] }
 0x5d4   :  { %v8831_v7 = vor.u32 %v10401_v20, %v8830_v57  ;;  %v10399_v57 = vld [vmem:[%s13218_s8 + $0xcc] sm:$0xf] }
 0x5d6   :  { %5080 = vmatpush.bf16.msra.mxu1 %v8971_v15  ;;  %5045 = vmatpush.bf16.msrb.mxu2 %v8983_v53  ;;  %v10406_v15 = vld [vmem:[%s13218_s8 + $0x104] sm:$0xf]  ;;  %v9003_v53 = vor.u32 %v10442_v48, %v9000_v56  ;;  %v8832_v56 = vld [vmem:[%s13218_s8 + $0xd8] sm:$0xf0] }
 0x5d7   :  { %5070 = vmatpush.bf16.msra.mxu0 %v8779_v52  ;;  %v10422_v52 = vld [vmem:[%s13218_s8 + $0x184] sm:$0xf]  ;;  %v8859_v12 = vor.u32 %v10406_v15, %v8856_v2 }
 0x5d8   :  { %v8923_v55 = vor.u32 %v10422_v52, %v8920_v8  ;;  %v8782_v8 = vld [vmem:[%s13218_s8 + $0x68] sm:$0xf] }
 0x5da   :  { %5081 = vmatpush.bf16.msra.mxu1 %v8955_v14  ;;  %5094 = vmatpush.bf16.msra.mxu2 %v9099_v22  ;;  %v8814_v22 = vld [vmem:[%s13218_s8 + $0xa8] sm:$0xf] }
 0x5db   :  { %5071 = vmatpush.bf16.msra.mxu0 %v8763_v59  ;;  %v10454_v59 = vld [vmem:[%s13218_s8 + $0x284] sm:$0xf]  ;;  %v8815_v54 = vor.u32 %v10397_v3, %v8814_v22  ;;  %v8958_v3 = vld [vmem:[%s13218_s8 + $0x1c8] sm:$0xf] }
 0x5dc   :  { %v9051_v58 = vor.u32 %v10454_v59, %v9048_v5  ;;  %v9206_v5 = vld [vmem:[%s13218_s8 + $0x3c0] sm:$0xf] }
 0x5de   :  { %5082 = vmatpush.bf16.msra.mxu1 %v8939_v51  ;;  %5095 = vmatpush.bf16.msra.mxu2 %v9083_v49  ;;  %v8984_v51 = vld [vmem:[%s13218_s8 + $0x210] sm:$0xf0]  ;;  %v10393_v49 = vld [vmem:[%s13218_s8 + $0x94] sm:$0xf0] }
 0x5df   :  { %5072 = vmatpush.bf16.msra.mxu0 %v8747_v62  ;;  %v10450_v62 = vld [vmem:[%s13218_s8 + $0x264] sm:$0xf]  ;;  %v8987_v19 = vor.u32 %v10438_v13, %v8984_v51  ;;  %v10433_v13 = vld [vmem:[%s13218_s8 + $0x1d4] sm:$0xf0] }
 0x5e0   :  { %v9035_v35 = vor.u32 %v10450_v62, %v9032_v18  ;;  %v10381_v62 = vld [vmem:[%s13218_s8 + $0x34] sm:$0xf0]  ;;  %v9190_v18 = vld [vmem:[%s13218_s8 + $0x3a0] sm:$0xf] }
 0x5e2   :  { %5083 = vmatpush.bf16.msra.mxu1 %v8923_v55  ;;  %5096 = vmatpush.bf16.msra.mxu2 %v9067_v24  ;;  %v10389_v55 = vld [vmem:[%s13218_s8 + $0x74] sm:$0xf0]  ;;  %v9223_v24 = vor.u32 %v10500_v50, %v9222_v36  ;;  %v8816_v36 = vld [vmem:[%s13218_s8 + $0xb8] sm:$0xf0]  ;;  %v9142_v50 = vld [vmem:[%s13218_s8 + $0x340] sm:$0xf] }
 0x5e3   :  { %5073 = vmatpush.bf16.msra.mxu0 %v8731_v43  ;;  %v10446_v43 = vld [vmem:[%s13218_s8 + $0x244] sm:$0xf]  ;;  %v8783_v28 = vor.u32 %v10389_v55, %v8782_v8  ;;  %v8959_v55 = vor.u32 %v10433_v13, %v8958_v3  ;;  %v10383_v13 = vld [vmem:[%s13218_s8 + $0x4c] sm:$0xf] }
 0x5e4   :  { %v9019_v33 = vor.u32 %v10446_v43, %v9016_v47  ;;  %5052 = vmatpush.bf16.msrb.mxu3 %v9223_v24  ;;  %v8848_v43 = vld [vmem:[%s13218_s8 + $0xf8] sm:$0xf0]  ;;  %v9174_v47 = vld [vmem:[%s13218_s8 + $0x380] sm:$0xf]  ;;  %v10480_v24 = vld [vmem:[%s13218_s8 + $0x34c] sm:$0xf0] }
 0x5e6   :  { %5084 = vmatpush.bf16.msra.mxu1 %v8907_v34  ;;  %5097 = vmatpush.bf16.msra.mxu2 %v9051_v58  ;;  %v10385_v34 = vld [vmem:[%s13218_s8 + $0x54] sm:$0xf0]  ;;  %v10496_v58 = vld [vmem:[%s13218_s8 + $0x3cc] sm:$0xf0] }
 0x5e7   :  { %v9207_v38 = vor.u32 %v10496_v58, %v9206_v5  ;;  %v8767_v27 = vor.u32 %v10385_v34, %v8766_v31  ;;  %v10429_v5 = vld [vmem:[%s13218_s8 + $0x1b4] sm:$0xf0]  ;;  %v9143_v58 = vor.u32 %v10480_v24, %v9142_v50  ;;  %v10379_v24 = vld [vmem:[%s13218_s8 + $0x2c] sm:$0xf] }
 0x5e9   :  { %5053 = vmatpush.bf16.msrb.mxu3 %v9207_v38  ;;  %v9086_v38 = vld [vmem:[%s13218_s8 + $0x2c8] sm:$0xf] }
 0x5ea   :  { %5085 = vmatpush.bf16.msra.mxu1 %v8891_v17  ;;  %5098 = vmatpush.bf16.msra.mxu2 %v9035_v35  ;;  %v8750_v17 = vld [vmem:[%s13218_s8 + $0x28] sm:$0xf]  ;;  %v10492_v35 = vld [vmem:[%s13218_s8 + $0x3ac] sm:$0xf0] }
 0x5eb   :  { %v9191_v25 = vor.u32 %v10492_v35, %v9190_v18  ;;  %v8751_v11 = vor.u32 %v10381_v62, %v8750_v17  ;;  %v10391_v62 = vld [vmem:[%s13218_s8 + $0x8c] sm:$0xf]  ;;  %v8800_v35 = vld [vmem:[%s13218_s8 + $0x98] sm:$0xf0] }
 0x5ed   :  { %5054 = vmatpush.bf16.msrb.mxu3 %v9191_v25  ;;  %v9126_v25 = vld [vmem:[%s13218_s8 + $0x320] sm:$0xf] }
 0x5ee   :  { %v4192_v23 = vpop.f32.mrf.mxu3  ;;  %5086 = vmatpush.bf16.msra.mxu1 %v8875_v26  ;;  %5099 = vmatpush.bf16.msra.mxu2 %v9019_v33  ;;  %v10377_v26 = vld [vmem:[%s13218_s8 + $0x14] sm:$0xf0]  ;;  %v8974_v33 = vld [vmem:[%s13218_s8 + $0x1e8] sm:$0xf] }
 0x5f2   :  { %5087 = vmatpush.bf16.msra.mxu1 %v8859_v12  ;;  %5100 = vmatpush.bf16.msra.mxu2 %v9003_v53  ;;  %v9158_v53 = vld [vmem:[%s13218_s8 + $0x360] sm:$0xf] }
 0x5f6   :  { %v4195_v21 = vpop.f32.mrf.mxu3  ;;  %5101 = vmatpush.bf16.msra.mxu2 %v8987_v19  ;;  %v9102_v19 = vld [vmem:[%s13218_s8 + $0x2e8] sm:$0xf] }
 0x5f7   :  { %v10744_v41 = vpack.i.bf16 %v4195_v21, %v4192_v23  ;;  %v8798_v21 = vld [vmem:[%s13218_s8 + $0x88] sm:$0xf] }
 0x5f8   :  { %v8799_v52 = vor.u32 %v10393_v49, %v8798_v21 }
 0x5f9   :  { %10745 = vrot.lane.b32.xlu0 %v10744_v41, %s11274_s7  ;;  %v3570_v41 = vpop.f32.mrf.mxu1 }
 0x601   :  { %v3573_v59 = vpop.f32.mrf.mxu1 }
 0x604   :  { %v10751_v63 = vpop.permute.xlu1 %10750 }
 0x605   :  { %v10753_v29 = vunpack.i.h.bf16 %v10751_v63  ;;  %v10752_v16 = vunpack.i.l.bf16 %v10751_v63  ;;  %v10403_v63 = vld [vmem:[%s13218_s8 + $0xec] sm:$0xf] }
 0x607   :  { %v4231_v4 = vsel %vm13260_vm1, %v3326_v42, %v10753_v29  ;;  %v4230_v23 = vsel %vm13261_vm11, %v3323_v40, %v10752_v16  ;;  %v10488_v29 = vld [vmem:[%s13218_s8 + $0x38c] sm:$0xf0]  ;;  %v10437_v42 = vld [vmem:[%s13218_s8 + $0x1f4] sm:$0xf0]  ;;  %vm13276_vm1 = vmmov %vm13270_vm0 }
 0x608   :  { %v12485_v14 = vpack.c.bf16 %v4231_v4, %v4230_v23  ;;  %v9175_v15 = vor.u32 %v10488_v29, %v9174_v47  ;;  %v8735_v23 = vor.u32 %v10377_v26, %v8734_v39  ;;  %v8975_v48 = vor.u32 %v10437_v42, %v8974_v33  ;;  %v8926_v26 = vld [vmem:[%s13218_s8 + $0x188] sm:$0xf]  ;;  %v10461_v47 = vld [vmem:[%s13218_s8 + $0x2b4] sm:$0xf0]  ;;  %v8784_v33 = vld [vmem:[%s13218_s8 + $0x78] sm:$0xf0] }
 0x609   :  { %v8803_v29 = vor.u32 %v10391_v62, %v8800_v35  ;;  %vm13277_vm11 = vmmov %vm13272_vm2 }
 0x60a   :  { %5018 = vmatmul.bf16.vlgmr.msrb.gmra.mxu0 %v12485_v14  ;;  %5055 = vmatpush.bf16.msrb.mxu3 %v9175_v15  ;;  %v8910_v15 = vld [vmem:[%s13218_s8 + $0x168] sm:$0xf] }
 0x60b   :  { %5122 = vmatpush.bf16.msrb.mxu0 %v8847_v32  ;;  %v8851_v32 = vor.u32 %v10403_v63, %v8848_v43  ;;  %v10425_v63 = vld [vmem:[%s13218_s8 + $0x194] sm:$0xf0]  ;;  %v9070_v43 = vld [vmem:[%s13218_s8 + $0x2a8] sm:$0xf] }
 0x60c   :  { %v8927_v42 = vor.u32 %v10425_v63, %v8926_v26  ;;  %v10435_v63 = vld [vmem:[%s13218_s8 + $0x1ec] sm:$0xf] }
 0x60f   :  { %5123 = vmatpush.bf16.msrb.mxu0 %v8831_v7  ;;  %v10484_v7 = vld [vmem:[%s13218_s8 + $0x36c] sm:$0xf0] }
 0x610   :  { %v9159_v51 = vor.u32 %v10484_v7, %v9158_v53 }
 0x612   :  { %5056 = vmatpush.bf16.msrb.mxu3 %v9159_v51  ;;  %v8768_v51 = vld [vmem:[%s13218_s8 + $0x58] sm:$0xf0] }
 0x613   :  { %5124 = vmatpush.bf16.msrb.mxu0 %v8815_v54  ;;  %v10469_v54 = vld [vmem:[%s13218_s8 + $0x2f4] sm:$0xf0] }
 0x614   :  { %v9103_v34 = vor.u32 %v10469_v54, %v9102_v19  ;;  %v8894_v19 = vld [vmem:[%s13218_s8 + $0x148] sm:$0xf] }
 0x616   :  { %5057 = vmatpush.bf16.msrb.mxu3 %v9143_v58  ;;  %v9192_v58 = vld [vmem:[%s13218_s8 + $0x3b0] sm:$0xf0] }
 0x617   :  { %5125 = vmatpush.bf16.msrb.mxu0 %v8799_v52  ;;  %v10395_v52 = vld [vmem:[%s13218_s8 + $0xac] sm:$0xf] }
 0x618   :  { %v8819_v17 = vor.u32 %v10395_v52, %v8816_v36  ;;  %v9038_v52 = vld [vmem:[%s13218_s8 + $0x268] sm:$0xf]  ;;  %v8771_v36 = vor.u32 %v10383_v13, %v8768_v51  ;;  %v9144_v13 = vld [vmem:[%s13218_s8 + $0x350] sm:$0xf0] }
 0x61a   :  { %5074 = vmatmul.bf16.vlgmr.msra.gmra.mxu0 %v12485_v14 }
 0x61b   :  { %5126 = vmatpush.bf16.msrb.mxu0 %v8783_v28 }
 0x61f   :  { %v10741_v40 = vpop.permute.xlu2 %10740  ;;  %5127 = vmatpush.bf16.msrb.mxu0 %v8767_v27  ;;  %v10465_v27 = vld [vmem:[%s13218_s8 + $0x2d4] sm:$0xf0] }
 0x620   :  { %v10743_v21 = vunpack.i.h.bf16 %v10741_v40  ;;  %v10742_v49 = vunpack.i.l.bf16 %v10741_v40  ;;  %v9087_v39 = vor.u32 %v10465_v27, %v9086_v38  ;;  %v9022_v38 = vld [vmem:[%s13218_s8 + $0x248] sm:$0xf]  ;;  %v10449_v27 = vld [vmem:[%s13218_s8 + $0x254] sm:$0xf0] }
 0x621   :  { %v9023_v26 = vor.u32 %v10449_v27, %v9022_v38 }
 0x623   :  { %v3817_v37 = vpop.f32.mrf.mxu1  ;;  %5128 = vmatpush.bf16.msrb.mxu0 %v8751_v11  ;;  %v10476_v11 = vld [vmem:[%s13218_s8 + $0x32c] sm:$0xf0] }
 0x624   :  { %v4234_v28 = vsel %vm13264_vm10, %v3817_v37, %v10742_v49  ;;  %v9127_v37 = vor.u32 %v10476_v11, %v9126_v25  ;;  %v10494_v49 = vld [vmem:[%s13218_s8 + $0x3c4] sm:$0xf]  ;;  %v8736_v25 = vld [vmem:[%s13218_s8 + $0x18] sm:$0xf0]  ;;  %v8862_v11 = vld [vmem:[%s13218_s8 + $0x108] sm:$0xf] }
 0x626   :  { %5058 = vmatpush.bf16.msrb.mxu3 %v9127_v37  ;;  %v10486_v37 = vld [vmem:[%s13218_s8 + $0x384] sm:$0xf] }
 0x627   :  { %v10756_v16 = vpop.permute.xlu2 %10755  ;;  %5129 = vmatpush.bf16.msrb.mxu0 %v8735_v23  ;;  %v9071_v23 = vor.u32 %v10461_v47, %v9070_v43  ;;  %v9176_v43 = vld [vmem:[%s13218_s8 + $0x390] sm:$0xf0]  ;;  %v8976_v47 = vld [vmem:[%s13218_s8 + $0x1f8] sm:$0xf0] }
 0x628   :  { %v10758_v2 = vunpack.i.h.bf16 %v10756_v16  ;;  %v10757_v4 = vunpack.i.l.bf16 %v10756_v16  ;;  %v10387_v16 = vld [vmem:[%s13218_s8 + $0x6c] sm:$0xf] }
 0x629   :  { %v8787_v7 = vor.u32 %v10387_v16, %v8784_v33  ;;  %v10445_v16 = vld [vmem:[%s13218_s8 + $0x234] sm:$0xf0]  ;;  %v9179_v33 = vor.u32 %v10486_v37, %v9176_v43  ;;  %v10451_v37 = vld [vmem:[%s13218_s8 + $0x26c] sm:$0xf]  ;;  %v9040_v43 = vld [vmem:[%s13218_s8 + $0x278] sm:$0xf0] }
 0x62a   :  { %v4232_v12 = vsel %vm13262_vm8, %v3570_v41, %v10757_v4  ;;  %v4233_v20 = vsel %vm13263_vm9, %v3573_v59, %v10758_v2  ;;  %v8835_v41 = vor.u32 %v10399_v57, %v8832_v56  ;;  %5130 = vmatmul.bf16.vlgmr.msrb.gmra.mxu0 %v12485_v14  ;;  %v8942_v59 = vld [vmem:[%s13218_s8 + $0x1a8] sm:$0xf]  ;;  %v9110_v2 = vld [vmem:[%s13218_s8 + $0x300] sm:$0xf]  ;;  %v10472_v4 = vld [vmem:[%s13218_s8 + $0x30c] sm:$0xf0] }
 0x62b   :  { %v12590_v22 = vpack.c.bf16 %v4233_v20, %v4232_v12  ;;  %5178 = vmatpush.bf16.msra.mxu0 %v8851_v32  ;;  %v3820_v8 = vpop.f32.mrf.mxu1  ;;  %v8943_v18 = vor.u32 %v10429_v5, %v8942_v59  ;;  %v10421_v32 = vld [vmem:[%s13218_s8 + $0x174] sm:$0xf0]  ;;  %v9111_v57 = vor.u32 %v10472_v4, %v9110_v2  ;;  %v10498_v12 = vld [vmem:[%s13218_s8 + $0x3e4] sm:$0xf]  ;;  %v9224_v20 = vld [vmem:[%s13218_s8 + $0x3f0] sm:$0xf0]  ;;  %v8979_v2 = vor.u32 %v10435_v63, %v8976_v47 }
 0x62c   :  { %v4235_v31 = vsel %vm13265_vm12, %v3820_v8, %v10743_v21  ;;  %v10457_v56 = vld [vmem:[%s13218_s8 + $0x294] sm:$0xf0]  ;;  %v9227_v53 = vor.u32 %v10498_v12, %v9224_v20  ;;  %v8911_v3 = vor.u32 %v10421_v32, %v8910_v15  ;;  %v10490_v5 = vld [vmem:[%s13218_s8 + $0x3a4] sm:$0xf]  ;;  %v8960_v12 = vld [vmem:[%s13218_s8 + $0x1d8] sm:$0xf0] }
 0x62d   :  { %5032 = vmatmul.bf16.vlgmr.msrb.gmra.mxu1 %v12590_v22  ;;  %v12626_v40 = vpack.c.bf16 %v4235_v31, %v4234_v28  ;;  %v10417_v21 = vld [vmem:[%s13218_s8 + $0x154] sm:$0xf0]  ;;  %5059 = vmatpush.bf16.msrb.mxu3 %v9111_v57  ;;  %v8752_v28 = vld [vmem:[%s13218_s8 + $0x38] sm:$0xf0]  ;;  %v8878_v31 = vld [vmem:[%s13218_s8 + $0x128] sm:$0xf] }
 0x62e   :  { %5136 = vmatpush.bf16.msrb.mxu1 %v8975_v48  ;;  %v9054_v48 = vld [vmem:[%s13218_s8 + $0x288] sm:$0xf]  ;;  %v10453_v8 = vld [vmem:[%s13218_s8 + $0x274] sm:$0xf0]  ;;  %v8895_v50 = vor.u32 %v10417_v21, %v8894_v19  ;;  %v8755_v62 = vor.u32 %v10379_v24, %v8752_v28  ;;  %v10482_v32 = vld [vmem:[%s13218_s8 + $0x364] sm:$0xf] }
 0x62f   :  { %5179 = vmatpush.bf16.msra.mxu0 %v8835_v41  ;;  %5046 = vmatmul.bf16.vlgmr.msrb.gmra.mxu2 %v12626_v40  ;;  %v9055_v54 = vor.u32 %v10457_v56, %v9054_v48  ;;  %v9208_v41 = vld [vmem:[%s13218_s8 + $0x3d0] sm:$0xf0]  ;;  %v10413_v59 = vld [vmem:[%s13218_s8 + $0x134] sm:$0xf0]  ;;  %v8990_v20 = vld [vmem:[%s13218_s8 + $0x208] sm:$0xf] }
 0x630   :  { %5150 = vmatpush.bf16.msrb.mxu2 %v9103_v34  ;;  %v9039_v34 = vor.u32 %v10453_v8, %v9038_v52  ;;  %v8879_v35 = vor.u32 %v10413_v59, %v8878_v31  ;;  %v9160_v57 = vld [vmem:[%s13218_s8 + $0x370] sm:$0xf0]  ;;  %v10441_v48 = vld [vmem:[%s13218_s8 + $0x214] sm:$0xf0]  ;;  %v10427_v21 = vld [vmem:[%s13218_s8 + $0x1ac] sm:$0xf] }
 0x631   :  { %5108 = vmatpush.bf16.msra.mxu3 %v9227_v53  ;;  %v9163_v56 = vor.u32 %v10482_v32, %v9160_v57  ;;  %v10467_v53 = vld [vmem:[%s13218_s8 + $0x2ec] sm:$0xf]  ;;  %v8991_v19 = vor.u32 %v10441_v48, %v8990_v20  ;;  %v8928_v28 = vld [vmem:[%s13218_s8 + $0x198] sm:$0xf0] }
 0x632   :  { %5137 = vmatpush.bf16.msrb.mxu1 %v8959_v55  ;;  %v9211_v55 = vor.u32 %v10494_v49, %v9208_v41  ;;  %v8944_v49 = vld [vmem:[%s13218_s8 + $0x1b8] sm:$0xf0]  ;;  %v10463_v52 = vld [vmem:[%s13218_s8 + $0x2cc] sm:$0xf] }
 0x633   :  { %5180 = vmatpush.bf16.msra.mxu0 %v8819_v17  ;;  %v9195_v17 = vor.u32 %v10490_v5, %v9192_v58  ;;  %v8947_v8 = vor.u32 %v10427_v21, %v8944_v49  ;;  %v10423_v24 = vld [vmem:[%s13218_s8 + $0x18c] sm:$0xf]  ;;  %v9072_v59 = vld [vmem:[%s13218_s8 + $0x2b8] sm:$0xf0]  ;;  %v10470_v5 = vld [vmem:[%s13218_s8 + $0x304] sm:$0xf] }
 0x634   :  { %5151 = vmatpush.bf16.msrb.mxu2 %v9087_v39  ;;  %v10409_v39 = vld [vmem:[%s13218_s8 + $0x114] sm:$0xf0]  ;;  %v9112_v58 = vld [vmem:[%s13218_s8 + $0x310] sm:$0xf0]  ;;  %v8931_v38 = vor.u32 %v10423_v24, %v8928_v28  ;;  %v8896_v63 = vld [vmem:[%s13218_s8 + $0x158] sm:$0xf0] }
 0x635   :  { %5109 = vmatpush.bf16.msra.mxu3 %v9211_v55  ;;  %v8863_v15 = vor.u32 %v10409_v39, %v8862_v11  ;;  %v10474_v55 = vld [vmem:[%s13218_s8 + $0x324] sm:$0xf]  ;;  %v8864_v32 = vld [vmem:[%s13218_s8 + $0x118] sm:$0xf0]  ;;  %v10443_v57 = vld [vmem:[%s13218_s8 + $0x22c] sm:$0xf] }
 0x636   :  { %5138 = vmatpush.bf16.msrb.mxu1 %v8943_v18  ;;  %v10375_v18 = vld [vmem:[%s13218_s8 + $0xc] sm:$0xf]  ;;  %v9182_v28 = vld [vmem:[%s13218_s8 + $0x388] sm:$0xf] }
 0x637   :  { %5181 = vmatpush.bf16.msra.mxu0 %v8803_v29  ;;  %v9006_v29 = vld [vmem:[%s13218_s8 + $0x228] sm:$0xf] }
 0x638   :  { %5152 = vmatpush.bf16.msrb.mxu2 %v9071_v23  ;;  %v9007_v4 = vor.u32 %v10445_v16, %v9006_v29  ;;  %v10431_v23 = vld [vmem:[%s13218_s8 + $0x1cc] sm:$0xf]  ;;  %v9043_v29 = vor.u32 %v10451_v37, %v9040_v43 }
 0x639   :  { %5110 = vmatpush.bf16.msra.mxu3 %v9195_v17  ;;  %v8963_v51 = vor.u32 %v10431_v23, %v8960_v12  ;;  %v10419_v17 = vld [vmem:[%s13218_s8 + $0x16c] sm:$0xf]  ;;  %v9008_v12 = vld [vmem:[%s13218_s8 + $0x238] sm:$0xf0] }
 0x63a   :  { %5139 = vmatpush.bf16.msrb.mxu1 %v8927_v42  ;;  %v8739_v42 = vor.u32 %v10375_v18, %v8736_v25  ;;  %v9115_v18 = vor.u32 %v10470_v5, %v9112_v58  ;;  %v9056_v25 = vld [vmem:[%s13218_s8 + $0x298] sm:$0xf0]  ;;  %v10411_v16 = vld [vmem:[%s13218_s8 + $0x12c] sm:$0xf]  ;;  %v9011_v48 = vor.u32 %v10443_v57, %v9008_v12  ;;  %v10485_v5 = vld [vmem:[%s13218_s8 + $0x374] sm:$0xf0] }
 0x63b   :  { %5182 = vmatpush.bf16.msra.mxu0 %v8787_v7  ;;  %v9104_v7 = vld [vmem:[%s13218_s8 + $0x2f8] sm:$0xf0]  ;;  %v10407_v23 = vld [vmem:[%s13218_s8 + $0x10c] sm:$0xf] }
 0x63c   :  { %5153 = vmatpush.bf16.msrb.mxu2 %v9055_v54  ;;  %v9107_v54 = vor.u32 %v10467_v53, %v9104_v7  ;;  %v8867_v20 = vor.u32 %v10407_v23, %v8864_v32  ;;  %v8992_v53 = vld [vmem:[%s13218_s8 + $0x218] sm:$0xf0]  ;;  %v4064_v7 = vpop.f32.mrf.mxu1  ;;  %v10495_v43 = vld [vmem:[%s13218_s8 + $0x3cc] sm:$0xf] }
 0x63d   :  { %5088 = vmatmul.bf16.vlgmr.msra.gmra.mxu1 %v12590_v22  ;;  %5111 = vmatpush.bf16.msra.mxu3 %v9179_v33  ;;  %v8880_v33 = vld [vmem:[%s13218_s8 + $0x138] sm:$0xf0]  ;;  %v10483_v23 = vld [vmem:[%s13218_s8 + $0x36c] sm:$0xf] }
 0x63e   :  { %5140 = vmatpush.bf16.msrb.mxu1 %v8911_v3  ;;  %v10478_v3 = vld [vmem:[%s13218_s8 + $0x344] sm:$0xf]  ;;  %v9168_v32 = vld [vmem:[%s13218_s8 + $0x378] sm:$0xf0]  ;;  %v10479_v12 = vld [vmem:[%s13218_s8 + $0x34c] sm:$0xf] }
 0x63f   :  { %5183 = vmatpush.bf16.msra.mxu0 %v8771_v36  ;;  %5102 = vmatmul.bf16.vlgmr.msra.gmra.mxu2 %v12626_v40  ;;  %v9147_v41 = vor.u32 %v10478_v3, %v9144_v13  ;;  %v9128_v36 = vld [vmem:[%s13218_s8 + $0x330] sm:$0xf0]  ;;  %v9171_v57 = vor.u32 %v10483_v23, %v9168_v32 }
 0x640   :  { %5154 = vmatpush.bf16.msrb.mxu2 %v9039_v34  ;;  %v9131_v31 = vor.u32 %v10474_v55, %v9128_v36  ;;  %v10459_v34 = vld [vmem:[%s13218_s8 + $0x2ac] sm:$0xf]  ;;  %v10497_v55 = vld [vmem:[%s13218_s8 + $0x3d4] sm:$0xf0]  ;;  %v9198_v36 = vld [vmem:[%s13218_s8 + $0x3a8] sm:$0xf] }
 0x641   :  { %5112 = vmatpush.bf16.msra.mxu3 %v9163_v56  ;;  %v9075_v27 = vor.u32 %v10459_v34, %v9072_v59  ;;  %v10439_v56 = vld [vmem:[%s13218_s8 + $0x20c] sm:$0xf]  ;;  %v9166_v59 = vld [vmem:[%s13218_s8 + $0x368] sm:$0xf] }
 0x642   :  { %5141 = vmatpush.bf16.msrb.mxu1 %v8895_v50  ;;  %v8995_v3 = vor.u32 %v10439_v56, %v8992_v53  ;;  %v9167_v58 = vor.u32 %v10485_v5, %v9166_v59  ;;  %v10475_v56 = vld [vmem:[%s13218_s8 + $0x32c] sm:$0xf]  ;;  %v9136_v53 = vld [vmem:[%s13218_s8 + $0x338] sm:$0xf0] }
 0x643   :  { %5184 = vmatpush.bf16.msra.mxu0 %v8755_v62  ;;  %v8912_v62 = vld [vmem:[%s13218_s8 + $0x178] sm:$0xf0] }
 0x644   :  { %5155 = vmatpush.bf16.msrb.mxu2 %v9023_v26  ;;  %v8915_v11 = vor.u32 %v10419_v17, %v8912_v62  ;;  %v10415_v26 = vld [vmem:[%s13218_s8 + $0x14c] sm:$0xf]  ;;  %v4067_v49 = vpop.f32.mrf.mxu1  ;;  %v9134_v62 = vld [vmem:[%s13218_s8 + $0x328] sm:$0xf] }
 0x645   :  { %5113 = vmatpush.bf16.msra.mxu3 %v9147_v41  ;;  %v8899_v47 = vor.u32 %v10415_v26, %v8896_v63  ;;  %v9232_v26 = vld [vmem:[%s13218_s8 + $0x3f8] sm:$0xf0] }
 0x646   :  { %5142 = vmatpush.bf16.msrb.mxu1 %v8879_v35  ;;  %v10455_v35 = vld [vmem:[%s13218_s8 + $0x28c] sm:$0xf] }
 0x647   :  { %5185 = vmatpush.bf16.msra.mxu0 %v8739_v42  ;;  %v9059_v39 = vor.u32 %v10455_v35, %v9056_v25  ;;  %v10447_v42 = vld [vmem:[%s13218_s8 + $0x24c] sm:$0xf]  ;;  %v9118_v25 = vld [vmem:[%s13218_s8 + $0x308] sm:$0xf] }
 0x648   :  { %5156 = vmatpush.bf16.msrb.mxu2 %v9007_v4 }
 0x649   :  { %5114 = vmatpush.bf16.msra.mxu3 %v9131_v31  ;;  %v10489_v31 = vld [vmem:[%s13218_s8 + $0x394] sm:$0xf0] }
 0x64a   :  { %5143 = vmatpush.bf16.msrb.mxu1 %v8863_v15  ;;  %5186 = vmatmul.bf16.vlgmr.msra.gmra.mxu0 %v12485_v14  ;;  %v9088_v14 = vld [vmem:[%s13218_s8 + $0x2d8] sm:$0xf0]  ;;  %v9183_v34 = vor.u32 %v10489_v31, %v9182_v28 }
 0x64b   :  { %v9091_v50 = vor.u32 %v10463_v52, %v9088_v14  ;;  %v9024_v15 = vld [vmem:[%s13218_s8 + $0x258] sm:$0xf0] }
 0x64c   :  { %5157 = vmatpush.bf16.msrb.mxu2 %v8991_v19  ;;  %v9027_v4 = vor.u32 %v10447_v42, %v9024_v15  ;;  %v10501_v19 = vld [vmem:[%s13218_s8 + $0x3f4] sm:$0xf0]  ;;  %v10487_v15 = vld [vmem:[%s13218_s8 + $0x38c] sm:$0xf] }
 0x64d   :  { %5144 = vmatmul.bf16.vlgmr.msrb.gmra.mxu1 %v12590_v22  ;;  %5115 = vmatpush.bf16.msra.mxu3 %v9115_v18  ;;  %v10477_v18 = vld [vmem:[%s13218_s8 + $0x334] sm:$0xf0] }
 0x64e   :  { %5192 = vmatpush.bf16.msra.mxu1 %v8979_v2  ;;  %v8883_v2 = vor.u32 %v10411_v16, %v8880_v33  ;;  %v9135_v35 = vor.u32 %v10477_v18, %v9134_v62  ;;  %v10491_v16 = vld [vmem:[%s13218_s8 + $0x3ac] sm:$0xf]  ;;  %v9200_v33 = vld [vmem:[%s13218_s8 + $0x3b8] sm:$0xf0] }
 0x64f   :  { %5158 = vmatmul.bf16.vlgmr.msrb.gmra.mxu2 %v12626_v40  ;;  %v9203_v42 = vor.u32 %v10491_v16, %v9200_v33 }
 0x650   :  { %5206 = vmatpush.bf16.msra.mxu2 %v9107_v54 }
 0x652   :  { %5193 = vmatpush.bf16.msra.mxu1 %v8963_v51  ;;  %v9230_v51 = vld [vmem:[%s13218_s8 + $0x3e8] sm:$0xf] }
 0x654   :  { %5207 = vmatpush.bf16.msra.mxu2 %v9091_v50  ;;  %v10493_v50 = vld [vmem:[%s13218_s8 + $0x3b4] sm:$0xf0] }
 0x655   :  { %v9199_v24 = vor.u32 %v10493_v50, %v9198_v36 }
 0x656   :  { %5194 = vmatpush.bf16.msra.mxu1 %v8947_v8  ;;  %v9214_v8 = vld [vmem:[%s13218_s8 + $0x3c8] sm:$0xf] }
 0x658   :  { %5208 = vmatpush.bf16.msra.mxu2 %v9075_v27  ;;  %v10481_v27 = vld [vmem:[%s13218_s8 + $0x354] sm:$0xf0] }
 0x65a   :  { %5195 = vmatpush.bf16.msra.mxu1 %v8931_v38  ;;  %v9150_v38 = vld [vmem:[%s13218_s8 + $0x348] sm:$0xf] }
 0x65b   :  { %v9151_v17 = vor.u32 %v10481_v27, %v9150_v38 }
 0x65c   :  { %5209 = vmatpush.bf16.msra.mxu2 %v9059_v39  ;;  %v10499_v39 = vld [vmem:[%s13218_s8 + $0x3ec] sm:$0xf] }
 0x65d   :  { %v9235_v37 = vor.u32 %v10499_v39, %v9232_v26 }
 0x65e   :  { %5196 = vmatpush.bf16.msra.mxu1 %v8915_v11  ;;  %v10473_v11 = vld [vmem:[%s13218_s8 + $0x314] sm:$0xf0] }
 0x65f   :  { %v9119_v63 = vor.u32 %v10473_v11, %v9118_v25 }
 0x660   :  { %5210 = vmatpush.bf16.msra.mxu2 %v9043_v29 }
 0x662   :  { %5197 = vmatpush.bf16.msra.mxu1 %v8899_v47  ;;  %v9216_v47 = vld [vmem:[%s13218_s8 + $0x3d8] sm:$0xf0] }
 0x663   :  { %v9219_v29 = vor.u32 %v10495_v43, %v9216_v47 }
 0x664   :  { %5211 = vmatpush.bf16.msra.mxu2 %v9027_v4 }
 0x666   :  { %5198 = vmatpush.bf16.msra.mxu1 %v8883_v2  ;;  %v9184_v2 = vld [vmem:[%s13218_s8 + $0x398] sm:$0xf0] }
 0x667   :  { %v9187_v4 = vor.u32 %v10487_v15, %v9184_v2 }
 0x668   :  { %5212 = vmatpush.bf16.msra.mxu2 %v9011_v48 }
 0x66a   :  { %5199 = vmatpush.bf16.msra.mxu1 %v8867_v20  ;;  %v9152_v20 = vld [vmem:[%s13218_s8 + $0x358] sm:$0xf0] }
 0x66b   :  { %v10746_v13 = vpop.permute.xlu0 %10745  ;;  %v9155_v48 = vor.u32 %v10479_v12, %v9152_v20 }
 0x66c   :  { %5213 = vmatpush.bf16.msra.mxu2 %v8995_v3  ;;  %v10748_v54 = vunpack.i.h.bf16 %v10746_v13  ;;  %v10747_v21 = vunpack.i.l.bf16 %v10746_v13  ;;  %v10471_v3 = vld [vmem:[%s13218_s8 + $0x30c] sm:$0xf]  ;;  %v9120_v13 = vld [vmem:[%s13218_s8 + $0x318] sm:$0xf0] }
 0x66d   :  { %5200 = vmatmul.bf16.vlgmr.msra.gmra.mxu1 %v12590_v22  ;;  %v9231_v22 = vor.u32 %v10501_v19, %v9230_v51  ;;  %v9123_v51 = vor.u32 %v10471_v3, %v9120_v13 }
 0x66e   :  { %v4237_v41 = vsel %vm13266_vm13, %v4067_v49, %v10748_v54  ;;  %v4236_v52 = vsel %vm13267_vm14, %v4064_v7, %v10747_v21  ;;  %v9139_v7 = vor.u32 %v10475_v56, %v9136_v53 }
 0x66f   :  { %5214 = vmatmul.bf16.vlgmr.msra.gmra.mxu2 %v12626_v40  ;;  %v12902_v14 = vpack.c.bf16 %v4237_v41, %v4236_v52  ;;  %v9215_v40 = vor.u32 %v10497_v55, %v9214_v8 }
 0x671   :  { %5060 = vmatmul.bf16.vlgmr.msrb.gmra.mxu3 %v12902_v14 }
 0x672   :  { %5164 = vmatpush.bf16.msrb.mxu3 %v9231_v22 }
 0x676   :  { %5165 = vmatpush.bf16.msrb.mxu3 %v9215_v40 }
 0x67a   :  { %5166 = vmatpush.bf16.msrb.mxu3 %v9199_v24 }
 0x67e   :  { %5167 = vmatpush.bf16.msrb.mxu3 %v9183_v34 }
 0x681   :  { %5116 = vmatmul.bf16.vlgmr.msra.gmra.mxu3 %v12902_v14 }
 0x682   :  { %5168 = vmatpush.bf16.msrb.mxu3 %v9167_v58 }
 0x686   :  { %5169 = vmatpush.bf16.msrb.mxu3 %v9151_v17 }
 0x687   :  { %v5019_v54 = vpop.f32.mrf.mxu0 }
 0x68a   :  { %5170 = vmatpush.bf16.msrb.mxu3 %v9135_v35 }
 0x68e   :  { %5171 = vmatpush.bf16.msrb.mxu3 %v9119_v63 }
 0x68f   :  { %v5021_v52 = vpop.f32.mrf.mxu0 }
 0x691   :  { %5172 = vmatmul.bf16.vlgmr.msrb.gmra.mxu3 %v12902_v14 }
 0x692   :  { %5220 = vmatpush.bf16.msra.mxu3 %v9235_v37 }
 0x696   :  { %5221 = vmatpush.bf16.msra.mxu3 %v9219_v29 }
 0x697   :  { %v5075_v40 = vpop.f32.mrf.mxu0 }
 0x69a   :  { %5222 = vmatpush.bf16.msra.mxu3 %v9203_v42 }
 0x69e   :  { %5223 = vmatpush.bf16.msra.mxu3 %v9187_v4  ;;  %v5242_v4 = vld [vmem:[#allocation15] sm:$0xf] }
 0x69f   :  { %v5077_v28 = vpop.f32.mrf.mxu0  ;;  %v5245_v32 = vperm.slane %v5242_v4, 1  ;;  %v5244_v53 = vperm.slane %v5242_v4, 0  ;;  %v5246_v3 = vperm.slane %v5242_v4, 2 }
 0x6a2   :  { %5224 = vmatpush.bf16.msra.mxu3 %v9171_v57 }
 0x6a6   :  { %5225 = vmatpush.bf16.msra.mxu3 %v9155_v48 }
 0x6a7   :  { %v5131_v5 = vpop.f32.mrf.mxu0 }
 0x6aa   :  { %5226 = vmatpush.bf16.msra.mxu3 %v9139_v7  ;;  %v5033_v19 = vpop.f32.mrf.mxu1 }
 0x6ab   :  { %v5034_v18 = vadd.f32 %v5033_v19, %v5019_v54 }
 0x6ae   :  { %5227 = vmatpush.bf16.msra.mxu3 %v9123_v51 }
 0x6af   :  { %v5133_v27 = vpop.f32.mrf.mxu0 }
 0x6b1   :  { %5228 = vmatmul.bf16.vlgmr.msra.gmra.mxu3 %v12902_v14 }
 0x6b2   :  { %v5047_v21 = vpop.f32.mrf.mxu2  ;;  %v5035_v41 = vpop.f32.mrf.mxu1 }
 0x6b3   :  { %v5048_v11 = vadd.f32 %v5047_v21, %v5034_v18  ;;  %v5036_v42 = vadd.f32 %v5035_v41, %v5021_v52  ;;  %v5247_v41 = vperm.slane %v5242_v4, 3 }
 0x6ba   :  { %v5049_v22 = vpop.f32.mrf.mxu2  ;;  %v5089_v55 = vpop.f32.mrf.mxu1 }
 0x6bb   :  { %v5090_v62 = vadd.f32 %v5089_v55, %v5075_v40  ;;  %v5050_v57 = vadd.f32 %v5049_v22, %v5036_v42 }
 0x6c2   :  { %v5103_v36 = vpop.f32.mrf.mxu2  ;;  %v5091_v24 = vpop.f32.mrf.mxu1 }
 0x6c3   :  { %v5104_v35 = vadd.f32 %v5103_v36, %v5090_v62  ;;  %v5092_v43 = vadd.f32 %v5091_v24, %v5077_v28 }
 0x6c7   :  { %v5187_v47 = vpop.f32.mrf.mxu0 }
 0x6ca   :  { %v5105_v31 = vpop.f32.mrf.mxu2  ;;  %v5145_v59 = vpop.f32.mrf.mxu1 }
 0x6cb   :  { %v5146_v25 = vadd.f32 %v5145_v59, %v5131_v5  ;;  %v5106_v15 = vadd.f32 %v5105_v31, %v5092_v43  ;;  %v10533_v43 = vld [vmem:[#allocation19 + $0xf4] sm:$0xf0] }
 0x6d2   :  { %v5159_v58 = vpop.f32.mrf.mxu2  ;;  %v5147_v38 = vpop.f32.mrf.mxu1 }
 0x6d3   :  { %v5160_v39 = vadd.f32 %v5159_v58, %v5146_v25  ;;  %v5148_v2 = vadd.f32 %v5147_v38, %v5133_v27 }
 0x6da   :  { %v5161_v17 = vpop.f32.mrf.mxu2 }
 0x6db   :  { %v5162_v12 = vadd.f32 %v5161_v17, %v5148_v2 }
 0x6ea   :  { %v5201_v26 = vpop.f32.mrf.mxu1 }
 0x6eb   :  { %v5202_v20 = vadd.f32 %v5201_v26, %v5187_v47  ;;  %v10517_v26 = vld [vmem:[#allocation19 + $0x74] sm:$0xf0]  ;;  %v9286_v47 = vld [vmem:[#allocation19 + $0x60] sm:$0xf] }
 0x6f2   :  { %v5215_v29 = vpop.f32.mrf.mxu2  ;;  %v5203_v52 = vpop.f32.mrf.mxu1 }
 0x6f3   :  { %v5216_v13 = vadd.f32 %v5215_v29, %v5202_v20  ;;  %v10515_v29 = vld [vmem:[#allocation19 + $0x64] sm:$0xf0] }
 0x6f4   :  { %v5061_v49 = vpop.f32.mrf.mxu3  ;;  %v9287_v42 = vor.u32 %v10515_v29, %v9286_v47  ;;  %v10525_v47 = vld [vmem:[#allocation19 + $0xb4] sm:$0xf0]  ;;  %v9414_v29 = vld [vmem:[#allocation19 + $0x160] sm:$0xf] }
 0x6f5   :  { %v5062_v16 = vadd.f32 %v5061_v49, %v5048_v11 }
 0x6f7   :  { %v5234_v56 = vadd.f32 %v5062_v16, %v11635_v0 }
 0x6f9   :  { %v13004_v22 = vadd.f32 %v5244_v53, %v5234_v56 }
 0x6fa   :  { %v5217_v36 = vpop.f32.mrf.mxu2 }
 0x6fc   :  { %v5063_v8 = vpop.f32.mrf.mxu3 }
 0x6fd   :  { %v5064_v51 = vadd.f32 %v5063_v8, %v5050_v57  ;;  %v5189_v8 = vpop.f32.mrf.mxu0 }
 0x6fe   :  { %v5204_v24 = vadd.f32 %v5203_v52, %v5189_v8 }
 0x6ff   :  { %v5238_v0 = vadd.f32 %v5064_v51, %v11619_v44 }
 0x701   :  { %v5256_v59 = vadd.f32 %v5244_v53, %v5238_v0 }
 0x703   :  { %v5268_v27 = vsel %vm13270_vm0, %v5256_v59, 0.0  ;;  %vm13280_vm0 = vcmask 1043456  }
 0x704   :  { %v5117_v50 = vpop.f32.mrf.mxu3 }
 0x705   :  { %v5118_v63 = vadd.f32 %v5117_v50, %v5104_v35 }
 0x707   :  { %v5235_v23 = vadd.f32 %v5118_v63, %v11639_v1  ;;  %v9358_v63 = vld [vmem:[#allocation19 + $0xf0] sm:$0xf] }
 0x708   :  { %v9359_v16 = vor.u32 %v10533_v43, %v9358_v63  ;;  %v10509_v63 = vld [vmem:[#allocation19 + $0x34] sm:$0xf0] }
 0x709   :  { %v13001_v54 = vadd.f32 %v5245_v32, %v5235_v23 }
 0x70a   :  { %5703 = vmatpush.bf16.msrb.mxu1 %v9359_v16  ;;  %v10547_v16 = vld [vmem:[#allocation19 + $0x164] sm:$0xf0] }
 0x70b   :  { %v5262_v50 = vadd.f32 %v13001_v54, %v13004_v22 }
 0x70c   :  { %v5119_v34 = vpop.f32.mrf.mxu3 }
 0x70d   :  { %v5120_v48 = vadd.f32 %v5119_v34, %v5106_v15  ;;  %v5218_v34 = vadd.f32 %v5217_v36, %v5204_v24 }
 0x70f   :  { %v5239_v49 = vadd.f32 %v5120_v48, %v11621_v45 }
 0x711   :  { %v5257_v45 = vadd.f32 %v5245_v32, %v5239_v49 }
 0x714   :  { %v5173_v14 = vpop.f32.mrf.mxu3 }
 0x715   :  { %v5174_v33 = vadd.f32 %v5173_v14, %v5160_v39  ;;  %v5269_v14 = vsel %vm13269_vm4, %v5257_v45, 0.0  ;;  %v9294_v39 = vld [vmem:[#allocation19 + $0x70] sm:$0xf]  ;;  %vm13279_vm4 = vmmov %vm13273_vm3 }
 0x716   :  { %v5270_v62 = vadd.f32 %v5269_v14, %v5268_v27  ;;  %v10511_v27 = vld [vmem:[#allocation19 + $0x44] sm:$0xf0] }
 0x717   :  { %v5236_v7 = vadd.f32 %v5174_v33, %v11647_v9  ;;  %v10531_v33 = vld [vmem:[#allocation19 + $0xe4] sm:$0xf0] }
 0x719   :  { %v13006_v55 = vadd.f32 %v5246_v3, %v5236_v7 }
 0x71b   :  { %v5263_v31 = vadd.f32 %v5262_v50, %v13006_v55 }
 0x71c   :  { %v5175_v37 = vpop.f32.mrf.mxu3 }
 0x71d   :  { %v5176_v19 = vadd.f32 %v5175_v37, %v5162_v12  ;;  %v9295_v37 = vor.u32 %v10517_v26, %v9294_v39  ;;  %v9262_v26 = vld [vmem:[#allocation19 + $0x30] sm:$0xf] }
 0x71e   :  { %v9263_v43 = vor.u32 %v10509_v63, %v9262_v26  ;;  %v10539_v26 = vld [vmem:[#allocation19 + $0x124] sm:$0xf0]  ;;  %v10514_v63 = vld [vmem:[#allocation19 + $0x64] sm:$0xf] }
 0x71f   :  { %v5240_v9 = vadd.f32 %v5176_v19, %v11627_v60  ;;  %5689 = vmatpush.bf16.msrb.mxu0 %v9295_v37  ;;  %v9326_v37 = vld [vmem:[#allocation19 + $0xb0] sm:$0xf] }
 0x721   :  { %v5258_v5 = vadd.f32 %v5246_v3, %v5240_v9 }
 0x723   :  { %v5271_v17 = vsel %vm13271_vm6, %v5258_v5, 0.0  ;;  %5690 = vmatpush.bf16.msrb.mxu0 %v9287_v42  ;;  %v9254_v42 = vld [vmem:[#allocation19 + $0x20] sm:$0xf]  ;;  %vm13281_vm6 = vmmov %vm13280_vm0 }
 0x724   :  { %v5272_v35 = vadd.f32 %v5271_v17, %v5270_v62  ;;  %v9334_v17 = vld [vmem:[#allocation19 + $0xc0] sm:$0xf] }
 0x734   :  { %v5229_v21 = vpop.f32.mrf.mxu3 }
 0x735   :  { %v5230_v1 = vadd.f32 %v5229_v21, %v5216_v13 }
 0x737   :  { %v5237_v40 = vadd.f32 %v5230_v1, %v11651_v10 }
 0x739   :  { %v13013_v28 = vadd.f32 %v5247_v41, %v5237_v40 }
 0x73b   :  { %v5264_v44 = vsel %vm13268_vm15, %v13013_v28, 0.0  ;;  %vm13278_vm15 = vmmov %vm13273_vm3 }
 0x73c   :  { %v5231_v60 = vpop.f32.mrf.mxu3  ;;  %v5265_v58 = vadd.f32 %v5264_v44, %v5263_v31  ;;  %v10513_v44 = vld [vmem:[#allocation19 + $0x54] sm:$0xf0] }
 0x73d   :  { %v5232_v10 = vadd.f32 %v5231_v60, %v5218_v34  ;;  %v9342_v60 = vld [vmem:[#allocation19 + $0xd0] sm:$0xf] }
 0x73e   :  { %5266 = vadd.xlane.f32.xlu2 %v5265_v58 }
 0x73f   :  { %v5241_v38 = vadd.f32 %v5232_v10, %v11629_v61  ;;  %v9350_v61 = vld [vmem:[#allocation19 + $0xe0] sm:$0xf]  ;;  %v10529_v10 = vld [vmem:[#allocation19 + $0xd4] sm:$0xf0] }
 0x740   :  { %v9351_v15 = vor.u32 %v10531_v33, %v9350_v61  ;;  %v9343_v14 = vor.u32 %v10529_v10, %v9342_v60  ;;  %v9327_v61 = vor.u32 %v10525_v47, %v9326_v37  ;;  %v9415_v33 = vor.u32 %v10547_v16, %v9414_v29  ;;  %v9390_v60 = vld [vmem:[#allocation19 + $0x130] sm:$0xf]  ;;  %v10516_v10 = vld [vmem:[#allocation19 + $0x74] sm:$0xf]  ;;  %v10530_v47 = vld [vmem:[#allocation19 + $0xe4] sm:$0xf] }
 0x741   :  { %v5259_v18 = vadd.f32 %v5247_v41, %v5241_v38  ;;  %v9270_v38 = vld [vmem:[#allocation19 + $0x40] sm:$0xf]  ;;  %v9352_v29 = vld [vmem:[#allocation19 + $0xe8] sm:$0xf0] }
 0x742   :  { %5704 = vmatpush.bf16.msrb.mxu1 %v9351_v15  ;;  %v9271_v62 = vor.u32 %v10511_v27, %v9270_v38  ;;  %v10507_v15 = vld [vmem:[#allocation19 + $0x24] sm:$0xf0]  ;;  %v9296_v38 = vld [vmem:[#allocation19 + $0x78] sm:$0xf0]  ;;  %v10532_v27 = vld [vmem:[#allocation19 + $0xf4] sm:$0xf] }
 0x743   :  { %v5273_v25 = vsel %vm13272_vm2, %v5259_v18, 0.0  ;;  %vm13282_vm2 = vmmov %vm13280_vm0 }
 0x744   :  { %v5274_v11 = vadd.f32 %v5273_v25, %v5272_v35  ;;  %v9422_v35 = vld [vmem:[#allocation19 + $0x170] sm:$0xf]  ;;  %v10549_v25 = vld [vmem:[#allocation19 + $0x174] sm:$0xf0] }
 0x745   :  { %v9423_v39 = vor.u32 %v10549_v25, %v9422_v35  ;;  %v10548_v35 = vld [vmem:[#allocation19 + $0x174] sm:$0xf]  ;;  %v9424_v25 = vld [vmem:[#allocation19 + $0x178] sm:$0xf0] }
 0x746   :  { %5275 = vadd.xlane.f32.xlu0 %v5274_v11  ;;  %5705 = vmatpush.bf16.msrb.mxu1 %v9343_v14 }
 0x747   :  { %5717 = vmatpush.bf16.msrb.mxu2 %v9423_v39  ;;  %v9382_v39 = vld [vmem:[#allocation19 + $0x120] sm:$0xf] }
 0x748   :  { %v9383_v37 = vor.u32 %v10539_v26, %v9382_v39  ;;  %v10506_v26 = vld [vmem:[#allocation19 + $0x24] sm:$0xf] }
 0x74b   :  { %5718 = vmatpush.bf16.msrb.mxu2 %v9415_v33  ;;  %v10546_v33 = vld [vmem:[#allocation19 + $0x164] sm:$0xf] }
 0x7b1   :  { %v5267_v2 = vpop.xlane.xlu2 %5266 }
 0x7b2   :  { %v5277_v4 = vmul.f32 %v5267_v2, %v11656_v30  ;;  %v9318_v2 = vld [vmem:[#allocation19 + $0xa0] sm:$0xf] }
 0x7b4   :  { %v13025_v23 = vsub.f32 %v13004_v22, %v5277_v4  ;;  %v13028_v32 = vsub.f32 %v13001_v54, %v5277_v4  ;;  %v13031_v57 = vsub.f32 %v13006_v55, %v5277_v4  ;;  %v13034_v12 = vsub.f32 %v13013_v28, %v5277_v4 }
 0x7b5   :  { %v9255_v4 = vor.u32 %v10507_v15, %v9254_v42  ;;  %v9416_v42 = vld [vmem:[#allocation19 + $0x168] sm:$0xf0] }
 0x7b6   :  { %v5287_v20 = vmul.f32 %v13025_v23, %v13025_v23  ;;  %v5288_v48 = vmul.f32 %v13028_v32, %v13028_v32  ;;  %v5290_v56 = vmul.f32 %v13034_v12, %v13034_v12  ;;  %v5289_v53 = vmul.f32 %v13031_v57, %v13031_v57 }
 0x7b7   :  { %v9419_v15 = vor.u32 %v10546_v33, %v9416_v42  ;;  %v10550_v42 = vld [vmem:[#allocation19 + $0x184] sm:$0xf] }
 0x7b8   :  { %v5295_v7 = vadd.f32 %v5288_v48, %v5287_v20  ;;  %v5297_v19 = vsel %vm13273_vm3, %v5290_v56, 0.0  ;;  %v10523_v20 = vld [vmem:[#allocation19 + $0xa4] sm:$0xf0]  ;;  %v9406_v48 = vld [vmem:[#allocation19 + $0x150] sm:$0xf]  ;;  %vm13283_vm3 = vmmov %vm13280_vm0 }
 0x7b9   :  { %v5276_v3 = vpop.xlane.xlu0 %5275  ;;  %v10545_v56 = vld [vmem:[#allocation19 + $0x154] sm:$0xf0] }
 0x7ba   :  { %v5278_v13 = vmul.f32 %v5276_v3, %v11656_v30  ;;  %v5296_v51 = vadd.f32 %v5295_v7, %v5289_v53  ;;  %v9319_v53 = vor.u32 %v10523_v20, %v9318_v2  ;;  %v9407_v7 = vor.u32 %v10545_v56, %v9406_v48  ;;  %v9246_v3 = vld [vmem:[#allocation19 + $0x10] sm:$0xf]  ;;  %v10537_v20 = vld [vmem:[#allocation19 + $0x114] sm:$0xf0]  ;;  %v10512_v48 = vld [vmem:[#allocation19 + $0x54] sm:$0xf] }
 0x7bc   :  { %v13046_v21 = vsub.f32 %v5256_v59, %v5278_v13  ;;  %v13048_v49 = vsub.f32 %v5257_v45, %v5278_v13  ;;  %v5298_v1 = vadd.f32 %v5297_v19, %v5296_v51  ;;  %v13050_v41 = vsub.f32 %v5258_v5, %v5278_v13  ;;  %v9278_v5 = vld [vmem:[#allocation19 + $0x50] sm:$0xf]  ;;  %5719 = vmatpush.bf16.msrb.mxu2 %v9407_v7  ;;  %v9280_v7 = vld [vmem:[#allocation19 + $0x58] sm:$0xf0] }
 0x7bd   :  { %v13052_v52 = vsub.f32 %v5259_v18, %v5278_v13  ;;  %v9279_v58 = vor.u32 %v10513_v44, %v9278_v5  ;;  %v10527_v18 = vld [vmem:[#allocation19 + $0xc4] sm:$0xf0]  ;;  %v10505_v13 = vld [vmem:[#allocation19 + $0x14] sm:$0xf0]  ;;  %v9310_v51 = vld [vmem:[#allocation19 + $0x90] sm:$0xf] }
 0x7be   :  { %5299 = vadd.xlane.f32.xlu1 %v5298_v1  ;;  %v5291_v0 = vmul.f32 %v13046_v21, %v13046_v21  ;;  %v5292_v9 = vmul.f32 %v13048_v49, %v13048_v49  ;;  %v5293_v40 = vmul.f32 %v13050_v41, %v13050_v41  ;;  %v9335_v11 = vor.u32 %v10527_v18, %v9334_v17  ;;  %v10521_v1 = vld [vmem:[#allocation19 + $0x94] sm:$0xf0]  ;;  %v9360_v17 = vld [vmem:[#allocation19 + $0xf8] sm:$0xf0] }
 0x7bf   :  { %v5294_v8 = vmul.f32 %v13052_v52, %v13052_v52  ;;  %5691 = vmatpush.bf16.msrb.mxu0 %v9279_v58  ;;  %v9247_v19 = vor.u32 %v10505_v13, %v9246_v3  ;;  %v10541_v58 = vld [vmem:[#allocation19 + $0x134] sm:$0xf0]  ;;  %v9363_v18 = vor.u32 %v10532_v27, %v9360_v17  ;;  %v10528_v3 = vld [vmem:[#allocation19 + $0xd4] sm:$0xf]  ;;  %v9344_v13 = vld [vmem:[#allocation19 + $0xd8] sm:$0xf0] }
 0x7c0   :  { %v5301_v36 = vsel %vm13274_vm5, %v5291_v0, 0.0  ;;  %v5302_v50 = vsel %vm13275_vm7, %v5292_v9, 0.0  ;;  %v5304_v45 = vsel %vm13276_vm1, %v5293_v40, 0.0  ;;  %5706 = vmatpush.bf16.msrb.mxu1 %v9335_v11  ;;  %v9398_v0 = vld [vmem:[#allocation19 + $0x140] sm:$0xf]  ;;  %v9311_v40 = vor.u32 %v10521_v1, %v9310_v51 }
 0x7c1   :  { %v5303_v24 = vadd.f32 %v5302_v50, %v5301_v36  ;;  %v5306_v34 = vsel %vm13277_vm11, %v5294_v8, 0.0  ;;  %v10543_v9 = vld [vmem:[#allocation19 + $0x144] sm:$0xf0]  ;;  %v9238_v36 = vld [vmem:[#allocation19] sm:$0xf]  ;;  %v9391_v14 = vor.u32 %v10541_v58, %v9390_v60  ;;  %v9427_v11 = vor.u32 %v10548_v35, %v9424_v25 }
 0x7c2   :  { %v9399_v8 = vor.u32 %v10543_v9, %v9398_v0  ;;  %v10503_v50 = vld [vmem:[#allocation19 + $0x4] sm:$0xf0]  ;;  %v9283_v51 = vor.u32 %v10512_v48, %v9280_v7  ;;  %v10544_v1 = vld [vmem:[#allocation19 + $0x154] sm:$0xf]  ;;  %v9408_v0 = vld [vmem:[#allocation19 + $0x158] sm:$0xf0] }
 0x7c3   :  { %v5305_v31 = vadd.f32 %v5304_v45, %v5303_v24  ;;  %5692 = vmatpush.bf16.msrb.mxu0 %v9271_v62  ;;  %v9302_v24 = vld [vmem:[#allocation19 + $0x80] sm:$0xf]  ;;  %v9239_v45 = vor.u32 %v10503_v50, %v9238_v36  ;;  %v9299_v62 = vor.u32 %v10516_v10, %v9296_v38  ;;  %v10535_v36 = vld [vmem:[#allocation19 + $0x104] sm:$0xf0]  ;;  %v10510_v50 = vld [vmem:[#allocation19 + $0x44] sm:$0xf] }
 0x7c4   :  { %5707 = vmatpush.bf16.msrb.mxu1 %v9327_v61  ;;  %5720 = vmatpush.bf16.msrb.mxu2 %v9399_v8  ;;  %v9355_v61 = vor.u32 %v10530_v47, %v9352_v29  ;;  %v9366_v8 = vld [vmem:[#allocation19 + $0x100] sm:$0xf]  ;;  %v9400_v60 = vld [vmem:[#allocation19 + $0x148] sm:$0xf0]  ;;  %v10508_v10 = vld [vmem:[#allocation19 + $0x34] sm:$0xf] }
 0x7c5   :  { %v5307_v59 = vadd.f32 %v5306_v34, %v5305_v31  ;;  %v10519_v31 = vld [vmem:[#allocation19 + $0x84] sm:$0xf0]  ;;  %v9430_v34 = vld [vmem:[#allocation19 + $0x180] sm:$0xf]  ;;  %v10524_v38 = vld [vmem:[#allocation19 + $0xb4] sm:$0xf] }
 0x7c6   :  { %v9303_v5 = vor.u32 %v10519_v31, %v9302_v24  ;;  %v9367_v24 = vor.u32 %v10535_v36, %v9366_v8  ;;  %v10526_v31 = vld [vmem:[#allocation19 + $0xc4] sm:$0xf]  ;;  %v9392_v35 = vld [vmem:[#allocation19 + $0x138] sm:$0xf0]  ;;  %v9320_v47 = vld [vmem:[#allocation19 + $0xa8] sm:$0xf0] }
 0x7c7   :  { %5308 = vadd.xlane.f32.xlu0 %v5307_v59  ;;  %5693 = vmatpush.bf16.msrb.mxu0 %v9263_v43  ;;  %v10551_v59 = vld [vmem:[#allocation19 + $0x184] sm:$0xf0]  ;;  %v9288_v43 = vld [vmem:[#allocation19 + $0x68] sm:$0xf0]  ;;  %v10538_v29 = vld [vmem:[#allocation19 + $0x124] sm:$0xf] }
 0x7c8   :  { %5708 = vmatpush.bf16.msrb.mxu1 %v9319_v53  ;;  %v9431_v44 = vor.u32 %v10551_v59, %v9430_v34  ;;  %5721 = vmatpush.bf16.msrb.mxu2 %v9391_v14  ;;  %v9291_v16 = vor.u32 %v10514_v63, %v9288_v43  ;;  %v9336_v34 = vld [vmem:[#allocation19 + $0xc8] sm:$0xf0]  ;;  %v9264_v14 = vld [vmem:[#allocation19 + $0x38] sm:$0xf0]  ;;  %v10520_v7 = vld [vmem:[#allocation19 + $0x94] sm:$0xf] }
 0x7c9   :  { %v9267_v17 = vor.u32 %v10508_v10, %v9264_v14  ;;  %v9256_v63 = vld [vmem:[#allocation19 + $0x28] sm:$0xf0]  ;;  %v5260_v14 = vld [vmem:[#allocation16] sm:$0xf]  ;;  %vm6149_vm5 = vcmask 588800  }
 0x7ca   :  { %5738 = vmatpush.bf16.msrb.mxu3 %v9431_v44  ;;  %v10542_v44 = vld [vmem:[#allocation19 + $0x144] sm:$0xf] }
 0x7cb   :  { %5694 = vmatpush.bf16.msrb.mxu0 %v9255_v4  ;;  %v9374_v4 = vld [vmem:[#allocation19 + $0x110] sm:$0xf]  ;;  %v9403_v58 = vor.u32 %v10542_v44, %v9400_v60 }
 0x7cc   :  { %5709 = vmatpush.bf16.msrb.mxu1 %v9311_v40  ;;  %5722 = vmatpush.bf16.msrb.mxu2 %v9383_v37  ;;  %v9375_v53 = vor.u32 %v10537_v20, %v9374_v4  ;;  %v9411_v40 = vor.u32 %v10544_v1, %v9408_v0  ;;  %v10522_v37 = vld [vmem:[#allocation19 + $0xa4] sm:$0xf]  ;;  %v10504_v20 = vld [vmem:[#allocation19 + $0x14] sm:$0xf] }
 0x7ce   :  { %5745 = vmatpush.bf16.msra.mxu3 %v9299_v62  ;;  %v9328_v62 = vld [vmem:[#allocation19 + $0xb8] sm:$0xf0] }
 0x7cf   :  { %5695 = vmatpush.bf16.msrb.mxu0 %v9247_v19  ;;  %v9347_v19 = vor.u32 %v10528_v3, %v9344_v13  ;;  %v9312_v3 = vld [vmem:[#allocation19 + $0x98] sm:$0xf0]  ;;  %v10536_v13 = vld [vmem:[#allocation19 + $0x114] sm:$0xf] }
 0x7d0   :  { %5710 = vmatpush.bf16.msrb.mxu1 %v9303_v5  ;;  %5723 = vmatpush.bf16.msrb.mxu2 %v9375_v53  ;;  %v9339_v5 = vor.u32 %v10526_v31, %v9336_v34  ;;  %v9248_v53 = vld [vmem:[#allocation19 + $0x18] sm:$0xf0]  ;;  %v9315_v0 = vor.u32 %v10520_v7, %v9312_v3  ;;  %v10534_v31 = vld [vmem:[#allocation19 + $0x104] sm:$0xf]  ;;  %v9368_v34 = vld [vmem:[#allocation19 + $0x108] sm:$0xf0] }
 0x7d1   :  { %v9251_v1 = vor.u32 %v10504_v20, %v9248_v53  ;;  %v9371_v10 = vor.u32 %v10534_v31, %v9368_v34  ;;  %v9536_v31 = vld [vmem:[#allocation22 + $0xc0] sm:$0xf]  ;;  %v10578_v34 = vld [vmem:[#allocation22 + $0xcc] sm:$0xf0] }
 0x7d2   :  { %5746 = vmatpush.bf16.msra.mxu3 %v9291_v16  ;;  %v9384_v16 = vld [vmem:[#allocation19 + $0x128] sm:$0xf0] }
 0x7d3   :  { %5696 = vmatpush.bf16.msrb.mxu0 %v9239_v45  ;;  %v9272_v45 = vld [vmem:[#allocation19 + $0x48] sm:$0xf0] }
 0x7d4   :  { %5773 = vmatpush.bf16.msra.mxu1 %v9427_v11  ;;  %v9275_v59 = vor.u32 %v10510_v50, %v9272_v45  ;;  %5724 = vmatpush.bf16.msrb.mxu2 %v9367_v24  ;;  %v9331_v11 = vor.u32 %v10524_v38, %v9328_v62  ;;  %v9240_v50 = vld [vmem:[#allocation19 + $0x8] sm:$0xf0]  ;;  %v10518_v24 = vld [vmem:[#allocation19 + $0x84] sm:$0xf]  ;;  %v5344_v62 = vperm.slane %v5260_v14, 1 }
 0x7d5   :  { %v9304_v45 = vld [vmem:[#allocation19 + $0x88] sm:$0xf0] }
 0x7d6   :  { %5747 = vmatpush.bf16.msra.mxu3 %v9283_v51  ;;  %v9376_v51 = vld [vmem:[#allocation19 + $0x118] sm:$0xf0] }
 0x7d7   :  { %5759 = vmatpush.bf16.msra.mxu0 %v9363_v18  ;;  %v10540_v18 = vld [vmem:[#allocation19 + $0x134] sm:$0xf]  ;;  %v9379_v36 = vor.u32 %v10536_v13, %v9376_v51 }
 0x7d8   :  { %5774 = vmatpush.bf16.msra.mxu1 %v9419_v15  ;;  %v9395_v39 = vor.u32 %v10540_v18, %v9392_v35  ;;  %v9432_v15 = vld [vmem:[#allocation19 + $0x188] sm:$0xf0]  ;;  %v5261_v35 = vld [vmem:[#allocation18] sm:$0xf] }
 0x7d9   :  { %v9435_v4 = vor.u32 %v10550_v42, %v9432_v15  ;;  %v5362_v42 = vperm.slane %v5261_v35, 2 }
 0x7da   :  { %5748 = vmatpush.bf16.msra.mxu3 %v9275_v59 }
 0x7db   :  { %5760 = vmatpush.bf16.msra.mxu0 %v9355_v61  ;;  %5794 = vmatpush.bf16.msra.mxu2 %v9435_v4 }
 0x7dc   :  { %5775 = vmatpush.bf16.msra.mxu1 %v9411_v40  ;;  %v10502_v40 = vld [vmem:[#allocation19 + $0x4] sm:$0xf] }
 0x7dd   :  { %v9243_v60 = vor.u32 %v10502_v40, %v9240_v50 }
 0x7de   :  { %5749 = vmatpush.bf16.msra.mxu3 %v9267_v17  ;;  %v5343_v17 = vperm.slane %v5260_v14, 0 }
 0x7df   :  { %5761 = vmatpush.bf16.msra.mxu0 %v9347_v19 }
 0x7e0   :  { %5776 = vmatpush.bf16.msra.mxu1 %v9403_v58  ;;  %v9307_v58 = vor.u32 %v10518_v24, %v9304_v45  ;;  %v9554_v24 = vld [vmem:[#allocation22 + $0xf0] sm:$0xf0] }
 0x7e3   :  { %5762 = vmatpush.bf16.msra.mxu0 %v9339_v5 }
 0x7e4   :  { %5777 = vmatpush.bf16.msra.mxu1 %v9395_v39 }
 0x7e7   :  { %5763 = vmatpush.bf16.msra.mxu0 %v9331_v11  ;;  %v5346_v11 = vperm.slane %v5260_v14, 3 }
 0x831   :  { %v5300_v2 = vpop.xlane.xlu1 %5299 }
 0x832   :  { %v5310_v56 = vmul.f32 %v5300_v2, %v11656_v30  ;;  %v9259_v2 = vor.u32 %v10506_v26, %v9256_v63 }
 0x834   :  { %v13067_v9 = vadd.f32 1e-05, %v5310_v56  ;;  %v9387_v56 = vor.u32 %v10538_v29, %v9384_v16  ;;  %5750 = vmatpush.bf16.msra.mxu3 %v9259_v2  ;;  %v5360_v16 = vperm.slane %v5261_v35, 0 }
 0x836   :  { %10829 = vrsqrt.f32 %v13067_v9  ;;  %5778 = vmatpush.bf16.msra.mxu1 %v9387_v56  ;;  %vm5320_vm9 = vweird.f32 %v13067_v9 }
 0x838   :  { %5751 = vmatpush.bf16.msra.mxu3 %v9251_v1 }
 0x83a   :  { %v5309_v27 = vpop.xlane.xlu0 %5308  ;;  %5779 = vmatpush.bf16.msra.mxu1 %v9379_v36  ;;  %v10580_v36 = vld [vmem:[#allocation22 + $0xe4] sm:$0xf] }
 0x83b   :  { %v5311_v25 = vmul.f32 %v5309_v27, %v11656_v30  ;;  %v9323_v30 = vor.u32 %v10522_v37, %v9320_v47  ;;  %v9557_v45 = vor.u32 %v10580_v36, %v9554_v24  ;;  %v9600_v36 = vld [vmem:[#allocation22 + $0x140] sm:$0xf]  ;;  %v10592_v24 = vld [vmem:[#allocation22 + $0x144] sm:$0xf] }
 0x83c   :  { %v10830_v43 = vpop.eup %10829  ;;  %5752 = vmatpush.bf16.msra.mxu3 %v9243_v60 }
 0x83d   :  { %v5315_v61 = vmul.f32 %v10830_v43, %v13067_v9  ;;  %v13072_v33 = vadd.f32 1e-05, %v5311_v25  ;;  %5764 = vmatpush.bf16.msra.mxu0 %v9323_v30  ;;  %vm5321_vm8 = vweird.f32 %v10830_v43  ;;  %v5345_v25 = vperm.slane %v5260_v14, 2  ;;  %v10572_v14 = vld [vmem:[#allocation22 + $0xa4] sm:$0xf] }
 0x83e   :  { %vm5322_vm10 = vmor %vm5320_vm9, %vm5321_vm8  ;;  %5780 = vmatpush.bf16.msra.mxu1 %v9371_v10  ;;  %v10574_v10 = vld [vmem:[#allocation22 + $0xac] sm:$0xf0] }
 0x83f   :  { %v5316_v48 = vmul.f32 %v10830_v43, %v5315_v61  ;;  %10831 = vrsqrt.f32 %v13072_v33  ;;  %vm5330_vm13 = vweird.f32 %v13072_v33  ;;  %v5361_v61 = vperm.slane %v5261_v35, 1 }
 0x841   :  { %v5317_v19 = vmul.f32 0.5, %v5316_v48  ;;  %5765 = vmatpush.bf16.msra.mxu0 %v9315_v0 }
 0x843   :  { %v5318_v8 = vsub.f32 1.5, %v5317_v19 }
 0x845   :  { %v10832_v59 = vpop.eup %10831  ;;  %v5319_v5 = vmul.f32 %v10830_v43, %v5318_v8  ;;  %5766 = vmatpush.bf16.msra.mxu0 %v9307_v58  ;;  %v9520_v58 = vld [vmem:[#allocation22 + $0xa0] sm:$0xf] }
 0x846   :  { %v5325_v44 = vmul.f32 %v10832_v59, %v13072_v33  ;;  %vm5331_vm12 = vweird.f32 %v10832_v59 }
 0x847   :  { %v5323_v38 = vsel %vm5322_vm10, %v10830_v43, %v5319_v5  ;;  %v5363_v43 = vperm.slane %v5261_v35, 3  ;;  %vm5332_vm14 = vmor %vm5330_vm13, %vm5331_vm12  ;;  %v9537_v5 = vor.u32 %v10578_v34, %v9536_v31  ;;  %v10568_v35 = vld [vmem:[#allocation22 + $0x84] sm:$0xf]  ;;  %v9602_v31 = vld [vmem:[#allocation22 + $0x150] sm:$0xf0] }
 0x848   :  { %v5326_v27 = vmul.f32 %v10832_v59, %v5325_v44  ;;  %v5334_v39 = vmul.f32 %v5323_v38, %v13025_v23  ;;  %v5335_v9 = vmul.f32 %v5323_v38, %v13028_v32  ;;  %v5336_v26 = vmul.f32 %v5323_v38, %v13031_v57  ;;  %v9538_v44 = vld [vmem:[#allocation22 + $0xd0] sm:$0xf0]  ;;  %v9440_v34 = vld [vmem:[#allocation22] sm:$0xf] }
 0x849   :  { %v5337_v63 = vmul.f32 %v5323_v38, %v13034_v12  ;;  %v9521_v38 = vor.u32 %v10574_v10, %v9520_v58  ;;  %v10552_v58 = vld [vmem:[#allocation22 + $0x4] sm:$0xf]  ;;  %v9442_v10 = vld [vmem:[#allocation22 + $0x10] sm:$0xf0] }
 0x84a   :  { %v5327_v18 = vmul.f32 0.5, %v5326_v27  ;;  %v5351_v29 = vmul.f32 %v5343_v17, %v5334_v39  ;;  %v5352_v15 = vmul.f32 %v5344_v62, %v5335_v9  ;;  %v5353_v2 = vmul.f32 %v5345_v25, %v5336_v26  ;;  %v9522_v27 = vld [vmem:[#allocation22 + $0xb0] sm:$0xf0]  ;;  %v9488_v9 = vld [vmem:[#allocation22 + $0x60] sm:$0xf] }
 0x84b   :  { %v5354_v23 = vmul.f32 %v5346_v11, %v5337_v63  ;;  %v10566_v26 = vld [vmem:[#allocation22 + $0x6c] sm:$0xf0]  ;;  %v10564_v63 = vld [vmem:[#allocation22 + $0x64] sm:$0xf] }
 0x84c   :  { %v5328_v37 = vsub.f32 1.5, %v5327_v18  ;;  %v5368_v7 = vadd.f32 %v5360_v16, %v5351_v29  ;;  %v5369_v3 = vadd.f32 %v5361_v61, %v5352_v15  ;;  %v5370_v13 = vadd.f32 %v5362_v42, %v5353_v2  ;;  %v10570_v18 = vld [vmem:[#allocation22 + $0x8c] sm:$0xf0]  ;;  %v13088_v29 = vld [vmem:[#allocation21] sm:$0x3] }
 0x84d   :  { %v5371_v53 = vadd.f32 %v5363_v43, %v5354_v23  ;;  %v9472_v23 = vld [vmem:[#allocation22 + $0x40] sm:$0xf] }
 0x84e   :  { %v5329_v47 = vmul.f32 %v10832_v59, %v5328_v37  ;;  %v9489_v37 = vor.u32 %v10566_v26, %v9488_v9  ;;  %v10588_v9 = vld [vmem:[#allocation22 + $0x124] sm:$0xf] }
 0x850   :  { %v5333_v30 = vsel %vm5332_vm14, %v10832_v59, %v5329_v47  ;;  %v10576_v59 = vld [vmem:[#allocation22 + $0xc4] sm:$0xf] }
 0x851   :  { %v5338_v32 = vmul.f32 %v5333_v30, %v13046_v21  ;;  %v5339_v57 = vmul.f32 %v5333_v30, %v13048_v49  ;;  %v5340_v12 = vmul.f32 %v5333_v30, %v13050_v41  ;;  %v5341_v4 = vmul.f32 %v5333_v30, %v13052_v52  ;;  %v9552_v41 = vld [vmem:[#allocation22 + $0xe0] sm:$0xf]  ;;  %v10582_v52 = vld [vmem:[#allocation22 + $0xec] sm:$0xf0] }
 0x852   :  { %v9553_v50 = vor.u32 %v10582_v52, %v9552_v41  ;;  %v9541_v60 = vor.u32 %v10576_v59, %v9538_v44  ;;  %v5887_v47 = vld [vmem:[#allocation22 + $0x180] sm:$0xff]  ;;  %v10562_v30 = vld [vmem:[#allocation22 + $0x4c] sm:$0xf0]  ;;  %v9605_v44 = vor.u32 %v10592_v24, %v9602_v31  ;;  %v10579_v24 = vld [vmem:[#allocation22 + $0xd4] sm:$0xf0] }
 0x853   :  { %v5355_v20 = vmul.f32 %v5343_v17, %v5338_v32  ;;  %v5356_v48 = vmul.f32 %v5344_v62, %v5339_v57  ;;  %v5357_v33 = vmul.f32 %v5345_v25, %v5340_v12  ;;  %v5358_v56 = vmul.f32 %v5346_v11, %v5341_v4  ;;  %v9504_v62 = vld [vmem:[#allocation22 + $0x80] sm:$0xf]  ;;  %v9506_v11 = vld [vmem:[#allocation22 + $0x90] sm:$0xf0]  ;;  %v10560_v32 = vld [vmem:[#allocation22 + $0x44] sm:$0xf] }
 0x854   :  { %v9525_v17 = vor.u32 %v10572_v14, %v9522_v27  ;;  %v9505_v25 = vor.u32 %v10570_v18, %v9504_v62  ;;  %v9509_v39 = vor.u32 %v10568_v35, %v9506_v11  ;;  %v5432_v57 = vperm.slane %v13088_v29, 0  ;;  %v9474_v4 = vld [vmem:[#allocation22 + $0x50] sm:$0xf0]  ;;  %v10554_v59 = vld [vmem:[#allocation22 + $0xc] sm:$0xf0]  ;;  %v5888_v14 = vld [vmem:[#allocation22 + $0x188] sm:$0xff] }
 0x855   :  { %v5375_v51 = vadd.f32 %v5363_v43, %v5358_v56  ;;  %v5372_v19 = vadd.f32 %v5360_v16, %v5355_v20  ;;  %v5373_v1 = vadd.f32 %v5361_v61, %v5356_v48  ;;  %v5374_v0 = vadd.f32 %v5362_v42, %v5357_v33  ;;  %v9490_v43 = vld [vmem:[#allocation22 + $0x70] sm:$0xf0]  ;;  %v9584_v11 = vld [vmem:[#allocation22 + $0x120] sm:$0xf] }
 0x856   :  { %v9493_v16 = vor.u32 %v10564_v63, %v9490_v43  ;;  %v6045_v61 = vunpack.c.l.b16 %v5887_v47  ;;  %v6046_v42 = vunpack.c.h.b16 %v5887_v47  ;;  %v9473_v12 = vor.u32 %v10562_v30, %v9472_v23  ;;  %v9586_v63 = vld [vmem:[#allocation22 + $0x130] sm:$0xf0]  ;;  %v9568_v23 = vld [vmem:[#allocation22 + $0x100] sm:$0xf] }
 0x857   :  { %v5376_v40 = vpack.c.bf16 %v5372_v19, %v5368_v7  ;;  %v5377_v21 = vpack.c.bf16 %v5373_v1, %v5369_v3  ;;  %v5378_v8 = vpack.c.bf16 %v5374_v0, %v5370_v13  ;;  %v5379_v49 = vpack.c.bf16 %v5375_v51, %v5371_v53  ;;  %v9616_v53 = vld [vmem:[#allocation22 + $0x160] sm:$0xf]  ;;  %v10598_v7 = vld [vmem:[#allocation22 + $0x16c] sm:$0xf0]  ;;  %v10596_v3 = vld [vmem:[#allocation22 + $0x164] sm:$0xf] }
 0x858   :  { %v6097_v15 = vpack.c.b16 %v6045_v61, %v6045_v61  ;;  %v6098_v2 = vpack.c.b16 %v6046_v42, %v6046_v42  ;;  %v9477_v33 = vor.u32 %v10560_v32, %v9474_v4  ;;  %v9617_v13 = vor.u32 %v10598_v7, %v9616_v53  ;;  %v9618_v51 = vld [vmem:[#allocation22 + $0x170] sm:$0xf0]  ;;  %v9456_v19 = vld [vmem:[#allocation22 + $0x20] sm:$0xf]  ;;  %v10558_v1 = vld [vmem:[#allocation22 + $0x2c] sm:$0xf0] }
 0x859   :  { %5697 = vmatmul.bf16.vlgmr.msrb.gmra.mxu0 %v5376_v40  ;;  %5711 = vmatmul.bf16.vlgmr.msrb.gmra.mxu1 %v5377_v21  ;;  %v6047_v62 = vunpack.c.l.b16 %v5888_v14  ;;  %v6048_v18 = vunpack.c.h.b16 %v5888_v14  ;;  %v10586_v32 = vld [vmem:[#allocation22 + $0x10c] sm:$0xf0]  ;;  %v9570_v4 = vld [vmem:[#allocation22 + $0x110] sm:$0xf0]  ;;  %v10583_v53 = vld [vmem:[#allocation22 + $0xf4] sm:$0xf0] }
 0x85a   :  { %5725 = vmatmul.bf16.vlgmr.msrb.gmra.mxu2 %v5378_v8  ;;  %9436 = vmatmul.msk.bf16.vlgmr.msrb.gmra.mxu3 %vm13278_vm15, %v5379_v49  ;;  %v6154_v20 = vsel %vm13280_vm0, %v6097_v15, 0  ;;  %v6157_v48 = vsel %vm13281_vm6, %v6098_v2, 0  ;;  %v9624_v7 = vld [vmem:[#allocation22 + $0x168] sm:$0xf]  ;;  %v10593_v14 = vld [vmem:[#allocation22 + $0x14c] sm:$0xf] }
 0x85b   :  { %6165 = vmatpush.bf16.msrb.mxu2 %v9553_v50  ;;  %6191 = vmatpush.bf16.msrb.mxu0 %v9557_v45  ;;  %v10594_v50 = vld [vmem:[#allocation22 + $0x14c] sm:$0xf0]  ;;  %v6100_v61 = vpack.c.b16 %v6048_v18, %v6048_v18 }
 0x85c   :  { %6181 = vmatpush.bf16.msrb.mxu3 %v6154_v20  ;;  %6207 = vmatpush.bf16.msrb.mxu1 %v6157_v48  ;;  %v9601_v45 = vor.u32 %v10594_v50, %v9600_v36  ;;  %v9569_v48 = vor.u32 %v10586_v32, %v9568_v23  ;;  %v9544_v50 = vld [vmem:[#allocation22 + $0xc8] sm:$0xf] }
 0x85d   :  { %v6163_v2 = vsel %vm13283_vm3, %v6100_v61, 0 }
 0x85f   :  { %6166 = vmatpush.bf16.msrb.mxu2 %v9537_v5  ;;  %6192 = vmatpush.bf16.msrb.mxu0 %v9541_v60  ;;  %v9441_v60 = vor.u32 %v10554_v59, %v9440_v34  ;;  %v9545_v59 = vor.u32 %v10579_v24, %v9544_v50  ;;  %v9498_v24 = vld [vmem:[#allocation22 + $0x78] sm:$0xf0] }
 0x860   :  { %6182 = vmatpush.bf16.msrb.mxu3 %v9617_v13 }
 0x863   :  { %6167 = vmatpush.bf16.msrb.mxu2 %v9521_v38  ;;  %6193 = vmatpush.bf16.msrb.mxu0 %v9525_v17  ;;  %v9445_v17 = vor.u32 %v10552_v58, %v9442_v10 }
 0x864   :  { %6183 = vmatpush.bf16.msrb.mxu3 %v9601_v45  ;;  %v9608_v45 = vld [vmem:[#allocation22 + $0x148] sm:$0xf] }
 0x867   :  { %6168 = vmatpush.bf16.msrb.mxu2 %v9505_v25  ;;  %6194 = vmatpush.bf16.msrb.mxu0 %v9509_v39  ;;  %v10590_v39 = vld [vmem:[#allocation22 + $0x12c] sm:$0xf0] }
 0x868   :  { %v9585_v26 = vor.u32 %v10590_v39, %v9584_v11  ;;  %v9592_v11 = vld [vmem:[#allocation22 + $0x128] sm:$0xf] }
 0x869   :  { %5767 = vmatmul.bf16.vlgmr.msra.gmra.mxu0 %v5377_v21  ;;  %5781 = vmatmul.bf16.vlgmr.msra.gmra.mxu1 %v5378_v8  ;;  %v9457_v21 = vor.u32 %v10558_v1, %v9456_v19  ;;  %v10556_v8 = vld [vmem:[#allocation22 + $0x24] sm:$0xf]  ;;  %v10599_v19 = vld [vmem:[#allocation22 + $0x174] sm:$0xf0]  ;;  %v10581_v1 = vld [vmem:[#allocation22 + $0xec] sm:$0xf] }
 0x86a   :  { %5753 = vmatmul.bf16.vlgmr.msra.gmra.mxu3 %v5376_v40  ;;  %9437 = vmatmul.msk.bf16.vlgmr.msra.gmra.mxu2 %vm13279_vm4, %v5379_v49  ;;  %v9621_v40 = vor.u32 %v10596_v3, %v9618_v51  ;;  %v9458_v49 = vld [vmem:[#allocation22 + $0x30] sm:$0xf0] }
 0x86b   :  { %6169 = vmatpush.bf16.msrb.mxu2 %v9489_v37  ;;  %6195 = vmatpush.bf16.msrb.mxu0 %v9493_v16  ;;  %v9461_v52 = vor.u32 %v10556_v8, %v9458_v49  ;;  %v6099_v37 = vpack.c.b16 %v6047_v62, %v6047_v62  ;;  %v9589_v16 = vor.u32 %v10588_v9, %v9586_v63  ;;  %v10597_v49 = vld [vmem:[#allocation22 + $0x16c] sm:$0xf]  ;;  %v5433_v62 = vperm.slane %v13088_v29, 1  ;;  %v9594_v29 = vld [vmem:[#allocation22 + $0x138] sm:$0xf0] }
 0x86c   :  { %6208 = vmatpush.bf16.msrb.mxu1 %v9621_v40  ;;  %6184 = vmatpush.bf16.msrb.mxu3 %v9585_v26  ;;  %v9625_v8 = vor.u32 %v10599_v19, %v9624_v7  ;;  %v10591_v26 = vld [vmem:[#allocation22 + $0x134] sm:$0xf0]  ;;  %v10573_v63 = vld [vmem:[#allocation22 + $0xac] sm:$0xf]  ;;  %v9514_v7 = vld [vmem:[#allocation22 + $0x98] sm:$0xf0] }
 0x86d   :  { %v6160_v42 = vsel %vm13282_vm2, %v6099_v37, 0  ;;  %v9530_v37 = vld [vmem:[#allocation22 + $0xb8] sm:$0xf0]  ;;  %v9593_v61 = vor.u32 %v10591_v26, %v9592_v11  ;;  %v10585_v19 = vld [vmem:[#allocation22 + $0x10c] sm:$0xf] }
 0x86f   :  { %6170 = vmatpush.bf16.msrb.mxu2 %v9473_v12  ;;  %6196 = vmatpush.bf16.msrb.mxu0 %v9477_v33  ;;  %v10584_v12 = vld [vmem:[#allocation22 + $0x104] sm:$0xf] }
 0x870   :  { %6209 = vmatpush.bf16.msrb.mxu1 %v9605_v44  ;;  %v9573_v33 = vor.u32 %v10584_v12, %v9570_v4  ;;  %6185 = vmatpush.bf16.msrb.mxu3 %v9569_v48  ;;  %v10577_v44 = vld [vmem:[#allocation22 + $0xcc] sm:$0xf]  ;;  %v9512_v12 = vld [vmem:[#allocation22 + $0x88] sm:$0xf]  ;;  %v10571_v4 = vld [vmem:[#allocation22 + $0x94] sm:$0xf0] }
 0x873   :  { %6171 = vmatpush.bf16.msrb.mxu2 %v9457_v21  ;;  %6197 = vmatpush.bf16.msrb.mxu0 %v9461_v52 }
 0x874   :  { %6210 = vmatpush.bf16.msrb.mxu1 %v9589_v16 }
 0x877   :  { %6172 = vmatpush.bf16.msrb.mxu2 %v9441_v60  ;;  %6198 = vmatpush.bf16.msrb.mxu0 %v9445_v17  ;;  %v9546_v60 = vld [vmem:[#allocation22 + $0xd8] sm:$0xf0] }
 0x878   :  { %6211 = vmatpush.bf16.msrb.mxu1 %v9573_v33  ;;  %v9549_v10 = vor.u32 %v10577_v44, %v9546_v60  ;;  %v9513_v33 = vor.u32 %v10571_v4, %v9512_v12  ;;  %v9480_v44 = vld [vmem:[#allocation22 + $0x48] sm:$0xf] }
 0x87b   :  { %6233 = vmatpush.bf16.msra.mxu2 %v6160_v42  ;;  %6259 = vmatpush.bf16.msra.mxu0 %v6163_v2  ;;  %v9533_v42 = vor.u32 %v10573_v63, %v9530_v37 }
 0x87f   :  { %6234 = vmatpush.bf16.msra.mxu2 %v9625_v8 }
 0x8d6   :  { %v5698_v56 = vpop.f32.mrf.mxu0  ;;  %v5712_v41 = vpop.f32.mrf.mxu1 }
 0x8d7   :  { %v5699_v0 = vadd.f32 %v5698_v56, %v5432_v57  ;;  %v9560_v56 = vld [vmem:[#allocation22 + $0xe8] sm:$0xf] }
 0x8d8   :  { %v9561_v51 = vor.u32 %v10583_v53, %v9560_v56  ;;  %v10587_v56 = vld [vmem:[#allocation22 + $0x114] sm:$0xf0]  ;;  %v10569_v53 = vld [vmem:[#allocation22 + $0x8c] sm:$0xf] }
 0x8d9   :  { %v5713_v5 = vadd.f32 %v5712_v41, %v5699_v0  ;;  %v9562_v0 = vld [vmem:[#allocation22 + $0xf8] sm:$0xf0] }
 0x8da   :  { %v9626_v41 = vld [vmem:[#allocation22 + $0x178] sm:$0xf0]  ;;  %6217 = vmatpush.bf16.msra.mxu3 %v9561_v51  ;;  %v9565_v52 = vor.u32 %v10581_v1, %v9562_v0  ;;  %v9517_v51 = vor.u32 %v10569_v53, %v9514_v7 }
 0x8db   :  { %v9629_v36 = vor.u32 %v10597_v49, %v9626_v41  ;;  %v9578_v1 = vld [vmem:[#allocation22 + $0x118] sm:$0xf0]  ;;  %v9496_v49 = vld [vmem:[#allocation22 + $0x68] sm:$0xf]  ;;  %v10567_v41 = vld [vmem:[#allocation22 + $0x74] sm:$0xf0] }
 0x8dc   :  { %6243 = vmatpush.bf16.msra.mxu1 %v9565_v52  ;;  %v10565_v52 = vld [vmem:[#allocation22 + $0x6c] sm:$0xf]  ;;  %v9497_v50 = vor.u32 %v10567_v41, %v9496_v49 }
 0x8dd   :  { %v5726_v38 = vpop.f32.mrf.mxu2  ;;  %v5740_v27 = vpop.f32.mrf.mxu3  ;;  %6260 = vmatpush.bf16.msra.mxu0 %v9629_v36 }
 0x8de   :  { %v5727_v35 = vadd.f32 %v5726_v38, %v5713_v5  ;;  %v5700_v25 = vpop.f32.mrf.mxu0  ;;  %v5714_v30 = vpop.f32.mrf.mxu1  ;;  %v10595_v5 = vld [vmem:[#allocation22 + $0x154] sm:$0xf0]  ;;  %v9610_v38 = vld [vmem:[#allocation22 + $0x158] sm:$0xf0]  ;;  %6218 = vmatpush.bf16.msra.mxu3 %v9545_v59 }
 0x8df   :  { %v5701_v47 = vadd.f32 %v5700_v25, %v5432_v57  ;;  %v9609_v58 = vor.u32 %v10595_v5, %v9608_v45  ;;  %v9613_v18 = vor.u32 %v10593_v14, %v9610_v38  ;;  %v10575_v25 = vld [vmem:[#allocation22 + $0xb4] sm:$0xf0]  ;;  %v9501_v5 = vor.u32 %v10565_v52, %v9498_v24  ;;  %v9482_v14 = vld [vmem:[#allocation22 + $0x58] sm:$0xf0]  ;;  %v5889_v24 = vld [vmem:[#allocation24] sm:$0xf] }
 0x8e0   :  { %v13093_v43 = vadd.f32 %v5740_v27, %v5727_v35  ;;  %v9528_v35 = vld [vmem:[#allocation22 + $0xa8] sm:$0xf]  ;;  %6244 = vmatpush.bf16.msra.mxu1 %v9549_v10  ;;  %v10561_v10 = vld [vmem:[#allocation22 + $0x4c] sm:$0xf] }
 0x8e1   :  { %v5715_v57 = vadd.f32 %v5714_v30, %v5701_v47  ;;  %6235 = vmatpush.bf16.msra.mxu2 %v9609_v58  ;;  %v9529_v9 = vor.u32 %v10575_v25, %v9528_v35  ;;  %6261 = vmatpush.bf16.msra.mxu0 %v9613_v18  ;;  %v10563_v58 = vld [vmem:[#allocation22 + $0x54] sm:$0xf0]  ;;  %v9464_v18 = vld [vmem:[#allocation22 + $0x28] sm:$0xf] }
 0x8e2   :  { %v5805_v15 = vmul.f32 0.044715, %v13093_v43  ;;  %v10559_v35 = vld [vmem:[#allocation22 + $0x34] sm:$0xf0] }
 0x8e3   :  { %6219 = vmatpush.bf16.msra.mxu3 %v9529_v9 }
 0x8e4   :  { %v5809_v20 = vmul.f32 %v5805_v15, %v13093_v43  ;;  %v10589_v15 = vld [vmem:[#allocation22 + $0x12c] sm:$0xf]  ;;  %6245 = vmatpush.bf16.msra.mxu1 %v9533_v42 }
 0x8e5   :  { %v5728_v3 = vpop.f32.mrf.mxu2  ;;  %v5742_v13 = vpop.f32.mrf.mxu3  ;;  %v9597_v30 = vor.u32 %v10589_v15, %v9594_v29  ;;  %6236 = vmatpush.bf16.msra.mxu2 %v9593_v61  ;;  %v9465_v61 = vor.u32 %v10559_v35, %v9464_v18  ;;  %v10557_v42 = vld [vmem:[#allocation22 + $0x2c] sm:$0xf]  ;;  %v9466_v15 = vld [vmem:[#allocation22 + $0x38] sm:$0xf0] }
 0x8e6   :  { %v5813_v40 = vmul.f32 %v5809_v20, %v13093_v43  ;;  %v5729_v21 = vadd.f32 %v5728_v3, %v5715_v57  ;;  %v5768_v47 = vpop.f32.mrf.mxu0  ;;  %v5782_v32 = vpop.f32.mrf.mxu1  ;;  %v9576_v20 = vld [vmem:[#allocation22 + $0x108] sm:$0xf]  ;;  %v9469_v4 = vor.u32 %v10557_v42, %v9466_v15 }
 0x8e7   :  { %6262 = vmatpush.bf16.msra.mxu0 %v9597_v30  ;;  %6220 = vmatpush.bf16.msra.mxu3 %v9513_v33  ;;  %v10555_v30 = vld [vmem:[#allocation22 + $0x14] sm:$0xf0] }
 0x8e8   :  { %v5817_v31 = vadd.f32 %v5813_v40, %v13093_v43  ;;  %v13101_v34 = vadd.f32 %v5742_v13, %v5729_v21  ;;  %v9577_v13 = vor.u32 %v10587_v56, %v9576_v20  ;;  %v9581_v21 = vor.u32 %v10585_v19, %v9578_v1  ;;  %6246 = vmatpush.bf16.msra.mxu1 %v9517_v51 }
 0x8ea   :  { %v5821_v27 = vmul.f32 0.7978846, %v5817_v31  ;;  %v5807_v17 = vmul.f32 0.044715, %v13101_v34  ;;  %6237 = vmatpush.bf16.msra.mxu2 %v9577_v13  ;;  %v5803_v37 = vmul.f32 0.5, %v13101_v34 }
 0x8eb   :  { %6263 = vmatpush.bf16.msra.mxu0 %v9581_v21  ;;  %6221 = vmatpush.bf16.msra.mxu3 %v9497_v50 }
 0x8ec   :  { %v5811_v39 = vmul.f32 %v5807_v17, %v13101_v34  ;;  %10833 = vtanh.f32 %v5821_v27  ;;  %v9481_v17 = vor.u32 %v10563_v58, %v9480_v44  ;;  %6247 = vmatpush.bf16.msra.mxu1 %v9501_v5  ;;  %v5891_v44 = vperm.slane %v5889_v24, 0 }
 0x8ed   :  { %v5754_v16 = vpop.f32.mrf.mxu3  ;;  %v5796_v3 = vpop.f32.mrf.mxu2 }
 0x8ee   :  { %v5815_v2 = vmul.f32 %v5811_v39, %v13101_v34  ;;  %v5755_v23 = vadd.f32 %v5754_v16, %v5433_v62  ;;  %v5770_v60 = vpop.f32.mrf.mxu0  ;;  %v5784_v11 = vpop.f32.mrf.mxu1  ;;  %v9485_v39 = vor.u32 %v10561_v10, %v9482_v14 }
 0x8ef   :  { %6222 = vmatpush.bf16.msra.mxu3 %v9481_v17 }
 0x8f0   :  { %v5819_v57 = vadd.f32 %v5815_v2, %v13101_v34  ;;  %v5769_v48 = vadd.f32 %v5768_v47, %v5755_v23  ;;  %v9448_v23 = vld [vmem:[#allocation22 + $0x8] sm:$0xf]  ;;  %6248 = vmatpush.bf16.msra.mxu1 %v9485_v39  ;;  %v10553_v34 = vld [vmem:[#allocation22 + $0xc] sm:$0xf] }
 0x8f2   :  { %v5823_v0 = vmul.f32 0.7978846, %v5819_v57  ;;  %v5783_v40 = vadd.f32 %v5782_v32, %v5769_v48  ;;  %v10834_v45 = vpop.eup %10833  ;;  %v9449_v57 = vor.u32 %v10555_v30, %v9448_v23  ;;  %v9450_v48 = vld [vmem:[#allocation22 + $0x18] sm:$0xf0] }
 0x8f3   :  { %v5829_v25 = vadd.f32 1.0, %v10834_v45  ;;  %6223 = vmatpush.bf16.msra.mxu3 %v9465_v61  ;;  %v9453_v7 = vor.u32 %v10553_v34, %v9450_v48 }
 0x8f4   :  { %10835 = vtanh.f32 %v5823_v0  ;;  %v13108_v8 = vadd.f32 %v5796_v3, %v5783_v40  ;;  %6249 = vmatpush.bf16.msra.mxu1 %v9469_v4 }
 0x8f5   :  { %v5756_v36 = vpop.f32.mrf.mxu3  ;;  %v5798_v16 = vpop.f32.mrf.mxu2 }
 0x8f6   :  { %v5806_v31 = vmul.f32 0.044715, %v13108_v8  ;;  %v5757_v59 = vadd.f32 %v5756_v36, %v5433_v62  ;;  %v5801_v62 = vmul.f32 0.5, %v13093_v43  ;;  %v5802_v0 = vmul.f32 0.5, %v13108_v8 }
 0x8f7   :  { %6224 = vmatpush.bf16.msra.mxu3 %v9449_v57 }
 0x8f8   :  { %v5810_v38 = vmul.f32 %v5806_v31, %v13108_v8  ;;  %v5771_v27 = vadd.f32 %v5770_v60, %v5757_v59  ;;  %v5833_v32 = vmul.f32 %v5829_v25, %v5801_v62  ;;  %6250 = vmatpush.bf16.msra.mxu1 %v9453_v7  ;;  %v5892_v31 = vperm.slane %v5889_v24, 1 }
 0x8fa   :  { %v10836_v9 = vpop.eup %10835  ;;  %v5814_v26 = vmul.f32 %v5810_v38, %v13108_v8  ;;  %v5785_v63 = vadd.f32 %v5784_v11, %v5771_v27  ;;  %v5894_v11 = vperm.slane %v5889_v24, 3 }
 0x8fb   :  { %v5831_v47 = vadd.f32 1.0, %v10836_v9 }
 0x8fc   :  { %v5818_v29 = vadd.f32 %v5814_v26, %v13108_v8  ;;  %v5799_v2 = vadd.f32 %v5798_v16, %v5785_v63 }
 0x8fd   :  { %v5835_v12 = vmul.f32 %v5831_v47, %v5803_v37  ;;  %v5893_v37 = vperm.slane %v5889_v24, 2 }
 0x8fe   :  { %v5808_v43 = vmul.f32 0.044715, %v5799_v2  ;;  %v5822_v33 = vmul.f32 0.7978846, %v5818_v29  ;;  %v5804_v40 = vmul.f32 0.5, %v5799_v2 }
 0x8ff   :  { %v5837_v20 = vpack.c.bf16 %v5835_v12, %v5833_v32 }
 0x900   :  { %v5812_v56 = vmul.f32 %v5808_v43, %v5799_v2  ;;  %10837 = vtanh.f32 %v5822_v33 }
 0x901   :  { %6173 = vmatmul.bf16.vlgmr.msrb.gmra.mxu2 %v5837_v20  ;;  %6199 = vmatmul.bf16.vlgmr.msrb.gmra.mxu0 %v5837_v20 }
 0x902   :  { %v5816_v53 = vmul.f32 %v5812_v56, %v5799_v2 }
 0x904   :  { %v5820_v3 = vadd.f32 %v5816_v53, %v5799_v2 }
 0x906   :  { %v5824_v13 = vmul.f32 0.7978846, %v5820_v3  ;;  %v10838_v51 = vpop.eup %10837 }
 0x907   :  { %v5830_v19 = vadd.f32 1.0, %v10838_v51 }
 0x908   :  { %10839 = vtanh.f32 %v5824_v13 }
 0x909   :  { %v5834_v49 = vmul.f32 %v5830_v19, %v5802_v0 }
 0x90e   :  { %v10840_v1 = vpop.eup %10839 }
 0x90f   :  { %v5832_v21 = vadd.f32 1.0, %v10840_v1 }
 0x911   :  { %v5836_v41 = vmul.f32 %v5832_v21, %v5804_v40 }
 0x913   :  { %v5838_v52 = vpack.c.bf16 %v5836_v41, %v5834_v49 }
 0x915   :  { %9630 = vmatmul.msk.bf16.vlgmr.msrb.gmra.mxu3 %vm6149_vm5, %v5838_v52  ;;  %9631 = vmatmul.msk.bf16.vlgmr.msrb.gmra.mxu1 %vm6149_vm5, %v5838_v52 }
 0x916   :  { %9632 = vmatmul.msk.bf16.vlgmr.msra.gmra.mxu2 %vm6149_vm5, %v5838_v52  ;;  %9633 = vmatmul.msk.bf16.vlgmr.msra.gmra.mxu0 %vm6149_vm5, %v5838_v52 }
 0x925   :  { %6225 = vmatmul.bf16.vlgmr.msra.gmra.mxu3 %v5837_v20  ;;  %6251 = vmatmul.bf16.vlgmr.msra.gmra.mxu1 %v5837_v20 }
 0x97e   :  { %v6200_v8 = vpop.f32.mrf.mxu0 }
 0x97f   :  { %v6201_v59 = vadd.f32 %v6200_v8, %v5892_v31 }
 0x984   :  { %v6174_v36 = vpop.f32.mrf.mxu2 }
 0x985   :  { %v6175_v14 = vadd.f32 %v6174_v36, %v5891_v44 }
 0x986   :  { %v6202_v50 = vpop.f32.mrf.mxu0 }
 0x98c   :  { %v6176_v45 = vpop.f32.mrf.mxu2 }
 0x992   :  { %v6213_v5 = vpop.f32.mrf.mxu1 }
 0x993   :  { %v6214_v60 = vadd.f32 %v6213_v5, %v6201_v59  ;;  %v6265_v58 = vpop.f32.mrf.mxu0 }
 0x995   :  { %v13121_v10 = vadd.f32 %v6214_v60, %v13001_v54 }
 0x998   :  { %v6187_v38 = vpop.f32.mrf.mxu3 }
 0x999   :  { %v6188_v27 = vadd.f32 %v6187_v38, %v6175_v14  ;;  %v6239_v17 = vpop.f32.mrf.mxu2 }
 0x99a   :  { %v6215_v18 = vpop.f32.mrf.mxu1 }
 0x99b   :  { %v13124_v35 = vadd.f32 %v6188_v27, %v13004_v22  ;;  %v6267_v25 = vpop.f32.mrf.mxu0 }
 0x9a0   :  { %v6189_v39 = vpop.f32.mrf.mxu3 }
 0x9a1   :  { %v6241_v9 = vpop.f32.mrf.mxu2 }
 0x9a2   :  { %v6252_v62 = vpop.f32.mrf.mxu1 }
 0x9a3   :  { %v6253_v26 = vadd.f32 %v6252_v62, %v5894_v11 }
 0x9a5   :  { %v6266_v63 = vadd.f32 %v6265_v58, %v6253_v26 }
 0x9a7   :  { %v6272_v47 = vadd.f32 %v6266_v63, %v13013_v28 }
 0x9a8   :  { %v6226_v54 = vpop.f32.mrf.mxu3 }
 0x9a9   :  { %v6227_v16 = vadd.f32 %v6226_v54, %v5893_v37 }
 0x9aa   :  { %v6254_v61 = vpop.f32.mrf.mxu1 }
 0x9ab   :  { %v6240_v42 = vadd.f32 %v6239_v17, %v6227_v16 }
 0x9ad   :  { %v13128_v15 = vadd.f32 %v6240_v42, %v13006_v55 }
 0x9b0   :  { %v6228_v29 = vpop.f32.mrf.mxu3 }
 0x9b1   :  { %11257 = dma.done.wait [#allocation3], 12800 }
 0x9b2   :  { %11258 = vsyncadd [#allocation3], 4294954496  ;;  %v9748_v22 = vld [vmem:[#allocation2 + $0xe0] sm:$0xf]  ;;  %v10630_v2 = vld [vmem:[#allocation2 + $0xec] sm:$0xf0]  ;;  %v13130_v5 = vpack.c.bf16 %v6272_v47, %v6272_v47  ;;  %vm7102_vm10 = vcmp.eq.s32.totalorder %v11898_v46, %v11900_v6 }
 0x9b3   :  { %v9876_v23 = vld [vmem:[#allocation2 + $0x1e0] sm:$0xf]  ;;  %v9749_v30 = vor.u32 %v10630_v2, %v9748_v22  ;;  %v10662_v32 = vld [vmem:[#allocation2 + $0x1ec] sm:$0xf0]  ;;  %v10628_v41 = vld [vmem:[#allocation2 + $0xe4] sm:$0xf] }
 0x9b4   :  { %v9732_v12 = vld [vmem:[#allocation2 + $0xc0] sm:$0xf]  ;;  %v10626_v43 = vld [vmem:[#allocation2 + $0xcc] sm:$0xf0]  ;;  %v9877_v4 = vor.u32 %v10662_v32, %v9876_v23  ;;  %v9750_v52 = vld [vmem:[#allocation2 + $0xf0] sm:$0xf0] }
 0x9b5   :  { %v9860_v20 = vld [vmem:[#allocation2 + $0x1c0] sm:$0xf]  ;;  %v10658_v28 = vld [vmem:[#allocation2 + $0x1cc] sm:$0xf0]  ;;  %6894 = vmatpush.bf16.msrb.mxu2 %v9749_v30  ;;  %v9733_v34 = vor.u32 %v10626_v43, %v9732_v12  ;;  %v9753_v50 = vor.u32 %v10628_v41, %v9750_v52  ;;  %v10624_v60 = vld [vmem:[#allocation2 + $0xc4] sm:$0xf] }
 0x9b6   :  { %v10004_v57 = vld [vmem:[#allocation2 + $0x2e0] sm:$0xf]  ;;  %v10694_v48 = vld [vmem:[#allocation2 + $0x2ec] sm:$0xf0]  ;;  %6907 = vmatpush.bf16.msrb.mxu3 %v9877_v4  ;;  %v9861_v56 = vor.u32 %v10658_v28, %v9860_v20  ;;  %v9734_v58 = vld [vmem:[#allocation2 + $0xd0] sm:$0xf0] }
 0x9b7   :  { %v9716_v33 = vld [vmem:[#allocation2 + $0xa0] sm:$0xf]  ;;  %v10622_v55 = vld [vmem:[#allocation2 + $0xac] sm:$0xf0]  ;;  %v10005_v53 = vor.u32 %v10694_v48, %v10004_v57  ;;  %v9737_v38 = vor.u32 %v10624_v60, %v9734_v58  ;;  %vm13284_vm7 = vmmov %vm13279_vm4  ;;  %s13288_s1 = sld [smem:[#allocation43_spill]]  ;;  %vm7124_vm9 = vcmask 9216  }
 0x9b8   :  { %v9844_v7 = vld [vmem:[#allocation2 + $0x1a0] sm:$0xf]  ;;  %v10654_v3 = vld [vmem:[#allocation2 + $0x1ac] sm:$0xf0]  ;;  %v9717_v21 = vor.u32 %v10622_v55, %v9716_v33  ;;  %v10620_v39 = vld [vmem:[#allocation2 + $0xa4] sm:$0xf] }
 0x9b9   :  { %v9988_v13 = vld [vmem:[#allocation2 + $0x2c0] sm:$0xf]  ;;  %v10690_v51 = vld [vmem:[#allocation2 + $0x2cc] sm:$0xf0]  ;;  %6920 = vmatpush.bf16.msrb.mxu0 %v10005_v53  ;;  %6895 = vmatpush.bf16.msrb.mxu2 %v9733_v34  ;;  %v9845_v8 = vor.u32 %v10654_v3, %v9844_v7  ;;  %v9718_v26 = vld [vmem:[#allocation2 + $0xb0] sm:$0xf0] }
 0x9ba   :  { %v10020_v19 = vld [vmem:[#allocation2 + $0x300] sm:$0xf]  ;;  %v10698_v1 = vld [vmem:[#allocation2 + $0x30c] sm:$0xf0]  ;;  %v9989_v0 = vor.u32 %v10690_v51, %v9988_v13  ;;  %6908 = vmatpush.bf16.msrb.mxu3 %v9861_v56  ;;  %v9721_v37 = vor.u32 %v10620_v39, %v9718_v26  ;;  %v10616_v61 = vld [vmem:[#allocation2 + $0x84] sm:$0xf]  ;;  %v13136_v39 = vpack.c.bf16 %v13124_v35, %v13124_v35 }
 0x9bb   :  { %v10021_v40 = vor.u32 %v10698_v1, %v10020_v19  ;;  %v9700_v49 = vld [vmem:[#allocation2 + $0x80] sm:$0xf]  ;;  %v10618_v36 = vld [vmem:[#allocation2 + $0x8c] sm:$0xf0]  ;;  %v9702_v42 = vld [vmem:[#allocation2 + $0x90] sm:$0xf0] }
 0x9bc   :  { %v9972_v24 = vld [vmem:[#allocation2 + $0x2a0] sm:$0xf]  ;;  %v10686_v45 = vld [vmem:[#allocation2 + $0x2ac] sm:$0xf0]  ;;  %v9701_v14 = vor.u32 %v10618_v36, %v9700_v49  ;;  %v9705_v12 = vor.u32 %v10616_v61, %v9702_v42  ;;  %v10612_v28 = vld [vmem:[#allocation2 + $0x64] sm:$0xf] }
 0x9bd   :  { %6940 = vmatpush.bf16.msrb.mxu1 %v10021_v40  ;;  %v9828_v31 = vld [vmem:[#allocation2 + $0x180] sm:$0xf]  ;;  %v10650_v59 = vld [vmem:[#allocation2 + $0x18c] sm:$0xf0]  ;;  %6921 = vmatpush.bf16.msrb.mxu0 %v9989_v0  ;;  %v9973_v44 = vor.u32 %v10686_v45, %v9972_v24  ;;  %v9686_v57 = vld [vmem:[#allocation2 + $0x70] sm:$0xf0] }
 0x9be   :  { %6896 = vmatpush.bf16.msrb.mxu2 %v9717_v21  ;;  %v9956_v27 = vld [vmem:[#allocation2 + $0x280] sm:$0xf]  ;;  %v10682_v17 = vld [vmem:[#allocation2 + $0x28c] sm:$0xf0]  ;;  %6909 = vmatpush.bf16.msrb.mxu3 %v9845_v8  ;;  %v9829_v18 = vor.u32 %v10650_v59, %v9828_v31  ;;  %v9689_v7 = vor.u32 %v10612_v28, %v9686_v57  ;;  %v10608_v19 = vld [vmem:[#allocation2 + $0x44] sm:$0xf] }
 0x9bf   :  { %v9684_v25 = vld [vmem:[#allocation2 + $0x60] sm:$0xf]  ;;  %v10614_v11 = vld [vmem:[#allocation2 + $0x6c] sm:$0xf0]  ;;  %v9957_v63 = vor.u32 %v10682_v17, %v9956_v27  ;;  %v9670_v1 = vld [vmem:[#allocation2 + $0x50] sm:$0xf0] }
 0x9c0   :  { %10034 = vmatmul.msk.bf16.vlgmr.msrb.gmra.mxu1 %vm13284_vm7, %v13130_v5  ;;  %v9812_v9 = vld [vmem:[#allocation2 + $0x160] sm:$0xf]  ;;  %v10646_v62 = vld [vmem:[#allocation2 + $0x16c] sm:$0xf0]  ;;  %v9685_v54 = vor.u32 %v10614_v11, %v9684_v25  ;;  %v10660_v52 = vld [vmem:[#allocation2 + $0x1e4] sm:$0xf]  ;;  %v9673_v45 = vor.u32 %v10608_v19, %v9670_v1 }
 0x9c1   :  { %6946 = vmatpush.bf16.msra.mxu1 %v9753_v50  ;;  %6922 = vmatpush.bf16.msrb.mxu0 %v9973_v44  ;;  %v9940_v47 = vld [vmem:[#allocation2 + $0x260] sm:$0xf]  ;;  %v10678_v16 = vld [vmem:[#allocation2 + $0x26c] sm:$0xf0]  ;;  %v9813_v29 = vor.u32 %v10646_v62, %v9812_v9  ;;  %v9878_v8 = vld [vmem:[#allocation2 + $0x1f0] sm:$0xf0] }
 0x9c2   :  { %6897 = vmatpush.bf16.msrb.mxu2 %v9701_v14  ;;  %6910 = vmatpush.bf16.msrb.mxu3 %v9829_v18  ;;  %v9668_v22 = vld [vmem:[#allocation2 + $0x40] sm:$0xf]  ;;  %v10610_v2 = vld [vmem:[#allocation2 + $0x4c] sm:$0xf0]  ;;  %v9941_v32 = vor.u32 %v10678_v16, %v9940_v47  ;;  %v10692_v36 = vld [vmem:[#allocation2 + $0x2e4] sm:$0xf]  ;;  %v9881_v58 = vor.u32 %v10660_v52, %v9878_v8 }
 0x9c3   :  { %v9796_v23 = vld [vmem:[#allocation2 + $0x140] sm:$0xf]  ;;  %v10642_v30 = vld [vmem:[#allocation2 + $0x14c] sm:$0xf0]  ;;  %v9669_v4 = vor.u32 %v10610_v2, %v9668_v22  ;;  %v10006_v50 = vld [vmem:[#allocation2 + $0x2f0] sm:$0xf0] }
 0x9c4   :  { %v9924_v43 = vld [vmem:[#allocation2 + $0x240] sm:$0xf]  ;;  %v10674_v20 = vld [vmem:[#allocation2 + $0x24c] sm:$0xf0]  ;;  %v9797_v34 = vor.u32 %v10642_v30, %v9796_v23  ;;  %v10656_v14 = vld [vmem:[#allocation2 + $0x1c4] sm:$0xf]  ;;  %v10009_v17 = vor.u32 %v10692_v36, %v10006_v50  ;;  %v13144_v23 = vpack.c.bf16 %v13128_v15, %v13128_v15 }
 0x9c5   :  { %6947 = vmatpush.bf16.msra.mxu1 %v9737_v38  ;;  %6923 = vmatpush.bf16.msrb.mxu0 %v9957_v63  ;;  %v9652_v48 = vld [vmem:[#allocation2 + $0x20] sm:$0xf]  ;;  %v10606_v33 = vld [vmem:[#allocation2 + $0x2c] sm:$0xf0]  ;;  %v9925_v53 = vor.u32 %v10674_v20, %v9924_v43  ;;  %v10604_v38 = vld [vmem:[#allocation2 + $0x24] sm:$0xf]  ;;  %v13140_v63 = vpack.c.bf16 %v13121_v10, %v13121_v10 }
 0x9c6   :  { %6898 = vmatpush.bf16.msrb.mxu2 %v9685_v54  ;;  %6911 = vmatpush.bf16.msrb.mxu3 %v9813_v29  ;;  %v9780_v55 = vld [vmem:[#allocation2 + $0x120] sm:$0xf]  ;;  %v10638_v56 = vld [vmem:[#allocation2 + $0x12c] sm:$0xf0]  ;;  %v9653_v13 = vor.u32 %v10606_v33, %v9652_v48  ;;  %v9654_v27 = vld [vmem:[#allocation2 + $0x30] sm:$0xf0] }
 0x9c7   :  { %v9908_v3 = vld [vmem:[#allocation2 + $0x220] sm:$0xf]  ;;  %v10670_v51 = vld [vmem:[#allocation2 + $0x22c] sm:$0xf0]  ;;  %v9781_v0 = vor.u32 %v10638_v56, %v9780_v55  ;;  %v9862_v18 = vld [vmem:[#allocation2 + $0x1d0] sm:$0xf0] }
 0x9c8   :  { %v9636_v40 = vld [vmem:[#allocation2] sm:$0xf]  ;;  %v10602_v21 = vld [vmem:[#allocation2 + $0xc] sm:$0xf0]  ;;  %v9909_v24 = vor.u32 %v10670_v51, %v9908_v3  ;;  %v10696_v25 = vld [vmem:[#allocation2 + $0x304] sm:$0xf]  ;;  %v9865_v16 = vor.u32 %v10656_v14, %v9862_v18 }
 0x9c9   :  { %6948 = vmatpush.bf16.msra.mxu1 %v9721_v37  ;;  %6924 = vmatpush.bf16.msrb.mxu0 %v9941_v32  ;;  %v9764_v49 = vld [vmem:[#allocation2 + $0x100] sm:$0xf]  ;;  %v10634_v41 = vld [vmem:[#allocation2 + $0x10c] sm:$0xf0]  ;;  %v9637_v31 = vor.u32 %v10602_v21, %v9636_v40  ;;  %v10022_v11 = vld [vmem:[#allocation2 + $0x310] sm:$0xf0]  ;;  %v9657_v37 = vor.u32 %v10604_v38, %v9654_v27 }
 0x9ca   :  { %6899 = vmatpush.bf16.msrb.mxu2 %v9669_v4  ;;  %6912 = vmatpush.bf16.msrb.mxu3 %v9797_v34  ;;  %v9892_v59 = vld [vmem:[#allocation2 + $0x200] sm:$0xf]  ;;  %v10666_v44 = vld [vmem:[#allocation2 + $0x20c] sm:$0xf0]  ;;  %v9765_v60 = vor.u32 %v10634_v41, %v9764_v49  ;;  %v10688_v9 = vld [vmem:[#allocation2 + $0x2c4] sm:$0xf]  ;;  %v10025_v42 = vor.u32 %v10696_v25, %v10022_v11 }
 0x9cb   :  { %v9990_v62 = vld [vmem:[#allocation2 + $0x2d0] sm:$0xf0]  ;;  %v9893_v26 = vor.u32 %v10666_v44, %v9892_v59  ;;  %v9756_v47 = vld [vmem:[#allocation2 + $0xe8] sm:$0xf]  ;;  %v10631_v54 = vld [vmem:[#allocation2 + $0xf4] sm:$0xf0] }
 0x9cc   :  { %v10652_v61 = vld [vmem:[#allocation2 + $0x1a4] sm:$0xf]  ;;  %v9638_v29 = vld [vmem:[#allocation2 + $0x10] sm:$0xf0]  ;;  %v9993_v22 = vor.u32 %v10688_v9, %v9990_v62  ;;  %v9884_v30 = vld [vmem:[#allocation2 + $0x1e8] sm:$0xf]  ;;  %v9757_v43 = vor.u32 %v10631_v54, %v9756_v47 }
 0x9cd   :  { %6949 = vmatpush.bf16.msra.mxu1 %v9705_v12  ;;  %6925 = vmatpush.bf16.msrb.mxu0 %v9925_v53  ;;  %v10600_v35 = vld [vmem:[#allocation2 + $0x4] sm:$0xf]  ;;  %v9846_v2 = vld [vmem:[#allocation2 + $0x1b0] sm:$0xf0]  ;;  %v10663_v10 = vld [vmem:[#allocation2 + $0x1f4] sm:$0xf0] }
 0x9ce   :  { %6900 = vmatpush.bf16.msrb.mxu2 %v9653_v13  ;;  %6913 = vmatpush.bf16.msrb.mxu3 %v9781_v0  ;;  %v10684_v32 = vld [vmem:[#allocation2 + $0x2a4] sm:$0xf]  ;;  %v9974_v12 = vld [vmem:[#allocation2 + $0x2b0] sm:$0xf0]  ;;  %v9641_v4 = vor.u32 %v10600_v35, %v9638_v29  ;;  %v9740_v20 = vld [vmem:[#allocation2 + $0xc8] sm:$0xf]  ;;  %v9849_v57 = vor.u32 %v10652_v61, %v9846_v2  ;;  %v9885_v15 = vor.u32 %v10663_v10, %v9884_v30 }
 0x9cf   :  { %v10627_v28 = vld [vmem:[#allocation2 + $0xd4] sm:$0xf0]  ;;  %v10648_v34 = vld [vmem:[#allocation2 + $0x184] sm:$0xf]  ;;  %v9977_v48 = vor.u32 %v10684_v32, %v9974_v12  ;;  %v9830_v33 = vld [vmem:[#allocation2 + $0x190] sm:$0xf0] }
 0x9d0   :  { %v9868_v55 = vld [vmem:[#allocation2 + $0x1c8] sm:$0xf]  ;;  %v10659_v56 = vld [vmem:[#allocation2 + $0x1d4] sm:$0xf0]  ;;  %v10680_v53 = vld [vmem:[#allocation2 + $0x284] sm:$0xf]  ;;  %v9741_v3 = vor.u32 %v10627_v28, %v9740_v20  ;;  %v9833_v19 = vor.u32 %v10648_v34, %v9830_v33 }
 0x9d1   :  { %6950 = vmatpush.bf16.msra.mxu1 %v9689_v7  ;;  %6926 = vmatpush.bf16.msrb.mxu0 %v9909_v24  ;;  %v9958_v7 = vld [vmem:[#allocation2 + $0x290] sm:$0xf0]  ;;  %v9724_v13 = vld [vmem:[#allocation2 + $0xa8] sm:$0xf]  ;;  %v10623_v51 = vld [vmem:[#allocation2 + $0xb4] sm:$0xf0]  ;;  %v9869_v0 = vor.u32 %v10659_v56, %v9868_v55 }
 0x9d2   :  { %6901 = vmatpush.bf16.msrb.mxu2 %v9637_v31  ;;  %6914 = vmatpush.bf16.msrb.mxu3 %v9765_v60  ;;  %v10644_v1 = vld [vmem:[#allocation2 + $0x164] sm:$0xf]  ;;  %v9961_v40 = vor.u32 %v10680_v53, %v9958_v7  ;;  %v9814_v21 = vld [vmem:[#allocation2 + $0x170] sm:$0xf0]  ;;  %v9852_v49 = vld [vmem:[#allocation2 + $0x1a8] sm:$0xf]  ;;  %v9725_v36 = vor.u32 %v10623_v51, %v9724_v13 }
 0x9d3   :  { %v10655_v41 = vld [vmem:[#allocation2 + $0x1b4] sm:$0xf0]  ;;  %v10676_v52 = vld [vmem:[#allocation2 + $0x264] sm:$0xf]  ;;  %v9942_v8 = vld [vmem:[#allocation2 + $0x270] sm:$0xf0] }
 0x9d4   :  { %v9708_v50 = vld [vmem:[#allocation2 + $0x88] sm:$0xf]  ;;  %v10619_v24 = vld [vmem:[#allocation2 + $0x94] sm:$0xf0]  ;;  %v10640_v31 = vld [vmem:[#allocation2 + $0x144] sm:$0xf]  ;;  %v9853_v59 = vor.u32 %v10655_v41, %v9852_v49  ;;  %v9945_v44 = vor.u32 %v10676_v52, %v9942_v8 }
 0x9d5   :  { %6951 = vmatpush.bf16.msra.mxu1 %v9673_v45  ;;  %6902 = vmatmul.bf16.vlgmr.msrb.gmra.mxu2 %v13136_v39  ;;  %v9817_v45 = vor.u32 %v10644_v1, %v9814_v21  ;;  %v9798_v60 = vld [vmem:[#allocation2 + $0x150] sm:$0xf0]  ;;  %v10651_v14 = vld [vmem:[#allocation2 + $0x194] sm:$0xf0]  ;;  %v10672_v38 = vld [vmem:[#allocation2 + $0x244] sm:$0xf] }
 0x9d6   :  { %6959 = vmatpush.bf16.msra.mxu2 %v9881_v58  ;;  %6972 = vmatpush.bf16.msra.mxu3 %v10009_v17  ;;  %v9836_v58 = vld [vmem:[#allocation2 + $0x188] sm:$0xf]  ;;  %v9926_v27 = vld [vmem:[#allocation2 + $0x250] sm:$0xf0]  ;;  %v9709_v17 = vor.u32 %v10619_v24, %v9708_v50  ;;  %v10615_v25 = vld [vmem:[#allocation2 + $0x74] sm:$0xf0]  ;;  %v9801_v11 = vor.u32 %v10640_v31, %v9798_v60 }
 0x9d7   :  { %6927 = vmatpush.bf16.msrb.mxu0 %v9893_v26  ;;  %6915 = vmatmul.bf16.vlgmr.msrb.gmra.mxu3 %v13140_v63  ;;  %v9692_v18 = vld [vmem:[#allocation2 + $0x68] sm:$0xf]  ;;  %v10636_v9 = vld [vmem:[#allocation2 + $0x124] sm:$0xf]  ;;  %v9837_v62 = vor.u32 %v10651_v14, %v9836_v58  ;;  %v9929_v26 = vor.u32 %v10672_v38, %v9926_v27  ;;  %v10647_v54 = vld [vmem:[#allocation2 + $0x174] sm:$0xf0] }
 0x9d8   :  { %v9820_v47 = vld [vmem:[#allocation2 + $0x168] sm:$0xf]  ;;  %v9910_v61 = vld [vmem:[#allocation2 + $0x230] sm:$0xf0]  ;;  %v10611_v29 = vld [vmem:[#allocation2 + $0x54] sm:$0xf0] }
 0x9d9   :  { %6952 = vmatpush.bf16.msra.mxu1 %v9657_v37  ;;  %v9782_v37 = vld [vmem:[#allocation2 + $0x130] sm:$0xf0]  ;;  %v9676_v35 = vld [vmem:[#allocation2 + $0x48] sm:$0xf]  ;;  %v10632_v2 = vld [vmem:[#allocation2 + $0x104] sm:$0xf]  ;;  %v9821_v32 = vor.u32 %v10647_v54, %v9820_v47 }
 0x9da   :  { %6960 = vmatpush.bf16.msra.mxu2 %v9865_v16  ;;  %6973 = vmatpush.bf16.msra.mxu3 %v9993_v22  ;;  %v10668_v16 = vld [vmem:[#allocation2 + $0x224] sm:$0xf]  ;;  %v9785_v22 = vor.u32 %v10636_v9, %v9782_v37  ;;  %v9766_v30 = vld [vmem:[#allocation2 + $0x110] sm:$0xf0]  ;;  %v10643_v20 = vld [vmem:[#allocation2 + $0x154] sm:$0xf0]  ;;  %v9677_v34 = vor.u32 %v10611_v29, %v9676_v35 }
 0x9db   :  { %6992 = vmatpush.bf16.msra.mxu0 %v10025_v42  ;;  %v9693_v42 = vor.u32 %v10615_v25, %v9692_v18  ;;  %v10664_v10 = vld [vmem:[#allocation2 + $0x204] sm:$0xf]  ;;  %v9913_v12 = vor.u32 %v10668_v16, %v9910_v61  ;;  %vm13285_vm1 = vmmov %vm13279_vm4  ;;  %v10012_v28 = vld [vmem:[#allocation2 + $0x2e8] sm:$0xf]  ;;  %v9769_v56 = vor.u32 %v10632_v2, %v9766_v30  ;;  %s11286_s3 = smov [#allocation27]   ;;  %s7305_s4 = sshll.u32 %s13228_s18, 4  ;;  %s7306_s4 = int_to_ptr.hbm [resolvable:$true] %s7305_s4 }
 0x9dc   :  { %6928 = vmatmul.bf16.vlgmr.msrb.gmra.mxu0 %v13144_v23  ;;  %v9660_v33 = vld [vmem:[#allocation2 + $0x28] sm:$0xf]  ;;  %v10607_v55 = vld [vmem:[#allocation2 + $0x34] sm:$0xf0]  ;;  %v10629_v13 = vld [vmem:[#allocation2 + $0xec] sm:$0xf] }
 0x9dd   :  { %6953 = vmatpush.bf16.msra.mxu1 %v9641_v4  ;;  %v9804_v4 = vld [vmem:[#allocation2 + $0x148] sm:$0xf]  ;;  %v10691_v21 = vld [vmem:[#allocation2 + $0x2d4] sm:$0xf0]  ;;  %v9661_v49 = vor.u32 %v10607_v55, %v9660_v33  ;;  %v9886_v50 = vld [vmem:[#allocation2 + $0x1f8] sm:$0xf0] }
 0x9de   :  { %6961 = vmatpush.bf16.msra.mxu2 %v9849_v57  ;;  %6974 = vmatpush.bf16.msra.mxu3 %v9977_v48  ;;  %v10695_v57 = vld [vmem:[#allocation2 + $0x2f4] sm:$0xf0]  ;;  %v9805_v53 = vor.u32 %v10643_v20, %v9804_v4  ;;  %v9788_v51 = vld [vmem:[#allocation2 + $0x128] sm:$0xf]  ;;  %v10625_v31 = vld [vmem:[#allocation2 + $0xcc] sm:$0xf] }
 0x9df   :  { %6998 = vmatpush.bf16.msrb.mxu0 %v9757_v43  ;;  %v9894_v43 = vld [vmem:[#allocation2 + $0x210] sm:$0xf0]  ;;  %v10699_v48 = vld [vmem:[#allocation2 + $0x314] sm:$0xf0]  ;;  %v9644_v41 = vld [vmem:[#allocation2 + $0x8] sm:$0xf] }
 0x9e0   :  { %6954 = vmatmul.bf16.vlgmr.msra.gmra.mxu1 %v13136_v39  ;;  %v9897_v7 = vor.u32 %v10664_v10, %v9894_v43  ;;  %v10603_v52 = vld [vmem:[#allocation2 + $0x14] sm:$0xf0]  ;;  %v9742_v60 = vld [vmem:[#allocation2 + $0xd8] sm:$0xf0]  ;;  %v9980_v58 = vld [vmem:[#allocation2 + $0x2a8] sm:$0xf] }
 0x9e1   :  { %7011 = vmatpush.bf16.msrb.mxu1 %v9885_v15  ;;  %v10028_v15 = vld [vmem:[#allocation2 + $0x308] sm:$0xf]  ;;  %v10687_v14 = vld [vmem:[#allocation2 + $0x2b4] sm:$0xf0]  ;;  %v9645_v38 = vor.u32 %v10603_v52, %v9644_v41  ;;  %v10014_v18 = vld [vmem:[#allocation2 + $0x2f8] sm:$0xf0] }
 0x9e2   :  { %6962 = vmatpush.bf16.msra.mxu2 %v9833_v19  ;;  %6975 = vmatpush.bf16.msra.mxu3 %v9961_v40  ;;  %v10639_v19 = vld [vmem:[#allocation2 + $0x134] sm:$0xf0]  ;;  %v10029_v1 = vor.u32 %v10699_v48, %v10028_v15  ;;  %v9996_v40 = vld [vmem:[#allocation2 + $0x2c8] sm:$0xf]  ;;  %v9870_v9 = vld [vmem:[#allocation2 + $0x1d8] sm:$0xf0] }
 0x9e3   :  { %6999 = vmatpush.bf16.msrb.mxu0 %v9741_v3  ;;  %v10013_v3 = vor.u32 %v10695_v57, %v10012_v28  ;;  %v9789_v8 = vor.u32 %v10639_v19, %v9788_v51  ;;  %v10621_v37 = vld [vmem:[#allocation2 + $0xac] sm:$0xf]  ;;  %v9726_v47 = vld [vmem:[#allocation2 + $0xb8] sm:$0xf0]  ;;  %v9964_v54 = vld [vmem:[#allocation2 + $0x288] sm:$0xf] }
 0x9e4   :  { %v10683_v16 = vld [vmem:[#allocation2 + $0x294] sm:$0xf0]  ;;  %v10689_v35 = vld [vmem:[#allocation2 + $0x2cc] sm:$0xf]  ;;  %v9998_v29 = vld [vmem:[#allocation2 + $0x2d8] sm:$0xf0]  ;;  %v9729_v30 = vor.u32 %v10621_v37, %v9726_v47 }
 0x9e5   :  { %7012 = vmatpush.bf16.msrb.mxu1 %v9869_v0  ;;  %v9758_v0 = vld [vmem:[#allocation2 + $0xf8] sm:$0xf0]  ;;  %v9965_v10 = vor.u32 %v10683_v16, %v9964_v54  ;;  %v9948_v43 = vld [vmem:[#allocation2 + $0x268] sm:$0xf]  ;;  %v10679_v4 = vld [vmem:[#allocation2 + $0x274] sm:$0xf0]  ;;  %v10001_v20 = vor.u32 %v10689_v35, %v9998_v29 }
 0x9e6   :  { %6963 = vmatpush.bf16.msra.mxu2 %v9817_v45  ;;  %6976 = vmatpush.bf16.msra.mxu3 %v9945_v44  ;;  %v9761_v24 = vor.u32 %v10629_v13, %v9758_v0  ;;  %v9997_v45 = vor.u32 %v10691_v21, %v9996_v40  ;;  %v10635_v44 = vld [vmem:[#allocation2 + $0x114] sm:$0xf0]  ;;  %v9854_v2 = vld [vmem:[#allocation2 + $0x1b8] sm:$0xf0]  ;;  %v10685_v57 = vld [vmem:[#allocation2 + $0x2ac] sm:$0xf]  ;;  %v9949_v55 = vor.u32 %v10679_v4, %v9948_v43 }
 0x9e7   :  { %7000 = vmatpush.bf16.msrb.mxu0 %v9725_v36  ;;  %v10661_v36 = vld [vmem:[#allocation2 + $0x1ec] sm:$0xf]  ;;  %v9838_v48 = vld [vmem:[#allocation2 + $0x198] sm:$0xf0]  ;;  %vm13286_vm11 = vmmov %vm13285_vm1  ;;  %s7303_s24 = sshll.u32 %s11286_s3, 4  ;;  %vm7296_vm12 = vcmask 0   ;;  %s7304_s24 = int_to_ptr.vmem [resolvable:$true] %s7303_s24 }
 0x9e8   :  { %v9889_v27 = vor.u32 %v10661_v36, %v9886_v50  ;;  %v10649_v15 = vld [vmem:[#allocation2 + $0x18c] sm:$0xf]  ;;  %v9822_v40 = vld [vmem:[#allocation2 + $0x178] sm:$0xf0]  ;;  %v10671_v36 = vld [vmem:[#allocation2 + $0x234] sm:$0xf0] }
 0x9e9   :  { %7013 = vmatpush.bf16.msrb.mxu1 %v9853_v59  ;;  %v9772_v59 = vld [vmem:[#allocation2 + $0x108] sm:$0xf]  ;;  %v9841_v51 = vor.u32 %v10649_v15, %v9838_v48  ;;  %v10681_v19 = vld [vmem:[#allocation2 + $0x28c] sm:$0xf]  ;;  %v9678_v52 = vld [vmem:[#allocation2 + $0x58] sm:$0xf0] }
 0x9ea   :  { %6964 = vmatpush.bf16.msra.mxu2 %v9801_v11  ;;  %6977 = vmatpush.bf16.msra.mxu3 %v9929_v26  ;;  %v9773_v25 = vor.u32 %v10635_v44, %v9772_v59  ;;  %v10657_v11 = vld [vmem:[#allocation2 + $0x1cc] sm:$0xf]  ;;  %v9981_v26 = vor.u32 %v10687_v14, %v9980_v58  ;;  %v9806_v44 = vld [vmem:[#allocation2 + $0x158] sm:$0xf0]  ;;  %vm13287_vm8 = vmmov %vm13285_vm1 }
 0x9eb   :  { %7001 = vmatpush.bf16.msrb.mxu0 %v9709_v17  ;;  %v10693_v17 = vld [vmem:[#allocation2 + $0x2ec] sm:$0xf]  ;;  %v9790_v47 = vld [vmem:[#allocation2 + $0x138] sm:$0xf0] }
 0x9ec   :  { %10035 = vmatmul.msk.bf16.vlgmr.msra.gmra.mxu0 %vm13285_vm1, %v13130_v5  ;;  %v10017_v61 = vor.u32 %v10693_v17, %v10014_v18  ;;  %v10645_v0 = vld [vmem:[#allocation2 + $0x16c] sm:$0xf]  ;;  %v10667_v17 = vld [vmem:[#allocation2 + $0x214] sm:$0xf0] }
 0x9ed   :  { %7014 = vmatpush.bf16.msrb.mxu1 %v9837_v62  ;;  %v9745_v62 = vor.u32 %v10625_v31, %v9742_v60  ;;  %v10609_v41 = vld [vmem:[#allocation2 + $0x4c] sm:$0xf]  ;;  %v9950_v31 = vld [vmem:[#allocation2 + $0x278] sm:$0xf0] }
 0x9ee   :  { %6965 = vmatpush.bf16.msra.mxu2 %v9785_v22  ;;  %6978 = vmatpush.bf16.msra.mxu3 %v9913_v12  ;;  %v10653_v22 = vld [vmem:[#allocation2 + $0x1ac] sm:$0xf]  ;;  %v9710_v12 = vld [vmem:[#allocation2 + $0x98] sm:$0xf0]  ;;  %v9681_v60 = vor.u32 %v10609_v41, %v9678_v52 }
 0x9ef   :  { %7002 = vmatpush.bf16.msrb.mxu0 %v9693_v42  ;;  %v9873_v42 = vor.u32 %v10657_v11, %v9870_v9  ;;  %v9857_v28 = vor.u32 %v10653_v22, %v9854_v2  ;;  %v10641_v59 = vld [vmem:[#allocation2 + $0x14c] sm:$0xf]  ;;  %v9934_v9 = vld [vmem:[#allocation2 + $0x258] sm:$0xf0] }
 0x9f0   :  { %v10605_v14 = vld [vmem:[#allocation2 + $0x2c] sm:$0xf]  ;;  %v9809_v11 = vor.u32 %v10641_v59, %v9806_v44 }
 0x9f1   :  { %7015 = vmatpush.bf16.msrb.mxu1 %v9821_v32  ;;  %v10617_v32 = vld [vmem:[#allocation2 + $0x8c] sm:$0xf] }
 0x9f2   :  { %6966 = vmatpush.bf16.msra.mxu2 %v9769_v56  ;;  %6979 = vmatpush.bf16.msra.mxu3 %v9897_v7  ;;  %v9713_v33 = vor.u32 %v10617_v32, %v9710_v12  ;;  %v10613_v56 = vld [vmem:[#allocation2 + $0x6c] sm:$0xf]  ;;  %v9932_v7 = vld [vmem:[#allocation2 + $0x248] sm:$0xf]  ;;  %v9774_v32 = vld [vmem:[#allocation2 + $0x118] sm:$0xf0] }
 0x9f3   :  { %7003 = vmatpush.bf16.msrb.mxu0 %v9677_v34  ;;  %v9982_v34 = vld [vmem:[#allocation2 + $0x2b8] sm:$0xf0]  ;;  %v10637_v37 = vld [vmem:[#allocation2 + $0x12c] sm:$0xf] }
 0x9f4   :  { %v9985_v13 = vor.u32 %v10685_v57, %v9982_v34  ;;  %v9793_v22 = vor.u32 %v10637_v37, %v9790_v47  ;;  %v10669_v2 = vld [vmem:[#allocation2 + $0x22c] sm:$0xf] }
 0x9f5   :  { %7016 = vmatpush.bf16.msrb.mxu1 %v9805_v53  ;;  %6967 = vmatmul.bf16.vlgmr.msra.gmra.mxu2 %v13140_v63  ;;  %v9694_v53 = vld [vmem:[#allocation2 + $0x78] sm:$0xf0]  ;;  %v6381_v48 = vld [vmem:[#allocation25] sm:$0xf] }
 0x9f6   :  { %7024 = vmatpush.bf16.msrb.mxu2 %v10013_v3  ;;  %7044 = vmatpush.bf16.msrb.mxu3 %v10029_v1  ;;  %v10675_v3 = vld [vmem:[#allocation2 + $0x254] sm:$0xf0]  ;;  %v9966_v1 = vld [vmem:[#allocation2 + $0x298] sm:$0xf0]  ;;  %v9697_v21 = vor.u32 %v10613_v56, %v9694_v53 }
 0x9f7   :  { %7004 = vmatpush.bf16.msrb.mxu0 %v9661_v49  ;;  %6980 = vmatmul.bf16.vlgmr.msra.gmra.mxu3 %v13144_v23  ;;  %v9933_v49 = vor.u32 %v10675_v3, %v9932_v7  ;;  %v9969_v50 = vor.u32 %v10681_v19, %v9966_v1 }
 0x9f9   :  { %7017 = vmatpush.bf16.msrb.mxu1 %v9789_v8  ;;  %v9916_v8 = vld [vmem:[#allocation2 + $0x228] sm:$0xf] }
 0x9fa   :  { %7050 = vmatpush.bf16.msra.mxu3 %v9761_v24  ;;  %7025 = vmatpush.bf16.msrb.mxu2 %v9997_v45  ;;  %v9825_v24 = vor.u32 %v10645_v0, %v9822_v40  ;;  %v10677_v45 = vld [vmem:[#allocation2 + $0x26c] sm:$0xf]  ;;  %v9917_v58 = vor.u32 %v10671_v36, %v9916_v8 }
 0x9fb   :  { %7005 = vmatpush.bf16.msrb.mxu0 %v9645_v38  ;;  %v9662_v38 = vld [vmem:[#allocation2 + $0x38] sm:$0xf0]  ;;  %v9953_v18 = vor.u32 %v10677_v45, %v9950_v31  ;;  %v10038_v31 = vld [vmem:[%s13288_s1 + $0x2] sm:$0x3] }
 0x9fc   :  { %v9665_v54 = vor.u32 %v10605_v14, %v9662_v38  ;;  %v6385_v38 = vperm.slane %v6381_v48, 2 }
 0x9fd   :  { %7018 = vmatpush.bf16.msrb.mxu1 %v9773_v25  ;;  %v10673_v25 = vld [vmem:[#allocation2 + $0x24c] sm:$0xf] }
 0x9fe   :  { %7051 = vmatpush.bf16.msra.mxu3 %v9745_v62  ;;  %7026 = vmatpush.bf16.msrb.mxu2 %v9981_v26  ;;  %v10697_v62 = vld [vmem:[#allocation2 + $0x30c] sm:$0xf]  ;;  %v10030_v26 = vld [vmem:[#allocation2 + $0x318] sm:$0xf0]  ;;  %v9937_v35 = vor.u32 %v10673_v25, %v9934_v9 }
 0x9ff   :  { %7063 = vmatpush.bf16.msra.mxu0 %v9889_v27  ;;  %v9900_v27 = vld [vmem:[#allocation2 + $0x208] sm:$0xf]  ;;  %v10033_v29 = vor.u32 %v10697_v62, %v10030_v26  ;;  %v6386_v62 = vperm.slane %v6381_v48, 3 }
 0xa00   :  { %7006 = vmatmul.bf16.vlgmr.msrb.gmra.mxu0 %v13136_v39  ;;  %7019 = vmatmul.bf16.vlgmr.msrb.gmra.mxu1 %v13140_v63  ;;  %v9901_v16 = vor.u32 %v10667_v17, %v9900_v27 }
 0xa01   :  { %7076 = vmatpush.bf16.msra.mxu1 %v10017_v61  ;;  %v10601_v61 = vld [vmem:[#allocation2 + $0xc] sm:$0xf] }
 0xa02   :  { %7052 = vmatpush.bf16.msra.mxu3 %v9729_v30  ;;  %7027 = vmatpush.bf16.msrb.mxu2 %v9965_v10  ;;  %v9918_v30 = vld [vmem:[#allocation2 + $0x238] sm:$0xf0]  ;;  %v10633_v10 = vld [vmem:[#allocation2 + $0x10c] sm:$0xf] }
 0xa03   :  { %7064 = vmatpush.bf16.msra.mxu0 %v9873_v42  ;;  %v9646_v42 = vld [vmem:[#allocation2 + $0x18] sm:$0xf0]  ;;  %v9921_v43 = vor.u32 %v10669_v2, %v9918_v30  ;;  %v9777_v4 = vor.u32 %v10633_v10, %v9774_v32  ;;  %v10040_v32 = vld [vmem:[%s13288_s1 + $0x6] sm:$0x3] }
 0xa04   :  { %v9649_v12 = vor.u32 %v10601_v61, %v9646_v42 }
 0xa05   :  { %7077 = vmatpush.bf16.msra.mxu1 %v10001_v20  ;;  %v10665_v20 = vld [vmem:[#allocation2 + $0x20c] sm:$0xf] }
 0xa06   :  { %7053 = vmatpush.bf16.msra.mxu3 %v9713_v33  ;;  %7028 = vmatpush.bf16.msrb.mxu2 %v9949_v55  ;;  %v6383_v33 = vperm.slane %v6381_v48, 0 }
 0xa07   :  { %7065 = vmatpush.bf16.msra.mxu0 %v9857_v28  ;;  %10036 = vmatmul.msk.bf16.vlgmr.msrb.gmra.mxu3 %vm13286_vm11, %v13130_v5  ;;  %v9902_v28 = vld [vmem:[#allocation2 + $0x218] sm:$0xf0] }
 0xa08   :  { %v9905_v57 = vor.u32 %v10665_v20, %v9902_v28 }
 0xa09   :  { %7078 = vmatpush.bf16.msra.mxu1 %v9985_v13 }
 0xa0a   :  { %7054 = vmatpush.bf16.msra.mxu3 %v9697_v21  ;;  %7029 = vmatpush.bf16.msrb.mxu2 %v9933_v49  ;;  %v6384_v21 = vperm.slane %v6381_v48, 1 }
 0xa0b   :  { %7066 = vmatpush.bf16.msra.mxu0 %v9841_v51 }
 0xa0d   :  { %7079 = vmatpush.bf16.msra.mxu1 %v9969_v50 }
 0xa0e   :  { %7055 = vmatpush.bf16.msra.mxu3 %v9681_v60  ;;  %7030 = vmatpush.bf16.msrb.mxu2 %v9917_v58 }
 0xa0f   :  { %7067 = vmatpush.bf16.msra.mxu0 %v9825_v24 }
 0xa11   :  { %7080 = vmatpush.bf16.msra.mxu1 %v9953_v18 }
 0xa12   :  { %7056 = vmatpush.bf16.msra.mxu3 %v9665_v54  ;;  %7031 = vmatpush.bf16.msrb.mxu2 %v9901_v16  ;;  %v10039_v16 = vld [vmem:[%s13288_s1 + $0x4] sm:$0x3] }
 0xa13   :  { %7068 = vmatpush.bf16.msra.mxu0 %v9809_v11 }
 0xa15   :  { %7081 = vmatpush.bf16.msra.mxu1 %v9937_v35  ;;  %7032 = vmatmul.bf16.vlgmr.msrb.gmra.mxu2 %v13144_v23 }
 0xa16   :  { %7096 = vmatpush.bf16.msra.mxu2 %v10033_v29  ;;  %7057 = vmatpush.bf16.msra.mxu3 %v9649_v12 }
 0xa17   :  { %7069 = vmatpush.bf16.msra.mxu0 %v9793_v22 }
 0xa19   :  { %7082 = vmatpush.bf16.msra.mxu1 %v9921_v43  ;;  %7058 = vmatmul.bf16.vlgmr.msra.gmra.mxu3 %v13136_v39 }
 0xa1b   :  { %7070 = vmatpush.bf16.msra.mxu0 %v9777_v4 }
 0xa1d   :  { %7083 = vmatpush.bf16.msra.mxu1 %v9905_v57 }
 0xa1e   :  { %7071 = vmatmul.bf16.vlgmr.msra.gmra.mxu0 %v13140_v63  ;;  %v7103_v63 = vld [vmem:[%s13288_s1] sm:$0x3] }
 0xa20   :  { %7084 = vmatmul.bf16.vlgmr.msra.gmra.mxu1 %v13144_v23 }
 0xa25   :  { %10037 = vmatmul.msk.bf16.vlgmr.msra.gmra.mxu2 %vm13287_vm8, %v13130_v5 }
 0xa3d   :  { %v6942_v34 = vpop.f32.mrf.mxu1 }
 0xa45   :  { %v6944_v15 = vpop.f32.mrf.mxu1 }
 0xa58   :  { %v6903_v56 = vpop.f32.mrf.mxu2 }
 0xa59   :  { %v6929_v55 = vpop.f32.mrf.mxu0  ;;  %v6904_v53 = vadd.f32 %v6903_v56, %v6383_v33 }
 0xa5a   :  { %v6916_v7 = vpop.f32.mrf.mxu3 }
 0xa5b   :  { %v6917_v13 = vadd.f32 %v6916_v7, %v6904_v53 }
 0xa5d   :  { %v6955_v3 = vpop.f32.mrf.mxu1  ;;  %v6930_v51 = vadd.f32 %v6929_v55, %v6917_v13 }
 0xa5e   :  { %v6956_v49 = vadd.f32 %v6955_v3, %v6384_v21 }
 0xa5f   :  { %v6943_v19 = vadd.f32 %v6942_v34, %v6930_v51 }
 0xa60   :  { %v6905_v1 = vpop.f32.mrf.mxu2 }
 0xa61   :  { %v6931_v39 = vpop.f32.mrf.mxu0  ;;  %7119 = vmatpush.xpose.msrb.mxu2 %v6943_v19 }
 0xa62   :  { %v6918_v5 = vpop.f32.mrf.mxu3 }
 0xa64   :  { %7120 = vmatmul.f32.vlgmr.msrb.gmra.mxu2 %v7103_v63 }
 0xa65   :  { %v6957_v23 = vpop.f32.mrf.mxu1 }
 0xa69   :  { %v6994_v0 = vpop.f32.mrf.mxu0 }
 0xa71   :  { %v6996_v40 = vpop.f32.mrf.mxu0 }
 0xa78   :  { %v6968_v41 = vpop.f32.mrf.mxu2 }
 0xa79   :  { %v6969_v52 = vadd.f32 %v6968_v41, %v6956_v49 }
 0xa7a   :  { %v6981_v8 = vpop.f32.mrf.mxu3 }
 0xa7b   :  { %v6982_v24 = vadd.f32 %v6981_v8, %v6969_v52 }
 0xa7d   :  { %v7007_v36 = vpop.f32.mrf.mxu0  ;;  %v7020_v50 = vpop.f32.mrf.mxu1  ;;  %v6995_v45 = vadd.f32 %v6994_v0, %v6982_v24 }
 0xa7e   :  { %v7008_v27 = vadd.f32 %v7007_v36, %v6385_v38 }
 0xa7f   :  { %7168 = vmatpush.xpose.msrb.mxu3 %v6995_v45 }
 0xa80   :  { %v6970_v59 = vpop.f32.mrf.mxu2  ;;  %v7021_v18 = vadd.f32 %v7020_v50, %v7008_v27 }
 0xa82   :  { %v6983_v44 = vpop.f32.mrf.mxu3  ;;  %7169 = vmatmul.f32.vlgmr.msrb.gmra.mxu3 %v10038_v31 }
 0xa85   :  { %v7009_v60 = vpop.f32.mrf.mxu0  ;;  %v7022_v58 = vpop.f32.mrf.mxu1 }
 0xa8a   :  { %v7046_v14 = vpop.f32.mrf.mxu3 }
 0xa92   :  { %v7048_v17 = vpop.f32.mrf.mxu3 }
 0xa98   :  { %v7033_v25 = vpop.f32.mrf.mxu2 }
 0xa99   :  { %v7034_v9 = vadd.f32 %v7033_v25, %v7021_v18 }
 0xa9b   :  { %v7072_v11 = vpop.f32.mrf.mxu0  ;;  %v7047_v26 = vadd.f32 %v7046_v14, %v7034_v9 }
 0xa9c   :  { %v7059_v47 = vpop.f32.mrf.mxu3 }
 0xa9d   :  { %v7085_v37 = vpop.f32.mrf.mxu1  ;;  %v7060_v54 = vadd.f32 %v7059_v47, %v6386_v62  ;;  %7216 = vmatpush.xpose.msra.mxu2 %v7047_v26 }
 0xa9f   :  { %v7073_v35 = vadd.f32 %v7072_v11, %v7060_v54 }
 0xaa0   :  { %v7035_v61 = vpop.f32.mrf.mxu2  ;;  %7217 = vmatmul.f32.vlgmr.msra.gmra.mxu2 %v10039_v16 }
 0xaa1   :  { %v7086_v2 = vadd.f32 %v7085_v37, %v7073_v35 }
 0xaa3   :  { %v7074_v42 = vpop.f32.mrf.mxu0 }
 0xaa4   :  { %v7061_v22 = vpop.f32.mrf.mxu3 }
 0xaa5   :  { %v7087_v29 = vpop.f32.mrf.mxu1 }
 0xaa8   :  { %v7098_v30 = vpop.f32.mrf.mxu2 }
 0xaa9   :  { %v7099_v10 = vadd.f32 %v7098_v30, %v7086_v2 }
 0xaab   :  { %7264 = vmatpush.xpose.msra.mxu3 %v7099_v10 }
 0xaae   :  { %7265 = vmatmul.f32.vlgmr.msra.gmra.mxu3 %v10040_v32 }
 0xab0   :  { %v7100_v12 = vpop.f32.mrf.mxu2 }
 0xae7   :  { %v7121_v43 = vpop.f32.mrf.mxu2 }
 0xae8   :  { %v7125_v4 = vsel %vm7124_vm9, %v7121_v43, -inf }
 0xae9   :  { %7126 = vmax.xlane.f32.xlu0 %v7125_v4 }
 0xb05   :  { %v7170_v20 = vpop.f32.mrf.mxu3 }
 0xb06   :  { %v7173_v28 = vsel %vm7124_vm9, %v7170_v20, -inf }
 0xb07   :  { %7174 = vmax.xlane.f32.xlu0 %v7173_v28 }
 0xb23   :  { %v7218_v57 = vpop.f32.mrf.mxu2 }
 0xb24   :  { %v7221_v34 = vsel %vm7124_vm9, %v7218_v57, -inf }
 0xb25   :  { %7222 = vmax.xlane.f32.xlu1 %v7221_v34 }
 0xb31   :  { %v13179_v15 = vpop.f32.mrf.mxu3 }
 0xb32   :  { %v7269_v48 = vsel %vm7124_vm9, %v13179_v15, -inf }
 0xb33   :  { %7270 = vmax.xlane.f32.xlu1 %v7269_v48 }
 0xb5c   :  { %v7127_v33 = vpop.xlane.xlu0 %7126 }
 0xb5d   :  { %v7128_v55 = vsub.f32 %v7121_v43, %v7127_v33 }
 0xb5f   :  { %v7129_v56 = vmul.f32 1.442695, %v7128_v55 }
 0xb61   :  { %10841 = vpow2.f32 %v7129_v56 }
 0xb67   :  { %v10842_v53 = vpop.eup %10841 }
 0xb68   :  { %v7131_v7 = vsel %vm7124_vm9, %v10842_v53, 0.0 }
 0xb69   :  { %7132 = vadd.xlane.f32.xlu2 %v7131_v7 }
 0xb7a   :  { %v7175_v3 = vpop.xlane.xlu0 %7174 }
 0xb7b   :  { %v7176_v13 = vsub.f32 %v7170_v20, %v7175_v3 }
 0xb7d   :  { %v7177_v51 = vmul.f32 1.442695, %v7176_v13 }
 0xb7f   :  { %10843 = vpow2.f32 %v7177_v51 }
 0xb85   :  { %v10844_v39 = vpop.eup %10843 }
 0xb86   :  { %v7179_v19 = vsel %vm7124_vm9, %v10844_v39, 0.0 }
 0xb87   :  { %7180 = vadd.xlane.f32.xlu2 %v7179_v19 }
 0xb98   :  { %v7223_v1 = vpop.xlane.xlu1 %7222 }
 0xb99   :  { %v7224_v63 = vsub.f32 %v7218_v57, %v7223_v1 }
 0xb9b   :  { %v7225_v5 = vmul.f32 1.442695, %v7224_v63 }
 0xb9d   :  { %10845 = vpow2.f32 %v7225_v5 }
 0xba3   :  { %v10846_v23 = vpop.eup %10845 }
 0xba4   :  { %v7227_v0 = vsel %vm7124_vm9, %v10846_v23, 0.0 }
 0xba5   :  { %7228 = vadd.xlane.f32.xlu0 %v7227_v0 }
 0xba6   :  { %v7271_v40 = vpop.xlane.xlu1 %7270 }
 0xba7   :  { %v7272_v21 = vsub.f32 %v13179_v15, %v7271_v40 }
 0xba9   :  { %v7273_v49 = vmul.f32 1.442695, %v7272_v21 }
 0xbab   :  { %10847 = vpow2.f32 %v7273_v49 }
 0xbb1   :  { %v10848_v41 = vpop.eup %10847 }
 0xbb2   :  { %v7275_v52 = vsel %vm7124_vm9, %v10848_v41, 0.0 }
 0xbb3   :  { %7276 = vadd.xlane.f32.xlu1 %v7275_v52 }
 0xbdc   :  { %v7133_v8 = vpop.xlane.xlu2 %7132 }
 0xbdd   :  { %10849 = vlog2.f32 %v7133_v8 }
 0xbe3   :  { %v10850_v36 = vpop.eup %10849 }
 0xbe4   :  { %v7135_v50 = vmul.f32 0.6931472, %v10850_v36 }
 0xbe6   :  { %v7136_v24 = vadd.f32 %v7135_v50, %v7127_v33 }
 0xbe8   :  { %v7137_v45 = vsub.f32 %v7121_v43, %v7136_v24 }
 0xbea   :  { %v7138_v31 = vsel %vm7102_vm10, %v7137_v45, 0.0 }
 0xbeb   :  { %v7139_v59 = vsel %vm7124_vm9, %v7138_v31, 0.0 }
 0xbec   :  { %7140 = vadd.xlane.f32.xlu2 %v7139_v59 }
 0xbfa   :  { %v7181_v44 = vpop.xlane.xlu2 %7180 }
 0xbfb   :  { %10851 = vlog2.f32 %v7181_v44 }
 0xc01   :  { %v10852_v60 = vpop.eup %10851 }
 0xc02   :  { %v7183_v58 = vmul.f32 0.6931472, %v10852_v60 }
 0xc04   :  { %v7184_v14 = vadd.f32 %v7183_v58, %v7175_v3 }
 0xc06   :  { %v7185_v38 = vsub.f32 %v7170_v20, %v7184_v14 }
 0xc08   :  { %v7186_v27 = vsel %vm7102_vm10, %v7185_v38, 0.0 }
 0xc09   :  { %v7187_v17 = vsel %vm7124_vm9, %v7186_v27, 0.0 }
 0xc0a   :  { %7188 = vadd.xlane.f32.xlu0 %v7187_v17 }
 0xc18   :  { %v7229_v18 = vpop.xlane.xlu0 %7228 }
 0xc19   :  { %10853 = vlog2.f32 %v7229_v18 }
 0xc1f   :  { %v10854_v25 = vpop.eup %10853 }
 0xc20   :  { %v7231_v11 = vmul.f32 0.6931472, %v10854_v25 }
 0xc22   :  { %v7232_v9 = vadd.f32 %v7231_v11, %v7223_v1 }
 0xc24   :  { %v7233_v62 = vsub.f32 %v7218_v57, %v7232_v9 }
 0xc26   :  { %v7277_v26 = vpop.xlane.xlu1 %7276  ;;  %v7234_v37 = vsel %vm7102_vm10, %v7233_v62, 0.0 }
 0xc27   :  { %10855 = vlog2.f32 %v7277_v26  ;;  %v7235_v47 = vsel %vm7124_vm9, %v7234_v37, 0.0 }
 0xc28   :  { %7236 = vadd.xlane.f32.xlu1 %v7235_v47 }
 0xc2d   :  { %v10856_v54 = vpop.eup %10855 }
 0xc2e   :  { %v7279_v16 = vmul.f32 0.6931472, %v10856_v54 }
 0xc30   :  { %v7280_v61 = vadd.f32 %v7279_v16, %v7271_v40 }
 0xc32   :  { %v7281_v42 = vsub.f32 %v13179_v15, %v7280_v61 }
 0xc34   :  { %v7282_v35 = vsel %vm7102_vm10, %v7281_v42, 0.0 }
 0xc35   :  { %v7283_v29 = vsel %vm7124_vm9, %v7282_v35, 0.0 }
 0xc36   :  { %7284 = vadd.xlane.f32.xlu2 %v7283_v29 }
 0xc5f   :  { %v7141_v22 = vpop.xlane.xlu2 %7140 }
 0xc60   :  { %v7142_v2 = vrot.slane %v7141_v22, 4 }
 0xc62   :  { %v7143_v30 = vadd.f32 %v7142_v2, %v7141_v22 }
 0xc64   :  { %v7144_v10 = vrot.slane %v7143_v30, 2 }
 0xc66   :  { %v7145_v32 = vadd.f32 %v7144_v10, %v7143_v30 }
 0xc68   :  { %v7146_v12 = vrot.slane %v7145_v32, 1 }
 0xc6a   :  { %v7147_v43 = vadd.f32 %v7146_v12, %v7145_v32 }
 0xc6c   :  { %10700 = vpush %v7147_v43 }
 0xc7d   :  { %v7189_v4 = vpop.xlane.xlu0 %7188 }
 0xc7e   :  { %v7190_v20 = vrot.slane %v7189_v4, 4 }
 0xc80   :  { %v7191_v28 = vadd.f32 %v7190_v20, %v7189_v4 }
 0xc82   :  { %v7192_v57 = vrot.slane %v7191_v28, 2 }
 0xc84   :  { %v7193_v34 = vadd.f32 %v7192_v57, %v7191_v28 }
 0xc86   :  { %v7194_v15 = vrot.slane %v7193_v34, 1 }
 0xc88   :  { %v7195_v48 = vadd.f32 %v7194_v15, %v7193_v34 }
 0xc8a   :  { %10702 = vpush %v7195_v48 }
 0xc9b   :  { %v7237_v46 = vpop.xlane.xlu1 %7236 }
 0xc9c   :  { %v7238_v6 = vrot.slane %v7237_v46, 4 }
 0xc9d   :  { %s10701_s7 = spop %10700 }
 0xc9e   :  { %v7239_v33 = vadd.f32 %v7238_v6, %v7237_v46  ;;  %v7149_v23 = vstv %s10701_s7 }
 0xca0   :  { %v7240_v55 = vrot.slane %v7239_v33, 2 }
 0xca2   :  { %v7241_v56 = vadd.f32 %v7240_v55, %v7239_v33 }
 0xca4   :  { %v7242_v53 = vrot.slane %v7241_v56, 1 }
 0xca6   :  { %v7243_v7 = vadd.f32 %v7242_v53, %v7241_v56 }
 0xca8   :  { %10704 = vpush %v7243_v7 }
 0xca9   :  { %v7285_v3 = vpop.xlane.xlu2 %7284 }
 0xcaa   :  { %v7286_v13 = vrot.slane %v7285_v3, 4 }
 0xcac   :  { %v7287_v51 = vadd.f32 %v7286_v13, %v7285_v3 }
 0xcae   :  { %v7288_v39 = vrot.slane %v7287_v51, 2 }
 0xcb0   :  { %v7289_v19 = vadd.f32 %v7288_v39, %v7287_v51 }
 0xcb2   :  { %v7290_v1 = vrot.slane %v7289_v19, 1 }
 0xcb4   :  { %v7291_v63 = vadd.f32 %v7290_v1, %v7289_v19 }
 0xcb6   :  { %10706 = vpush %v7291_v63 }
 0xcbb   :  { %s10703_s23 = spop %10702 }
 0xcbc   :  { %v7197_v5 = vstv %s10703_s23 }
 0xcbd   :  { %v7198_v40 = vadd.f32 %v7197_v5, %v7149_v23 }
 0xcd9   :  { %s10705_s13 = spop %10704 }
 0xcda   :  { %v7245_v0 = vstv %s10705_s13 }
 0xcdb   :  { %v7246_v21 = vadd.f32 %v7245_v0, %v7198_v40 }
 0xce7   :  { %s10707_s25 = spop %10706 }
 0xce8   :  { %v7293_v49 = vstv %s10707_s25 }
 0xce9   :  { %v7294_v41 = vadd.f32 %v7293_v49, %v7246_v21 }
 0xceb   :  { %v7295_v52 = vmul.f32 -0.125, %v7294_v41 }
 0xced   :  { %7297 = vst.msk [vmem:[#allocation27] sm:$0x1] %vm7296_vm12, %v7295_v52 }
 0xcee   :  { %7308 = dma.vmem_to_hbm [thread:$0]  %s7304_s24, 16, %s7306_s4, [#allocation6]  }
 0xcef   :  { %11259 = dma.done.wait [#allocation6], 16  }
 0xcf0   :  { %11260 = vsyncadd [#allocation6], 4294967280 }
 0xcf1   :  { %7313 = vsyncpa [#allocation5], 1 }
 0xcf2   :  { %7314 = vsyncpa [#allocation8], 1 }
 0xcf3   :  { %7315 = vsyncpa [#allocation11], 1 }
 0xcf4   :  { %7316 = vsyncpa [#allocation14], 1 }
 0xcf5   :  { %7317 = vsyncpa [#allocation17], 1 }
 0xcf6   :  { %7318 = vsyncpa [#allocation20], 1 }
 0xcf7   :  { %7319 = vsyncpa [#allocation23], 1 }
 0xcf8   :  { %7320 = vsyncpa [#allocation26], 1 }
 0xcf9   :  { %7321 = vsyncpa [#allocation6], 1 }
 0xcfa   :  { %7322 = vsyncmov [#allocation3] }
 0xcfd   :  { %s7323_s18 = vpop.sfrf %7322 }
 0xcfe   :  { %p10041_p0 = scmp.ne.s32.totalorder %s7323_s18, 0 }
 0xd00   :  { %7327 = shalt.err (%p10041_p0)  }

</bundles_post_ra>
